<compile_context>
chip_gen: v6e
topology: v6e:2x2x1
jax: 0.10.0
libtpu: 0.0.40
codegen_flags: <defaults>
</compile_context>

<pallas_src>
import functools

import jax
import jax.numpy as jnp
from jax.experimental import pallas as pl
from jax.experimental.pallas import tpu as pltpu

HIDDEN = 768       # Roberta hidden size (hard-coded by the module: Linear(768, ...))
BOTTLENECK = 128   # Adapter bottleneck (Linear(768, 128) / Linear(128, 768))
LN_EPS = 1e-12     # Roberta LayerNorm eps


def _round_up(x, m):
    return ((x + m - 1) // m) * m


def _adapted_self_output_kernel(x_ref, res_ref,
                                wd_ref, w1_ref, w2_ref,
                                vh_ref, vb_ref,
                                out_ref,
                                h0_ref, *, eps):
    # vh_ref rows: 0 = dense bias, 1 = fc2 bias, 2 = g2, 3 = ln_gamma, 4 = ln_beta   (each (1,768) f32)
    # vb_ref rows: 0 = fc1 bias,   1 = g1                                            (each (1,128) f32)

    # --- dense (RobertaSelfOutput.dense): bf16 operands, f32 accumulation ---
    h0_ref[...] = (jnp.dot(x_ref[...], wd_ref[...],
                           preferred_element_type=jnp.float32)
                   + vh_ref[0:1, :])                                # (tm, 768) f32, staged in VMEM
    # dropout: identity in eval mode

    # --- adapter (adapter_hat); gates g1/g2 precomputed in the wrapper ---
    a1 = jnp.dot(h0_ref[...].astype(jnp.bfloat16), w1_ref[...],
                 preferred_element_type=jnp.float32) + vb_ref[0:1, :]
    a1 = jax.nn.gelu(a1, approximate=True) * vb_ref[1:2, :]         # (tm, 128)

    a2 = jnp.dot(a1.astype(jnp.bfloat16), w2_ref[...],
                 preferred_element_type=jnp.float32) + vh_ref[1:2, :]
    a2 = jax.nn.gelu(a2, approximate=True) * vh_ref[2:3, :]         # (tm, 768)

    # --- residuals accumulated into the scratch (one live f32 slab at LN time) ---
    h0_ref[...] += a2 + res_ref[...].astype(jnp.float32)

    # --- LayerNorm with fused statistics (single elementwise pass feeds both reductions) ---
    y = h0_ref[...]
    mean = jnp.mean(y, axis=-1, keepdims=True)
    mean_sq = jnp.mean(y * y, axis=-1, keepdims=True)
    var = mean_sq - mean * mean
    y_norm = (y - mean) * jax.lax.rsqrt(var + eps)
    out_ref[...] = (y_norm * vh_ref[3:4, :] + vh_ref[4:5, :]).astype(out_ref.dtype)


def roberta_adapted_self_output(hidden_states, input_tensor, params, *,
                                task, s, block_tokens=512,
                                out_dtype=jnp.float32):
    """hidden_states, input_tensor: (B, S, 768).

    out_dtype defaults to f32 for module fidelity; pass jnp.bfloat16 to also halve the
    output writeback stream when the consumer tolerates it.
    """
    B, S, H = hidden_states.shape
    assert H == HIDDEN
    M = B * S

    # bf16 activation I/O: the kernel is HBM-bound with f32 activations on v6e/v7x;
    # halving the x / input_tensor streams is the single biggest lever.
    x2d = hidden_states.reshape(M, H).astype(jnp.bfloat16)
    r2d = input_tensor.reshape(M, H).astype(jnp.bfloat16)

    # --- glue (runs once, outside the grid) ---
    # HAT gates hoisted out of the kernel: sigmoid + broadcast would otherwise be
    # re-executed on every grid step (JAX does not CSE broadcasts).
    g1 = jax.nn.sigmoid(s * params["efc1"][task])                  # (128,)
    g2 = jax.nn.sigmoid(s * params["efc2"][task])                  # (768,)

    # Pack the small per-feature operands -> fewer DMA descriptors.
    vecH = jnp.stack([params["dense_b"], params["fc2_b"], g2,
                      params["ln_gamma"], params["ln_beta"]], axis=0).astype(jnp.float32)  # (5, 768)
    vecB = jnp.stack([params["fc1_b"], g1], axis=0).astype(jnp.float32)                    # (2, 128)

    # Weights in bf16 (MXU-native, half the HBM/VMEM bytes); accumulation stays f32.
    wd = params["dense_w"].astype(jnp.bfloat16)                    # (768, 768)
    w1 = params["fc1_w"].astype(jnp.bfloat16)                      # (768, 128)
    w2 = params["fc2_w"].astype(jnp.bfloat16)                      # (128, 768)

    # --- tiling: big token tile, NO wrapper-side padding (Pallas masks the ragged tail;
    # out-of-range rows are never written back and are independent of valid rows) ---
    tm = min(block_tokens, _round_up(M, 8))
    if pl.cdiv(M, tm) < 2 and tm > 128:
        # keep >= 2 token blocks so the "parallel" axis can shard across v7x's 2 TensorCores
        tm = max(128, _round_up(tm // 2, 8))
    num_blocks = pl.cdiv(M, tm)
    grid = (num_blocks,)

    # Resident operands: constant index_map -> never re-fetched; single-buffer them to
    # save VMEM (important on v7x's 64 MiB VMEM when tm is large).
    resident = lambda shape: pl.BlockSpec(shape, lambda i: (0, 0),
                                          pipeline_mode=pl.Buffered(1))
    tok = pl.BlockSpec((tm, H), lambda i: (i, 0))

    kernel = functools.partial(_adapted_self_output_kernel, eps=LN_EPS)

    out_bytes = jnp.dtype(out_dtype).itemsize
    flops = (2 * M * H * H            # dense
             + 2 * M * H * BOTTLENECK  # fc1
             + 2 * M * BOTTLENECK * H  # fc2
             + 12 * M * H)             # gates, residuals, LayerNorm
    transcendentals = M * (H + BOTTLENECK + 1)   # 2x tanh-GELU + rsqrt per row
    bytes_accessed = (2 * M * H * 2                            # x, res (bf16)
                      + M * H * out_bytes                      # out
                      + (H * H + 2 * H * BOTTLENECK) * 2       # bf16 weights
                      + (5 * H + 2 * BOTTLENECK) * 4)          # packed vectors

    out2d = pl.pallas_call(
        kernel,
        out_shape=jax.ShapeDtypeStruct((M, H), out_dtype),
        grid_spec=pltpu.PrefetchScalarGridSpec(
            num_scalar_prefetch=0,
            grid=grid,
            in_specs=[
                tok,                                  # hidden_states tile (bf16)
                tok,                                  # input_tensor tile (bf16)
                resident((H, H)),                     # dense weight [in, out] (bf16)
                resident((H, BOTTLENECK)),            # fc1 weight   [in, out] (bf16)
                resident((BOTTLENECK, H)),            # fc2 weight   [in, out] (bf16)
                resident((5, H)),                     # packed: dense_b, fc2_b, g2, gamma, beta
                resident((2, BOTTLENECK)),            # packed: fc1_b, g1
            ],
            out_specs=pl.BlockSpec((tm, H), lambda i: (i, 0)),
            scratch_shapes=[pltpu.VMEM((tm, H), jnp.float32)],     # staged h0 / LN accumulator
        ),
        compiler_params=pltpu.CompilerParams(
            dimension_semantics=("parallel",),        # token blocks shard across TCs (v7x)
            vmem_limit_bytes=32 * 1024 * 1024,        # footprint ~6-11 MiB even at tm=512
        ),
        cost_estimate=pl.CostEstimate(
            flops=flops, transcendentals=transcendentals, bytes_accessed=bytes_accessed),
    )(x2d, r2d, wd, w1, w2, vecH, vecB)

    return out2d.reshape(B, S, H)


def _reference(hidden_states, input_tensor, params, *, task, s):
    # f32 reference with exact (erf) GELU, matching the PyTorch module in eval mode.
    h0 = hidden_states @ params["dense_w"] + params["dense_b"]
    g1 = jax.nn.sigmoid(s * params["efc1"][task])
    g2 = jax.nn.sigmoid(s * params["efc2"][task])
    a1 = jax.nn.gelu(h0 @ params["fc1_w"] + params["fc1_b"], approximate=False) * g1
    a2 = jax.nn.gelu(a1 @ params["fc2_w"] + params["fc2_b"], approximate=False) * g2
    y = h0 + a2 + input_tensor
    mean = jnp.mean(y, axis=-1, keepdims=True)
    var = jnp.mean((y - mean) ** 2, axis=-1, keepdims=True)
    return (y - mean) * jax.lax.rsqrt(var + LN_EPS) * params["ln_gamma"] + params["ln_beta"]


if __name__ == "__main__":
    key = jax.random.PRNGKey(0)
    keys = jax.random.split(key, 12)

    batch, seq = 2, 128            # M = 256 -> two token blocks of 128 (pipelining / 2 TCs)
    ntasks, task, s_gate = 3, 1, 4.0

    # deterministic synthetic parameters (shapes dictated by the module __init__)
    params = {
        "dense_w": jax.random.normal(keys[0], (HIDDEN, HIDDEN), jnp.float32) * 0.02,
        "dense_b": jax.random.normal(keys[1], (HIDDEN,), jnp.float32) * 0.02,
        "fc1_w":   jax.random.normal(keys[2], (HIDDEN, BOTTLENECK), jnp.float32) * 0.02,
        "fc1_b":   jax.random.normal(keys[3], (BOTTLENECK,), jnp.float32) * 0.02,
        "fc2_w":   jax.random.normal(keys[4], (BOTTLENECK, HIDDEN), jnp.float32) * 0.02,
        "fc2_b":   jax.random.normal(keys[5], (HIDDEN,), jnp.float32) * 0.02,
        "efc1":    jax.random.normal(keys[6], (ntasks, BOTTLENECK), jnp.float32),
        "efc2":    jax.random.normal(keys[7], (ntasks, HIDDEN), jnp.float32),
        "ln_gamma": jnp.ones((HIDDEN,), jnp.float32)
                    + 0.01 * jax.random.normal(keys[8], (HIDDEN,), jnp.float32),
        "ln_beta":  0.01 * jax.random.normal(keys[9], (HIDDEN,), jnp.float32),
    }
    # TODO(synk): the 'adapter_bcl' capsule-network branch (CapsNet dynamic routing) is not
    # implemented; this kernel covers the dense + adapter(HAT gates) + LayerNorm path.

    hidden_states = jax.random.normal(keys[10], (batch, seq, HIDDEN), jnp.float32)
    input_tensor = jax.random.normal(keys[11], (batch, seq, HIDDEN), jnp.float32)

    out = roberta_adapted_self_output(hidden_states, input_tensor, params,
                                      task=task, s=s_gate)
    out = jax.block_until_ready(out)

    ref = _reference(hidden_states, input_tensor, params, task=task, s=s_gate)
    assert out.shape == (batch, seq, HIDDEN)
    err = float(jnp.max(jnp.abs(out - ref)))
    # bf16 activations/weights on the MXU + tanh-GELU vs the exact f32 reference -> loose tolerance.
    assert err < 5e-2, f"max abs error {err}"

    print("KERNEL_OK")
</pallas_src>

<mosaic_0001>
module attributes {stable_mosaic.version = 11 : i64} {
  func.func @_adapted_self_output_kernel(%arg0: i32, %arg1: memref<128x768xbf16, #tpu.memory_space<vmem>>, %arg2: memref<128x768xbf16, #tpu.memory_space<vmem>>, %arg3: memref<768x768xbf16, #tpu.memory_space<vmem>>, %arg4: memref<768x128xbf16, #tpu.memory_space<vmem>>, %arg5: memref<128x768xbf16, #tpu.memory_space<vmem>>, %arg6: memref<5x768xf32, #tpu.memory_space<vmem>>, %arg7: memref<2x128xf32, #tpu.memory_space<vmem>>, %arg8: memref<128x768xf32, #tpu.memory_space<vmem>>, %arg9: memref<128x768xf32, #tpu.memory_space<vmem>>) attributes {dimension_semantics = [#tpu.dimension_semantics<parallel>], iteration_bounds = array<i64: 2>, scalar_prefetch = 0 : i64, scratch_operands = 1 : i64, tpu.core_type = #tpu.core_type<tc>, window_params = [{transform_indices = @transform_0, window_bounds = array<i64: 128, 768>}, {transform_indices = @transform_1, window_bounds = array<i64: 128, 768>}, {pipeline_mode = #tpu.pipeline_mode<synchronous>, transform_indices = @transform_2, window_bounds = array<i64: 768, 768>}, {pipeline_mode = #tpu.pipeline_mode<synchronous>, transform_indices = @transform_3, window_bounds = array<i64: 768, 128>}, {pipeline_mode = #tpu.pipeline_mode<synchronous>, transform_indices = @transform_4, window_bounds = array<i64: 128, 768>}, {pipeline_mode = #tpu.pipeline_mode<synchronous>, transform_indices = @transform_5, window_bounds = array<i64: 5, 768>}, {pipeline_mode = #tpu.pipeline_mode<synchronous>, transform_indices = @transform_6, window_bounds = array<i64: 2, 128>}, {transform_indices = @transform_7, window_bounds = array<i64: 128, 768>}]} {
    %c0 = arith.constant 0 : index
    %c0_0 = arith.constant 0 : index
    %0 = vector.load %arg1[%c0, %c0_0] : memref<128x768xbf16, #tpu.memory_space<vmem>>, vector<128x768xbf16>
    %c0_1 = arith.constant 0 : index
    %c0_2 = arith.constant 0 : index
    %1 = vector.load %arg3[%c0_1, %c0_2] : memref<768x768xbf16, #tpu.memory_space<vmem>>, vector<768x768xbf16>
    %cst = arith.constant dense<0.000000e+00> : vector<128x768xf32>
    %2 = tpu.matmul %0, %1, %cst {dimension_numbers = #tpu.dot_dimension_numbers<[1], [0], [0], [1], [0, 0, 1, 1], [], []>} : vector<128x768xbf16>, vector<768x768xbf16>, vector<128x768xf32> -> vector<128x768xf32>
    %c0_3 = arith.constant 0 : index
    %c0_4 = arith.constant 0 : index
    %3 = vector.load %arg6[%c0_3, %c0_4] : memref<5x768xf32, #tpu.memory_space<vmem>>, vector<1x768xf32>
    %4 = vector.broadcast %3 : vector<1x768xf32> to vector<128x768xf32>
    %5 = arith.addf %2, %4 : vector<128x768xf32>
    %c0_5 = arith.constant 0 : index
    %c0_6 = arith.constant 0 : index
    %6 = vector.load %arg9[%c0_5, %c0_6] : memref<128x768xf32, #tpu.memory_space<vmem>>, vector<128x768xf32>
    tpu.vector_store %arg9[%c0_5, %c0_6], %5 {strides = array<i32>} : memref<128x768xf32, #tpu.memory_space<vmem>>, vector<128x768xf32>,
    %c0_7 = arith.constant 0 : index
    %c0_8 = arith.constant 0 : index
    %7 = vector.load %arg9[%c0_7, %c0_8] : memref<128x768xf32, #tpu.memory_space<vmem>>, vector<128x768xf32>
    %8 = arith.truncf %7 : vector<128x768xf32> to vector<128x768xbf16>
    %c0_9 = arith.constant 0 : index
    %c0_10 = arith.constant 0 : index
    %9 = vector.load %arg4[%c0_9, %c0_10] : memref<768x128xbf16, #tpu.memory_space<vmem>>, vector<768x128xbf16>
    %cst_11 = arith.constant dense<0.000000e+00> : vector<128x128xf32>
    %10 = tpu.matmul %8, %9, %cst_11 {dimension_numbers = #tpu.dot_dimension_numbers<[1], [0], [0], [1], [0, 0, 1, 1], [], []>} : vector<128x768xbf16>, vector<768x128xbf16>, vector<128x128xf32> -> vector<128x128xf32>
    %c0_12 = arith.constant 0 : index
    %c0_13 = arith.constant 0 : index
    %11 = vector.load %arg7[%c0_12, %c0_13] : memref<2x128xf32, #tpu.memory_space<vmem>>, vector<1x128xf32>
    %12 = vector.broadcast %11 : vector<1x128xf32> to vector<128x128xf32>
    %13 = arith.addf %10, %12 : vector<128x128xf32>
    %14 = arith.mulf %13, %13 : vector<128x128xf32>
    %15 = arith.mulf %13, %14 : vector<128x128xf32>
    %cst_14 = arith.constant 4.471500e-02 : f32
    %16 = vector.broadcast %cst_14 : f32 to vector<128x128xf32>
    %17 = arith.mulf %16, %15 : vector<128x128xf32>
    %18 = arith.addf %13, %17 : vector<128x128xf32>
    %cst_15 = arith.constant 0.797884583 : f32
    %19 = vector.broadcast %cst_15 : f32 to vector<128x128xf32>
    %20 = arith.mulf %19, %18 : vector<128x128xf32>
    %21 = math.tanh %20 : vector<128x128xf32>
    %cst_16 = arith.constant 1.000000e+00 : f32
    %22 = vector.broadcast %cst_16 : f32 to vector<128x128xf32>
    %23 = arith.addf %22, %21 : vector<128x128xf32>
    %cst_17 = arith.constant 5.000000e-01 : f32
    %24 = vector.broadcast %cst_17 : f32 to vector<128x128xf32>
    %25 = arith.mulf %24, %23 : vector<128x128xf32>
    %26 = arith.mulf %13, %25 : vector<128x128xf32>
    %c1 = arith.constant 1 : index
    %c0_18 = arith.constant 0 : index
    %27 = vector.load %arg7[%c1, %c0_18] : memref<2x128xf32, #tpu.memory_space<vmem>>, vector<1x128xf32>
    %28 = vector.broadcast %27 : vector<1x128xf32> to vector<128x128xf32>
    %29 = arith.mulf %26, %28 : vector<128x128xf32>
    %30 = arith.truncf %29 : vector<128x128xf32> to vector<128x128xbf16>
    %c0_19 = arith.constant 0 : index
    %c0_20 = arith.constant 0 : index
    %31 = vector.load %arg5[%c0_19, %c0_20] : memref<128x768xbf16, #tpu.memory_space<vmem>>, vector<128x768xbf16>
    %cst_21 = arith.constant dense<0.000000e+00> : vector<128x768xf32>
    %32 = tpu.matmul %30, %31, %cst_21 {dimension_numbers = #tpu.dot_dimension_numbers<[1], [0], [0], [1], [0, 0, 1, 1], [], []>} : vector<128x128xbf16>, vector<128x768xbf16>, vector<128x768xf32> -> vector<128x768xf32>
    %c1_22 = arith.constant 1 : index
    %c0_23 = arith.constant 0 : index
    %33 = vector.load %arg6[%c1_22, %c0_23] : memref<5x768xf32, #tpu.memory_space<vmem>>, vector<1x768xf32>
    %34 = vector.broadcast %33 : vector<1x768xf32> to vector<128x768xf32>
    %35 = arith.addf %32, %34 : vector<128x768xf32>
    %36 = arith.mulf %35, %35 : vector<128x768xf32>
    %37 = arith.mulf %35, %36 : vector<128x768xf32>
    %cst_24 = arith.constant 4.471500e-02 : f32
    %38 = vector.broadcast %cst_24 : f32 to vector<128x768xf32>
    %39 = arith.mulf %38, %37 : vector<128x768xf32>
    %40 = arith.addf %35, %39 : vector<128x768xf32>
    %cst_25 = arith.constant 0.797884583 : f32
    %41 = vector.broadcast %cst_25 : f32 to vector<128x768xf32>
    %42 = arith.mulf %41, %40 : vector<128x768xf32>
    %43 = math.tanh %42 : vector<128x768xf32>
    %cst_26 = arith.constant 1.000000e+00 : f32
    %44 = vector.broadcast %cst_26 : f32 to vector<128x768xf32>
    %45 = arith.addf %44, %43 : vector<128x768xf32>
    %cst_27 = arith.constant 5.000000e-01 : f32
    %46 = vector.broadcast %cst_27 : f32 to vector<128x768xf32>
    %47 = arith.mulf %46, %45 : vector<128x768xf32>
    %48 = arith.mulf %35, %47 : vector<128x768xf32>
    %c2 = arith.constant 2 : index
    %c0_28 = arith.constant 0 : index
    %49 = vector.load %arg6[%c2, %c0_28] : memref<5x768xf32, #tpu.memory_space<vmem>>, vector<1x768xf32>
    %50 = vector.broadcast %49 : vector<1x768xf32> to vector<128x768xf32>
    %51 = arith.mulf %48, %50 : vector<128x768xf32>
    %c0_29 = arith.constant 0 : index
    %c0_30 = arith.constant 0 : index
    %52 = vector.load %arg9[%c0_29, %c0_30] : memref<128x768xf32, #tpu.memory_space<vmem>>, vector<128x768xf32>
    %c0_31 = arith.constant 0 : index
    %c0_32 = arith.constant 0 : index
    %53 = vector.load %arg2[%c0_31, %c0_32] : memref<128x768xbf16, #tpu.memory_space<vmem>>, vector<128x768xbf16>
    %54 = arith.extf %53 : vector<128x768xbf16> to vector<128x768xf32>
    %55 = arith.addf %51, %54 : vector<128x768xf32>
    %56 = arith.addf %52, %55 : vector<128x768xf32>
    %c0_33 = arith.constant 0 : index
    %c0_34 = arith.constant 0 : index
    %57 = vector.load %arg9[%c0_33, %c0_34] : memref<128x768xf32, #tpu.memory_space<vmem>>, vector<128x768xf32>
    tpu.vector_store %arg9[%c0_33, %c0_34], %56 {strides = array<i32>} : memref<128x768xf32, #tpu.memory_space<vmem>>, vector<128x768xf32>,
    %c0_35 = arith.constant 0 : index
    %c0_36 = arith.constant 0 : index
    %58 = vector.load %arg9[%c0_35, %c0_36] : memref<128x768xf32, #tpu.memory_space<vmem>>, vector<128x768xf32>
    %cst_37 = arith.constant dense<0.000000e+00> : vector<128xf32>
    %59 = vector.multi_reduction <add>, %58, %cst_37 [1] : vector<128x768xf32> to vector<128xf32>
    %60 = vector.shape_cast %59 : vector<128xf32> to vector<128x1xf32>
    %cst_38 = arith.constant 7.680000e+02 : f32
    %61 = vector.broadcast %cst_38 : f32 to vector<128x1xf32>
    %62 = arith.divf %60, %61 : vector<128x1xf32>
    %63 = arith.mulf %58, %58 : vector<128x768xf32>
    %cst_39 = arith.constant dense<0.000000e+00> : vector<128xf32>
    %64 = vector.multi_reduction <add>, %63, %cst_39 [1] : vector<128x768xf32> to vector<128xf32>
    %65 = vector.shape_cast %64 : vector<128xf32> to vector<128x1xf32>
    %cst_40 = arith.constant 7.680000e+02 : f32
    %66 = vector.broadcast %cst_40 : f32 to vector<128x1xf32>
    %67 = arith.divf %65, %66 : vector<128x1xf32>
    %68 = arith.mulf %62, %62 : vector<128x1xf32>
    %69 = arith.subf %67, %68 : vector<128x1xf32>
    %70 = vector.broadcast %62 : vector<128x1xf32> to vector<128x768xf32>
    %71 = arith.subf %58, %70 : vector<128x768xf32>
    %cst_41 = arith.constant 9.99999996E-13 : f32
    %72 = vector.broadcast %cst_41 : f32 to vector<128x1xf32>
    %73 = arith.addf %69, %72 : vector<128x1xf32>
    %74 = math.rsqrt %73 : vector<128x1xf32>
    %75 = vector.broadcast %74 : vector<128x1xf32> to vector<128x768xf32>
    %76 = arith.mulf %71, %75 : vector<128x768xf32>
    %c3 = arith.constant 3 : index
    %c0_42 = arith.constant 0 : index
    %77 = vector.load %arg6[%c3, %c0_42] : memref<5x768xf32, #tpu.memory_space<vmem>>, vector<1x768xf32>
    %78 = vector.broadcast %77 : vector<1x768xf32> to vector<128x768xf32>
    %79 = arith.mulf %76, %78 : vector<128x768xf32>
    %c4 = arith.constant 4 : index
    %c0_43 = arith.constant 0 : index
    %80 = vector.load %arg6[%c4, %c0_43] : memref<5x768xf32, #tpu.memory_space<vmem>>, vector<1x768xf32>
    %81 = vector.broadcast %80 : vector<1x768xf32> to vector<128x768xf32>
    %82 = arith.addf %79, %81 : vector<128x768xf32>
    %c0_44 = arith.constant 0 : index
    %c0_45 = arith.constant 0 : index
    %83 = vector.load %arg8[%c0_44, %c0_45] : memref<128x768xf32, #tpu.memory_space<vmem>>, vector<128x768xf32>
    tpu.vector_store %arg8[%c0_44, %c0_45], %82 {strides = array<i32>} : memref<128x768xf32, #tpu.memory_space<vmem>>, vector<128x768xf32>,
    return
  }
  func.func @transform_0(%arg0: i32) -> (i32, i32) {
    %c0_i32 = arith.constant 0 : i32
    %c0_i32_0 = arith.constant 0 : i32
    return %arg0, %c0_i32 : i32, i32
  }
  func.func @transform_1(%arg0: i32) -> (i32, i32) {
    %c0_i32 = arith.constant 0 : i32
    %c0_i32_0 = arith.constant 0 : i32
    return %arg0, %c0_i32 : i32, i32
  }
  func.func @transform_2(%arg0: i32) -> (i32, i32) {
    %c0_i32 = arith.constant 0 : i32
    %c0_i32_0 = arith.constant 0 : i32
    %c0_i32_1 = arith.constant 0 : i32
    return %c0_i32, %c0_i32_0 : i32, i32
  }
  func.func @transform_3(%arg0: i32) -> (i32, i32) {
    %c0_i32 = arith.constant 0 : i32
    %c0_i32_0 = arith.constant 0 : i32
    %c0_i32_1 = arith.constant 0 : i32
    return %c0_i32, %c0_i32_0 : i32, i32
  }
  func.func @transform_4(%arg0: i32) -> (i32, i32) {
    %c0_i32 = arith.constant 0 : i32
    %c0_i32_0 = arith.constant 0 : i32
    %c0_i32_1 = arith.constant 0 : i32
    return %c0_i32, %c0_i32_0 : i32, i32
  }
  func.func @transform_5(%arg0: i32) -> (i32, i32) {
    %c0_i32 = arith.constant 0 : i32
    %c0_i32_0 = arith.constant 0 : i32
    %c0_i32_1 = arith.constant 0 : i32
    return %c0_i32, %c0_i32_0 : i32, i32
  }
  func.func @transform_6(%arg0: i32) -> (i32, i32) {
    %c0_i32 = arith.constant 0 : i32
    %c0_i32_0 = arith.constant 0 : i32
    %c0_i32_1 = arith.constant 0 : i32
    return %c0_i32, %c0_i32_0 : i32, i32
  }
  func.func @transform_7(%arg0: i32) -> (i32, i32) {
    %c0_i32 = arith.constant 0 : i32
    %c0_i32_0 = arith.constant 0 : i32
    return %arg0, %c0_i32 : i32, i32
  }
}

</mosaic_0001>

<bundles_post_ra>
// kernel: tpu_custom_call.1
= control target key start
LH: loop header
LB: loop body
LE: loop exit
PB: predicated region body
PF: predicated region fallthrough
CT: control target
= control target key end

     0   :  { %s14499_s0 = inlined_call_operand.hbm [shape: bf16[256,768], index: 0, kind: input, shape index: {}]   ;;  %s14500_s1 = inlined_call_operand.hbm [shape: bf16[256,768], index: 1, kind: input, shape index: {}]   ;;  %s14501_s2 = inlined_call_operand.hbm [shape: bf16[768,768], index: 2, kind: input, shape index: {}]   ;;  %s14502_s3 = inlined_call_operand.hbm [shape: bf16[768,128], index: 3, kind: input, shape index: {}]   ;;  %s14503_s4 = inlined_call_operand.hbm [shape: bf16[128,768], index: 4, kind: input, shape index: {}]   ;;  %s14504_s5 = inlined_call_operand.hbm [shape: f32[5,768], index: 5, kind: input, shape index: {}]   ;;  %s14505_s6 = inlined_call_operand.hbm [shape: f32[2,128], index: 6, kind: input, shape index: {}]   ;;  %s14506_s7 = inlined_call_operand.hbm [shape: f32[256,768], index: 7, kind: output, shape index: {}]  }
   0x1   :  { %14720 = sst [smem:[#allocation176_spill]] %s14499_s0 }
   0x2   :  { %14721 = sst [smem:[#allocation177_spill]] %s14501_s2 }
   0x3   :  { %14722 = sst [smem:[#allocation178_spill]] %s14502_s3 }
   0x4   :  { %14723 = sst [smem:[#allocation179_spill]] %s14503_s4 }
   0x5   :  { %12 = vsyncpa [#allocation4], 0 }
   0x6   :  { %14 = vsyncpa [#allocation4 + $0x1], 0 }
   0x7   :  { %15 = vsyncpa [#allocation7], 0 }
   0x8   :  { %17 = vsyncpa [#allocation7 + $0x1], 0 }
   0x9   :  { %18 = vsyncpa [#allocation10], 0 }
   0xa   :  { %19 = vsyncpa [#allocation13], 0 }
   0xb   :  { %20 = vsyncpa [#allocation5], 0 }
   0xc   :  { %22 = vsyncpa [#allocation5 + $0x1], 0  ;;  %s9946_s24 = smov 0   ;;  %s9948_s25 = smov 0  }
   0xd   :  { %s9950_s26 = smov 0   ;;  %s9952_s27 = smov 0  }
   0xe LB: > { %s9891_s28 = smov [#allocation8]   ;;  %s9967_s30 = sadd.s32 4294967295, %s9889_s27   ;;  %s9889_s27 = sphi %s9952_s27, %s15323_s27   ;;  %s9885_s26 = sphi %s9950_s26, %s15322_s26   ;;  %s9881_s25 = sphi %s9948_s25, %s15321_s25   ;;  %s9877_s24 = sphi %s9946_s24, %s15320_s24  }
   0xf   : > { %s228_s29 = sshll.u32 %s9891_s28, 4  ;;  %p7882_p0 = scmp.ge.s32.totalorder %s9889_s27, 1  ;;  %s229_s29 = int_to_ptr.vmem [resolvable:$true] %s228_s29 }
  0x10   : > { %p14512_p1 = scmp.eq.s32.totalorder %s9967_s30, 0  ;;  %p216_p2 = scmp.lt.s32.totalorder %s9889_s27, 3 }
  0x11   : > { %s9892_s9 = smov [#allocation9]   ;;  %s9893_s12 = smov [#allocation12]  }
  0x12   : > { %p9972_p3 = pnand %p7882_p0, %p216_p2  ;;  %s241_s10 = sshll.u32 %s9892_s9, 4  ;;  %s9985_s10 = int_to_ptr.vmem [resolvable:$true] %s241_s10 }
  0x13   : > { %s9987_s13 = sshll.u32 %s9893_s12, 4  ;;  %s9634_s15 = scalar_lea.vmem %s229_s29, 36864  ;;  %s269_s13 = int_to_ptr.vmem [resolvable:$true] %s9987_s13 }
  0x14   : > { %p8597_p5 = pneg %p9972_p3  ;;  %p9635_p8 = scmp.ne.s32.totalorder %s229_s29, %s9634_s15 }
  0x15   : > { %p9642_p11 = scmp.lt.s32.totalorder %s229_s29, %s229_s29  ;;  %p9643_p12 = scmp.lt.s32.totalorder %s9634_s15, %s9634_s15 }
  0x16   : > { %p9981_p6 = pnand %p8597_p5, %p14512_p1 }
  0x17   : > { %p9644_p13 = por %p9643_p12, %p9642_p11 }
  0x18   : > { %p9991_p7 = pneg %p9981_p6 }
  0x1a   : > { %p9637_p9 = pnand %p9635_p8, %p9991_p7 }
  0x1c   : > { %p9638_p10 = pneg %p9637_p9 }
  0x1e   : > { %p9645_p0 = pnand %p9644_p13, %p9638_p10 }
  0x20   : > { %9648 = shalt.err (!%p9645_p0)
}
  0x21   : > { %s14507_s16 = smov 384   ;;  %s14509_s17 = smov 24  }
  0x22   : > { %s14727_s2 = sld [smem:[#allocation177_spill]]  ;;  %s9660_s20 = scalar_lea.vmem %s9985_s10, 6144 }
  0x23   : > { %p9661_p2 = scmp.ne.s32.totalorder %s9985_s10, %s9660_s20  ;;  %p9668_p9 = scmp.lt.s32.totalorder %s9985_s10, %s9985_s10 }
  0x24   : > { %p9669_p10 = scmp.lt.s32.totalorder %s9660_s20, %s9660_s20 }
  0x25   : > { %p9663_p5 = pnand %p9661_p2, %p9991_p7 }
  0x26   : > { %p9670_p11 = por %p9669_p10, %p9668_p9 }
  0x27   : > { %p9664_p8 = pneg %p9663_p5 }
  0x28   : > { %8600 = dma.hbm_to_vmem [thread:$0]  (!%p9981_p6), %s14727_s2, 36864, %s229_s29, [#allocation7], %s14507_s16, %s14507_s16, %s14509_s17  }
  0x29   : > { %p9671_p12 = pnand %p9670_p11, %p9664_p8 }
  0x2b   : > { %9674 = shalt.err (!%p9671_p12)
}
  0x2c   : > { %s9896_s21 = smov 64   ;;  %s9897_s22 = smov 4  }
  0x2d   : > { %s14728_s3 = sld [smem:[#allocation178_spill]]  ;;  %s9686_s29 = scalar_lea.vmem %s269_s13, 768 }
  0x2e   : > { %p9687_p13 = scmp.ne.s32.totalorder %s269_s13, %s9686_s29  ;;  %p9694_p5 = scmp.lt.s32.totalorder %s269_s13, %s269_s13 }
  0x2f   : > { %p9695_p8 = scmp.lt.s32.totalorder %s9686_s29, %s9686_s29 }
  0x30   : > { %p9689_p0 = pnand %p9687_p13, %p9991_p7 }
  0x31   : > { %p9696_p9 = por %p9695_p8, %p9694_p5 }
  0x32   : > { %p9690_p2 = pneg %p9689_p0 }
  0x33   : > { %8603 = dma.hbm_to_vmem [thread:$0]  (!%p9981_p6), %s14728_s3, 6144, %s9985_s10, [#allocation10], %s9896_s21, %s9896_s21, %s9897_s22  }
  0x34   : > { %p9697_p10 = pnand %p9696_p9, %p9690_p2 }
  0x36   : > { %9700 = shalt.err (!%p9697_p10)
}
  0x37   : > { %8609 = dma.hbm_to_vmem [thread:$0]  (!%p9981_p6), %s14504_s5, 768, %s269_s13, [#allocation13]  }
  0x38   : > { %s9898_s15 = smov [#allocation11]   ;;  %s9899_s18 = smov [#allocation14]  }
  0x39   : > { %s254_s10 = sshll.u32 %s9898_s15, 4  ;;  %s279_s19 = sshll.u32 %s9899_s18, 4  ;;  %s255_s10 = int_to_ptr.vmem [resolvable:$true] %s254_s10  ;;  %s280_s19 = int_to_ptr.vmem [resolvable:$true] %s279_s19 }
  0x3a   : > { %s9712_s20 = scalar_lea.vmem %s255_s10, 6144  ;;  %p9720_p0 = scmp.lt.s32.totalorder %s255_s10, %s255_s10 }
  0x3b   : > { %p9713_p11 = scmp.ne.s32.totalorder %s255_s10, %s9712_s20  ;;  %p9721_p2 = scmp.lt.s32.totalorder %s9712_s20, %s9712_s20 }
  0x3d   : > { %p9715_p12 = pnand %p9713_p11, %p9991_p7  ;;  %p9722_p5 = por %p9721_p2, %p9720_p0 }
  0x3f   : > { %p9716_p13 = pneg %p9715_p12 }
  0x41   : > { %p9723_p8 = pnand %p9722_p5, %p9716_p13 }
  0x43   : > { %9726 = shalt.err (!%p9723_p8)
}
  0x44   : > { %s14729_s4 = sld [smem:[#allocation179_spill]]  ;;  %s9738_s22 = scalar_lea.vmem %s280_s19, 32 }
  0x45   : > { %p9739_p9 = scmp.ne.s32.totalorder %s280_s19, %s9738_s22  ;;  %p9746_p12 = scmp.lt.s32.totalorder %s280_s19, %s280_s19 }
  0x46   : > { %p9747_p0 = scmp.lt.s32.totalorder %s9738_s22, %s9738_s22 }
  0x47   : > { %p9741_p10 = pnand %p9739_p9, %p9991_p7 }
  0x48   : > { %p9748_p13 = por %p9747_p0, %p9746_p12 }
  0x49   : > { %p9742_p11 = pneg %p9741_p10 }
  0x4a   : > { %8606 = dma.hbm_to_vmem [thread:$0]  (!%p9981_p6), %s14729_s4, 6144, %s255_s10, [#allocation10], %s14507_s16, %s14507_s16, %s14509_s17  }
  0x4b   : > { %p9749_p2 = pnand %p9748_p13, %p9742_p11 }
  0x4d   : > { %9752 = shalt.err (!%p9749_p2)
}
  0x4e   : > { %8612 = dma.hbm_to_vmem [thread:$0]  (!%p9981_p6), %s14505_s6, 32, %s280_s19, [#allocation13]  }
  0x4f   : > { %s7881_s14 = sadd.s32 4294967294, %s9889_s27   ;;  %s10044_s11 = sadd.s32 1, %s9889_s27  }
  0x50   : > { %s35_s29 = sadd.s32 1, %s9885_s26  ;;  %s32_s9 = ssub.s32 %s9889_s27, %s10044_s11 }
  0x51   : > { %p42_p7 = scmp.ne.s32.totalorder %s9885_s26, %s9881_s25  ;;  %p33_p5 = scmp.eq.s32.totalorder %s32_s9, 0 }
  0x52   : > { %p43_p8 = scmp.eq.s32.totalorder %s9889_s27, 0  ;;  %p48_p9 = scmp.ne.s32.totalorder %s9881_s25, %s9877_s24 }
  0x53   : > { %p203_p10 = scmp.eq.s32.totalorder %s9967_s30, 1  ;;  %p209_p0 = scmp.eq.s32.totalorder %s7881_s14, 1 }
  0x54   : > { %s10056_s12 = scalar_select %p33_p5, %s9885_s26, %s35_s29  }
  0x55   : > { %p44_p11 = por %p43_p8, %p42_p7  ;;  %p10060_p6 = por %p14512_p1, %p48_p9 }
  0x56   : > { %p10064_p12 = por %p203_p10, %p42_p7  ;;  %p8629_p13 = scmp.lt.s32.totalorder %s9889_s27, 2 }
  0x57   : > { %s14730_s15 = scalar_select %p10060_p6, 1, 0 }
  0x58   : > { %s14731_s10 = scalar_select %p10064_p12, 1, 0 }
  0x59   : > { %s290_s18 = sand.u32 1, %s9885_s26   ;;  %p10070_p2 = por %p209_p0, %p48_p9 }
  0x5a   : > { %s10074_s20 = smul.u32 384, %s290_s18  ;;  %p10076_p5 = pnand %p8629_p13, %p44_p11 }
  0x5b   : > { %s14732_s19 = scalar_select %p10070_p2, 1, 0 }
  0x5c   : > { %s14511_s21 = smul.u32 6144, %s9889_s27  ;;  %s14734_s0 = sld [smem:[#allocation176_spill]] }
  0x5d   : > { %s294_s29 = scalar_lea.vmem [#allocation3], %s10074_s20  ;;  %s10092_s16 = scalar_lea.sflag [#allocation4], %s290_s18 }
  0x5e   : > { %s302_s9 = sshll.u32 %s294_s29, 4  ;;  %p9755_p8 = pneg %p10076_p5  ;;  %s10090_s9 = int_to_ptr.vmem [resolvable:$true] %s302_s9 }
  0x62   : > { %s10087_s14 = scalar_lea.hbm %s14734_s0, %s14511_s21  ;;  %s9758_s22 = scalar_lea.hbm %s14734_s0, 12288 }
  0x63   : > { %s9753_s17 = scalar_lea.hbm %s10087_s14, 6144  ;;  %p9759_p11 = scmp.lt.s32.totalorder %s10087_s14, %s14734_s0 }
  0x64   : > { %p9754_p7 = scmp.ne.s32.totalorder %s10087_s14, %s9753_s17  ;;  %p9760_p0 = scmp.lt.s32.totalorder %s9758_s22, %s9753_s17 }
  0x66   : > { %p9756_p9 = pnand %p9755_p8, %p9754_p7  ;;  %p9761_p13 = por %p9760_p0, %p9759_p11 }
  0x68   : > { %p9757_p10 = pneg %p9756_p9 }
  0x6a   : > { %p9762_p4 = pnand %p9761_p13, %p9757_p10 }
  0x6c   : > { %9765 = shalt.err (!%p9762_p4)
}
  0x6d   : > { %s9766_s18 = scalar_lea.vmem %s10090_s9, 6144  ;;  %s9900_s29 = smov [#allocation3]  }
  0x6e   : > { %p9767_p1 = scmp.ne.s32.totalorder %s10090_s9, %s9766_s18  ;;  %s9771_s23 = sshll.u32 %s9900_s29, 4  ;;  %s9772_s23 = int_to_ptr.vmem [resolvable:$false] %s9771_s23 }
  0x6f   : > { %s9773_s28 = scalar_lea.vmem %s9772_s23, 12288  ;;  %p9774_p2 = scmp.lt.s32.totalorder %s10090_s9, %s9772_s23 }
  0x70   : > { %p9769_p7 = pnand %p9767_p1, %p9755_p8  ;;  %p9775_p12 = scmp.lt.s32.totalorder %s9773_s28, %s9766_s18 }
  0x72   : > { %p9770_p9 = pneg %p9769_p7  ;;  %p9776_p6 = por %p9775_p12, %p9774_p2 }
  0x74   : > { %p9777_p11 = pnand %p9776_p6, %p9770_p9 }
  0x76   : > { %9780 = shalt.err (!%p9777_p11)
}
  0x77   : > { %s14735_s2 = smov 24   ;;  %s14736_s17 = smov 384  }
  0x78   : > { %8616 = dma.hbm_to_vmem [thread:$0]  (!%p10076_p5), %s10087_s14, 6144, %s10090_s9, %s10092_s16, %s14736_s17, %s14736_s17, %s14735_s2  }
  0x79   : > { %s14737_s21 = smul.u32 6144, %s9889_s27  ;;  %s316_s23 = scalar_lea.vmem [#allocation6], %s10074_s20 }
  0x7a   : > { %s324_s28 = sshll.u32 %s316_s23, 4  ;;  %s14738_s0 = sand.u32 1, %s9889_s27   ;;  %s10130_s28 = int_to_ptr.vmem [resolvable:$true] %s324_s28 }
  0x7b   : > { %s10127_s18 = scalar_lea.hbm %s14500_s1, %s14737_s21  ;;  %s313_s3 = scalar_lea.sflag [#allocation7], %s14738_s0 }
  0x7c   : > { %s9781_s4 = scalar_lea.hbm %s10127_s18, 6144  ;;  %s9786_s9 = scalar_lea.hbm %s14500_s1, 12288 }
  0x7d   : > { %p9782_p1 = scmp.ne.s32.totalorder %s10127_s18, %s9781_s4  ;;  %p9787_p12 = scmp.lt.s32.totalorder %s10127_s18, %s14500_s1 }
  0x7e   : > { %p9788_p2 = scmp.lt.s32.totalorder %s9786_s9, %s9781_s4 }
  0x7f   : > { %p9784_p4 = pnand %p9782_p1, %p9755_p8 }
  0x80   : > { %p9789_p10 = por %p9788_p2, %p9787_p12 }
  0x81   : > { %p9785_p6 = pneg %p9784_p4 }
  0x83   : > { %p9790_p0 = pnand %p9789_p10, %p9785_p6 }
  0x85   : > { %9793 = shalt.err (!%p9790_p0)
}
  0x86   : > { %s9794_s0 = scalar_lea.vmem %s10130_s28, 6144  ;;  %s9901_s20 = smov [#allocation6]  }
  0x87   : > { %p9795_p13 = scmp.ne.s32.totalorder %s10130_s28, %s9794_s0  ;;  %s9799_s29 = sshll.u32 %s9901_s20, 4  ;;  %s9800_s29 = int_to_ptr.vmem [resolvable:$false] %s9799_s29 }
  0x88   : > { %s9801_s23 = scalar_lea.vmem %s9800_s29, 12288  ;;  %p9802_p11 = scmp.lt.s32.totalorder %s10130_s28, %s9800_s29 }
  0x89   : > { %p9797_p7 = pnand %p9795_p13, %p9755_p8  ;;  %p9803_p1 = scmp.lt.s32.totalorder %s9801_s23, %s9794_s0 }
  0x8b   : > { %p9798_p9 = pneg %p9797_p7  ;;  %p9804_p4 = por %p9803_p1, %p9802_p11 }
  0x8d   : > { %p9805_p12 = pnand %p9804_p4, %p9798_p9 }
  0x8f   : > { %9808 = shalt.err (!%p9805_p12)
}
  0x90   : > { %8619 = dma.hbm_to_vmem [thread:$0]  (!%p10076_p5), %s10127_s18, 6144, %s10130_s28, %s313_s3, %s14736_s17, %s14736_s17, %s14735_s2  }
  0x91   : > { %336 = sbr.rel (%p9972_p3) target bundleno = 1737 (0x6c9), region = 48 }
  0x96   : > { %s10162_s4 = sand.u32 1, %s9881_s25   ;;  %p14739_p8 = scmp.ne.s32.totalorder %s14730_s15, 0 }
  0x97   : > { %s8568_s16 = smul.u32 384, %s10162_s4  ;;  %s339_s14 = scalar_lea.sflag [#allocation4], %s10162_s4 }
  0x99   : > { %s10166_s9 = scalar_lea.vmem [#allocation3], %s8568_s16 }
  0x9a   : > { %9852 = dma.done.wait (%p14739_p8), %s339_s14, 6144  }
  0x9b   : > { %9854 = vsyncadd (%p14739_p8), %s339_s14, 4294961152  ;;  %s347_s3 = sand.u32 1, %s9967_s30   ;;  %s10173_s13 = scalar_lea.vmem [#allocation6], %s8568_s16 }
  0x9c   : > { %s348_s8 = scalar_lea.sflag [#allocation7], %s347_s3 }
  0x9d   : > { %9856 = dma.done.wait (%p14739_p8), %s348_s8, 6144  }
  0x9e   : > { %9858 = vsyncadd (%p14739_p8), %s348_s8, 4294961152  ;;  %p14740_p3 = scmp.eq.s32.totalorder %s9967_s30, 0 }
  0xa0   : > { %9860 = dma.done.wait (%p14740_p3), [#allocation7], 36864   ;;  %p14741_p5 = pmov %p14740_p3 }
  0xa1   : > { %p14742_p6 = pmov %p14740_p3 }
  0xa2   : > { %9862 = vsyncadd (%p14741_p5), [#allocation7], 4294930432 }
  0xa3   : > { %9864 = dma.done.wait (%p14742_p6), [#allocation10], 12288   ;;  %p14743_p2 = pmov %p14740_p3 }
  0xa5   : > { %9866 = vsyncadd (%p14743_p2), [#allocation10], 4294955008  ;;  %p14744_p10 = pmov %p14743_p2 }
  0xa6   : > { %p14745_p0 = pmov %p14743_p2 }
  0xa7   : > { %9868 = dma.done.wait (%p14744_p10), [#allocation13], 800  }
  0xa8   : > { %9870 = vsyncadd (%p14745_p0), [#allocation13], 4294966496  ;;  %v8680_v0 = vld [vmem:[#allocation8 + $0x154] ss:$24 sps:$4 sm:$0xff]   ;;  %v8684_v2 = vld [vmem:[#allocation8 + $0x150] ss:$24 sps:$4 sm:$0xff]  }
  0xa9   : > { %v8682_v1 = vld [vmem:[#allocation8 + $0x454] ss:$24 sps:$4 sm:$0xff]   ;;  %2461 = vmatprep.subr.bf16.mxu0 %v8680_v0  ;;  %v8685_v3 = vld [vmem:[#allocation8 + $0x450] ss:$24 sps:$4 sm:$0xff]   ;;  %v8686_v4 = vld [vmem:[#allocation8 + $0x124] ss:$24 sps:$4 sm:$0xff]  }
  0xaa   : > { %2574 = vmatprep.subr.bf16.mxu1 %v8682_v1  ;;  %2462 = vmatpush1.bf16.msra.mxu0 %v8684_v2  ;;  %v8688_v5 = vld [vmem:[#allocation8 + $0x424] ss:$24 sps:$4 sm:$0xff]   ;;  %v8690_v6 = vld [vmem:[#allocation8 + $0x120] ss:$24 sps:$4 sm:$0xff]   ;;  %v8692_v8 = vld [vmem:[#allocation8 + $0xf4] ss:$24 sps:$4 sm:$0xff]  }
  0xab   : > { %2575 = vmatpush1.bf16.msra.mxu1 %v8685_v3  ;;  %2463 = vmatprep.subr.bf16.mxu0 %v8686_v4  ;;  %v8691_v7 = vld [vmem:[#allocation8 + $0x420] ss:$24 sps:$4 sm:$0xff]   ;;  %v8694_v9 = vld [vmem:[#allocation8 + $0x3f4] ss:$24 sps:$4 sm:$0xff]   ;;  %v8696_v10 = vld [vmem:[#allocation8 + $0xf0] ss:$24 sps:$4 sm:$0xff]  }
  0xac   : > { %2576 = vmatprep.subr.bf16.mxu1 %v8688_v5  ;;  %v8697_v11 = vld [vmem:[#allocation8 + $0x3f0] ss:$24 sps:$4 sm:$0xff]   ;;  %v8698_v12 = vld [vmem:[#allocation8 + $0xc4] ss:$24 sps:$4 sm:$0xff]   ;;  %v8702_v14 = vld [vmem:[#allocation8 + $0xc0] ss:$24 sps:$4 sm:$0xff]  }
  0xad   : > { %v8700_v13 = vld [vmem:[#allocation8 + $0x3c4] ss:$24 sps:$4 sm:$0xff]   ;;  %v8703_v15 = vld [vmem:[#allocation8 + $0x3c0] ss:$24 sps:$4 sm:$0xff]   ;;  %v8704_v16 = vld [vmem:[#allocation8 + $0x94] ss:$24 sps:$4 sm:$0xff]  }
  0xae   : > { %2464 = vmatpush1.bf16.msra.mxu0 %v8690_v6  ;;  %v8706_v17 = vld [vmem:[#allocation8 + $0x394] ss:$24 sps:$4 sm:$0xff]   ;;  %v8708_v18 = vld [vmem:[#allocation8 + $0x90] ss:$24 sps:$4 sm:$0xff]   ;;  %v8710_v20 = vld [vmem:[#allocation8 + $0x64] ss:$24 sps:$4 sm:$0xff]  }
  0xaf   : > { %2577 = vmatpush1.bf16.msra.mxu1 %v8691_v7  ;;  %2465 = vmatprep.subr.bf16.mxu0 %v8692_v8  ;;  %v8709_v19 = vld [vmem:[#allocation8 + $0x390] ss:$24 sps:$4 sm:$0xff]   ;;  %v8712_v21 = vld [vmem:[#allocation8 + $0x364] ss:$24 sps:$4 sm:$0xff]   ;;  %v8714_v22 = vld [vmem:[#allocation8 + $0x60] ss:$24 sps:$4 sm:$0xff]  }
  0xb0   : > { %2578 = vmatprep.subr.bf16.mxu1 %v8694_v9  ;;  %v8715_v23 = vld [vmem:[#allocation8 + $0x360] ss:$24 sps:$4 sm:$0xff]   ;;  %v8716_v24 = vld [vmem:[#allocation8 + $0x34] ss:$24 sps:$4 sm:$0xff]   ;;  %v8720_v26 = vld [vmem:[#allocation8 + $0x30] ss:$24 sps:$4 sm:$0xff]  }
  0xb1   : > { %v8718_v25 = vld [vmem:[#allocation8 + $0x334] ss:$24 sps:$4 sm:$0xff]   ;;  %v8721_v27 = vld [vmem:[#allocation8 + $0x330] ss:$24 sps:$4 sm:$0xff]   ;;  %v8722_v28 = vld [vmem:[#allocation8 + $0x4] ss:$24 sps:$4 sm:$0xff]  }
  0xb2   : > { %2466 = vmatpush1.bf16.msra.mxu0 %v8696_v10  ;;  %v8724_v29 = vld [vmem:[#allocation8 + $0x304] ss:$24 sps:$4 sm:$0xff]   ;;  %v8726_v30 = vld [vmem:[#allocation8] ss:$24 sps:$4 sm:$0xff]   ;;  %v8728_v32 = vld [vmem:[#allocation8 + $0x2d4] ss:$24 sps:$4 sm:$0xff]  }
  0xb3   : > { %2579 = vmatpush1.bf16.msra.mxu1 %v8697_v11  ;;  %2467 = vmatprep.subr.bf16.mxu0 %v8698_v12  ;;  %v8727_v31 = vld [vmem:[#allocation8 + $0x300] ss:$24 sps:$4 sm:$0xff]   ;;  %v8730_v33 = vld [vmem:[#allocation8 + $0x5d4] ss:$24 sps:$4 sm:$0xff]   ;;  %v8732_v34 = vld [vmem:[#allocation8 + $0x2d0] ss:$24 sps:$4 sm:$0xff]  }
  0xb4   : > { %2580 = vmatprep.subr.bf16.mxu1 %v8700_v13  ;;  %v8733_v35 = vld [vmem:[#allocation8 + $0x5d0] ss:$24 sps:$4 sm:$0xff]   ;;  %v8734_v36 = vld [vmem:[#allocation8 + $0x2a4] ss:$24 sps:$4 sm:$0xff]   ;;  %v8738_v38 = vld [vmem:[#allocation8 + $0x2a0] ss:$24 sps:$4 sm:$0xff]  }
  0xb5   : > { %v8736_v37 = vld [vmem:[#allocation8 + $0x5a4] ss:$24 sps:$4 sm:$0xff]   ;;  %v8739_v39 = vld [vmem:[#allocation8 + $0x5a0] ss:$24 sps:$4 sm:$0xff]   ;;  %v8740_v40 = vld [vmem:[#allocation8 + $0x274] ss:$24 sps:$4 sm:$0xff]  }
  0xb6   : > { %2468 = vmatpush1.bf16.msra.mxu0 %v8702_v14  ;;  %v8742_v41 = vld [vmem:[#allocation8 + $0x574] ss:$24 sps:$4 sm:$0xff]   ;;  %v8744_v42 = vld [vmem:[#allocation8 + $0x270] ss:$24 sps:$4 sm:$0xff]   ;;  %v8746_v44 = vld [vmem:[#allocation8 + $0x244] ss:$24 sps:$4 sm:$0xff]  }
  0xb7   : > { %2581 = vmatpush1.bf16.msra.mxu1 %v8703_v15  ;;  %2469 = vmatprep.subr.bf16.mxu0 %v8704_v16  ;;  %v8745_v43 = vld [vmem:[#allocation8 + $0x570] ss:$24 sps:$4 sm:$0xff]   ;;  %v8748_v45 = vld [vmem:[#allocation8 + $0x544] ss:$24 sps:$4 sm:$0xff]   ;;  %v8750_v46 = vld [vmem:[#allocation8 + $0x240] ss:$24 sps:$4 sm:$0xff]  }
  0xb8   : > { %2582 = vmatprep.subr.bf16.mxu1 %v8706_v17  ;;  %v8751_v47 = vld [vmem:[#allocation8 + $0x540] ss:$24 sps:$4 sm:$0xff]   ;;  %v10192_v48 = vld [vmem:[%s10166_s9 + $0x4] ss:$24 sps:$4 sm:$0xff]   ;;  %v8752_v49 = vld [vmem:[#allocation8 + $0x214] ss:$24 sps:$4 sm:$0xff]  }
  0xb9   : > { %v8778_v50 = vld [vmem:[%s10166_s9 + $0xc] ss:$24 sps:$4 sm:$0xff]   ;;  %2493 = vmatprep.mubr.bf16.mxu0 %v10192_v48  ;;  %v8756_v52 = vld [vmem:[#allocation8 + $0x210] ss:$24 sps:$4 sm:$0xff]   ;;  %v8762_v56 = vld [vmem:[#allocation8 + $0x1e0] ss:$24 sps:$4 sm:$0xff]  }
  0xba   : > { %2470 = vmatpush1.bf16.msra.mxu0 %v8708_v18  ;;  %v8754_v51 = vld [vmem:[#allocation8 + $0x514] ss:$24 sps:$4 sm:$0xff]   ;;  %2606 = vmatprep.mubr.bf16.mxu1 %v8778_v50  ;;  %v8757_v53 = vld [vmem:[#allocation8 + $0x510] ss:$24 sps:$4 sm:$0xff]   ;;  %v8758_v54 = vld [vmem:[#allocation8 + $0x1e4] ss:$24 sps:$4 sm:$0xff]  }
  0xbb   : > { %2583 = vmatpush1.bf16.msra.mxu1 %v8709_v19  ;;  %2471 = vmatprep.subr.bf16.mxu0 %v8710_v20  ;;  %v8760_v55 = vld [vmem:[#allocation8 + $0x4e4] ss:$24 sps:$4 sm:$0xff]   ;;  %v8763_v57 = vld [vmem:[#allocation8 + $0x4e0] ss:$24 sps:$4 sm:$0xff]   ;;  %v8764_v58 = vld [vmem:[#allocation8 + $0x1b4] ss:$24 sps:$4 sm:$0xff]  }
  0xbc   : > { %2584 = vmatprep.subr.bf16.mxu1 %v8712_v21  ;;  %v8766_v59 = vld [vmem:[#allocation8 + $0x4b4] ss:$24 sps:$4 sm:$0xff]   ;;  %v8768_v60 = vld [vmem:[#allocation8 + $0x1b0] ss:$24 sps:$4 sm:$0xff]   ;;  %v8770_v62 = vld [vmem:[#allocation8 + $0x184] ss:$24 sps:$4 sm:$0xff]  }
  0xbd   : > { %v8769_v61 = vld [vmem:[#allocation8 + $0x4b0] ss:$24 sps:$4 sm:$0xff]   ;;  %v8772_v63 = vld [vmem:[#allocation8 + $0x484] ss:$24 sps:$4 sm:$0xff]   ;;  %v8774_v0 = vld [vmem:[#allocation8 + $0x180] ss:$24 sps:$4 sm:$0xff]  }
  0xbe   : > { %2472 = vmatpush1.bf16.msra.mxu0 %v8714_v22  ;;  %v8775_v1 = vld [vmem:[#allocation8 + $0x480] ss:$24 sps:$4 sm:$0xff]   ;;  %v8784_v2 = vld [vmem:[#allocation8 + $0x754] ss:$24 sps:$4 sm:$0xff]   ;;  %v8782_v6 = vld [vmem:[#allocation8 + $0x750] ss:$24 sps:$4 sm:$0xff]  }
  0xbf   : > { %2585 = vmatpush1.bf16.msra.mxu1 %v8715_v23  ;;  %2473 = vmatprep.subr.bf16.mxu0 %v8716_v24  ;;  %v8787_v3 = vld [vmem:[#allocation8 + $0x15c] ss:$24 sps:$4 sm:$0xff]   ;;  %v10197_v4 = vld [vmem:[%s10166_s9] ss:$24 sps:$4 sm:$0xff]   ;;  %v8793_v9 = vld [vmem:[#allocation8 + $0x12c] ss:$24 sps:$4 sm:$0xff]  }
  0xc0   : > { %2586 = vmatprep.subr.bf16.mxu1 %v8718_v25  ;;  %v8781_v5 = vld [vmem:[%s10166_s9 + $0x8] ss:$24 sps:$4 sm:$0xff]   ;;  %v8785_v7 = vld [vmem:[#allocation8 + $0x158] ss:$24 sps:$4 sm:$0xff]   ;;  %v8790_v8 = vld [vmem:[#allocation8 + $0x724] ss:$24 sps:$4 sm:$0xff]  }
  0xc1   : > { %v10201_v10 = vld [vmem:[%s10166_s9 + $0x34] ss:$24 sps:$4 sm:$0xff]   ;;  %v8788_v12 = vld [vmem:[#allocation8 + $0x720] ss:$24 sps:$4 sm:$0xff]   ;;  %v10207_v16 = vld [vmem:[%s10166_s9 + $0x30] ss:$24 sps:$4 sm:$0xff]  }
  0xc2   : > { %2474 = vmatpush1.bf16.msra.mxu0 %v8720_v26  ;;  %v8796_v11 = vld [vmem:[%s10166_s9 + $0x3c] ss:$24 sps:$4 sm:$0xff]   ;;  %v8791_v13 = vld [vmem:[#allocation8 + $0x128] ss:$24 sps:$4 sm:$0xff]   ;;  %v8799_v17 = vld [vmem:[%s10166_s9 + $0x38] ss:$24 sps:$4 sm:$0xff]  }
  0xc3   : > { %2587 = vmatpush1.bf16.msra.mxu1 %v8721_v27  ;;  %2475 = vmatprep.subr.bf16.mxu0 %v8722_v28  ;;  %v8802_v14 = vld [vmem:[#allocation8 + $0x6f4] ss:$24 sps:$4 sm:$0xff]   ;;  %v8800_v18 = vld [vmem:[#allocation8 + $0x6f0] ss:$24 sps:$4 sm:$0xff]   ;;  %v8808_v20 = vld [vmem:[#allocation8 + $0x6c4] ss:$24 sps:$4 sm:$0xff]  }
  0xc4   : > { %2588 = vmatprep.subr.bf16.mxu1 %v8724_v29  ;;  %v8805_v15 = vld [vmem:[#allocation8 + $0xfc] ss:$24 sps:$4 sm:$0xff]   ;;  %v8803_v19 = vld [vmem:[#allocation8 + $0xf8] ss:$24 sps:$4 sm:$0xff]   ;;  %v8811_v21 = vld [vmem:[#allocation8 + $0xcc] ss:$24 sps:$4 sm:$0xff]  }
  0xc5   : > { %v10211_v22 = vld [vmem:[%s10166_s9 + $0x64] ss:$24 sps:$4 sm:$0xff]   ;;  %v8806_v24 = vld [vmem:[#allocation8 + $0x6c0] ss:$24 sps:$4 sm:$0xff]   ;;  %v8820_v26 = vld [vmem:[#allocation8 + $0x694] ss:$24 sps:$4 sm:$0xff]  }
  0xc6   : > { %2476 = vmatpush1.bf16.msra.mxu0 %v8726_v30  ;;  %v8814_v23 = vld [vmem:[%s10166_s9 + $0x6c] ss:$24 sps:$4 sm:$0xff]   ;;  %v8809_v25 = vld [vmem:[#allocation8 + $0xc8] ss:$24 sps:$4 sm:$0xff]   ;;  %v8823_v27 = vld [vmem:[#allocation8 + $0x9c] ss:$24 sps:$4 sm:$0xff]  }
  0xc7   : > { %2589 = vmatpush1.bf16.msra.mxu1 %v8727_v31  ;;  %2477 = vmatprep.subr.bf16.mxu0 %v8728_v32  ;;  %v10217_v28 = vld [vmem:[%s10166_s9 + $0x60] ss:$24 sps:$4 sm:$0xff]   ;;  %v8818_v30 = vld [vmem:[#allocation8 + $0x690] ss:$24 sps:$4 sm:$0xff]   ;;  %v8826_v32 = vld [vmem:[#allocation8 + $0x664] ss:$24 sps:$4 sm:$0xff]  }
  0xc8   : > { %2590 = vmatprep.subr.bf16.mxu1 %v8730_v33  ;;  %v8817_v29 = vld [vmem:[%s10166_s9 + $0x68] ss:$24 sps:$4 sm:$0xff]   ;;  %v8821_v31 = vld [vmem:[#allocation8 + $0x98] ss:$24 sps:$4 sm:$0xff]   ;;  %v8829_v33 = vld [vmem:[#allocation8 + $0x6c] ss:$24 sps:$4 sm:$0xff]  }
  0xc9   : > { %v8845_v50 = vld [vmem:[#allocation8 + $0x8] ss:$24 sps:$4 sm:$0xff]   ;;  %s8569_s15 = smul.u32 768, %s10162_s4  ;;  %s7724_s22 = scalar_lea.sflag [#allocation5], %s10162_s4 }
  0xca   : > { %2478 = vmatpush2.bf16.msra.mxu0 %v8732_v34  ;;  %v10221_v34 = vld [vmem:[%s10166_s9 + $0x94] ss:$24 sps:$4 sm:$0xff]   ;;  %s8570_s17 = smul.u32 12288, %s9967_s30  ;;  %p15317_p7 = scmp.ne.s32.totalorder %s14731_s10, 0 }
  0xcb   : > { %2591 = vmatpush2.bf16.msra.mxu1 %v8733_v35  ;;  %2479 = vmatprep.subr.bf16.mxu0 %v8734_v36  ;;  %v8832_v35 = vld [vmem:[%s10166_s9 + $0x9c] ss:$24 sps:$4 sm:$0xff]   ;;  %v8824_v36 = vld [vmem:[#allocation8 + $0x660] ss:$24 sps:$4 sm:$0xff]   ;;  %s13883_s2 = scalar_lea.vmem [#allocation15], %s8569_s15  ;;  %s9903_s20 = smov [#allocation15]  }
  0xcc   : > { %2592 = vmatprep.subr.bf16.mxu1 %v8736_v37  ;;  %v8827_v37 = vld [vmem:[#allocation8 + $0x68] ss:$24 sps:$4 sm:$0xff]   ;;  %s7738_s18 = sshll.u32 %s13883_s2, 4  ;;  %s14446_s21 = scalar_lea.hbm %s14506_s7, %s8570_s17  ;;  %s14450_s18 = int_to_ptr.vmem [resolvable:$true] %s7738_s18 }
  0xcd   : > { %s9809_s0 = scalar_lea.vmem %s14450_s18, 12288  ;;  %s9813_s29 = sshll.u32 %s9903_s20, 4  ;;  %s9814_s29 = int_to_ptr.vmem [resolvable:$false] %s9813_s29 }
  0xce   : > { %2480 = vmatpush2.bf16.msra.mxu0 %v8738_v38  ;;  %v8838_v38 = vld [vmem:[#allocation8 + $0x634] ss:$24 sps:$4 sm:$0xff]   ;;  %p9810_p13 = scmp.ne.s32.totalorder %s14450_s18, %s9809_s0  ;;  %s9815_s23 = scalar_lea.vmem %s9814_s29, 24576 }
  0xcf   : > { %2593 = vmatpush2.bf16.msra.mxu1 %v8739_v39  ;;  %2481 = vmatprep.subr.bf16.mxu0 %v8740_v40  ;;  %v8841_v39 = vld [vmem:[#allocation8 + $0x3c] ss:$24 sps:$4 sm:$0xff]   ;;  %v10227_v40 = vld [vmem:[%s10166_s9 + $0x90] ss:$24 sps:$4 sm:$0xff]   ;;  %p9816_p1 = scmp.lt.s32.totalorder %s14450_s18, %s9814_s29  ;;  %p9817_p4 = scmp.lt.s32.totalorder %s9815_s23, %s9809_s0 }
  0xd0   : > { %2594 = vmatprep.subr.bf16.mxu1 %v8742_v41  ;;  %v8835_v41 = vld [vmem:[%s10166_s9 + $0x98] ss:$24 sps:$4 sm:$0xff]   ;;  %p9811_p9 = pnand %p9810_p13, %p15317_p7 }
  0xd1   : > { %p9818_p12 = por %p9817_p4, %p9816_p1 }
  0xd2   : > { %2482 = vmatpush2.bf16.msra.mxu0 %v8744_v42  ;;  %v8836_v42 = vld [vmem:[#allocation8 + $0x630] ss:$24 sps:$4 sm:$0xff]   ;;  %p9812_p11 = pneg %p9811_p9 }
  0xd3   : > { %2595 = vmatpush2.bf16.msra.mxu1 %v8745_v43  ;;  %2483 = vmatprep.subr.bf16.mxu0 %v8746_v44  ;;  %v8839_v43 = vld [vmem:[#allocation8 + $0x38] ss:$24 sps:$4 sm:$0xff]   ;;  %v8844_v44 = vld [vmem:[#allocation8 + $0x604] ss:$24 sps:$4 sm:$0xff]  }
  0xd4   : > { %2596 = vmatprep.subr.bf16.mxu1 %v8748_v45  ;;  %v8847_v45 = vld [vmem:[#allocation8 + $0xc] ss:$24 sps:$4 sm:$0xff]   ;;  %p9819_p8 = pnand %p9818_p12, %p9812_p11 }
  0xd6   : > { %2484 = vmatpush2.bf16.msra.mxu0 %v8750_v46  ;;  %v10231_v46 = vld [vmem:[%s10166_s9 + $0xc4] ss:$24 sps:$4 sm:$0xff]  }
  0xd7   : > { %2597 = vmatpush2.bf16.msra.mxu1 %v8751_v47  ;;  %2485 = vmatprep.subr.bf16.mxu0 %v8752_v49  ;;  %v8850_v47 = vld [vmem:[%s10166_s9 + $0xcc] ss:$24 sps:$4 sm:$0xff]   ;;  %v8842_v49 = vld [vmem:[#allocation8 + $0x600] ss:$24 sps:$4 sm:$0xff]  }
  0xd8   : > { %2598 = vmatprep.subr.bf16.mxu1 %v8754_v51  ;;  %v8856_v51 = vld [vmem:[#allocation8 + $0x8d4] ss:$24 sps:$4 sm:$0xff]  }
  0xda   : > { %2486 = vmatpush2.bf16.msra.mxu0 %v8756_v52  ;;  %v8859_v52 = vld [vmem:[#allocation8 + $0x2dc] ss:$24 sps:$4 sm:$0xff]  }
  0xdb   : > { %2599 = vmatpush2.bf16.msra.mxu1 %v8757_v53  ;;  %2487 = vmatprep.subr.bf16.mxu0 %v8758_v54  ;;  %v10237_v53 = vld [vmem:[%s10166_s9 + $0xc0] ss:$24 sps:$4 sm:$0xff]  }
  0xdc   : > { %2600 = vmatprep.subr.bf16.mxu1 %v8760_v55  ;;  %v8853_v54 = vld [vmem:[%s10166_s9 + $0xc8] ss:$24 sps:$4 sm:$0xff]  }
  0xdd   : > { %v8854_v55 = vld [vmem:[#allocation8 + $0x8d0] ss:$24 sps:$4 sm:$0xff]  }
  0xde   : > { %2488 = vmatpush2.bf16.msra.mxu0 %v8762_v56  ;;  %v8857_v56 = vld [vmem:[#allocation8 + $0x2d8] ss:$24 sps:$4 sm:$0xff]  }
  0xdf   : > { %2601 = vmatpush2.bf16.msra.mxu1 %v8763_v57  ;;  %2489 = vmatprep.subr.bf16.mxu0 %v8764_v58  ;;  %v8862_v57 = vld [vmem:[#allocation8 + $0x8a4] ss:$24 sps:$4 sm:$0xff]  }
  0xe0   : > { %2602 = vmatprep.subr.bf16.mxu1 %v8766_v59  ;;  %v8865_v58 = vld [vmem:[#allocation8 + $0x2ac] ss:$24 sps:$4 sm:$0xff]  }
  0xe1   : > { %v10241_v59 = vld [vmem:[%s10166_s9 + $0xf4] ss:$24 sps:$4 sm:$0xff]  }
  0xe2   : > { %2490 = vmatpush2.bf16.msra.mxu0 %v8768_v60  ;;  %v8868_v60 = vld [vmem:[%s10166_s9 + $0xfc] ss:$24 sps:$4 sm:$0xff]  }
  0xe3   : > { %2603 = vmatpush2.bf16.msra.mxu1 %v8769_v61  ;;  %2491 = vmatprep.subr.bf16.mxu0 %v8770_v62  ;;  %v8860_v61 = vld [vmem:[#allocation8 + $0x8a0] ss:$24 sps:$4 sm:$0xff]  }
  0xe4   : > { %2604 = vmatprep.subr.bf16.mxu1 %v8772_v63  ;;  %v8863_v62 = vld [vmem:[#allocation8 + $0x2a8] ss:$24 sps:$4 sm:$0xff]   ;;  %v8874_v63 = vld [vmem:[#allocation8 + $0x874] ss:$24 sps:$4 sm:$0xff]  }
  0xe6   : > { %2492 = vmatpush2.bf16.msra.mxu0 %v8774_v0  ;;  %v8877_v0 = vld [vmem:[#allocation8 + $0x27c] ss:$24 sps:$4 sm:$0xff]  }
  0xe7   : > { %2605 = vmatpush2.bf16.msra.mxu1 %v8775_v1  ;;  %2687 = vmatprep.subr.bf16.mxu0 %v8784_v2  ;;  %v10247_v1 = vld [vmem:[%s10166_s9 + $0xf0] ss:$24 sps:$4 sm:$0xff]  }
  0xe8   : > { %2800 = vmatprep.subr.bf16.mxu1 %v8787_v3  ;;  %v8871_v2 = vld [vmem:[%s10166_s9 + $0xf8] ss:$24 sps:$4 sm:$0xff]  }
  0xe9   : > { %2494 = vmatmul.mubr.bf16.vlgmr.msra.gmra.mxu0 %v10197_v4  ;;  %v8872_v3 = vld [vmem:[#allocation8 + $0x870] ss:$24 sps:$4 sm:$0xff]  }
  0xea   : > { %2607 = vmatmul.mubr.bf16.vlgmr.msra.gmra.mxu1 %v8781_v5  ;;  %2688 = vmatpush1.bf16.msra.mxu0 %v8782_v6  ;;  %v8875_v5 = vld [vmem:[#allocation8 + $0x278] ss:$24 sps:$4 sm:$0xff]   ;;  %v8880_v6 = vld [vmem:[#allocation8 + $0x844] ss:$24 sps:$4 sm:$0xff]  }
  0xeb   : > { %2801 = vmatpush1.bf16.msra.mxu1 %v8785_v7  ;;  %2689 = vmatprep.subr.bf16.mxu0 %v8790_v8  ;;  %v8883_v7 = vld [vmem:[#allocation8 + $0x24c] ss:$24 sps:$4 sm:$0xff]  }
  0xec   : > { %2802 = vmatprep.subr.bf16.mxu1 %v8793_v9  ;;  %2503 = vmatprep.mubr.bf16.mxu0 %v10201_v10  ;;  %v10251_v8 = vld [vmem:[%s10166_s9 + $0x124] ss:$24 sps:$4 sm:$0xff]  }
  0xed   : > { %2616 = vmatprep.mubr.bf16.mxu1 %v8796_v11  ;;  %v8886_v9 = vld [vmem:[%s10166_s9 + $0x12c] ss:$24 sps:$4 sm:$0xff]   ;;  %v8878_v11 = vld [vmem:[#allocation8 + $0x840] ss:$24 sps:$4 sm:$0xff]  }
  0xee   : > { %2690 = vmatpush1.bf16.msra.mxu0 %v8788_v12  ;;  %v8881_v12 = vld [vmem:[#allocation8 + $0x248] ss:$24 sps:$4 sm:$0xff]  }
  0xef   : > { %2803 = vmatpush1.bf16.msra.mxu1 %v8791_v13  ;;  %2691 = vmatprep.subr.bf16.mxu0 %v8802_v14  ;;  %v8892_v13 = vld [vmem:[#allocation8 + $0x814] ss:$24 sps:$4 sm:$0xff]  }
  0xf0   : > { %2804 = vmatprep.subr.bf16.mxu1 %v8805_v15  ;;  %v8895_v14 = vld [vmem:[#allocation8 + $0x21c] ss:$24 sps:$4 sm:$0xff]   ;;  %v10257_v15 = vld [vmem:[%s10166_s9 + $0x120] ss:$24 sps:$4 sm:$0xff]  }
  0xf1   : > { %2504 = vmatmul.mubr.bf16.gmra.mxu0 %v10207_v16 }
  0xf2   : > { %2617 = vmatmul.mubr.bf16.gmra.mxu1 %v8799_v17  ;;  %2692 = vmatpush1.bf16.msra.mxu0 %v8800_v18  ;;  %v8889_v17 = vld [vmem:[%s10166_s9 + $0x128] ss:$24 sps:$4 sm:$0xff]  }
  0xf3   : > { %2805 = vmatpush1.bf16.msra.mxu1 %v8803_v19  ;;  %2693 = vmatprep.subr.bf16.mxu0 %v8808_v20  ;;  %v8890_v18 = vld [vmem:[#allocation8 + $0x810] ss:$24 sps:$4 sm:$0xff]   ;;  %v8898_v20 = vld [vmem:[#allocation8 + $0x7e4] ss:$24 sps:$4 sm:$0xff]  }
  0xf4   : > { %2806 = vmatprep.subr.bf16.mxu1 %v8811_v21  ;;  %2513 = vmatprep.mubr.bf16.mxu0 %v10211_v22  ;;  %v8893_v19 = vld [vmem:[#allocation8 + $0x218] ss:$24 sps:$4 sm:$0xff]   ;;  %v8901_v21 = vld [vmem:[#allocation8 + $0x1ec] ss:$24 sps:$4 sm:$0xff]  }
  0xf5   : > { %2626 = vmatprep.mubr.bf16.mxu1 %v8814_v23  ;;  %v10261_v23 = vld [vmem:[%s10166_s9 + $0x154] ss:$24 sps:$4 sm:$0xff]  }
  0xf6   : > { %2694 = vmatpush1.bf16.msra.mxu0 %v8806_v24  ;;  %v8904_v24 = vld [vmem:[%s10166_s9 + $0x15c] ss:$24 sps:$4 sm:$0xff]  }
  0xf7   : > { %2807 = vmatpush1.bf16.msra.mxu1 %v8809_v25  ;;  %2695 = vmatprep.subr.bf16.mxu0 %v8820_v26  ;;  %v8896_v25 = vld [vmem:[#allocation8 + $0x7e0] ss:$24 sps:$4 sm:$0xff]  }
  0xf8   : > { %2808 = vmatprep.subr.bf16.mxu1 %v8823_v27  ;;  %v8899_v26 = vld [vmem:[#allocation8 + $0x1e8] ss:$24 sps:$4 sm:$0xff]   ;;  %v8910_v27 = vld [vmem:[#allocation8 + $0x7b4] ss:$24 sps:$4 sm:$0xff]  }
  0xf9   : > { %2514 = vmatmul.mubr.bf16.gmra.mxu0 %v10217_v28 }
  0xfa   : > { %2627 = vmatmul.mubr.bf16.gmra.mxu1 %v8817_v29  ;;  %2696 = vmatpush1.bf16.msra.mxu0 %v8818_v30  ;;  %v8913_v29 = vld [vmem:[#allocation8 + $0x1bc] ss:$24 sps:$4 sm:$0xff]   ;;  %v10267_v30 = vld [vmem:[%s10166_s9 + $0x150] ss:$24 sps:$4 sm:$0xff]  }
  0xfb   : > { %2809 = vmatpush1.bf16.msra.mxu1 %v8821_v31  ;;  %2697 = vmatprep.subr.bf16.mxu0 %v8826_v32  ;;  %v8907_v31 = vld [vmem:[%s10166_s9 + $0x158] ss:$24 sps:$4 sm:$0xff]  }
  0xfc   : > { %2810 = vmatprep.subr.bf16.mxu1 %v8829_v33  ;;  %2523 = vmatprep.mubr.bf16.mxu0 %v10221_v34  ;;  %v8908_v32 = vld [vmem:[#allocation8 + $0x7b0] ss:$24 sps:$4 sm:$0xff]  }
  0xfd   : > { %2636 = vmatprep.mubr.bf16.mxu1 %v8832_v35  ;;  %v8911_v33 = vld [vmem:[#allocation8 + $0x1b8] ss:$24 sps:$4 sm:$0xff]   ;;  %v8916_v35 = vld [vmem:[#allocation8 + $0x784] ss:$24 sps:$4 sm:$0xff]  }
  0xfe   : > { %2698 = vmatpush1.bf16.msra.mxu0 %v8824_v36  ;;  %v8919_v36 = vld [vmem:[#allocation8 + $0x18c] ss:$24 sps:$4 sm:$0xff]  }
  0xff   : > { %2811 = vmatpush1.bf16.msra.mxu1 %v8827_v37  ;;  %2699 = vmatprep.subr.bf16.mxu0 %v8838_v38  ;;  %v10271_v37 = vld [vmem:[%s10166_s9 + $0x14] ss:$24 sps:$4 sm:$0xff]   ;;  %v8914_v38 = vld [vmem:[#allocation8 + $0x780] ss:$24 sps:$4 sm:$0xff]  }
 0x100   : > { %2812 = vmatprep.subr.bf16.mxu1 %v8841_v39  ;;  %v8917_v39 = vld [vmem:[#allocation8 + $0x188] ss:$24 sps:$4 sm:$0xff]  }
 0x101   : > { %2524 = vmatmul.mubr.bf16.gmra.mxu0 %v10227_v40 }
 0x102   : > { %2637 = vmatmul.mubr.bf16.gmra.mxu1 %v8835_v41  ;;  %2700 = vmatpush1.bf16.msra.mxu0 %v8836_v42  ;;  %v8925_v41 = vld [vmem:[#allocation8 + $0x45c] ss:$24 sps:$4 sm:$0xff]  }
 0x103   : > { %2813 = vmatpush1.bf16.msra.mxu1 %v8839_v43  ;;  %2701 = vmatprep.subr.bf16.mxu0 %v8844_v44  ;;  %v8928_v42 = vld [vmem:[#allocation8 + $0x75c] ss:$24 sps:$4 sm:$0xff]   ;;  %v10275_v43 = vld [vmem:[%s10166_s9 + $0x10] ss:$24 sps:$4 sm:$0xff]  }
 0x104   : > { %2814 = vmatprep.subr.bf16.mxu1 %v8847_v45  ;;  %2533 = vmatprep.mubr.bf16.mxu0 %v10231_v46  ;;  %v8923_v44 = vld [vmem:[#allocation8 + $0x458] ss:$24 sps:$4 sm:$0xff]  }
 0x105   : > { %2646 = vmatprep.mubr.bf16.mxu1 %v8850_v47  ;;  %v8926_v45 = vld [vmem:[#allocation8 + $0x758] ss:$24 sps:$4 sm:$0xff]   ;;  %v8931_v47 = vld [vmem:[#allocation8 + $0x42c] ss:$24 sps:$4 sm:$0xff]  }
 0x106   : > { %2702 = vmatpush1.bf16.msra.mxu0 %v8842_v49  ;;  %v8934_v49 = vld [vmem:[#allocation8 + $0x72c] ss:$24 sps:$4 sm:$0xff]  }
 0x107   : > { %2815 = vmatpush1.bf16.msra.mxu1 %v8845_v50  ;;  %2703 = vmatprep.subr.bf16.mxu0 %v8856_v51  ;;  %v10280_v50 = vld [vmem:[%s10166_s9 + $0x44] ss:$24 sps:$4 sm:$0xff]   ;;  %v8929_v51 = vld [vmem:[#allocation8 + $0x428] ss:$24 sps:$4 sm:$0xff]  }
 0x108   : > { %2816 = vmatprep.subr.bf16.mxu1 %v8859_v52  ;;  %v8932_v52 = vld [vmem:[#allocation8 + $0x728] ss:$24 sps:$4 sm:$0xff]  }
 0x109   : > { %2534 = vmatmul.mubr.bf16.gmra.mxu0 %v10237_v53 }
 0x10a   : > { %2647 = vmatmul.mubr.bf16.gmra.mxu1 %v8853_v54  ;;  %2704 = vmatpush2.bf16.msra.mxu0 %v8854_v55  ;;  %v8943_v54 = vld [vmem:[#allocation8 + $0x6fc] ss:$24 sps:$4 sm:$0xff]   ;;  %v10287_v55 = vld [vmem:[%s10166_s9 + $0x40] ss:$24 sps:$4 sm:$0xff]  }
 0x10b   : > { %2817 = vmatpush2.bf16.msra.mxu1 %v8857_v56  ;;  %2705 = vmatprep.subr.bf16.mxu0 %v8862_v57  ;;  %v8938_v56 = vld [vmem:[#allocation8 + $0x3f8] ss:$24 sps:$4 sm:$0xff]  }
 0x10c   : > { %2818 = vmatprep.subr.bf16.mxu1 %v8865_v58  ;;  %2543 = vmatprep.mubr.bf16.mxu0 %v10241_v59  ;;  %v8941_v57 = vld [vmem:[#allocation8 + $0x6f8] ss:$24 sps:$4 sm:$0xff]   ;;  %v8949_v58 = vld [vmem:[#allocation8 + $0x6cc] ss:$24 sps:$4 sm:$0xff]  }
 0x10d   : > { %2656 = vmatprep.mubr.bf16.mxu1 %v8868_v60  ;;  %v10290_v60 = vld [vmem:[%s10166_s9 + $0x74] ss:$24 sps:$4 sm:$0xff]  }
 0x10e   : > { %2706 = vmatpush2.bf16.msra.mxu0 %v8860_v61  ;;  %v8944_v61 = vld [vmem:[#allocation8 + $0x3c8] ss:$24 sps:$4 sm:$0xff]  }
 0x10f   : > { %2819 = vmatpush2.bf16.msra.mxu1 %v8863_v62  ;;  %2707 = vmatprep.subr.bf16.mxu0 %v8874_v63  ;;  %v8947_v62 = vld [vmem:[#allocation8 + $0x6c8] ss:$24 sps:$4 sm:$0xff]   ;;  %v8958_v63 = vld [vmem:[#allocation8 + $0x69c] ss:$24 sps:$4 sm:$0xff]  }
 0x110   : > { %2820 = vmatprep.subr.bf16.mxu1 %v8877_v0  ;;  %v10297_v0 = vld [vmem:[%s10166_s9 + $0x70] ss:$24 sps:$4 sm:$0xff]  }
 0x111   : > { %2544 = vmatmul.mubr.bf16.gmra.mxu0 %v10247_v1 }
 0x112   : > { %2657 = vmatmul.mubr.bf16.gmra.mxu1 %v8871_v2  ;;  %2708 = vmatpush2.bf16.msra.mxu0 %v8872_v3  ;;  %v8953_v2 = vld [vmem:[#allocation8 + $0x398] ss:$24 sps:$4 sm:$0xff]  }
 0x113   : > { %2821 = vmatpush2.bf16.msra.mxu1 %v8875_v5  ;;  %2709 = vmatprep.subr.bf16.mxu0 %v8880_v6  ;;  %v8956_v3 = vld [vmem:[#allocation8 + $0x698] ss:$24 sps:$4 sm:$0xff]   ;;  %v8964_v5 = vld [vmem:[#allocation8 + $0x66c] ss:$24 sps:$4 sm:$0xff]  }
 0x114   : > { %2822 = vmatprep.subr.bf16.mxu1 %v8883_v7  ;;  %2553 = vmatprep.mubr.bf16.mxu0 %v10251_v8  ;;  %v10300_v6 = vld [vmem:[%s10166_s9 + $0xa4] ss:$24 sps:$4 sm:$0xff]   ;;  %v8959_v7 = vld [vmem:[#allocation8 + $0x368] ss:$24 sps:$4 sm:$0xff]  }
 0x115   : > { %2666 = vmatprep.mubr.bf16.mxu1 %v8886_v9  ;;  %v8962_v9 = vld [vmem:[#allocation8 + $0x668] ss:$24 sps:$4 sm:$0xff]  }
 0x116   : > { %2710 = vmatpush2.bf16.msra.mxu0 %v8878_v11  ;;  %v8973_v11 = vld [vmem:[#allocation8 + $0x63c] ss:$24 sps:$4 sm:$0xff]  }
 0x117   : > { %2823 = vmatpush2.bf16.msra.mxu1 %v8881_v12  ;;  %2711 = vmatprep.subr.bf16.mxu0 %v8892_v13  ;;  %v10307_v12 = vld [vmem:[%s10166_s9 + $0xa0] ss:$24 sps:$4 sm:$0xff]  }
 0x118   : > { %2824 = vmatprep.subr.bf16.mxu1 %v8895_v14  ;;  %v8968_v13 = vld [vmem:[#allocation8 + $0x338] ss:$24 sps:$4 sm:$0xff]  }
 0x119   : > { %2554 = vmatmul.mubr.bf16.gmra.mxu0 %v10257_v15  ;;  %v8971_v14 = vld [vmem:[#allocation8 + $0x638] ss:$24 sps:$4 sm:$0xff]  }
 0x11a   : > { %2667 = vmatmul.mubr.bf16.gmra.mxu1 %v8889_v17  ;;  %2712 = vmatpush2.bf16.msra.mxu0 %v8890_v18  ;;  %v8979_v17 = vld [vmem:[#allocation8 + $0x60c] ss:$24 sps:$4 sm:$0xff]  }
 0x11b   : > { %2825 = vmatpush2.bf16.msra.mxu1 %v8893_v19  ;;  %2713 = vmatprep.subr.bf16.mxu0 %v8898_v20  ;;  %v10310_v18 = vld [vmem:[%s10166_s9 + $0xd4] ss:$24 sps:$4 sm:$0xff]   ;;  %v8974_v19 = vld [vmem:[#allocation8 + $0x308] ss:$24 sps:$4 sm:$0xff]  }
 0x11c   : > { %2826 = vmatprep.subr.bf16.mxu1 %v8901_v21  ;;  %2563 = vmatprep.mubr.bf16.mxu0 %v10261_v23  ;;  %v8977_v20 = vld [vmem:[#allocation8 + $0x608] ss:$24 sps:$4 sm:$0xff]   ;;  %v8988_v21 = vld [vmem:[#allocation8 + $0x8dc] ss:$24 sps:$4 sm:$0xff]  }
 0x11d   : > { %2676 = vmatprep.mubr.bf16.mxu1 %v8904_v24  ;;  %v10317_v24 = vld [vmem:[%s10166_s9 + $0xd0] ss:$24 sps:$4 sm:$0xff]  }
 0x11e   : > { %2714 = vmatpush2.bf16.msra.mxu0 %v8896_v25  ;;  %v8983_v25 = vld [vmem:[#allocation8 + $0x5d8] ss:$24 sps:$4 sm:$0xff]  }
 0x11f   : > { %2827 = vmatpush2.bf16.msra.mxu1 %v8899_v26  ;;  %2715 = vmatprep.subr.bf16.mxu0 %v8910_v27  ;;  %v8986_v26 = vld [vmem:[#allocation8 + $0x8d8] ss:$24 sps:$4 sm:$0xff]   ;;  %v8994_v27 = vld [vmem:[#allocation8 + $0x8ac] ss:$24 sps:$4 sm:$0xff]  }
 0x120   : > { %2828 = vmatprep.subr.bf16.mxu1 %v8913_v29  ;;  %v10320_v29 = vld [vmem:[%s10166_s9 + $0x104] ss:$24 sps:$4 sm:$0xff]  }
 0x121   : > { %2564 = vmatmul.mubr.bf16.gmra.mxu0 %v10267_v30 }
 0x122   : > { %2677 = vmatmul.mubr.bf16.gmra.mxu1 %v8907_v31  ;;  %2716 = vmatpush2.bf16.msra.mxu0 %v8908_v32  ;;  %v8989_v31 = vld [vmem:[#allocation8 + $0x5a8] ss:$24 sps:$4 sm:$0xff]  }
 0x123   : > { %2829 = vmatpush2.bf16.msra.mxu1 %v8911_v33  ;;  %2717 = vmatprep.subr.bf16.mxu0 %v8916_v35  ;;  %v8992_v32 = vld [vmem:[#allocation8 + $0x8a8] ss:$24 sps:$4 sm:$0xff]   ;;  %v9003_v33 = vld [vmem:[#allocation8 + $0x87c] ss:$24 sps:$4 sm:$0xff]  }
 0x124   : > { %2830 = vmatprep.subr.bf16.mxu1 %v8919_v36  ;;  %2719 = vmatprep.mubr.bf16.mxu0 %v10271_v37  ;;  %v10327_v35 = vld [vmem:[%s10166_s9 + $0x100] ss:$24 sps:$4 sm:$0xff]  }
 0x125   : > { %2832 = vmatprep.mubr.bf16.mxu1 %v10192_v48  ;;  %v8940_v48 = vld [vmem:[#allocation8 + $0x3fc] ss:$24 sps:$4 sm:$0xff]   ;;  %v8998_v36 = vld [vmem:[#allocation8 + $0x578] ss:$24 sps:$4 sm:$0xff]  }
 0x126   : > { %2718 = vmatpush2.bf16.msra.mxu0 %v8914_v38  ;;  %v9001_v38 = vld [vmem:[#allocation8 + $0x878] ss:$24 sps:$4 sm:$0xff]  }
 0x127   : > { %2831 = vmatpush2.bf16.msra.mxu1 %v8917_v39  ;;  %2913 = vmatprep.subr.bf16.mxu0 %v8925_v41  ;;  %v9009_v39 = vld [vmem:[#allocation8 + $0x84c] ss:$24 sps:$4 sm:$0xff]  }
 0x128   : > { %3026 = vmatprep.subr.bf16.mxu1 %v8928_v42  ;;  %v10330_v41 = vld [vmem:[%s10166_s9 + $0x134] ss:$24 sps:$4 sm:$0xff]   ;;  %v9004_v42 = vld [vmem:[#allocation8 + $0x548] ss:$24 sps:$4 sm:$0xff]  }
 0x129   : > { %2720 = vmatmul.mubr.bf16.vlgmr.msra.gmra.mxu0 %v10275_v43 }
 0x12a   : > { %2833 = vmatmul.mubr.bf16.vlgmr.msra.gmra.mxu1 %v10197_v4  ;;  %2914 = vmatpush1.bf16.msra.mxu0 %v8923_v44  ;;  %v8946_v4 = vld [vmem:[#allocation8 + $0x3cc] ss:$24 sps:$4 sm:$0xff]   ;;  %v9007_v44 = vld [vmem:[#allocation8 + $0x848] ss:$24 sps:$4 sm:$0xff]  }
 0x12b   : > { %3027 = vmatpush1.bf16.msra.mxu1 %v8926_v45  ;;  %2915 = vmatprep.subr.bf16.mxu0 %v8931_v47  ;;  %v9018_v45 = vld [vmem:[#allocation8 + $0x81c] ss:$24 sps:$4 sm:$0xff]   ;;  %v10337_v47 = vld [vmem:[%s10166_s9 + $0x130] ss:$24 sps:$4 sm:$0xff]  }
 0x12c   : > { %3028 = vmatprep.subr.bf16.mxu1 %v8934_v49  ;;  %2729 = vmatprep.mubr.bf16.mxu0 %v10280_v50  ;;  %v9013_v49 = vld [vmem:[#allocation8 + $0x518] ss:$24 sps:$4 sm:$0xff]  }
 0x12d   : > { %2842 = vmatprep.mubr.bf16.mxu1 %v10201_v10  ;;  %v8955_v10 = vld [vmem:[#allocation8 + $0x39c] ss:$24 sps:$4 sm:$0xff]  }
 0x12e   : > { %2916 = vmatpush1.bf16.msra.mxu0 %v8929_v51  ;;  %v9016_v51 = vld [vmem:[#allocation8 + $0x818] ss:$24 sps:$4 sm:$0xff]  }
 0x12f   : > { %3029 = vmatpush1.bf16.msra.mxu1 %v8932_v52  ;;  %2917 = vmatprep.subr.bf16.mxu0 %v8940_v48  ;;  %v9024_v52 = vld [vmem:[#allocation8 + $0x7ec] ss:$24 sps:$4 sm:$0xff]  }
 0x130   : > { %3030 = vmatprep.subr.bf16.mxu1 %v8943_v54  ;;  %v10340_v48 = vld [vmem:[%s10166_s9 + $0x164] ss:$24 sps:$4 sm:$0xff]   ;;  %v9019_v54 = vld [vmem:[#allocation8 + $0x4e8] ss:$24 sps:$4 sm:$0xff]  }
 0x131   : > { %2730 = vmatmul.mubr.bf16.gmra.mxu0 %v10287_v55 }
 0x132   : > { %2843 = vmatmul.mubr.bf16.gmra.mxu1 %v10207_v16  ;;  %2918 = vmatpush1.bf16.msra.mxu0 %v8938_v56  ;;  %v8961_v16 = vld [vmem:[#allocation8 + $0x36c] ss:$24 sps:$4 sm:$0xff]   ;;  %v9022_v56 = vld [vmem:[#allocation8 + $0x7e8] ss:$24 sps:$4 sm:$0xff]  }
 0x133   : > { %3031 = vmatpush1.bf16.msra.mxu1 %v8941_v57  ;;  %2919 = vmatprep.subr.bf16.mxu0 %v8946_v4  ;;  %v9033_v57 = vld [vmem:[#allocation8 + $0x7bc] ss:$24 sps:$4 sm:$0xff]   ;;  %v10347_v4 = vld [vmem:[%s10166_s9 + $0x160] ss:$24 sps:$4 sm:$0xff]  }
 0x134   : > { %3032 = vmatprep.subr.bf16.mxu1 %v8949_v58  ;;  %2739 = vmatprep.mubr.bf16.mxu0 %v10290_v60  ;;  %v9028_v58 = vld [vmem:[#allocation8 + $0x4b8] ss:$24 sps:$4 sm:$0xff]  }
 0x135   : > { %2852 = vmatprep.mubr.bf16.mxu1 %v10211_v22  ;;  %v8970_v22 = vld [vmem:[#allocation8 + $0x33c] ss:$24 sps:$4 sm:$0xff]  }
 0x136   : > { %2920 = vmatpush1.bf16.msra.mxu0 %v8944_v61  ;;  %v9031_v61 = vld [vmem:[#allocation8 + $0x7b8] ss:$24 sps:$4 sm:$0xff]  }
 0x137   : > { %3033 = vmatpush1.bf16.msra.mxu1 %v8947_v62  ;;  %2921 = vmatprep.subr.bf16.mxu0 %v8955_v10  ;;  %v9039_v62 = vld [vmem:[#allocation8 + $0x78c] ss:$24 sps:$4 sm:$0xff]   ;;  %v9034_v10 = vld [vmem:[#allocation8 + $0x488] ss:$24 sps:$4 sm:$0xff]  }
 0x138   : > { %3034 = vmatprep.subr.bf16.mxu1 %v8958_v63  ;;  %v9037_v63 = vld [vmem:[#allocation8 + $0x788] ss:$24 sps:$4 sm:$0xff]  }
 0x139   : > { %2740 = vmatmul.mubr.bf16.gmra.mxu0 %v10297_v0 }
 0x13a   : > { %2853 = vmatmul.mubr.bf16.gmra.mxu1 %v10217_v28  ;;  %2922 = vmatpush1.bf16.msra.mxu0 %v8953_v2  ;;  %v8976_v28 = vld [vmem:[#allocation8 + $0x30c] ss:$24 sps:$4 sm:$0xff]  }
 0x13b   : > { %3035 = vmatpush1.bf16.msra.mxu1 %v8956_v3  ;;  %2923 = vmatprep.subr.bf16.mxu0 %v8961_v16  ;;  %v9045_v2 = vld [vmem:[#allocation8 + $0x464] ss:$24 sps:$4 sm:$0xff]   ;;  %v9040_v16 = vld [vmem:[#allocation8 + $0x160] ss:$24 sps:$4 sm:$0xff]  }
 0x13c   : > { %3036 = vmatprep.subr.bf16.mxu1 %v8964_v5  ;;  %2749 = vmatprep.mubr.bf16.mxu0 %v10300_v6  ;;  %v10352_v3 = vld [vmem:[%s10166_s9 + $0xc] ss:$24 sps:$4 sm:$0xff]   ;;  %v9043_v5 = vld [vmem:[#allocation8 + $0x460] ss:$24 sps:$4 sm:$0xff]  }
 0x13d   : > { %2862 = vmatprep.mubr.bf16.mxu1 %v10221_v34  ;;  %v8985_v34 = vld [vmem:[#allocation8 + $0x5dc] ss:$24 sps:$4 sm:$0xff]  }
 0x13e   : > { %2924 = vmatpush1.bf16.msra.mxu0 %v8959_v7  ;;  %v9051_v7 = vld [vmem:[#allocation8 + $0x434] ss:$24 sps:$4 sm:$0xff]  }
 0x13f   : > { %3037 = vmatpush1.bf16.msra.mxu1 %v8962_v9  ;;  %2925 = vmatprep.subr.bf16.mxu0 %v8970_v22  ;;  %v10357_v9 = vld [vmem:[%s10166_s9 + $0x8] ss:$24 sps:$4 sm:$0xff]  }
 0x140   : > { %3038 = vmatprep.subr.bf16.mxu1 %v8973_v11  ;;  %v9046_v22 = vld [vmem:[#allocation8 + $0x130] ss:$24 sps:$4 sm:$0xff]  }
 0x141   : > { %2750 = vmatmul.mubr.bf16.gmra.mxu0 %v10307_v12  ;;  %v9049_v11 = vld [vmem:[#allocation8 + $0x430] ss:$24 sps:$4 sm:$0xff]  }
 0x142   : > { %2863 = vmatmul.mubr.bf16.gmra.mxu1 %v10227_v40  ;;  %2926 = vmatpush1.bf16.msra.mxu0 %v8968_v13  ;;  %v8991_v40 = vld [vmem:[#allocation8 + $0x5ac] ss:$24 sps:$4 sm:$0xff]  }
 0x143   : > { %3039 = vmatpush1.bf16.msra.mxu1 %v8971_v14  ;;  %2927 = vmatprep.subr.bf16.mxu0 %v8976_v28  ;;  %v9057_v13 = vld [vmem:[#allocation8 + $0x404] ss:$24 sps:$4 sm:$0xff]   ;;  %v9052_v28 = vld [vmem:[#allocation8 + $0x100] ss:$24 sps:$4 sm:$0xff]  }
 0x144   : > { %3040 = vmatprep.subr.bf16.mxu1 %v8979_v17  ;;  %2759 = vmatprep.mubr.bf16.mxu0 %v10310_v18  ;;  %v10362_v14 = vld [vmem:[%s10166_s9 + $0x3c] ss:$24 sps:$4 sm:$0xff]   ;;  %v9055_v17 = vld [vmem:[#allocation8 + $0x400] ss:$24 sps:$4 sm:$0xff]  }
 0x145   : > { %2872 = vmatprep.mubr.bf16.mxu1 %v10231_v46  ;;  %v9000_v46 = vld [vmem:[#allocation8 + $0x57c] ss:$24 sps:$4 sm:$0xff]  }
 0x146   : > { %2928 = vmatpush1.bf16.msra.mxu0 %v8974_v19  ;;  %v9063_v19 = vld [vmem:[#allocation8 + $0x3d4] ss:$24 sps:$4 sm:$0xff]  }
 0x147   : > { %3041 = vmatpush1.bf16.msra.mxu1 %v8977_v20  ;;  %2929 = vmatprep.subr.bf16.mxu0 %v8985_v34  ;;  %v10367_v20 = vld [vmem:[%s10166_s9 + $0x38] ss:$24 sps:$4 sm:$0xff]  }
 0x148   : > { %3042 = vmatprep.subr.bf16.mxu1 %v8988_v21  ;;  %v9058_v34 = vld [vmem:[#allocation8 + $0xd0] ss:$24 sps:$4 sm:$0xff]  }
 0x149   : > { %2760 = vmatmul.mubr.bf16.gmra.mxu0 %v10317_v24  ;;  %v9061_v21 = vld [vmem:[#allocation8 + $0x3d0] ss:$24 sps:$4 sm:$0xff]  }
 0x14a   : > { %2873 = vmatmul.mubr.bf16.gmra.mxu1 %v10237_v53  ;;  %2930 = vmatpush2.bf16.msra.mxu0 %v8983_v25  ;;  %v9006_v53 = vld [vmem:[#allocation8 + $0x54c] ss:$24 sps:$4 sm:$0xff]  }
 0x14b   : > { %3043 = vmatpush2.bf16.msra.mxu1 %v8986_v26  ;;  %2931 = vmatprep.subr.bf16.mxu0 %v8991_v40  ;;  %v9069_v25 = vld [vmem:[#allocation8 + $0x3a4] ss:$24 sps:$4 sm:$0xff]   ;;  %v9064_v40 = vld [vmem:[#allocation8 + $0xa0] ss:$24 sps:$4 sm:$0xff]  }
 0x14c   : > { %3044 = vmatprep.subr.bf16.mxu1 %v8994_v27  ;;  %2769 = vmatprep.mubr.bf16.mxu0 %v10320_v29  ;;  %v10372_v26 = vld [vmem:[%s10166_s9 + $0x6c] ss:$24 sps:$4 sm:$0xff]   ;;  %v9067_v27 = vld [vmem:[#allocation8 + $0x3a0] ss:$24 sps:$4 sm:$0xff]  }
 0x14d   : > { %2882 = vmatprep.mubr.bf16.mxu1 %v10241_v59  ;;  %v9015_v59 = vld [vmem:[#allocation8 + $0x51c] ss:$24 sps:$4 sm:$0xff]  }
 0x14e   : > { %2932 = vmatpush2.bf16.msra.mxu0 %v8989_v31  ;;  %v9075_v31 = vld [vmem:[#allocation8 + $0x374] ss:$24 sps:$4 sm:$0xff]  }
 0x14f   : > { %3045 = vmatpush2.bf16.msra.mxu1 %v8992_v32  ;;  %2933 = vmatprep.subr.bf16.mxu0 %v9000_v46  ;;  %v10377_v32 = vld [vmem:[%s10166_s9 + $0x68] ss:$24 sps:$4 sm:$0xff]  }
 0x150   : > { %3046 = vmatprep.subr.bf16.mxu1 %v9003_v33  ;;  %v9070_v46 = vld [vmem:[#allocation8 + $0x70] ss:$24 sps:$4 sm:$0xff]  }
 0x151   : > { %2770 = vmatmul.mubr.bf16.gmra.mxu0 %v10327_v35  ;;  %v9073_v33 = vld [vmem:[#allocation8 + $0x370] ss:$24 sps:$4 sm:$0xff]  }
 0x152   : > { %2883 = vmatmul.mubr.bf16.gmra.mxu1 %v10247_v1  ;;  %2934 = vmatpush2.bf16.msra.mxu0 %v8998_v36  ;;  %v9021_v1 = vld [vmem:[#allocation8 + $0x4ec] ss:$24 sps:$4 sm:$0xff]  }
 0x153   : > { %3047 = vmatpush2.bf16.msra.mxu1 %v9001_v38  ;;  %2935 = vmatprep.subr.bf16.mxu0 %v9006_v53  ;;  %v9081_v36 = vld [vmem:[#allocation8 + $0x344] ss:$24 sps:$4 sm:$0xff]   ;;  %v9076_v53 = vld [vmem:[#allocation8 + $0x40] ss:$24 sps:$4 sm:$0xff]  }
 0x154   : > { %3048 = vmatprep.subr.bf16.mxu1 %v9009_v39  ;;  %2779 = vmatprep.mubr.bf16.mxu0 %v10330_v41  ;;  %v10382_v38 = vld [vmem:[%s10166_s9 + $0x9c] ss:$24 sps:$4 sm:$0xff]   ;;  %v751_v39 = vlaneseq }
 0x155   : > { %2892 = vmatprep.mubr.bf16.mxu1 %v10251_v8  ;;  %v9030_v8 = vld [vmem:[#allocation8 + $0x4bc] ss:$24 sps:$4 sm:$0xff]  }
 0x156   : > { %2936 = vmatpush2.bf16.msra.mxu0 %v9004_v42  ;;  %v9084_v42 = vld [vmem:[#allocation8 + $0x14] ss:$24 sps:$4 sm:$0xff]  }
 0x157   : > { %3049 = vmatpush2.bf16.msra.mxu1 %v9007_v44  ;;  %2937 = vmatprep.subr.bf16.mxu0 %v9015_v59  ;;  %v9087_v44 = vld [vmem:[#allocation8 + $0x314] ss:$24 sps:$4 sm:$0xff]   ;;  %v10387_v59 = vld [vmem:[%s10166_s9 + $0x98] ss:$24 sps:$4 sm:$0xff]  }
 0x158   : > { %3050 = vmatprep.subr.bf16.mxu1 %v9018_v45  ;;  %v9082_v45 = vld [vmem:[#allocation8 + $0x10] ss:$24 sps:$4 sm:$0xff]  }
 0x159   : > { %2780 = vmatmul.mubr.bf16.gmra.mxu0 %v10337_v47 }
 0x15a   : > { %2893 = vmatmul.mubr.bf16.gmra.mxu1 %v10257_v15  ;;  %2938 = vmatpush2.bf16.msra.mxu0 %v9013_v49  ;;  %v9036_v15 = vld [vmem:[#allocation8 + $0x48c] ss:$24 sps:$4 sm:$0xff]   ;;  %v10391_v49 = vshrl.u32 %v751_v39, 7 }
 0x15b   : > { %3051 = vmatpush2.bf16.msra.mxu1 %v9016_v51  ;;  %2939 = vmatprep.subr.bf16.mxu0 %v9021_v1  ;;  %v9090_v51 = vld [vmem:[#allocation8 + $0x2e4] ss:$24 sps:$4 sm:$0xff]  }
 0x15c   : > { %3052 = vmatprep.subr.bf16.mxu1 %v9024_v52  ;;  %2789 = vmatprep.mubr.bf16.mxu0 %v10340_v48  ;;  %14746 = vst [vmem:[#allocation22_spill] sm:$0xff] %v10391_v49  ;;  %v9093_v1 = vld [vmem:[#allocation8 + $0x5e4] ss:$24 sps:$4 sm:$0xff]  }
 0x15d   : > { %2902 = vmatprep.mubr.bf16.mxu1 %v10261_v23  ;;  %v9042_v23 = vld [vmem:[#allocation8 + $0x164] ss:$24 sps:$4 sm:$0xff]  }
 0x15e   : > { %2940 = vmatpush2.bf16.msra.mxu0 %v9019_v54  ;;  %v10394_v52 = vld [vmem:[%s10166_s9 + $0xcc] ss:$24 sps:$4 sm:$0xff]   ;;  %v9088_v54 = vld [vmem:[#allocation8 + $0x2e0] ss:$24 sps:$4 sm:$0xff]  }
 0x15f   : > { %3053 = vmatpush2.bf16.msra.mxu1 %v9022_v56  ;;  %2941 = vmatprep.subr.bf16.mxu0 %v9030_v8  ;;  %v9091_v56 = vld [vmem:[#allocation8 + $0x5e0] ss:$24 sps:$4 sm:$0xff]   ;;  %v9096_v8 = vld [vmem:[#allocation8 + $0x2b4] ss:$24 sps:$4 sm:$0xff]  }
 0x160   : > { %3054 = vmatprep.subr.bf16.mxu1 %v9033_v57  ;;  %v10402_v57 = vsub.s32 1, %v10391_v49 }
 0x161   : > { %2790 = vmatmul.mubr.bf16.gmra.mxu0 %v10347_v4 }
 0x162   : > { %2903 = vmatmul.mubr.bf16.gmra.mxu1 %v10267_v30  ;;  %2942 = vmatpush2.bf16.msra.mxu0 %v9028_v58  ;;  %v9048_v30 = vld [vmem:[#allocation8 + $0x134] ss:$24 sps:$4 sm:$0xff]   ;;  %14748 = vst [vmem:[#allocation24_spill] sm:$0xff] %v10402_v57 }
 0x163   : > { %3055 = vmatpush2.bf16.msra.mxu1 %v9031_v61  ;;  %2943 = vmatprep.subr.bf16.mxu0 %v9036_v15  ;;  %v9099_v58 = vld [vmem:[#allocation8 + $0x5b4] ss:$24 sps:$4 sm:$0xff]   ;;  %v9094_v61 = vld [vmem:[#allocation8 + $0x2b0] ss:$24 sps:$4 sm:$0xff]  }
 0x164   : > { %3056 = vmatprep.subr.bf16.mxu1 %v9039_v62  ;;  %2945 = vmatprep.mubr.bf16.mxu0 %v10352_v3  ;;  %v10405_v15 = vld [vmem:[%s10166_s9 + $0xc8] ss:$24 sps:$4 sm:$0xff]   ;;  %v9102_v62 = vld [vmem:[#allocation8 + $0x284] ss:$24 sps:$4 sm:$0xff]  }
 0x165   : > { %3058 = vmatprep.mubr.bf16.mxu1 %v10271_v37  ;;  %v9054_v37 = vld [vmem:[#allocation8 + $0x104] ss:$24 sps:$4 sm:$0xff]  }
 0x166   : > { %2944 = vmatpush2.bf16.msra.mxu0 %v9034_v10  ;;  %v9105_v10 = vld [vmem:[#allocation8 + $0x584] ss:$24 sps:$4 sm:$0xff]  }
 0x167   : > { %3057 = vmatpush2.bf16.msra.mxu1 %v9037_v63  ;;  %3139 = vmatprep.subr.bf16.mxu0 %v9042_v23  ;;  %v10410_v63 = vld [vmem:[%s10166_s9 + $0xfc] ss:$24 sps:$4 sm:$0xff]   ;;  %v9100_v23 = vld [vmem:[#allocation8 + $0x280] ss:$24 sps:$4 sm:$0xff]  }
 0x168   : > { %3252 = vmatprep.subr.bf16.mxu1 %v9045_v2  ;;  %v9103_v2 = vld [vmem:[#allocation8 + $0x580] ss:$24 sps:$4 sm:$0xff]  }
 0x169   : > { %2946 = vmatmul.mubr.bf16.vlgmr.msra.gmra.mxu0 %v10357_v9 }
 0x16a   : > { %3059 = vmatmul.mubr.bf16.vlgmr.msra.gmra.mxu1 %v10275_v43  ;;  %3140 = vmatpush1.bf16.msra.mxu0 %v9040_v16  ;;  %v9060_v43 = vld [vmem:[#allocation8 + $0xd4] ss:$24 sps:$4 sm:$0xff]  }
 0x16b   : > { %3253 = vmatpush1.bf16.msra.mxu1 %v9043_v5  ;;  %3141 = vmatprep.subr.bf16.mxu0 %v9048_v30  ;;  %v9111_v16 = vld [vmem:[#allocation8 + $0x554] ss:$24 sps:$4 sm:$0xff]   ;;  %v9106_v5 = vld [vmem:[#allocation8 + $0x250] ss:$24 sps:$4 sm:$0xff]  }
 0x16c   : > { %3254 = vmatprep.subr.bf16.mxu1 %v9051_v7  ;;  %2955 = vmatprep.mubr.bf16.mxu0 %v10362_v14  ;;  %v10415_v30 = vld [vmem:[%s10166_s9 + $0xf8] ss:$24 sps:$4 sm:$0xff]  }
 0x16d   : > { %3068 = vmatprep.mubr.bf16.mxu1 %v10280_v50  ;;  %v9066_v50 = vld [vmem:[#allocation8 + $0xa4] ss:$24 sps:$4 sm:$0xff]   ;;  %v9109_v7 = vld [vmem:[#allocation8 + $0x550] ss:$24 sps:$4 sm:$0xff]  }
 0x16e   : > { %3142 = vmatpush1.bf16.msra.mxu0 %v9046_v22  ;;  %v9117_v22 = vld [vmem:[#allocation8 + $0x524] ss:$24 sps:$4 sm:$0xff]  }
 0x16f   : > { %3255 = vmatpush1.bf16.msra.mxu1 %v9049_v11  ;;  %3143 = vmatprep.subr.bf16.mxu0 %v9054_v37  ;;  %v10420_v11 = vld [vmem:[%s10166_s9 + $0x12c] ss:$24 sps:$4 sm:$0xff]   ;;  %v9112_v37 = vld [vmem:[#allocation8 + $0x220] ss:$24 sps:$4 sm:$0xff]  }
 0x170   : > { %3256 = vmatprep.subr.bf16.mxu1 %v9057_v13  ;;  %v9115_v13 = vld [vmem:[#allocation8 + $0x520] ss:$24 sps:$4 sm:$0xff]  }
 0x171   : > { %2956 = vmatmul.mubr.bf16.gmra.mxu0 %v10367_v20 }
 0x172   : > { %3069 = vmatmul.mubr.bf16.gmra.mxu1 %v10287_v55  ;;  %3144 = vmatpush1.bf16.msra.mxu0 %v9052_v28  ;;  %v9072_v55 = vld [vmem:[#allocation8 + $0x74] ss:$24 sps:$4 sm:$0xff]  }
 0x173   : > { %3257 = vmatpush1.bf16.msra.mxu1 %v9055_v17  ;;  %3145 = vmatprep.subr.bf16.mxu0 %v9060_v43  ;;  %v9123_v28 = vld [vmem:[#allocation8 + $0x4f4] ss:$24 sps:$4 sm:$0xff]   ;;  %v9118_v17 = vld [vmem:[#allocation8 + $0x1f0] ss:$24 sps:$4 sm:$0xff]  }
 0x174   : > { %3258 = vmatprep.subr.bf16.mxu1 %v9063_v19  ;;  %2965 = vmatprep.mubr.bf16.mxu0 %v10372_v26  ;;  %v9121_v43 = vld [vmem:[#allocation8 + $0x4f0] ss:$24 sps:$4 sm:$0xff]  }
 0x175   : > { %3078 = vmatprep.mubr.bf16.mxu1 %v10290_v60  ;;  %v9078_v60 = vld [vmem:[#allocation8 + $0x44] ss:$24 sps:$4 sm:$0xff]   ;;  %v10425_v19 = vld [vmem:[%s10166_s9 + $0x128] ss:$24 sps:$4 sm:$0xff]  }
 0x176   : > { %3146 = vmatpush1.bf16.msra.mxu0 %v9058_v34  ;;  %v9126_v34 = vld [vmem:[#allocation8 + $0x1c4] ss:$24 sps:$4 sm:$0xff]  }
 0x177   : > { %3259 = vmatpush1.bf16.msra.mxu1 %v9061_v21  ;;  %3147 = vmatprep.subr.bf16.mxu0 %v9066_v50  ;;  %v10430_v21 = vld [vmem:[%s10166_s9 + $0x15c] ss:$24 sps:$4 sm:$0xff]   ;;  %v9124_v50 = vld [vmem:[#allocation8 + $0x1c0] ss:$24 sps:$4 sm:$0xff]  }
 0x178   : > { %3260 = vmatprep.subr.bf16.mxu1 %v9069_v25  ;;  %v9127_v25 = vld [vmem:[#allocation8 + $0x4c0] ss:$24 sps:$4 sm:$0xff]  }
 0x179   : > { %2966 = vmatmul.mubr.bf16.gmra.mxu0 %v10377_v32 }
 0x17a   : > { %3079 = vmatmul.mubr.bf16.gmra.mxu1 %v10297_v0  ;;  %3148 = vmatpush1.bf16.msra.mxu0 %v9064_v40  ;;  %v9079_v0 = vld [vmem:[#allocation8 + $0x340] ss:$24 sps:$4 sm:$0xff]   ;;  %v9132_v40 = vld [vmem:[#allocation8 + $0x194] ss:$24 sps:$4 sm:$0xff]  }
 0x17b   : > { %3261 = vmatpush1.bf16.msra.mxu1 %v9067_v27  ;;  %3149 = vmatprep.subr.bf16.mxu0 %v9072_v55  ;;  %v747_v27 = vld [vmem:[#allocation12] ss:$8 sm:$0xf] }
 0x17c   : > { %3262 = vmatprep.subr.bf16.mxu1 %v9075_v31  ;;  %2975 = vmatprep.mubr.bf16.mxu0 %v10382_v38  ;;  %v748_v55 = vld [vmem:[#allocation12] ss:$8 sm:$0x30] }
 0x17d   : > { %3088 = vmatprep.mubr.bf16.mxu1 %v10300_v6  ;;  %v9085_v6 = vld [vmem:[#allocation8 + $0x310] ss:$24 sps:$4 sm:$0xff]  }
 0x17e   : > { %3150 = vmatpush1.bf16.msra.mxu0 %v9070_v46  ;;  %v9130_v31 = vld [vmem:[#allocation8 + $0x190] ss:$24 sps:$4 sm:$0xff]  }
 0x17f   : > { %3263 = vmatpush1.bf16.msra.mxu1 %v9073_v33  ;;  %3151 = vmatprep.subr.bf16.mxu0 %v9078_v60  ;;  %v10435_v46 = vld [vmem:[%s10166_s9 + $0x158] ss:$24 sps:$4 sm:$0xff]   ;;  %v9138_v60 = vld [vmem:[#allocation8 + $0x764] ss:$24 sps:$4 sm:$0xff]  }
 0x180   : > { %3264 = vmatprep.subr.bf16.mxu1 %v9081_v36  ;;  %v9133_v33 = vld [vmem:[#allocation8 + $0x490] ss:$24 sps:$4 sm:$0xff]   ;;  %v9576_v36 = vld [vmem:[%s10166_s9 + $0x4] ss:$24 sps:$4 sm:$0xff]  }
 0x181   : > { %2976 = vmatmul.mubr.bf16.gmra.mxu0 %v10387_v59 }
 0x182   : > { %3089 = vmatmul.mubr.bf16.gmra.mxu1 %v10307_v12  ;;  %3152 = vmatpush1.bf16.msra.mxu0 %v9076_v53  ;;  %v10399_v12 = vsub.s32 0, %v10391_v49  ;;  %v9136_v53 = vld [vmem:[#allocation8 + $0x760] ss:$24 sps:$4 sm:$0xff]  }
 0x183   : > { %3265 = vmatpush1.bf16.msra.mxu1 %v9079_v0  ;;  %3153 = vmatprep.subr.bf16.mxu0 %v9084_v42 }
 0x184   : > { %3266 = vmatprep.subr.bf16.mxu1 %v9087_v44  ;;  %2985 = vmatprep.mubr.bf16.mxu0 %v10394_v52  ;;  %14747 = vst [vmem:[#allocation23_spill] sm:$0xff] %v10399_v12 }
 0x185   : > { %3098 = vmatprep.mubr.bf16.mxu1 %v10310_v18  ;;  %v9097_v18 = vld [vmem:[#allocation8 + $0x5b0] ss:$24 sps:$4 sm:$0xff]  }
 0x186   : > { %3154 = vmatpush1.bf16.msra.mxu0 %v9082_v45  ;;  %v9577_v45 = vld [vmem:[%s10166_s9] ss:$24 sps:$4 sm:$0xff]  }
 0x187   : > { %3267 = vmatpush1.bf16.msra.mxu1 %v9085_v6  ;;  %3155 = vmatprep.subr.bf16.mxu0 %v9090_v51  ;;  %v9144_v51 = vld [vmem:[#allocation8 + $0x704] ss:$24 sps:$4 sm:$0xff]  }
 0x188   : > { %3268 = vmatprep.subr.bf16.mxu1 %v9093_v1 }
 0x189   : > { %2986 = vmatmul.mubr.bf16.gmra.mxu0 %v10405_v15 }
 0x18a   : > { %3099 = vmatmul.mubr.bf16.gmra.mxu1 %v10317_v24  ;;  %3156 = vmatpush2.bf16.msra.mxu0 %v9088_v54  ;;  %v9108_v24 = vld [vmem:[#allocation8 + $0x254] ss:$24 sps:$4 sm:$0xff]  }
 0x18b   : > { %3269 = vmatpush2.bf16.msra.mxu1 %v9091_v56  ;;  %3157 = vmatprep.subr.bf16.mxu0 %v9096_v8 }
 0x18c   : > { %3270 = vmatprep.subr.bf16.mxu1 %v9099_v58  ;;  %2995 = vmatprep.mubr.bf16.mxu0 %v10410_v63  ;;  %v9578_v58 = vld [vmem:[%s10166_s9 + $0x34] ss:$24 sps:$4 sm:$0xff]  }
 0x18d   : > { %3108 = vmatprep.mubr.bf16.mxu1 %v10320_v29  ;;  %v9114_v29 = vld [vmem:[#allocation8 + $0x224] ss:$24 sps:$4 sm:$0xff]  }
 0x18e   : > { %3158 = vmatpush2.bf16.msra.mxu0 %v9094_v61 }
 0x18f   : > { %3271 = vmatpush2.bf16.msra.mxu1 %v9097_v18  ;;  %3159 = vmatprep.subr.bf16.mxu0 %v9102_v62  ;;  %v9142_v18 = vld [vmem:[#allocation8 + $0x700] ss:$24 sps:$4 sm:$0xff]  }
 0x190   : > { %3272 = vmatprep.subr.bf16.mxu1 %v9105_v10 }
 0x191   : > { %2996 = vmatmul.mubr.bf16.gmra.mxu0 %v10415_v30 }
 0x192   : > { %3109 = vmatmul.mubr.bf16.gmra.mxu1 %v10327_v35  ;;  %3160 = vmatpush2.bf16.msra.mxu0 %v9100_v23  ;;  %v9120_v35 = vld [vmem:[#allocation8 + $0x1f4] ss:$24 sps:$4 sm:$0xff]  }
 0x193   : > { %3273 = vmatpush2.bf16.msra.mxu1 %v9103_v2  ;;  %3161 = vmatprep.subr.bf16.mxu0 %v9108_v24  ;;  %v9147_v23 = vld [vmem:[#allocation8 + $0x6d4] ss:$24 sps:$4 sm:$0xff]  }
 0x194   : > { %3274 = vmatprep.subr.bf16.mxu1 %v9111_v16  ;;  %3005 = vmatprep.mubr.bf16.mxu0 %v10420_v11 }
 0x195   : > { %3118 = vmatprep.mubr.bf16.mxu1 %v10330_v41  ;;  %v9129_v41 = vld [vmem:[#allocation8 + $0x4c4] ss:$24 sps:$4 sm:$0xff]  }
 0x196   : > { %3162 = vmatpush2.bf16.msra.mxu0 %v9106_v5 }
 0x197   : > { %3275 = vmatpush2.bf16.msra.mxu1 %v9109_v7  ;;  %3163 = vmatprep.subr.bf16.mxu0 %v9114_v29  ;;  %v9579_v29 = vld [vmem:[%s10166_s9 + $0x30] ss:$24 sps:$4 sm:$0xff]  }
 0x198   : > { %3276 = vmatprep.subr.bf16.mxu1 %v9117_v22  ;;  %v9145_v22 = vld [vmem:[#allocation8 + $0x6d0] ss:$24 sps:$4 sm:$0xff]  }
 0x199   : > { %3006 = vmatmul.mubr.bf16.gmra.mxu0 %v10425_v19 }
 0x19a   : > { %3119 = vmatmul.mubr.bf16.gmra.mxu1 %v10337_v47  ;;  %3164 = vmatpush2.bf16.msra.mxu0 %v9112_v37  ;;  %v9135_v47 = vld [vmem:[#allocation8 + $0x494] ss:$24 sps:$4 sm:$0xff]  }
 0x19b   : > { %3277 = vmatpush2.bf16.msra.mxu1 %v9115_v13  ;;  %3165 = vmatprep.subr.bf16.mxu0 %v9120_v35  ;;  %v9150_v35 = vld [vmem:[#allocation8 + $0x6a4] ss:$24 sps:$4 sm:$0xff]  }
 0x19c   : > { %3278 = vmatprep.subr.bf16.mxu1 %v9123_v28  ;;  %3015 = vmatprep.mubr.bf16.mxu0 %v10430_v21 }
 0x19d   : > { %3128 = vmatprep.mubr.bf16.mxu1 %v10340_v48  ;;  %v10439_v48 = vor.u32 %v748_v55, %v747_v27 }
 0x19e   : > { %3166 = vmatpush2.bf16.msra.mxu0 %v9118_v17 }
 0x19f   : > { %3279 = vmatpush2.bf16.msra.mxu1 %v9121_v43  ;;  %3167 = vmatprep.subr.bf16.mxu0 %v9126_v34  ;;  %14749 = vst [vmem:[#allocation25_spill] sm:$0xff] %v10439_v48  ;;  %v10445_v39 = vrot.slane %v10439_v48, %v10399_v12  ;;  %v10449_v0 = vrot.slane %v10439_v48, %v10402_v57  ;;  %v9196_v12 = vld [vmem:[#allocation9 + $0x48] sm:$0xff]  }
 0x1a0   : > { %3280 = vmatprep.subr.bf16.mxu1 %v9129_v41  ;;  %v9580_v41 = vld [vmem:[%s10166_s9 + $0x64] ss:$24 sps:$4 sm:$0xff]  }
 0x1a1   : > { %3016 = vmatmul.mubr.bf16.gmra.mxu0 %v10435_v46 }
 0x1a2   : > { %3129 = vmatmul.mubr.bf16.gmra.mxu1 %v10347_v4  ;;  %3168 = vmatpush2.bf16.msra.mxu0 %v9124_v50  ;;  %v9141_v4 = vld [vmem:[#allocation8 + $0x734] ss:$24 sps:$4 sm:$0xff]  }
 0x1a3   : > { %3281 = vmatpush2.bf16.msra.mxu1 %v9127_v25  ;;  %3169 = vmatprep.subr.bf16.mxu0 %v9132_v40  ;;  %v9153_v40 = vld [vmem:[#allocation8 + $0x674] ss:$24 sps:$4 sm:$0xff]  }
 0x1a4   : > { %3282 = vmatprep.subr.bf16.mxu1 %v9135_v47  ;;  %3171 = vmatprep.mubr.bf16.mxu0 %v9576_v36 }
 0x1a5   : > { %3284 = vmatprep.mubr.bf16.mxu1 %v10352_v3  ;;  %v9139_v3 = vld [vmem:[#allocation8 + $0x730] ss:$24 sps:$4 sm:$0xff]  }
 0x1a6   : > { %3170 = vmatpush2.bf16.msra.mxu0 %v9130_v31 }
 0x1a7   : > { %3283 = vmatpush2.bf16.msra.mxu1 %v9133_v33  ;;  %3365 = vmatprep.subr.bf16.mxu0 %v9138_v60 }
 0x1a8   : > { %8532 = vmatprep.subr.bf16.mxu1 %v9138_v60 }
 0x1a9   : > { %v2495_v42 = vpop.f32.mrf.mxu0  ;;  %3172 = vmatmul.mubr.bf16.vlgmr.msra.gmra.mxu0 %v9577_v45 }
 0x1aa   : > { %v2608_v44 = vpop.f32.mrf.mxu1  ;;  %3285 = vmatmul.mubr.bf16.vlgmr.msra.gmra.mxu1 %v10357_v9  ;;  %v2496_v6 = vadd.f32 %v2495_v42, %v10445_v39  ;;  %3366 = vmatpush1.bf16.msra.mxu0 %v9136_v53  ;;  %v9156_v42 = vld [vmem:[#allocation8 + $0x644] ss:$24 sps:$4 sm:$0xff]  }
 0x1ab   : > { %8548 = vmatpush1.bf16.msra.mxu1 %v9136_v53  ;;  %v2497_v1 = vpop.f32.mrf.mxu0  ;;  %3367 = vmatprep.subr.bf16.mxu0 %v9141_v4 }
 0x1ac   : > { %v2610_v54 = vpop.f32.mrf.mxu1  ;;  %8533 = vmatprep.subr.bf16.mxu1 %v9141_v4  ;;  %v10454_v56 = vadd.f32 %v2608_v44, %v2496_v6  ;;  %v2498_v8 = vadd.f32 %v2497_v1, %v10449_v0  ;;  %3181 = vmatprep.mubr.bf16.mxu0 %v9578_v58  ;;  %v9581_v4 = vld [vmem:[%s10166_s9 + $0x60] ss:$24 sps:$4 sm:$0xff]  }
 0x1ad   : > { %3294 = vmatprep.mubr.bf16.mxu1 %v10362_v14  ;;  %v2499_v61 = vpop.f32.mrf.mxu0 }
 0x1ae   : > { %v2612_v9 = vpop.f32.mrf.mxu1  ;;  %v10459_v62 = vadd.f32 %v2610_v54, %v2498_v8  ;;  %v2500_v10 = vadd.f32 %v2499_v61, %v10445_v39  ;;  %3368 = vmatpush1.bf16.msra.mxu0 %v9139_v3  ;;  %v9582_v54 = vld [vmem:[%s10166_s9 + $0x94] ss:$24 sps:$4 sm:$0xff]  }
 0x1af   : > { %8549 = vmatpush1.bf16.msra.mxu1 %v9139_v3  ;;  %v2501_v2 = vpop.f32.mrf.mxu0  ;;  %3369 = vmatprep.subr.bf16.mxu0 %v9144_v51  ;;  %v9159_v61 = vld [vmem:[#allocation8 + $0x614] ss:$24 sps:$4 sm:$0xff]  }
 0x1b0   : > { %v2614_v24 = vpop.f32.mrf.mxu1  ;;  %8534 = vmatprep.subr.bf16.mxu1 %v9144_v51  ;;  %v10462_v16 = vadd.f32 %v2612_v9, %v2500_v10  ;;  %v2502_v5 = vadd.f32 %v2501_v2, %v10449_v0 }
 0x1b1   : > { %v2505_v14 = vpop.f32.mrf.mxu0  ;;  %3182 = vmatmul.mubr.bf16.gmra.mxu0 %v9579_v29 }
 0x1b2   : > { %v2618_v7 = vpop.f32.mrf.mxu1  ;;  %3295 = vmatmul.mubr.bf16.gmra.mxu1 %v10367_v20  ;;  %v10467_v37 = vadd.f32 %v2614_v24, %v2502_v5  ;;  %v2506_v13 = vadd.f32 %v2505_v14, %v10445_v39  ;;  %3370 = vmatpush1.bf16.msra.mxu0 %v9142_v18  ;;  %v9148_v20 = vld [vmem:[#allocation8 + $0x6a0] ss:$24 sps:$4 sm:$0xff]   ;;  %v9583_v14 = vld [vmem:[%s10166_s9 + $0x90] ss:$24 sps:$4 sm:$0xff]  }
 0x1b3   : > { %8550 = vmatpush1.bf16.msra.mxu1 %v9142_v18  ;;  %v2507_v28 = vpop.f32.mrf.mxu0  ;;  %3371 = vmatprep.subr.bf16.mxu0 %v9147_v23 }
 0x1b4   : > { %v2620_v17 = vpop.f32.mrf.mxu1  ;;  %8535 = vmatprep.subr.bf16.mxu1 %v9147_v23  ;;  %v10470_v43 = vadd.f32 %v2618_v7, %v2506_v13  ;;  %v2508_v34 = vadd.f32 %v2507_v28, %v10449_v0  ;;  %3191 = vmatprep.mubr.bf16.mxu0 %v9580_v41  ;;  %v9162_v28 = vld [vmem:[#allocation8 + $0x8e4] ss:$24 sps:$4 sm:$0xff]  }
 0x1b5   : > { %3304 = vmatprep.mubr.bf16.mxu1 %v10372_v26  ;;  %v2509_v50 = vpop.f32.mrf.mxu0  ;;  %v9151_v26 = vld [vmem:[#allocation8 + $0x670] ss:$24 sps:$4 sm:$0xff]   ;;  %v9584_v41 = vld [vmem:[%s10166_s9 + $0xc4] ss:$24 sps:$4 sm:$0xff]  }
 0x1b6   : > { %v2622_v25 = vpop.f32.mrf.mxu1  ;;  %v10475_v27 = vadd.f32 %v2620_v17, %v2508_v34  ;;  %v2510_v55 = vadd.f32 %v2509_v50, %v10445_v39  ;;  %3372 = vmatpush1.bf16.msra.mxu0 %v9145_v22 }
 0x1b7   : > { %8551 = vmatpush1.bf16.msra.mxu1 %v9145_v22  ;;  %v2511_v47 = vpop.f32.mrf.mxu0  ;;  %3373 = vmatprep.subr.bf16.mxu0 %v9150_v35  ;;  %v9157_v22 = vld [vmem:[#allocation8 + $0x610] ss:$24 sps:$4 sm:$0xff]  }
 0x1b8   : > { %v2624_v31 = vpop.f32.mrf.mxu1  ;;  %8536 = vmatprep.subr.bf16.mxu1 %v9150_v35  ;;  %v10478_v33 = vadd.f32 %v2622_v25, %v2510_v55  ;;  %v2512_v60 = vadd.f32 %v2511_v47, %v10449_v0 }
 0x1b9   : > { %v2515_v36 = vpop.f32.mrf.mxu0  ;;  %3192 = vmatmul.mubr.bf16.gmra.mxu0 %v9581_v4 }
 0x1ba   : > { %v2628_v53 = vpop.f32.mrf.mxu1  ;;  %3305 = vmatmul.mubr.bf16.gmra.mxu1 %v10377_v32  ;;  %v10483_v44 = vadd.f32 %v2624_v31, %v2512_v60  ;;  %v2516_v45 = vadd.f32 %v2515_v36, %v10445_v39  ;;  %3374 = vmatpush1.bf16.msra.mxu0 %v9148_v20  ;;  %v9154_v32 = vld [vmem:[#allocation8 + $0x640] ss:$24 sps:$4 sm:$0xff]   ;;  %v9165_v31 = vld [vmem:[#allocation8 + $0x8b4] ss:$24 sps:$4 sm:$0xff]  }
 0x1bb   : > { %8552 = vmatpush1.bf16.msra.mxu1 %v9148_v20  ;;  %v2517_v3 = vpop.f32.mrf.mxu0  ;;  %3375 = vmatprep.subr.bf16.mxu0 %v9153_v40 }
 0x1bc   : > { %v2630_v6 = vpop.f32.mrf.mxu1  ;;  %8537 = vmatprep.subr.bf16.mxu1 %v9153_v40  ;;  %v10486_v51 = vadd.f32 %v2628_v53, %v2516_v45  ;;  %v2518_v1 = vadd.f32 %v2517_v3, %v10449_v0  ;;  %3201 = vmatprep.mubr.bf16.mxu0 %v9582_v54  ;;  %v9160_v40 = vld [vmem:[#allocation8 + $0x8e0] ss:$24 sps:$4 sm:$0xff]   ;;  %v9163_v45 = vld [vmem:[#allocation8 + $0x8b0] ss:$24 sps:$4 sm:$0xff]  }
 0x1bd   : > { %3314 = vmatprep.mubr.bf16.mxu1 %v10382_v38  ;;  %v2519_v8 = vpop.f32.mrf.mxu0  ;;  %v9585_v53 = vld [vmem:[%s10166_s9 + $0xc0] ss:$24 sps:$4 sm:$0xff]  }
 0x1be   : > { %v2632_v58 = vpop.f32.mrf.mxu1  ;;  %v10491_v9 = vadd.f32 %v2630_v6, %v2518_v1  ;;  %v2520_v18 = vadd.f32 %v2519_v8, %v10445_v39  ;;  %3376 = vmatpush1.bf16.msra.mxu0 %v9151_v26  ;;  %v9168_v1 = vld [vmem:[#allocation8 + $0x884] ss:$24 sps:$4 sm:$0xff]   ;;  %v9586_v8 = vld [vmem:[%s10166_s9 + $0xf4] ss:$24 sps:$4 sm:$0xff]  }
 0x1bf   : > { %8553 = vmatpush1.bf16.msra.mxu1 %v9151_v26  ;;  %v2521_v10 = vpop.f32.mrf.mxu0  ;;  %3377 = vmatprep.subr.bf16.mxu0 %v9156_v42 }
 0x1c0   : > { %v2634_v23 = vpop.f32.mrf.mxu1  ;;  %8538 = vmatprep.subr.bf16.mxu1 %v9156_v42  ;;  %v10494_v2 = vadd.f32 %v2632_v58, %v2520_v18  ;;  %v2522_v24 = vadd.f32 %v2521_v10, %v10449_v0  ;;  %v9166_v10 = vld [vmem:[#allocation8 + $0x880] ss:$24 sps:$4 sm:$0xff]  }
 0x1c1   : > { %v2525_v38 = vpop.f32.mrf.mxu0  ;;  %3202 = vmatmul.mubr.bf16.gmra.mxu0 %v9583_v14 }
 0x1c2   : > { %v2638_v5 = vpop.f32.mrf.mxu1  ;;  %3315 = vmatmul.mubr.bf16.gmra.mxu1 %v10387_v59  ;;  %v10499_v7 = vadd.f32 %v2634_v23, %v2522_v24  ;;  %v2526_v29 = vadd.f32 %v2525_v38, %v10445_v39  ;;  %3378 = vmatpush1.bf16.msra.mxu0 %v9154_v32  ;;  %v9171_v38 = vld [vmem:[#allocation8 + $0x854] ss:$24 sps:$4 sm:$0xff]  }
 0x1c3   : > { %8554 = vmatpush1.bf16.msra.mxu1 %v9154_v32  ;;  %v2527_v13 = vpop.f32.mrf.mxu0  ;;  %3379 = vmatprep.subr.bf16.mxu0 %v9159_v61 }
 0x1c4   : > { %v2640_v35 = vpop.f32.mrf.mxu1  ;;  %8539 = vmatprep.subr.bf16.mxu1 %v9159_v61  ;;  %v10502_v17 = vadd.f32 %v2638_v5, %v2526_v29  ;;  %v2528_v34 = vadd.f32 %v2527_v13, %v10449_v0  ;;  %3211 = vmatprep.mubr.bf16.mxu0 %v9584_v41 }
 0x1c5   : > { %3324 = vmatprep.mubr.bf16.mxu1 %v10394_v52  ;;  %v2529_v59 = vpop.f32.mrf.mxu0 }
 0x1c6   : > { %v2642_v20 = vpop.f32.mrf.mxu1  ;;  %v10507_v50 = vadd.f32 %v2640_v35, %v2528_v34  ;;  %v2530_v25 = vadd.f32 %v2529_v59, %v10445_v39  ;;  %3380 = vmatpush1.bf16.msra.mxu0 %v9157_v22  ;;  %v9174_v59 = vld [vmem:[#allocation8 + $0x824] ss:$24 sps:$4 sm:$0xff]  }
 0x1c7   : > { %8555 = vmatpush1.bf16.msra.mxu1 %v9157_v22  ;;  %v2531_v55 = vpop.f32.mrf.mxu0  ;;  %3381 = vmatprep.subr.bf16.mxu0 %v9162_v28  ;;  %v9587_v22 = vld [vmem:[%s10166_s9 + $0xf0] ss:$24 sps:$4 sm:$0xff]  }
 0x1c8   : > { %v2644_v47 = vpop.f32.mrf.mxu1  ;;  %8540 = vmatprep.subr.bf16.mxu1 %v9162_v28  ;;  %v10510_v60 = vadd.f32 %v2642_v20, %v2530_v25  ;;  %v2532_v26 = vadd.f32 %v2531_v55, %v10449_v0  ;;  %v9169_v28 = vld [vmem:[#allocation8 + $0x850] ss:$24 sps:$4 sm:$0xff]  }
 0x1c9   : > { %v2535_v52 = vpop.f32.mrf.mxu0  ;;  %3212 = vmatmul.mubr.bf16.gmra.mxu0 %v9585_v53  ;;  %v9177_v53 = vld [vmem:[#allocation8 + $0x7f4] ss:$24 sps:$4 sm:$0xff]  }
 0x1ca   : > { %v2648_v36 = vpop.f32.mrf.mxu1  ;;  %3325 = vmatmul.mubr.bf16.gmra.mxu1 %v10405_v15  ;;  %v10515_v4 = vadd.f32 %v2644_v47, %v2532_v26  ;;  %v2536_v42 = vadd.f32 %v2535_v52, %v10445_v39  ;;  %3382 = vmatpush2.bf16.msra.mxu0 %v9160_v40  ;;  %v9172_v26 = vld [vmem:[#allocation8 + $0x820] ss:$24 sps:$4 sm:$0xff]  }
 0x1cb   : > { %8556 = vmatpush2.bf16.msra.mxu1 %v9160_v40  ;;  %v2537_v3 = vpop.f32.mrf.mxu0  ;;  %3383 = vmatprep.subr.bf16.mxu0 %v9165_v31  ;;  %v9588_v40 = vld [vmem:[%s10166_s9 + $0x124] ss:$24 sps:$4 sm:$0xff]  }
 0x1cc   : > { %v2650_v6 = vpop.f32.mrf.mxu1  ;;  %8541 = vmatprep.subr.bf16.mxu1 %v9165_v31  ;;  %v10518_v54 = vadd.f32 %v2648_v36, %v2536_v42  ;;  %v2538_v32 = vadd.f32 %v2537_v3, %v10449_v0  ;;  %3221 = vmatprep.mubr.bf16.mxu0 %v9586_v8  ;;  %v9175_v8 = vld [vmem:[#allocation8 + $0x7f0] ss:$24 sps:$4 sm:$0xff]  }
 0x1cd   : > { %3334 = vmatprep.mubr.bf16.mxu1 %v10410_v63  ;;  %v2539_v15 = vpop.f32.mrf.mxu0 }
 0x1ce   : > { %v2652_v58 = vpop.f32.mrf.mxu1  ;;  %v10523_v61 = vadd.f32 %v2650_v6, %v2538_v32  ;;  %v2540_v18 = vadd.f32 %v2539_v15, %v10445_v39  ;;  %3384 = vmatpush2.bf16.msra.mxu0 %v9163_v45  ;;  %v9589_v6 = vld [vmem:[%s10166_s9 + $0x120] ss:$24 sps:$4 sm:$0xff]  }
 0x1cf   : > { %8557 = vmatpush2.bf16.msra.mxu1 %v9163_v45  ;;  %v2541_v23 = vpop.f32.mrf.mxu0  ;;  %3385 = vmatprep.subr.bf16.mxu0 %v9168_v1 }
 0x1d0   : > { %v2654_v24 = vpop.f32.mrf.mxu1  ;;  %8542 = vmatprep.subr.bf16.mxu1 %v9168_v1  ;;  %v10526_v5 = vadd.f32 %v2652_v58, %v2540_v18  ;;  %v2542_v14 = vadd.f32 %v2541_v23, %v10449_v0  ;;  %v9180_v18 = vld [vmem:[#allocation8 + $0x7c4] ss:$24 sps:$4 sm:$0xff]  }
 0x1d1   : > { %v2545_v63 = vpop.f32.mrf.mxu0  ;;  %3222 = vmatmul.mubr.bf16.gmra.mxu0 %v9587_v22 }
 0x1d2   : > { %v2658_v29 = vpop.f32.mrf.mxu1  ;;  %3335 = vmatmul.mubr.bf16.gmra.mxu1 %v10415_v30  ;;  %v10531_v13 = vadd.f32 %v2654_v24, %v2542_v14  ;;  %v2546_v35 = vadd.f32 %v2545_v63, %v10445_v39  ;;  %3386 = vmatpush2.bf16.msra.mxu0 %v9166_v10  ;;  %v9590_v24 = vld [vmem:[%s10166_s9 + $0x154] ss:$24 sps:$4 sm:$0xff]  }
 0x1d3   : > { %8558 = vmatpush2.bf16.msra.mxu1 %v9166_v10  ;;  %v2547_v34 = vpop.f32.mrf.mxu0  ;;  %3387 = vmatprep.subr.bf16.mxu0 %v9171_v38 }
 0x1d4   : > { %v2660_v41 = vpop.f32.mrf.mxu1  ;;  %8543 = vmatprep.subr.bf16.mxu1 %v9171_v38  ;;  %v10534_v20 = vadd.f32 %v2658_v29, %v2546_v35  ;;  %v2548_v25 = vadd.f32 %v2547_v34, %v10449_v0  ;;  %3231 = vmatprep.mubr.bf16.mxu0 %v9588_v40  ;;  %v9178_v29 = vld [vmem:[#allocation8 + $0x7c0] ss:$24 sps:$4 sm:$0xff]  }
 0x1d5   : > { %3344 = vmatprep.mubr.bf16.mxu1 %v10420_v11  ;;  %v2549_v30 = vpop.f32.mrf.mxu0 }
 0x1d6   : > { %v2662_v55 = vpop.f32.mrf.mxu1  ;;  %v10539_v47 = vadd.f32 %v2660_v41, %v2548_v25  ;;  %v2550_v31 = vadd.f32 %v2549_v30, %v10445_v39  ;;  %3388 = vmatpush2.bf16.msra.mxu0 %v9169_v28  ;;  %v9591_v25 = vld [vmem:[%s10166_s9 + $0x150] ss:$24 sps:$4 sm:$0xff]  }
 0x1d7   : > { %8559 = vmatpush2.bf16.msra.mxu1 %v9169_v28  ;;  %v2551_v52 = vpop.f32.mrf.mxu0  ;;  %3389 = vmatprep.subr.bf16.mxu0 %v9174_v59  ;;  %v9183_v28 = vld [vmem:[#allocation8 + $0x794] ss:$24 sps:$4 sm:$0xff]  }
 0x1d8   : > { %v2664_v36 = vpop.f32.mrf.mxu1  ;;  %8544 = vmatprep.subr.bf16.mxu1 %v9174_v59  ;;  %v10542_v42 = vadd.f32 %v2662_v55, %v2550_v31  ;;  %v2552_v45 = vadd.f32 %v2551_v52, %v10449_v0  ;;  %v9181_v55 = vld [vmem:[#allocation8 + $0x790] ss:$24 sps:$4 sm:$0xff]   ;;  %v9184_v52 = vld [vmem:[#allocation9 + $0x78] sm:$0xff]  }
 0x1d9   : > { %v2555_v11 = vpop.f32.mrf.mxu0  ;;  %3232 = vmatmul.mubr.bf16.gmra.mxu0 %v9589_v6 }
 0x1da   : > { %v2668_v3 = vpop.f32.mrf.mxu1  ;;  %3345 = vmatmul.mubr.bf16.gmra.mxu1 %v10425_v19  ;;  %v10547_v1 = vadd.f32 %v2664_v36, %v2552_v45  ;;  %v2556_v32 = vadd.f32 %v2555_v11, %v10445_v39  ;;  %3390 = vmatpush2.bf16.msra.mxu0 %v9172_v26  ;;  %v9200_v36 = vld [vmem:[#allocation9 + $0xf8] sm:$0xff]   ;;  %v9592_v11 = vld [vmem:[%s10166_s9 + $0x14] ss:$24 sps:$4 sm:$0xff]  }
 0x1db   : > { %8560 = vmatpush2.bf16.msra.mxu1 %v9172_v26  ;;  %v2557_v15 = vpop.f32.mrf.mxu0  ;;  %3391 = vmatprep.subr.bf16.mxu0 %v9177_v53 }
 0x1dc   : > { %v2670_v58 = vpop.f32.mrf.mxu1  ;;  %8545 = vmatprep.subr.bf16.mxu1 %v9177_v53  ;;  %v10550_v10 = vadd.f32 %v2668_v3, %v2556_v32  ;;  %v2558_v23 = vadd.f32 %v2557_v15, %v10449_v0  ;;  %3241 = vmatprep.mubr.bf16.mxu0 %v9590_v24  ;;  %v9185_v15 = vld [vmem:[#allocation9 + $0x38] sm:$0xff]  }
 0x1dd   : > { %3354 = vmatprep.mubr.bf16.mxu1 %v10430_v21  ;;  %v2559_v19 = vpop.f32.mrf.mxu0 }
 0x1de   : > { %v2672_v38 = vpop.f32.mrf.mxu1  ;;  %v10555_v14 = vadd.f32 %v2670_v58, %v2558_v23  ;;  %v2560_v63 = vadd.f32 %v2559_v19, %v10445_v39  ;;  %3392 = vmatpush2.bf16.msra.mxu0 %v9175_v8  ;;  %v9186_v23 = vld [vmem:[#allocation9 + $0x70] sm:$0xff]  }
 0x1df   : > { %8561 = vmatpush2.bf16.msra.mxu1 %v9175_v8  ;;  %v2561_v22 = vpop.f32.mrf.mxu0  ;;  %3393 = vmatprep.subr.bf16.mxu0 %v9180_v18 }
 0x1e0   : > { %v2674_v35 = vpop.f32.mrf.mxu1  ;;  %8546 = vmatprep.subr.bf16.mxu1 %v9180_v18  ;;  %v10558_v34 = vadd.f32 %v2672_v38, %v2560_v63  ;;  %v2562_v41 = vadd.f32 %v2561_v22, %v10449_v0  ;;  %v9201_v38 = vld [vmem:[#allocation9 + $0xb8] sm:$0xff]   ;;  %v9595_v22 = vld [vmem:[%s10166_s9 + $0xd0] ss:$24 sps:$4 sm:$0xff]  }
 0x1e1   : > { %v2565_v21 = vpop.f32.mrf.mxu0  ;;  %3242 = vmatmul.mubr.bf16.gmra.mxu0 %v9591_v25  ;;  %v9597_v25 = vld [vmem:[%s10166_s9 + $0x104] ss:$24 sps:$4 sm:$0xff]  }
 0x1e2   : > { %v2678_v59 = vpop.f32.mrf.mxu1  ;;  %3355 = vmatmul.mubr.bf16.gmra.mxu1 %v10435_v46  ;;  %v10563_v40 = vadd.f32 %v2674_v35, %v2562_v41  ;;  %v2566_v30 = vadd.f32 %v2565_v21, %v10445_v39  ;;  %3394 = vmatpush2.bf16.msra.mxu0 %v9178_v29  ;;  %v9593_v46 = vld [vmem:[%s10166_s9 + $0xd4] ss:$24 sps:$4 sm:$0xff]   ;;  %v9596_v21 = vld [vmem:[%s10166_s9 + $0x44] ss:$24 sps:$4 sm:$0xff]  }
 0x1e3   : > { %8562 = vmatpush2.bf16.msra.mxu1 %v9178_v29  ;;  %v2567_v31 = vpop.f32.mrf.mxu0  ;;  %3395 = vmatprep.subr.bf16.mxu0 %v9183_v28  ;;  %v9202_v35 = vld [vmem:[#allocation9 + $0xf0] sm:$0xff]  }
 0x1e4   : > { %v2680_v26 = vpop.f32.mrf.mxu1  ;;  %8547 = vmatprep.subr.bf16.mxu1 %v9183_v28  ;;  %v10566_v53 = vadd.f32 %v2678_v59, %v2566_v30  ;;  %v2568_v45 = vadd.f32 %v2567_v31, %v10449_v0  ;;  %3397 = vmatprep.mubr.bf16.mxu0 %v9592_v11  ;;  %v9187_v41 = vld [vmem:[#allocation9 + $0x30] sm:$0xff]   ;;  %v9188_v30 = vld [vmem:[#allocation9 + $0x68] sm:$0xff]   ;;  %v9190_v11 = vld [vmem:[#allocation9 + $0x60] sm:$0xff]  }
 0x1e5   : > { %3437 = vmatprep.mubr.bf16.mxu1 %v9593_v46  ;;  %v2569_v3 = vpop.f32.mrf.mxu0  ;;  %v9204_v46 = vld [vmem:[#allocation9 + $0xe8] sm:$0xff]  }
 0x1e6   : > { %14750 = vst [vmem:[#allocation26_spill] sm:$0xff] %v10566_v53  ;;  %v2682_v6 = vpop.f32.mrf.mxu1  ;;  %v10571_v32 = vadd.f32 %v2680_v26, %v2568_v45  ;;  %v2570_v8 = vadd.f32 %v2569_v3, %v10445_v39  ;;  %3396 = vmatpush2.bf16.msra.mxu0 %v9181_v55  ;;  %v9594_v39 = vld [vmem:[%s10166_s9 + $0x10] ss:$24 sps:$4 sm:$0xff]  }
 0x1e7   : > { %8563 = vmatpush2.bf16.msra.mxu1 %v9181_v55  ;;  %v2571_v58 = vpop.f32.mrf.mxu0  ;;  %8404 = vmatprep.subr.bf16.mxu0 %v9200_v36  ;;  %v9203_v55 = vld [vmem:[#allocation9 + $0xb0] sm:$0xff]  }
 0x1e8   : > { %v2684_v18 = vpop.f32.mrf.mxu1  ;;  %8340 = vmatprep.subr.bf16.mxu1 %v9184_v52  ;;  %v10574_v24 = vadd.f32 %v2682_v6, %v2570_v8  ;;  %v2572_v19 = vadd.f32 %v2571_v58, %v10449_v0  ;;  %v9189_v52 = vld [vmem:[#allocation9 + $0x28] sm:$0xff]   ;;  %v9598_v8 = vld [vmem:[%s10166_s9 + $0x40] ss:$24 sps:$4 sm:$0xff]  }
 0x1e9   : > { %v10577_v63 = vpop.f32.mrf.mxu0  ;;  %3398 = vmatmul.mubr.bf16.vlgmr.msra.gmra.mxu0 %v9594_v39  ;;  %v9205_v58 = vld [vmem:[#allocation9 + $0xa8] sm:$0xff]  }
 0x1ea   : > { %14751 = vst [vmem:[#allocation27_spill] sm:$0xff] %v10574_v24  ;;  %v10579_v29 = vpop.f32.mrf.mxu1  ;;  %3438 = vmatmul.mubr.bf16.vlgmr.msra.gmra.mxu1 %v9595_v22  ;;  %v10583_v28 = vadd.f32 %v2684_v18, %v2572_v19  ;;  %3407 = vmatprep.mubr.bf16.mxu0 %v9596_v21  ;;  %v9191_v18 = vld [vmem:[#allocation9 + $0x20] sm:$0xff]   ;;  %v9601_v22 = vld [vmem:[%s10166_s9 + $0x134] ss:$24 sps:$4 sm:$0xff]  }
 0x1eb   : > { %8341 = vmatpush3.bf16.msra.mxu1 %v9185_v15  ;;  %v10586_v59 = vpop.f32.mrf.mxu0  ;;  %3447 = vmatprep.mubr.bf16.mxu1 %v9597_v25  ;;  %v9599_v15 = vld [vmem:[%s10166_s9 + $0x100] ss:$24 sps:$4 sm:$0xff]  }
 0x1ec   : > { %v10588_v0 = vpop.f32.mrf.mxu1  ;;  %8342 = vmatprep.subr.bf16.mxu1 %v9186_v23  ;;  %8405 = vmatpush3.bf16.msra.mxu0 %v9201_v38  ;;  %v9600_v23 = vld [vmem:[%s10166_s9 + $0x74] ss:$24 sps:$4 sm:$0xff]   ;;  %v9206_v19 = vld [vmem:[#allocation9 + $0xe0] sm:$0xff]   ;;  %v9193_v25 = vld [vmem:[#allocation9 + $0x18] sm:$0xff]  }
 0x1ed   : > { %v10591_v31 = vpop.f32.mrf.mxu0  ;;  %8406 = vmatprep.subr.bf16.mxu0 %v9202_v35  ;;  %v9192_v35 = vld [vmem:[#allocation9 + $0x58] sm:$0xff]  }
 0x1ee   : > { %v10593_v26 = vpop.f32.mrf.mxu1  ;;  %v9606_v24 = vld [vmem:[%s10166_s9 + $0xa0] ss:$24 sps:$4 sm:$0xff]  }
 0x1ef   : > { %8343 = vmatpush3.bf16.msra.mxu1 %v9187_v41  ;;  %v2727_v36 = vpop.f32.mrf.mxu0 }
 0x1f0   : > { %v10595_v45 = vpop.f32.mrf.mxu1  ;;  %8344 = vmatprep.subr.bf16.mxu1 %v9188_v30  ;;  %8407 = vmatpush3.bf16.msra.mxu0 %v9203_v55  ;;  %v10628_v53 = vadd.f32 %v2727_v36, %v10467_v37  ;;  %v9198_v37 = vld [vmem:[#allocation9 + $0x40] sm:$0xff]   ;;  %v9210_v36 = vld [vmem:[#allocation9 + $0xd0] sm:$0xff]  }
 0x1f1   : > { %v10597_v3 = vpop.f32.mrf.mxu0  ;;  %3408 = vmatmul.mubr.bf16.gmra.mxu0 %v9598_v8  ;;  %8408 = vmatprep.subr.bf16.mxu0 %v9204_v46 }
 0x1f2   : > { %v10599_v6 = vpop.f32.mrf.mxu1  ;;  %3448 = vmatmul.mubr.bf16.gmra.mxu1 %v9599_v15  ;;  %3417 = vmatprep.mubr.bf16.mxu0 %v9600_v23  ;;  %v9602_v15 = vld [vmem:[%s10166_s9 + $0x70] ss:$24 sps:$4 sm:$0xff]   ;;  %14754 = vst [vmem:[#allocation30_spill] sm:$0xff] %v10628_v53 }
 0x1f3   : > { %8345 = vmatpush3.bf16.msra.mxu1 %v9189_v52  ;;  %v10604_v38 = vpop.f32.mrf.mxu0  ;;  %3457 = vmatprep.mubr.bf16.mxu1 %v9601_v22  ;;  %v9194_v52 = vld [vmem:[#allocation9 + $0x50] sm:$0xff]   ;;  %v9604_v22 = vld [vmem:[%s10166_s9 + $0xa4] ss:$24 sps:$4 sm:$0xff]  }
 0x1f4   : > { %v10606_v39 = vpop.f32.mrf.mxu1  ;;  %8346 = vmatprep.subr.bf16.mxu1 %v9190_v11  ;;  %8409 = vmatpush3.bf16.msra.mxu0 %v9205_v58  ;;  %v9207_v11 = vld [vmem:[#allocation9 + $0xa0] sm:$0xff]   ;;  %v9603_v23 = vld [vmem:[%s10166_s9 + $0x130] ss:$24 sps:$4 sm:$0xff]   ;;  %v9208_v58 = vld [vmem:[#allocation9 + $0xd8] sm:$0xff]  }
 0x1f5   : > { %v10609_v41 = vpop.f32.mrf.mxu0  ;;  %8410 = vmatprep.subr.bf16.mxu0 %v9206_v19 }
 0x1f6   : > { %v10611_v21 = vpop.f32.mrf.mxu1 }
 0x1f7   : > { %8347 = vmatpush3.bf16.msra.mxu1 %v9191_v18  ;;  %v2737_v30 = vpop.f32.mrf.mxu0  ;;  %v9195_v18 = vld [vmem:[#allocation9 + $0x10] sm:$0xff]  }
 0x1f8   : > { %v10613_v55 = vpop.f32.mrf.mxu1  ;;  %8348 = vmatprep.subr.bf16.mxu1 %v9192_v35  ;;  %v9605_v35 = vld [vmem:[%s10166_s9 + $0x164] ss:$24 sps:$4 sm:$0xff]   ;;  %8411 = vmatpush3.bf16.msra.mxu0 %v9207_v11 }
 0x1f9   : > { %v10615_v8 = vpop.f32.mrf.mxu0  ;;  %3418 = vmatmul.mubr.bf16.gmra.mxu0 %v9602_v15  ;;  %v9209_v15 = vld [vmem:[#allocation9 + $0x98] sm:$0xff]   ;;  %8412 = vmatprep.subr.bf16.mxu0 %v9208_v58 }
 0x1fa   : > { %v10617_v46 = vpop.f32.mrf.mxu1  ;;  %3458 = vmatmul.mubr.bf16.gmra.mxu1 %v9603_v23  ;;  %3427 = vmatprep.mubr.bf16.mxu0 %v9604_v22  ;;  %v10636_v23 = vadd.f32 %v10586_v59, %v10459_v62  ;;  %v9607_v62 = vld [vmem:[%s10166_s9 + $0x160] ss:$24 sps:$4 sm:$0xff]   ;;  %v9212_v59 = vld [vmem:[#allocation9 + $0xc8] sm:$0xff]  }
 0x1fb   : > { %14752 = vst [vmem:[#allocation28_spill] sm:$0xff] %v10617_v46  ;;  %8349 = vmatpush3.bf16.msra.mxu1 %v9193_v25  ;;  %v10622_v19 = vpop.f32.mrf.mxu0  ;;  %3467 = vmatprep.mubr.bf16.mxu1 %v9605_v35 }
 0x1fc   : > { %v10624_v57 = vpop.f32.mrf.mxu1  ;;  %8350 = vmatprep.subr.bf16.mxu1 %v9194_v52  ;;  %14756 = vst [vmem:[#allocation32_spill] sm:$0xff] %v10636_v23  ;;  %v9197_v52 = vld [vmem:[#allocation9 + $0x8] sm:$0xff]   ;;  %v3671_v11 = vpack.c.bf16 %v10628_v53, %v10636_v23  ;;  %8413 = vmatpush3.bf16.msra.mxu0 %v9209_v15  ;;  %v9216_v53 = vld [vmem:[#allocation9 + $0x178] sm:$0xff]   ;;  %v10657_v23 = vadd.f32 %v2737_v30, %v10483_v44 }
 0x1fd   : > { %14753 = vst [vmem:[#allocation29_spill] sm:$0xff] %v10624_v57  ;;  %v10630_v46 = vpop.f32.mrf.mxu0  ;;  %v9211_v57 = vld [vmem:[#allocation9 + $0x90] sm:$0xff]   ;;  %8414 = vmatprep.subr.bf16.mxu0 %v9210_v36  ;;  %v9217_v36 = vld [vmem:[#allocation9 + $0x138] sm:$0xff]  }
 0x1fe   : > { %v10632_v25 = vpop.f32.mrf.mxu1  ;;  %14760 = vst [vmem:[#allocation36_spill] sm:$0xff] %v10657_v23 }
 0x1ff   : > { %14755 = vst [vmem:[#allocation31_spill] sm:$0xff] %v10632_v25  ;;  %8351 = vmatpush3.bf16.msra.mxu1 %v9195_v18  ;;  %v2747_v22 = vpop.f32.mrf.mxu0  ;;  %v9199_v18 = vld [vmem:[#allocation9] sm:$0xff]  }
 0x200   : > { %v10638_v35 = vpop.f32.mrf.mxu1  ;;  %8352 = vmatprep.subr.bf16.mxu1 %v9196_v12  ;;  %v10650_v12 = vadd.f32 %v10591_v31, %v10462_v16  ;;  %8415 = vmatpush3.bf16.msra.mxu0 %v9211_v57  ;;  %v9214_v31 = vld [vmem:[#allocation9 + $0xc0] sm:$0xff]  }
 0x201   : > { %14757 = vst [vmem:[#allocation33_spill] sm:$0xff] %v10638_v35  ;;  %v10642_v25 = vpop.f32.mrf.mxu0  ;;  %3428 = vmatmul.mubr.bf16.gmra.mxu0 %v9606_v24  ;;  %v9213_v24 = vld [vmem:[#allocation9 + $0x88] sm:$0xff]   ;;  %8416 = vmatprep.subr.bf16.mxu0 %v9212_v59 }
 0x202   : > { %v10644_v58 = vpop.f32.mrf.mxu1  ;;  %3468 = vmatmul.mubr.bf16.gmra.mxu1 %v9607_v62  ;;  %14759 = vst [vmem:[#allocation35_spill] sm:$0xff] %v10650_v12  ;;  %v9215_v62 = vld [vmem:[#allocation9 + $0x80] sm:$0xff]  }
 0x203   : > { %14758 = vst [vmem:[#allocation34_spill] sm:$0xff] %v10644_v58  ;;  %8353 = vmatpush3.bf16.msra.mxu1 %v9197_v52  ;;  %4139 = vmatprep.mubr.bf16.mxu1 %v3671_v11  ;;  %v10652_v35 = vpop.f32.mrf.mxu0  ;;  %v10661_v52 = vadd.f32 %v10577_v63, %v10454_v56  ;;  %v9218_v56 = vld [vmem:[#allocation9 + $0x170] sm:$0xff]  }
 0x204   : > { %v10654_v15 = vpop.f32.mrf.mxu1  ;;  %8354 = vmatprep.subr.bf16.mxu1 %v9198_v37  ;;  %v10669_v37 = vadd.f32 %v10604_v38, %v10475_v27  ;;  %8417 = vmatpush3.bf16.msra.mxu0 %v9213_v24  ;;  %v9219_v27 = vld [vmem:[#allocation9 + $0x130] sm:$0xff]   ;;  %v10683_v38 = vadd.f32 %v10609_v41, %v10478_v33  ;;  %v10688_v24 = vadd.f32 %v2747_v22, %v10499_v7  ;;  %v9221_v41 = vld [vmem:[#allocation9 + $0x128] sm:$0xff]  }
 0x205   : > { %14761 = vst [vmem:[#allocation37_spill] sm:$0xff] %v10661_v52  ;;  %v10663_v11 = vpop.f32.mrf.mxu0  ;;  %v3670_v57 = vpack.c.bf16 %v10650_v12, %v10661_v52  ;;  %8418 = vmatprep.subr.bf16.mxu0 %v9214_v31  ;;  %v10698_v33 = vadd.f32 %v10622_v19, %v10491_v9  ;;  %v9223_v9 = vld [vmem:[#allocation9 + $0x120] sm:$0xff]   ;;  %v10712_v19 = vadd.f32 %v10630_v46, %v10494_v2 }
 0x206   : > { %v10665_v16 = vpop.f32.mrf.mxu1  ;;  %14762 = vst [vmem:[#allocation38_spill] sm:$0xff] %v10669_v37  ;;  %v3677_v63 = vpack.c.bf16 %v10657_v23, %v10669_v37  ;;  %14763 = vst [vmem:[#allocation39_spill] sm:$0xff] %v10683_v38  ;;  %v9220_v23 = vld [vmem:[#allocation9 + $0x168] sm:$0xff]  }
 0x207   : > { %8355 = vmatpush3.bf16.msra.mxu1 %v9199_v18  ;;  %v2757_v44 = vpop.f32.mrf.mxu0  ;;  %14764 = vst [vmem:[#allocation40_spill] sm:$0xff] %v10688_v24  ;;  %14766 = vst [vmem:[#allocation42_spill] sm:$0xff] %v10698_v33 }
 0x208   : > { %v10673_v30 = vpop.f32.mrf.mxu1  ;;  %8468 = vmatprep.subr.bf16.mxu1 %v9216_v53  ;;  %8419 = vmatpush3.bf16.msra.mxu0 %v9215_v62  ;;  %14767 = vst [vmem:[#allocation43_spill] sm:$0xff] %v10712_v19 }
 0x209   : > { %v10677_v59 = vpop.f32.mrf.mxu0 }
 0x20a   : > { %v10679_v58 = vpop.f32.mrf.mxu1  ;;  %4140 = vmatmul.mubr.bf16.vlgmr.msra.gmra.mxu1 %v3670_v57  ;;  %v10692_v57 = vadd.f32 %v10597_v3, %v10470_v43  ;;  %v3683_v43 = vpack.c.bf16 %v10688_v24, %v10698_v33  ;;  %v9222_v3 = vld [vmem:[#allocation9 + $0x160] sm:$0xff]   ;;  %v10721_v24 = vadd.f32 %v10615_v8, %v10486_v51  ;;  %v9225_v51 = vld [vmem:[#allocation9 + $0x118] sm:$0xff]  }
 0x20b   : > { %4147 = vmatprep.mubr.bf16.mxu1 %v3677_v63  ;;  %8469 = vmatpush3.bf16.msra.mxu1 %v9217_v36  ;;  %v2763_v53 = vpop.f32.mrf.mxu0 }
 0x20c   : > { %v10685_v18 = vpop.f32.mrf.mxu1  ;;  %8470 = vmatprep.subr.bf16.mxu1 %v9218_v56  ;;  %14765 = vst [vmem:[#allocation41_spill] sm:$0xff] %v10692_v57  ;;  %v3676_v56 = vpack.c.bf16 %v10683_v38, %v10692_v57  ;;  %14769 = vst [vmem:[#allocation45_spill] sm:$0xff] %v10721_v24  ;;  %v3682_v2 = vpack.c.bf16 %v10712_v19, %v10721_v24 }
 0x20d   : > { %v2765_v31 = vpop.f32.mrf.mxu0 }
 0x20e   : > { %v10694_v36 = vpop.f32.mrf.mxu1 }
 0x20f   : > { %8471 = vmatpush3.bf16.msra.mxu1 %v9219_v27  ;;  %v2767_v63 = vpop.f32.mrf.mxu0 }
 0x210   : > { %v10702_v7 = vpop.f32.mrf.mxu1  ;;  %8472 = vmatprep.subr.bf16.mxu1 %v9220_v23  ;;  %v10717_v23 = vadd.f32 %v2757_v44, %v10515_v4  ;;  %v9224_v44 = vld [vmem:[#allocation9 + $0x158] sm:$0xff]   ;;  %v10746_v19 = vadd.f32 %v2767_v63, %v10531_v13  ;;  %v9226_v63 = vld [vmem:[#allocation9 + $0x150] sm:$0xff]  }
 0x211   : > { %v10706_v22 = vpop.f32.mrf.mxu0 }
 0x212   : > { %v10708_v62 = vpop.f32.mrf.mxu1  ;;  %4148 = vmatmul.mubr.bf16.gmra.mxu1 %v3676_v56  ;;  %14768 = vst [vmem:[#allocation44_spill] sm:$0xff] %v10717_v23  ;;  %14772 = vst [vmem:[#allocation48_spill] sm:$0xff] %v10746_v19 }
 0x213   : > { %4155 = vmatprep.mubr.bf16.mxu1 %v3683_v43  ;;  %8473 = vmatpush3.bf16.msra.mxu1 %v9221_v41  ;;  %v2773_v27 = vpop.f32.mrf.mxu0  ;;  %v10727_v41 = vadd.f32 %v10652_v35, %v10507_v50  ;;  %v10741_v50 = vadd.f32 %v10663_v11, %v10510_v60 }
 0x214   : > { %v10714_v38 = vpop.f32.mrf.mxu1  ;;  %8474 = vmatprep.subr.bf16.mxu1 %v9222_v3 }
 0x215   : > { %v2775_v33 = vpop.f32.mrf.mxu0  ;;  %14770 = vst [vmem:[#allocation46_spill] sm:$0xff] %v10727_v41  ;;  %v3689_v4 = vpack.c.bf16 %v10717_v23, %v10727_v41  ;;  %14771 = vst [vmem:[#allocation47_spill] sm:$0xff] %v10741_v50  ;;  %v10750_v23 = vadd.f32 %v10642_v25, %v10502_v17 }
 0x216   : > { %v10723_v56 = vpop.f32.mrf.mxu1 }
 0x217   : > { %8475 = vmatpush3.bf16.msra.mxu1 %v9223_v9  ;;  %v2777_v46 = vpop.f32.mrf.mxu0  ;;  %14773 = vst [vmem:[#allocation49_spill] sm:$0xff] %v10750_v23  ;;  %v3688_v60 = vpack.c.bf16 %v10741_v50, %v10750_v23  ;;  %v10777_v23 = vsub.s32 2, %v10391_v49 }
 0x218   : > { %v10731_v43 = vpop.f32.mrf.mxu1  ;;  %8476 = vmatprep.subr.bf16.mxu1 %v9224_v44 }
 0x219   : > { %v10735_v8 = vpop.f32.mrf.mxu0  ;;  %14776 = vst [vmem:[#allocation52_spill] sm:$0xff] %v10777_v23 }
 0x21a   : > { %v10737_v3 = vpop.f32.mrf.mxu1  ;;  %4156 = vmatmul.mubr.bf16.gmra.mxu1 %v3682_v2 }
 0x21b   : > { %4163 = vmatprep.mubr.bf16.mxu1 %v3689_v4  ;;  %v2783_v35 = vpop.f32.mrf.mxu0  ;;  %8477 = vmatpush3.bf16.msra.mxu1 %v9225_v51  ;;  %v10757_v4 = vadd.f32 %v2763_v53, %v10523_v61  ;;  %v9227_v51 = vld [vmem:[#allocation9 + $0x110] sm:$0xff]   ;;  %v10770_v61 = vadd.f32 %v2765_v31, %v10526_v5 }
 0x21c   : > { %v10743_v9 = vpop.f32.mrf.mxu1  ;;  %8478 = vmatprep.subr.bf16.mxu1 %v9226_v63 }
 0x21d   : > { %v10752_v41 = vpop.f32.mrf.mxu0  ;;  %14774 = vst [vmem:[#allocation50_spill] sm:$0xff] %v10757_v4  ;;  %v3695_v13 = vpack.c.bf16 %v10746_v19, %v10757_v4  ;;  %14775 = vst [vmem:[#allocation51_spill] sm:$0xff] %v10770_v61  ;;  %v10780_v19 = vsub.s32 3, %v10391_v49  ;;  %v10783_v4 = vadd.f32 %v2777_v46, %v10547_v1  ;;  %v10802_v1 = vrot.slane %v10439_v48, %v10777_v23  ;;  %v9228_v46 = vld [vmem:[#allocation9 + $0x148] sm:$0xff]   ;;  %v9231_v23 = vld [vmem:[#allocation9 + $0x100] sm:$0xff]  }
 0x21e   : > { %v10754_v2 = vpop.f32.mrf.mxu1 }
 0x21f   : > { %v2787_v11 = vpop.f32.mrf.mxu0  ;;  %8479 = vmatpush3.bf16.msra.mxu1 %v9227_v51  ;;  %14777 = vst [vmem:[#allocation53_spill] sm:$0xff] %v10780_v19  ;;  %14778 = vst [vmem:[#allocation54_spill] sm:$0xff] %v10783_v4  ;;  %v2839_v52 = vadd.f32 %v10593_v26, %v10802_v1 }
 0x220   : > { %v10761_v44 = vpop.f32.mrf.mxu1  ;;  %8480 = vmatprep.subr.bf16.mxu1 %v9228_v46 }
 0x221   : > { %v10765_v17 = vpop.f32.mrf.mxu0 }
 0x222   : > { %v10767_v25 = vpop.f32.mrf.mxu1  ;;  %4164 = vmatmul.mubr.bf16.gmra.mxu1 %v3688_v60  ;;  %v10787_v60 = vadd.f32 %v10677_v59, %v10518_v54  ;;  %v10806_v54 = vrot.slane %v10439_v48, %v10780_v19  ;;  %v9230_v19 = vld [vmem:[#allocation9 + $0x140] sm:$0xff]  }
 0x223   : > { %4171 = vmatprep.mubr.bf16.mxu1 %v3695_v13  ;;  %v10772_v53 = vpop.f32.mrf.mxu0  ;;  %v10794_v13 = vadd.f32 %v2773_v27, %v10539_v47  ;;  %v9229_v47 = vld [vmem:[#allocation9 + $0x108] sm:$0xff]  }
 0x224   : > { %v10774_v50 = vpop.f32.mrf.mxu1  ;;  %14779 = vst [vmem:[#allocation55_spill] sm:$0xff] %v10787_v60  ;;  %v3694_v63 = vpack.c.bf16 %v10770_v61, %v10787_v60  ;;  %v10811_v61 = vadd.f32 %v2775_v33, %v10542_v42  ;;  %8481 = vmatpush3.bf16.msra.mxu1 %v9229_v47  ;;  %v2837_v12 = vadd.f32 %v10588_v0, %v10806_v54 }
 0x225   : > { %v10789_v5 = vpop.f32.mrf.mxu0  ;;  %14780 = vst [vmem:[#allocation56_spill] sm:$0xff] %v10794_v13  ;;  %v3701_v59 = vpack.c.bf16 %v10783_v4, %v10794_v13  ;;  %v10818_v4 = vadd.f32 %v2787_v11, %v10563_v40  ;;  %v2841_v46 = vadd.f32 %v10595_v45, %v10806_v54  ;;  %v10829_v0 = vadd.f32 %v2783_v35, %v10555_v14 }
 0x226   : > { %v10791_v31 = vpop.f32.mrf.mxu1  ;;  %14781 = vst [vmem:[#allocation57_spill] sm:$0xff] %v10811_v61  ;;  %8482 = vmatprep.subr.bf16.mxu1 %v9230_v19  ;;  %v2849_v19 = vadd.f32 %v10611_v21, %v10802_v1  ;;  %v2851_v21 = vadd.f32 %v10613_v55, %v10806_v54 }
 0x227   : > { %v2797_v51 = vpop.f32.mrf.mxu0  ;;  %14782 = vst [vmem:[#allocation58_spill] sm:$0xff] %v10818_v4  ;;  %14784 = vst [vmem:[#allocation60_spill] sm:$0xff] %v10829_v0 }
 0x228   : > { %v10798_v24 = vpop.f32.mrf.mxu1  ;;  %8483 = vmatpush3.bf16.msra.mxu1 %v9231_v23 }
 0x229   : > { %v2947_v27 = vpop.f32.mrf.mxu0 }
 0x22a   : > { %v3060_v37 = vpop.f32.mrf.mxu1  ;;  %4172 = vmatmul.mubr.bf16.gmra.mxu1 %v3694_v63  ;;  %v2835_v63 = vadd.f32 %v10579_v29, %v10802_v1 }
 0x22b   : > { %4179 = vmatprep.mubr.bf16.mxu1 %v3701_v59  ;;  %v2949_v60 = vpop.f32.mrf.mxu0  ;;  %v10824_v59 = vadd.f32 %v10706_v22, %v10534_v20  ;;  %v3707_v20 = vpack.c.bf16 %v10818_v4, %v10829_v0 }
 0x22c   : > { %v3062_v57 = vpop.f32.mrf.mxu1  ;;  %v2950_v47 = vadd.f32 %v2949_v60, %v2837_v12  ;;  %v2948_v11 = vadd.f32 %v2947_v27, %v2835_v63  ;;  %v2847_v27 = vadd.f32 %v10606_v39, %v10806_v54 }
 0x22d   : > { %14783 = vst [vmem:[#allocation59_spill] sm:$0xff] %v10824_v59  ;;  %v2951_v42 = vpop.f32.mrf.mxu0  ;;  %v3700_v40 = vpack.c.bf16 %v10811_v61, %v10824_v59 }
 0x22e   : > { %v3064_v33 = vpop.f32.mrf.mxu1  ;;  %v2952_v26 = vadd.f32 %v2951_v42, %v2839_v52  ;;  %v10837_v14 = vadd.f32 %v3062_v57, %v2950_v47  ;;  %v10843_v52 = vadd.f32 %v10752_v41, %v10558_v34  ;;  %v10845_v35 = vadd.f32 %v3060_v37, %v2948_v11  ;;  %v14796_v11 = vld [vmem:[#allocation27_spill] sm:$0xff] }
 0x22f   : > { %v2953_v13 = vpop.f32.mrf.mxu0  ;;  %v10852_v57 = vadd.f32 %v2797_v51, %v10583_v28  ;;  %v2845_v34 = vadd.f32 %v10599_v6, %v10802_v1  ;;  %v10860_v37 = vadd.f32 %v10735_v8, %v10550_v10  ;;  %v10868_v28 = vadd.f32 %v10772_v53, %v10571_v32 }
 0x230   : > { %v3066_v29 = vpop.f32.mrf.mxu1  ;;  %v2954_v22 = vadd.f32 %v2953_v13, %v2841_v46  ;;  %v10835_v48 = vadd.f32 %v3064_v33, %v2952_v26  ;;  %14786 = vst [vmem:[#allocation62_spill] sm:$0xff] %v10837_v14  ;;  %14788 = vst [vmem:[#allocation64_spill] sm:$0xff] %v10843_v52 }
 0x231   : > { %v2957_v45 = vpop.f32.mrf.mxu0  ;;  %14789 = vst [vmem:[#allocation65_spill] sm:$0xff] %v10845_v35  ;;  %14790 = vst [vmem:[#allocation66_spill] sm:$0xff] %v10852_v57  ;;  %v3706_v6 = vpack.c.bf16 %v10843_v52, %v10860_v37  ;;  %v3713_v46 = vpack.c.bf16 %v10852_v57, %v10868_v28 }
 0x232   : > { %14785 = vst [vmem:[#allocation61_spill] sm:$0xff] %v10835_v48  ;;  %v3070_v49 = vpop.f32.mrf.mxu1  ;;  %4180 = vmatmul.mubr.bf16.gmra.mxu1 %v3700_v40  ;;  %v10839_v12 = vadd.f32 %v3066_v29, %v2954_v22  ;;  %14791 = vst [vmem:[#allocation67_spill] sm:$0xff] %v10860_v37  ;;  %v3672_v41 = vpack.c.bf16 %v10835_v48, %v10845_v35  ;;  %v2958_v10 = vadd.f32 %v2957_v45, %v2845_v34  ;;  %v14801_v34 = vld [vmem:[#allocation28_spill] sm:$0xff] }
 0x233   : > { %4187 = vmatprep.mubr.bf16.mxu1 %v3707_v20  ;;  %v2959_v60 = vpop.f32.mrf.mxu0  ;;  %14792 = vst [vmem:[#allocation68_spill] sm:$0xff] %v10868_v28  ;;  %v10882_v29 = vadd.f32 %v10789_v5, %v14796_v11 }
 0x234   : > { %14787 = vst [vmem:[#allocation63_spill] sm:$0xff] %v10839_v12  ;;  %v3072_v13 = vpop.f32.mrf.mxu1  ;;  %v3673_v23 = vpack.c.bf16 %v10839_v12, %v10837_v14  ;;  %v2960_v51 = vadd.f32 %v2959_v60, %v2847_v27  ;;  %v10884_v20 = vadd.f32 %v3070_v49, %v2958_v10  ;;  %v14799_v60 = vld [vmem:[#allocation29_spill] sm:$0xff] }
 0x235   : > { %v2961_v39 = vpop.f32.mrf.mxu0  ;;  %14797 = vst [vmem:[#allocation27_spill] sm:$0xff] %v10882_v29  ;;  %v2857_v27 = vadd.f32 %v14799_v60, %v10806_v54 }
 0x236   : > { %v3074_v63 = vpop.f32.mrf.mxu1  ;;  %v2962_v42 = vadd.f32 %v2961_v39, %v2849_v19  ;;  %4236 = vmatprep.mubr.bf16.mxu0 %v3673_v23  ;;  %v10876_v32 = vadd.f32 %v3072_v13, %v2960_v51  ;;  %14798 = vst [vmem:[#allocation72_spill] sm:$0xff] %v10884_v20  ;;  %v14800_v19 = vld [vmem:[#allocation31_spill] sm:$0xff]  ;;  %v14802_v39 = vld [vmem:[#allocation26_spill] sm:$0xff]  ;;  %v14804_v51 = vld [vmem:[#allocation33_spill] sm:$0xff] }
 0x237   : > { %v2963_v8 = vpop.f32.mrf.mxu0  ;;  %4237 = vmatmul.mubr.bf16.vlgmr.msra.gmra.mxu0 %v3672_v41  ;;  %v2859_v23 = vadd.f32 %v14800_v19, %v10802_v1  ;;  %v2855_v41 = vadd.f32 %v14801_v34, %v10802_v1  ;;  %v10896_v5 = vadd.f32 %v10765_v17, %v14802_v39 }
 0x238   : > { %v3076_v33 = vpop.f32.mrf.mxu1  ;;  %v2964_v47 = vadd.f32 %v2963_v8, %v2851_v21  ;;  %v10874_v26 = vadd.f32 %v3074_v63, %v2962_v42  ;;  %14794 = vst [vmem:[#allocation70_spill] sm:$0xff] %v10876_v32  ;;  %v2861_v42 = vadd.f32 %v14804_v51, %v10806_v54  ;;  %v2871_v51 = vadd.f32 %v10673_v30, %v10806_v54 }
 0x239   : > { %v2967_v55 = vpop.f32.mrf.mxu0  ;;  %14803 = vst [vmem:[#allocation29_spill] sm:$0xff] %v10896_v5  ;;  %v3712_v8 = vpack.c.bf16 %v10882_v29, %v10896_v5 }
 0x23a   : > { %14793 = vst [vmem:[#allocation69_spill] sm:$0xff] %v10874_v26  ;;  %v3080_v40 = vpop.f32.mrf.mxu1  ;;  %4188 = vmatmul.mubr.bf16.gmra.mxu1 %v3706_v6  ;;  %v10878_v53 = vadd.f32 %v3076_v33, %v2964_v47  ;;  %v3678_v49 = vpack.c.bf16 %v10874_v26, %v10884_v20  ;;  %v2968_v33 = vadd.f32 %v2967_v55, %v2855_v41 }
 0x23b   : > { %4195 = vmatprep.mubr.bf16.mxu1 %v3713_v46  ;;  %v2969_v22 = vpop.f32.mrf.mxu0  ;;  %v2867_v55 = vadd.f32 %v10654_v15, %v10806_v54 }
 0x23c   : > { %14795 = vst [vmem:[#allocation71_spill] sm:$0xff] %v10878_v53  ;;  %v3082_v45 = vpop.f32.mrf.mxu1  ;;  %v3679_v13 = vpack.c.bf16 %v10878_v53, %v10876_v32  ;;  %v2970_v6 = vadd.f32 %v2969_v22, %v2857_v27  ;;  %v10910_v22 = vadd.f32 %v3080_v40, %v2968_v33  ;;  %v14842_v32 = vld [vmem:[#allocation22_spill] sm:$0xff] }
 0x23d   : > { %v2971_v63 = vpop.f32.mrf.mxu0  ;;  %v11133_v20 = vsub.s32 5, %v14842_v32  ;;  %v11136_v12 = vsub.s32 4, %v14842_v32 }
 0x23e   : > { %v3084_v21 = vpop.f32.mrf.mxu1  ;;  %v2972_v10 = vadd.f32 %v2971_v63, %v2859_v23  ;;  %4244 = vmatprep.mubr.bf16.mxu0 %v3679_v13  ;;  %v10906_v34 = vadd.f32 %v3082_v45, %v2970_v6  ;;  %14808 = vst [vmem:[#allocation33_spill] sm:$0xff] %v10910_v22  ;;  %v2869_v13 = vadd.f32 %v10665_v16, %v10802_v1 }
 0x23f   : > { %v2973_v46 = vpop.f32.mrf.mxu0  ;;  %4245 = vmatmul.mubr.bf16.gmra.mxu0 %v3678_v49  ;;  %v14809_v49 = vld [vmem:[#allocation34_spill] sm:$0xff]  ;;  %14843 = vst [vmem:[#allocation22_spill] sm:$0xff] %v11133_v20  ;;  %14844 = vst [vmem:[#allocation104_spill] sm:$0xff] %v11136_v12 }
 0x240   : > { %v3086_v47 = vpop.f32.mrf.mxu1  ;;  %v2974_v17 = vadd.f32 %v2973_v46, %v2861_v42  ;;  %v10904_v11 = vadd.f32 %v3084_v21, %v2972_v10  ;;  %14806 = vst [vmem:[#allocation28_spill] sm:$0xff] %v10906_v34  ;;  %v2865_v63 = vadd.f32 %v14809_v49, %v10802_v1 }
 0x241   : > { %v2977_v60 = vpop.f32.mrf.mxu0 }
 0x242   : > { %14805 = vst [vmem:[#allocation31_spill] sm:$0xff] %v10904_v11  ;;  %v3090_v19 = vpop.f32.mrf.mxu1  ;;  %4196 = vmatmul.mubr.bf16.gmra.mxu1 %v3712_v8  ;;  %v10908_v39 = vadd.f32 %v3086_v47, %v2974_v17  ;;  %v3684_v45 = vpack.c.bf16 %v10904_v11, %v10910_v22  ;;  %v2978_v15 = vadd.f32 %v2977_v60, %v2865_v63 }
 0x243   : > { %v2979_v27 = vpop.f32.mrf.mxu0  ;;  %v2879_v60 = vadd.f32 %v10694_v36, %v10802_v1  ;;  %v2881_v63 = vadd.f32 %v10702_v7, %v10806_v54 }
 0x244   : > { %14807 = vst [vmem:[#allocation26_spill] sm:$0xff] %v10908_v39  ;;  %v3092_v23 = vpop.f32.mrf.mxu1  ;;  %v3685_v41 = vpack.c.bf16 %v10908_v39, %v10906_v34  ;;  %v2980_v42 = vadd.f32 %v2979_v27, %v2867_v55  ;;  %v10930_v57 = vadd.f32 %v3090_v19, %v2978_v15  ;;  %v2877_v27 = vadd.f32 %v10685_v18, %v10806_v54 }
 0x245   : > { %v2981_v21 = vpop.f32.mrf.mxu0 }
 0x246   : > { %v3094_v40 = vpop.f32.mrf.mxu1  ;;  %v2982_v6 = vadd.f32 %v2981_v21, %v2869_v13  ;;  %4252 = vmatprep.mubr.bf16.mxu0 %v3685_v41  ;;  %v10926_v17 = vadd.f32 %v3092_v23, %v2980_v42  ;;  %14813 = vst [vmem:[#allocation75_spill] sm:$0xff] %v10930_v57  ;;  %v2875_v13 = vadd.f32 %v10679_v58, %v10802_v1 }
 0x247   : > { %v2983_v10 = vpop.f32.mrf.mxu0  ;;  %4253 = vmatmul.mubr.bf16.gmra.mxu0 %v3684_v45 }
 0x248   : > { %v3096_v16 = vpop.f32.mrf.mxu1  ;;  %v2984_v8 = vadd.f32 %v2983_v10, %v2871_v51  ;;  %v10924_v33 = vadd.f32 %v3094_v40, %v2982_v6  ;;  %14811 = vst [vmem:[#allocation73_spill] sm:$0xff] %v10926_v17 }
 0x249   : > { %v2987_v46 = vpop.f32.mrf.mxu0 }
 0x24a   : > { %14810 = vst [vmem:[#allocation34_spill] sm:$0xff] %v10924_v33  ;;  %v3100_v47 = vpop.f32.mrf.mxu1  ;;  %v10928_v49 = vadd.f32 %v3096_v16, %v2984_v8  ;;  %v3690_v23 = vpack.c.bf16 %v10924_v33, %v10930_v57  ;;  %v2988_v18 = vadd.f32 %v2987_v46, %v2875_v13  ;;  %v2889_v46 = vadd.f32 %v10723_v56, %v10802_v1 }
 0x24b   : > { %v2989_v29 = vpop.f32.mrf.mxu0  ;;  %v2891_v13 = vadd.f32 %v10731_v43, %v10806_v54 }
 0x24c   : > { %14812 = vst [vmem:[#allocation74_spill] sm:$0xff] %v10928_v49  ;;  %v3102_v30 = vpop.f32.mrf.mxu1  ;;  %v3691_v55 = vpack.c.bf16 %v10928_v49, %v10926_v17  ;;  %v2990_v45 = vadd.f32 %v2989_v29, %v2877_v27  ;;  %v10950_v16 = vadd.f32 %v3100_v47, %v2988_v18  ;;  %v2887_v29 = vadd.f32 %v10714_v38, %v10806_v54 }
 0x24d   : > { %v2991_v41 = vpop.f32.mrf.mxu0 }
 0x24e   : > { %v3104_v19 = vpop.f32.mrf.mxu1  ;;  %v2992_v21 = vadd.f32 %v2991_v41, %v2879_v60  ;;  %4260 = vmatprep.mubr.bf16.mxu0 %v3691_v55  ;;  %v10946_v15 = vadd.f32 %v3102_v30, %v2990_v45  ;;  %14817 = vst [vmem:[#allocation79_spill] sm:$0xff] %v10950_v16  ;;  %v2885_v60 = vadd.f32 %v10708_v62, %v10802_v1 }
 0x24f   : > { %v2993_v40 = vpop.f32.mrf.mxu0  ;;  %4261 = vmatmul.mubr.bf16.gmra.mxu0 %v3690_v23 }
 0x250   : > { %v3106_v36 = vpop.f32.mrf.mxu1  ;;  %v2994_v51 = vadd.f32 %v2993_v40, %v2881_v63  ;;  %v10944_v42 = vadd.f32 %v3104_v19, %v2992_v21  ;;  %14815 = vst [vmem:[#allocation77_spill] sm:$0xff] %v10946_v15 }
 0x251   : > { %v2997_v6 = vpop.f32.mrf.mxu0 }
 0x252   : > { %14814 = vst [vmem:[#allocation76_spill] sm:$0xff] %v10944_v42  ;;  %v3110_v58 = vpop.f32.mrf.mxu1  ;;  %v10948_v10 = vadd.f32 %v3106_v36, %v2994_v51  ;;  %v3696_v30 = vpack.c.bf16 %v10944_v42, %v10950_v16  ;;  %v2998_v38 = vadd.f32 %v2997_v6, %v2885_v60  ;;  %v2899_v6 = vadd.f32 %v10754_v2, %v10802_v1 }
 0x253   : > { %v2999_v8 = vpop.f32.mrf.mxu0  ;;  %v2901_v60 = vadd.f32 %v10761_v44, %v10806_v54 }
 0x254   : > { %14816 = vst [vmem:[#allocation78_spill] sm:$0xff] %v10948_v10  ;;  %v3112_v7 = vpop.f32.mrf.mxu1  ;;  %v3697_v27 = vpack.c.bf16 %v10948_v10, %v10946_v15  ;;  %v3000_v23 = vadd.f32 %v2999_v8, %v2887_v29  ;;  %v10970_v36 = vadd.f32 %v3110_v58, %v2998_v38  ;;  %v2897_v8 = vadd.f32 %v10743_v9, %v10806_v54 }
 0x255   : > { %v3001_v55 = vpop.f32.mrf.mxu0 }
 0x256   : > { %v3114_v47 = vpop.f32.mrf.mxu1  ;;  %v3002_v41 = vadd.f32 %v3001_v55, %v2889_v46  ;;  %4268 = vmatprep.mubr.bf16.mxu0 %v3697_v27  ;;  %v10966_v18 = vadd.f32 %v3112_v7, %v3000_v23  ;;  %14821 = vst [vmem:[#allocation83_spill] sm:$0xff] %v10970_v36  ;;  %v2895_v46 = vadd.f32 %v10737_v3, %v10802_v1 }
 0x257   : > { %v3003_v19 = vpop.f32.mrf.mxu0  ;;  %4269 = vmatmul.mubr.bf16.gmra.mxu0 %v3696_v30 }
 0x258   : > { %v3116_v56 = vpop.f32.mrf.mxu1  ;;  %v3004_v63 = vadd.f32 %v3003_v19, %v2891_v13  ;;  %v10964_v45 = vadd.f32 %v3114_v47, %v3002_v41  ;;  %14819 = vst [vmem:[#allocation81_spill] sm:$0xff] %v10966_v18 }
 0x259   : > { %v3007_v21 = vpop.f32.mrf.mxu0 }
 0x25a   : > { %14818 = vst [vmem:[#allocation80_spill] sm:$0xff] %v10964_v45  ;;  %v3120_v62 = vpop.f32.mrf.mxu1  ;;  %v10968_v40 = vadd.f32 %v3116_v56, %v3004_v63  ;;  %v3702_v7 = vpack.c.bf16 %v10964_v45, %v10970_v36  ;;  %v3008_v9 = vadd.f32 %v3007_v21, %v2895_v46  ;;  %v2909_v21 = vadd.f32 %v10791_v31, %v10802_v1 }
 0x25b   : > { %v3009_v51 = vpop.f32.mrf.mxu0  ;;  %v2911_v46 = vadd.f32 %v10798_v24, %v10806_v54 }
 0x25c   : > { %14820 = vst [vmem:[#allocation82_spill] sm:$0xff] %v10968_v40  ;;  %v3122_v43 = vpop.f32.mrf.mxu1  ;;  %v3703_v29 = vpack.c.bf16 %v10968_v40, %v10966_v18  ;;  %v3010_v30 = vadd.f32 %v3009_v51, %v2897_v8  ;;  %v10990_v56 = vadd.f32 %v3120_v62, %v3008_v9  ;;  %v2907_v51 = vadd.f32 %v10774_v50, %v10806_v54 }
 0x25d   : > { %v3011_v27 = vpop.f32.mrf.mxu0 }
 0x25e   : > { %v3124_v58 = vpop.f32.mrf.mxu1  ;;  %v3012_v55 = vadd.f32 %v3011_v27, %v2899_v6  ;;  %4276 = vmatprep.mubr.bf16.mxu0 %v3703_v29  ;;  %v10986_v38 = vadd.f32 %v3122_v43, %v3010_v30  ;;  %14825 = vst [vmem:[#allocation87_spill] sm:$0xff] %v10990_v56  ;;  %v2905_v6 = vadd.f32 %v10767_v25, %v10802_v1 }
 0x25f   : > { %v3013_v47 = vpop.f32.mrf.mxu0  ;;  %4277 = vmatmul.mubr.bf16.gmra.mxu0 %v3702_v7 }
 0x260   : > { %v3126_v2 = vpop.f32.mrf.mxu1  ;;  %v3014_v13 = vadd.f32 %v3013_v47, %v2901_v60  ;;  %v10984_v23 = vadd.f32 %v3124_v58, %v3012_v55  ;;  %14823 = vst [vmem:[#allocation85_spill] sm:$0xff] %v10986_v38 }
 0x261   : > { %v3017_v41 = vpop.f32.mrf.mxu0 }
 0x262   : > { %14822 = vst [vmem:[#allocation84_spill] sm:$0xff] %v10984_v23  ;;  %v3130_v3 = vpop.f32.mrf.mxu1  ;;  %v10988_v19 = vadd.f32 %v3126_v2, %v3014_v13  ;;  %v3708_v43 = vpack.c.bf16 %v10984_v23, %v10990_v56  ;;  %v3018_v50 = vadd.f32 %v3017_v41, %v2905_v6 }
 0x263   : > { %v3019_v63 = vpop.f32.mrf.mxu0 }
 0x264   : > { %14824 = vst [vmem:[#allocation86_spill] sm:$0xff] %v10988_v19  ;;  %v3132_v44 = vpop.f32.mrf.mxu1  ;;  %v3709_v8 = vpack.c.bf16 %v10988_v19, %v10986_v38  ;;  %v3020_v7 = vadd.f32 %v3019_v63, %v2907_v51  ;;  %v11014_v47 = vadd.f32 %v3130_v3, %v3018_v50 }
 0x265   : > { %v3021_v29 = vpop.f32.mrf.mxu0 }
 0x266   : > { %v3134_v62 = vpop.f32.mrf.mxu1  ;;  %v3022_v27 = vadd.f32 %v3021_v29, %v2909_v21  ;;  %4284 = vmatprep.mubr.bf16.mxu0 %v3709_v8  ;;  %v11010_v1 = vadd.f32 %v3132_v44, %v3020_v7  ;;  %14829 = vst [vmem:[#allocation91_spill] sm:$0xff] %v11014_v47 }
 0x267   : > { %v3023_v58 = vpop.f32.mrf.mxu0  ;;  %4285 = vmatmul.mubr.bf16.gmra.mxu0 %v3708_v43 }
 0x268   : > { %v3136_v31 = vpop.f32.mrf.mxu1  ;;  %v3024_v60 = vadd.f32 %v3023_v58, %v2911_v46  ;;  %v11004_v30 = vadd.f32 %v3134_v62, %v3022_v27  ;;  %14827 = vst [vmem:[#allocation89_spill] sm:$0xff] %v11010_v1 }
 0x269   : > { %v11006_v55 = vpop.f32.mrf.mxu0 }
 0x26a   : > { %14826 = vst [vmem:[#allocation88_spill] sm:$0xff] %v11004_v30  ;;  %v11008_v25 = vpop.f32.mrf.mxu1  ;;  %v11012_v9 = vadd.f32 %v3136_v31, %v3024_v60  ;;  %v3714_v13 = vpack.c.bf16 %v11004_v30, %v11014_v47 }
 0x26b   : > { %v11016_v24 = vpop.f32.mrf.mxu0 }
 0x26c   : > { %14828 = vst [vmem:[#allocation90_spill] sm:$0xff] %v11012_v9  ;;  %v11018_v54 = vpop.f32.mrf.mxu1  ;;  %v3715_v2 = vpack.c.bf16 %v11012_v9, %v11010_v1 }
 0x26d   : > { %v11024_v41 = vpop.f32.mrf.mxu0 }
 0x26e   : > { %v11026_v63 = vpop.f32.mrf.mxu1  ;;  %4292 = vmatprep.mubr.bf16.mxu0 %v3715_v2 }
 0x26f   : > { %v11028_v44 = vpop.f32.mrf.mxu0  ;;  %4293 = vmatmul.mubr.bf16.gmra.mxu0 %v3714_v13 }
 0x270   : > { %v11030_v51 = vpop.f32.mrf.mxu1 }
 0x271   : > { %v11032_v3 = vpop.f32.mrf.mxu0 }
 0x272   : > { %v11034_v21 = vpop.f32.mrf.mxu1 }
 0x273   : > { %v11036_v8 = vpop.f32.mrf.mxu0 }
 0x274   : > { %v11038_v6 = vpop.f32.mrf.mxu1 }
 0x275   : > { %v11040_v43 = vpop.f32.mrf.mxu0 }
 0x276   : > { %v11042_v29 = vpop.f32.mrf.mxu1 }
 0x277   : > { %v11044_v62 = vpop.f32.mrf.mxu0 }
 0x278   : > { %v11046_v46 = vpop.f32.mrf.mxu1 }
 0x279   : > { %v11048_v7 = vpop.f32.mrf.mxu0 }
 0x27a   : > { %v11050_v27 = vpop.f32.mrf.mxu1 }
 0x27b   : > { %v11052_v50 = vpop.f32.mrf.mxu0 }
 0x27c   : > { %v11054_v58 = vpop.f32.mrf.mxu1 }
 0x27d   : > { %v11056_v31 = vpop.f32.mrf.mxu0 }
 0x27e   : > { %v11058_v60 = vpop.f32.mrf.mxu1 }
 0x27f   : > { %v11060_v2 = vpop.f32.mrf.mxu0 }
 0x280   : > { %v11062_v13 = vpop.f32.mrf.mxu1 }
 0x281   : > { %v11064_v9 = vpop.f32.mrf.mxu0 }
 0x282   : > { %v11066_v30 = vpop.f32.mrf.mxu1 }
 0x283   : > { %v11068_v1 = vpop.f32.mrf.mxu0 }
 0x284   : > { %v11070_v47 = vpop.f32.mrf.mxu1 }
 0x285   : > { %v11072_v28 = vpop.f32.mrf.mxu0 }
 0x286   : > { %v11074_v5 = vpop.f32.mrf.mxu1 }
 0x287   : > { %v11076_v19 = vpop.f32.mrf.mxu0 }
 0x288   : > { %v11078_v23 = vpop.f32.mrf.mxu1 }
 0x289   : > { %v11080_v4 = vpop.f32.mrf.mxu0 }
 0x28a   : > { %v11082_v52 = vpop.f32.mrf.mxu1 }
 0x28b   : > { %v11084_v38 = vpop.f32.mrf.mxu0 }
 0x28c   : > { %v11086_v56 = vpop.f32.mrf.mxu1 }
 0x28d   : > { %v11088_v0 = vpop.f32.mrf.mxu0 }
 0x28e   : > { %v11090_v37 = vpop.f32.mrf.mxu1 }
 0x28f   : > { %v11092_v40 = vpop.f32.mrf.mxu0 }
 0x290   : > { %v11094_v45 = vpop.f32.mrf.mxu1 }
 0x291   : > { %v11096_v61 = vpop.f32.mrf.mxu0 }
 0x292   : > { %14830 = vst [vmem:[#allocation92_spill] sm:$0xff] %v11096_v61  ;;  %v11098_v18 = vpop.f32.mrf.mxu1 }
 0x293   : > { %14831 = vst [vmem:[#allocation93_spill] sm:$0xff] %v11098_v18  ;;  %v11100_v36 = vpop.f32.mrf.mxu0 }
 0x294   : > { %v11102_v59 = vpop.f32.mrf.mxu1 }
 0x295   : > { %v11104_v10 = vpop.f32.mrf.mxu0 }
 0x296   : > { %v11106_v42 = vpop.f32.mrf.mxu1 }
 0x297   : > { %14832 = vst [vmem:[#allocation94_spill] sm:$0xff] %v11106_v42  ;;  %v11108_v15 = vpop.f32.mrf.mxu0 }
 0x298   : > { %v11110_v16 = vpop.f32.mrf.mxu1 }
 0x299   : > { %v11112_v49 = vpop.f32.mrf.mxu0 }
 0x29a   : > { %14833 = vst [vmem:[#allocation95_spill] sm:$0xff] %v11112_v49  ;;  %v11114_v33 = vpop.f32.mrf.mxu1 }
 0x29b   : > { %14834 = vst [vmem:[#allocation96_spill] sm:$0xff] %v11114_v33  ;;  %v11116_v17 = vpop.f32.mrf.mxu0 }
 0x29c   : > { %14835 = vst [vmem:[#allocation97_spill] sm:$0xff] %v11116_v17  ;;  %v11118_v57 = vpop.f32.mrf.mxu1 }
 0x29d   : > { %14836 = vst [vmem:[#allocation98_spill] sm:$0xff] %v11118_v57  ;;  %v11120_v39 = vpop.f32.mrf.mxu0 }
 0x29e   : > { %14837 = vst [vmem:[#allocation99_spill] sm:$0xff] %v11120_v39  ;;  %v11122_v11 = vpop.f32.mrf.mxu1 }
 0x29f   : > { %14838 = vst [vmem:[#allocation100_spill] sm:$0xff] %v11122_v11  ;;  %v11124_v34 = vpop.f32.mrf.mxu0  ;;  %v14849_v11 = vld [vmem:[#allocation25_spill] sm:$0xff] }
 0x2a0   : > { %v11126_v22 = vpop.f32.mrf.mxu1  ;;  %v11148_v49 = vrot.slane %v14849_v11, %v11133_v20 }
 0x2a1   : > { %14839 = vst [vmem:[#allocation101_spill] sm:$0xff] %v11126_v22  ;;  %v11128_v53 = vpop.f32.mrf.mxu0 }
 0x2a2   : > { %14840 = vst [vmem:[#allocation102_spill] sm:$0xff] %v11128_v53  ;;  %v11130_v26 = vpop.f32.mrf.mxu1  ;;  %v3180_v20 = vadd.f32 %v11028_v44, %v11148_v49 }
 0x2a3   : > { %14841 = vst [vmem:[#allocation103_spill] sm:$0xff] %v11130_v26  ;;  %v11138_v48 = vpop.f32.mrf.mxu0  ;;  %v11152_v26 = vrot.slane %v14849_v11, %v11136_v12 }
 0x2a4   : > { %14845 = vst [vmem:[#allocation105_spill] sm:$0xff] %v11138_v48  ;;  %v11140_v14 = vpop.f32.mrf.mxu1  ;;  %v3293_v18 = vadd.f32 %v11030_v51, %v3180_v20  ;;  %v3186_v20 = vadd.f32 %v11036_v8, %v11148_v49 }
 0x2a5   : > { %14846 = vst [vmem:[#allocation106_spill] sm:$0xff] %v11140_v14  ;;  %v11142_v35 = vpop.f32.mrf.mxu0  ;;  %v3178_v48 = vadd.f32 %v11024_v41, %v11152_v26  ;;  %v3174_v11 = vadd.f32 %v11006_v55, %v11152_v26 }
 0x2a6   : > { %14847 = vst [vmem:[#allocation107_spill] sm:$0xff] %v11142_v35  ;;  %v11144_v33 = vpop.f32.mrf.mxu1 }
 0x2a7   : > { %14848 = vst [vmem:[#allocation108_spill] sm:$0xff] %v11144_v33  ;;  %v11154_v53 = vpop.f32.mrf.mxu0  ;;  %v3176_v33 = vadd.f32 %v11016_v24, %v11148_v49  ;;  %v3287_v24 = vadd.f32 %v11008_v25, %v3174_v11 }
 0x2a8   : > { %14850 = vst [vmem:[#allocation25_spill] sm:$0xff] %v11154_v53  ;;  %v11156_v32 = vpop.f32.mrf.mxu1 }
 0x2a9   : > { %14851 = vst [vmem:[#allocation109_spill] sm:$0xff] %v11156_v32  ;;  %v3399_v14 = vpop.f32.mrf.mxu0  ;;  %v3291_v32 = vadd.f32 %v11026_v63, %v3178_v48  ;;  %v3289_v41 = vadd.f32 %v11018_v54, %v3176_v33  ;;  %v3188_v48 = vadd.f32 %v11040_v43, %v11152_v26 }
 0x2aa   : > { %v11160_v39 = vpop.f32.mrf.mxu1  ;;  %v11186_v63 = vadd.f32 %v3399_v14, %v3287_v24 }
 0x2ab   : > { %v3401_v12 = vpop.f32.mrf.mxu0  ;;  %v3301_v51 = vadd.f32 %v11042_v29, %v3188_v48  ;;  %v9232_v29 = vld [vmem:[#allocation11 + $0x150] ss:$24 sps:$4 sm:$0xff]   ;;  %v9234_v48 = vld [vmem:[#allocation11 + $0x154] ss:$24 sps:$4 sm:$0xff]  }
 0x2ac   : > { %v11168_v35 = vpop.f32.mrf.mxu1  ;;  %v11180_v55 = vadd.f32 %v3401_v12, %v3289_v41  ;;  %14855 = vst [vmem:[#allocation113_spill] sm:$0xff] %v11186_v63  ;;  %4894 = vmatprep.subr.bf16.mxu0 %v9234_v48 }
 0x2ad   : > { %v3403_v53 = vpop.f32.mrf.mxu0  ;;  %4895 = vmatpush1.bf16.msra.mxu0 %v9232_v29 }
 0x2ae   : > { %v11171_v57 = vpop.f32.mrf.mxu1  ;;  %v11176_v22 = vadd.f32 %v3403_v53, %v3291_v32  ;;  %14853 = vst [vmem:[#allocation111_spill] sm:$0xff] %v11180_v55  ;;  %v3190_v53 = vadd.f32 %v11044_v62, %v11148_v49  ;;  %v3299_v62 = vadd.f32 %v11038_v6, %v3186_v20  ;;  %v3196_v20 = vadd.f32 %v11052_v50, %v11148_v49  ;;  %v9240_v50 = vld [vmem:[#allocation11 + $0xf4] ss:$24 sps:$4 sm:$0xff]  }
 0x2af   : > { %v3405_v44 = vpop.f32.mrf.mxu0 }
 0x2b0   : > { %14852 = vst [vmem:[#allocation110_spill] sm:$0xff] %v11176_v22  ;;  %v11178_v42 = vpop.f32.mrf.mxu1  ;;  %v11182_v17 = vadd.f32 %v3405_v44, %v3293_v18  ;;  %v3184_v18 = vadd.f32 %v11032_v3, %v11152_v26  ;;  %v3674_v25 = vpack.c.bf16 %v11176_v22, %v11186_v63  ;;  %v3303_v32 = vadd.f32 %v11046_v46, %v3190_v53 }
 0x2b1   : > { %v3409_v61 = vpop.f32.mrf.mxu0  ;;  %v3200_v53 = vadd.f32 %v11060_v2, %v11148_v49 }
 0x2b2   : > { %14854 = vst [vmem:[#allocation112_spill] sm:$0xff] %v11182_v17  ;;  %v11188_v33 = vpop.f32.mrf.mxu1  ;;  %v3675_v12 = vpack.c.bf16 %v11182_v17, %v11180_v55  ;;  %v3297_v11 = vadd.f32 %v11034_v21, %v3184_v18  ;;  %v9237_v21 = vld [vmem:[#allocation11 + $0x124] ss:$24 sps:$4 sm:$0xff]  }
 0x2b3   : > { %v3411_v14 = vpop.f32.mrf.mxu0  ;;  %4896 = vmatprep.subr.bf16.mxu0 %v9237_v21  ;;  %v9238_v21 = vld [vmem:[#allocation11 + $0xf0] ss:$24 sps:$4 sm:$0xff]  }
 0x2b4   : > { %v11200_v54 = vpop.f32.mrf.mxu1  ;;  %4333 = vmatprep.mubr.bf16.mxu1 %v3675_v12  ;;  %v11212_v44 = vadd.f32 %v3411_v14, %v3299_v62  ;;  %v11218_v17 = vadd.f32 %v3409_v61, %v3297_v11  ;;  %v3194_v14 = vadd.f32 %v11048_v7, %v11152_v26  ;;  %v3309_v11 = vadd.f32 %v11054_v58, %v3196_v20 }
 0x2b5   : > { %v3413_v43 = vpop.f32.mrf.mxu0  ;;  %4334 = vmatmul.mubr.bf16.vlgmr.msra.gmra.mxu1 %v3674_v25  ;;  %v3198_v25 = vadd.f32 %v11056_v31, %v11152_v26  ;;  %v3313_v7 = vadd.f32 %v11062_v13, %v3200_v53  ;;  %v3210_v53 = vadd.f32 %v11076_v19, %v11148_v49 }
 0x2b6   : > { %v11203_v8 = vpop.f32.mrf.mxu1  ;;  %v11208_v3 = vadd.f32 %v3413_v43, %v3301_v51  ;;  %14857 = vst [vmem:[#allocation115_spill] sm:$0xff] %v11212_v44  ;;  %14859 = vst [vmem:[#allocation117_spill] sm:$0xff] %v11218_v17  ;;  %v9235_v43 = vld [vmem:[#allocation11 + $0x120] ss:$24 sps:$4 sm:$0xff]  }
 0x2b7   : > { %v3415_v41 = vpop.f32.mrf.mxu0  ;;  %v3311_v2 = vadd.f32 %v11058_v60, %v3198_v25  ;;  %4897 = vmatpush1.bf16.msra.mxu0 %v9235_v43  ;;  %v3208_v25 = vadd.f32 %v11072_v28, %v11152_v26  ;;  %v3204_v28 = vadd.f32 %v11064_v9, %v11152_v26  ;;  %v3323_v9 = vadd.f32 %v11078_v23, %v3210_v53 }
 0x2b8   : > { %14856 = vst [vmem:[#allocation114_spill] sm:$0xff] %v11208_v3  ;;  %v11210_v24 = vpop.f32.mrf.mxu1  ;;  %v11214_v12 = vadd.f32 %v3415_v41, %v3303_v32  ;;  %v3680_v61 = vpack.c.bf16 %v11208_v3, %v11218_v17  ;;  %v3307_v41 = vadd.f32 %v11050_v27, %v3194_v14  ;;  %4898 = vmatprep.subr.bf16.mxu0 %v9240_v50 }
 0x2b9   : > { %v3419_v6 = vpop.f32.mrf.mxu0  ;;  %v3206_v27 = vadd.f32 %v11068_v1, %v11148_v49  ;;  %v3220_v14 = vadd.f32 %v11092_v40, %v11148_v49  ;;  %v3216_v1 = vadd.f32 %v11084_v38, %v11148_v49  ;;  %v3321_v19 = vadd.f32 %v11074_v5, %v3208_v25 }
 0x2ba   : > { %14858 = vst [vmem:[#allocation116_spill] sm:$0xff] %v11214_v12  ;;  %v11220_v46 = vpop.f32.mrf.mxu1  ;;  %v3681_v18 = vpack.c.bf16 %v11214_v12, %v11212_v44  ;;  %v11250_v58 = vadd.f32 %v3419_v6, %v3307_v41  ;;  %v3218_v23 = vadd.f32 %v11088_v0, %v11152_v26  ;;  %v3226_v0 = vadd.f32 %v11100_v36, %v11148_v49 }
 0x2bb   : > { %v3421_v31 = vpop.f32.mrf.mxu0  ;;  %4899 = vmatpush1.bf16.msra.mxu0 %v9238_v21  ;;  %v3319_v50 = vadd.f32 %v11070_v47, %v3206_v27  ;;  %v3329_v38 = vadd.f32 %v11086_v56, %v3216_v1  ;;  %v3230_v47 = vadd.f32 %v11108_v15, %v11148_v49  ;;  %v3214_v56 = vadd.f32 %v11080_v4, %v11152_v26 }
 0x2bc   : > { %v11232_v51 = vpop.f32.mrf.mxu1  ;;  %4341 = vmatprep.mubr.bf16.mxu1 %v3681_v18  ;;  %v11244_v18 = vadd.f32 %v3421_v31, %v3309_v11  ;;  %14863 = vst [vmem:[#allocation121_spill] sm:$0xff] %v11250_v58 }
 0x2bd   : > { %v3423_v62 = vpop.f32.mrf.mxu0  ;;  %4342 = vmatmul.mubr.bf16.gmra.mxu1 %v3680_v61  ;;  %v11296_v27 = vadd.f32 %v11168_v35, %v3329_v38  ;;  %v3331_v35 = vadd.f32 %v11090_v37, %v3218_v23  ;;  %v3343_v4 = vadd.f32 %v11110_v16, %v3230_v47  ;;  %v3228_v37 = vadd.f32 %v11104_v10, %v11152_v26  ;;  %v14878_v23 = vld [vmem:[#allocation93_spill] sm:$0xff] }
 0x2be   : > { %v11235_v32 = vpop.f32.mrf.mxu1  ;;  %v11240_v48 = vadd.f32 %v3423_v62, %v3311_v2  ;;  %14861 = vst [vmem:[#allocation119_spill] sm:$0xff] %v11244_v18  ;;  %v3333_v2 = vadd.f32 %v11094_v45, %v3220_v14  ;;  %v3317_v62 = vadd.f32 %v11066_v30, %v3204_v28  ;;  %v3327_v28 = vadd.f32 %v11082_v52, %v3214_v56  ;;  %v14880_v56 = vld [vmem:[#allocation98_spill] sm:$0xff] }
 0x2bf   : > { %v3425_v12 = vpop.f32.mrf.mxu0  ;;  %14869 = vst [vmem:[#allocation127_spill] sm:$0xff] %v11296_v27  ;;  %v11322_v1 = vadd.f32 %v11210_v24, %v3343_v4  ;;  %v3240_v52 = vadd.f32 %v11124_v34, %v11148_v49 }
 0x2c0   : > { %14860 = vst [vmem:[#allocation118_spill] sm:$0xff] %v11240_v48  ;;  %v11242_v29 = vpop.f32.mrf.mxu1  ;;  %v11246_v60 = vadd.f32 %v3425_v12, %v3313_v7  ;;  %v3686_v6 = vpack.c.bf16 %v11240_v48, %v11250_v58  ;;  %v11283_v5 = vadd.f32 %v11178_v42, %v3333_v2 }
 0x2c1   : > { %v3429_v13 = vpop.f32.mrf.mxu0  ;;  %14871 = vst [vmem:[#allocation129_spill] sm:$0xff] %v11322_v1 }
 0x2c2   : > { %14862 = vst [vmem:[#allocation120_spill] sm:$0xff] %v11246_v60  ;;  %v11252_v20 = vpop.f32.mrf.mxu1  ;;  %v3687_v12 = vpack.c.bf16 %v11246_v60, %v11244_v18  ;;  %14865 = vst [vmem:[#allocation123_spill] sm:$0xff] %v11283_v5  ;;  %v11291_v45 = vadd.f32 %v3429_v13, %v3317_v62  ;;  %v3699_v13 = vpack.c.bf16 %v11283_v5, %v11296_v27  ;;  %v14876_v62 = vld [vmem:[#allocation94_spill] sm:$0xff] }
 0x2c3   : > { %v3431_v61 = vpop.f32.mrf.mxu0  ;;  %v3341_v34 = vadd.f32 %v14876_v62, %v3228_v37  ;;  %v14886_v37 = vld [vmem:[#allocation95_spill] sm:$0xff]  ;;  %v14890_v62 = vld [vmem:[#allocation96_spill] sm:$0xff] }
 0x2c4   : > { %v11266_v31 = vpop.f32.mrf.mxu1  ;;  %4349 = vmatprep.mubr.bf16.mxu1 %v3687_v12  ;;  %v11285_v21 = vadd.f32 %v3431_v61, %v3319_v50  ;;  %14868 = vst [vmem:[#allocation126_spill] sm:$0xff] %v11291_v45  ;;  %v3339_v61 = vadd.f32 %v11102_v59, %v3226_v0  ;;  %v14882_v0 = vld [vmem:[#allocation99_spill] sm:$0xff] }
 0x2c5   : > { %v3433_v40 = vpop.f32.mrf.mxu0  ;;  %4350 = vmatmul.mubr.bf16.gmra.mxu1 %v3686_v6  ;;  %v11316_v6 = vadd.f32 %v11171_v57, %v3331_v35  ;;  %v11350_v47 = vadd.f32 %v11203_v8, %v3341_v34 }
 0x2c6   : > { %v11271_v43 = vpop.f32.mrf.mxu1  ;;  %v11277_v11 = vadd.f32 %v3433_v40, %v3321_v19  ;;  %14866 = vst [vmem:[#allocation124_spill] sm:$0xff] %v11285_v21  ;;  %v11327_v19 = vadd.f32 %v11160_v39, %v3327_v28  ;;  %v11332_v57 = vadd.f32 %v11200_v54, %v3339_v61  ;;  %v14874_v40 = vld [vmem:[#allocation92_spill] sm:$0xff]  ;;  %v14877_v54 = vld [vmem:[#allocation101_spill] sm:$0xff] }
 0x2c7   : > { %v3435_v7 = vpop.f32.mrf.mxu0  ;;  %14870 = vst [vmem:[#allocation128_spill] sm:$0xff] %v11316_v6  ;;  %v3224_v50 = vadd.f32 %v14874_v40, %v11152_v26  ;;  %v3353_v38 = vadd.f32 %v14877_v54, %v3240_v52  ;;  %14879 = vst [vmem:[#allocation92_spill] sm:$0xff] %v11350_v47  ;;  %v14884_v28 = vld [vmem:[#allocation25_spill] sm:$0xff] }
 0x2c8   : > { %14864 = vst [vmem:[#allocation122_spill] sm:$0xff] %v11277_v11  ;;  %v11279_v41 = vpop.f32.mrf.mxu1  ;;  %v11287_v25 = vadd.f32 %v3435_v7, %v3323_v9  ;;  %v3692_v53 = vpack.c.bf16 %v11277_v11, %v11291_v45  ;;  %14872 = vst [vmem:[#allocation130_spill] sm:$0xff] %v11327_v19  ;;  %v3698_v59 = vpack.c.bf16 %v11316_v6, %v11327_v19  ;;  %v14875_v9 = vld [vmem:[#allocation97_spill] sm:$0xff] }
 0x2c9   : > { %14873 = vst [vmem:[#allocation131_spill] sm:$0xff] %v11332_v57  ;;  %v3236_v10 = vadd.f32 %v14875_v9, %v11148_v49  ;;  %v3705_v39 = vpack.c.bf16 %v11322_v1, %v11332_v57  ;;  %v3250_v61 = vadd.f32 %v14884_v28, %v11148_v49  ;;  %v14887_v40 = vld [vmem:[#allocation105_spill] sm:$0xff] }
 0x2ca   : > { %14867 = vst [vmem:[#allocation125_spill] sm:$0xff] %v11287_v25  ;;  %v8356_v30 = vpop.f32.mrf.mxu1  ;;  %v3693_v42 = vpack.c.bf16 %v11287_v25, %v11285_v21 }
 0x2cc   : > { %v8357_v14 = vpop.f32.mrf.mxu1  ;;  %4357 = vmatprep.mubr.bf16.mxu1 %v3693_v42 }
 0x2cd   : > { %v11308_v15 = vadd.f32 %v8357_v14, %v8356_v30  ;;  %4358 = vmatmul.mubr.bf16.gmra.mxu1 %v3692_v53  ;;  %v3337_v30 = vadd.f32 %v14878_v23, %v3224_v50  ;;  %v3349_v53 = vadd.f32 %v14880_v56, %v3236_v10  ;;  %v11356_v14 = vadd.f32 %v11242_v29, %v3353_v38  ;;  %v14894_v56 = vld [vmem:[#allocation107_spill] sm:$0xff] }
 0x2ce   : > { %v11311_v12 = vpop.f32.mrf.mxu1  ;;  %4365 = vmatprep.mubr.bf16.mxu1 %v3699_v13  ;;  %v3238_v13 = vadd.f32 %v14882_v0, %v11152_v26  ;;  %v3246_v50 = vadd.f32 %v14887_v40, %v11148_v49  ;;  %v14892_v49 = vld [vmem:[#allocation106_spill] sm:$0xff] }
 0x2cf   : > { %14881 = vst [vmem:[#allocation97_spill] sm:$0xff] %v11356_v14  ;;  %v11361_v35 = vadd.f32 %v11188_v33, %v3337_v30  ;;  %v11366_v8 = vadd.f32 %v11232_v51, %v3349_v53  ;;  %v14889_v51 = vld [vmem:[#allocation109_spill] sm:$0xff]  ;;  %v3248_v53 = vadd.f32 %v14894_v56, %v11152_v26 }
 0x2d0   : > { %v11318_v36 = vpop.f32.mrf.mxu1  ;;  %v3359_v23 = vadd.f32 %v14892_v49, %v3246_v50 }
 0x2d1   : > { %14883 = vst [vmem:[#allocation94_spill] sm:$0xff] %v11361_v35  ;;  %14885 = vst [vmem:[#allocation101_spill] sm:$0xff] %v11366_v8  ;;  %v3704_v29 = vpack.c.bf16 %v11350_v47, %v11361_v35  ;;  %v3711_v33 = vpack.c.bf16 %v11356_v14, %v11366_v8  ;;  %v8361_v5 = vadd.f32 %v11318_v36, %v11311_v12 }
 0x2d2   : > { %v8362_v16 = vpop.f32.mrf.mxu1 }
 0x2d4   : > { %v8363_v24 = vpop.f32.mrf.mxu1 }
 0x2d5   : > { %v11342_v2 = vadd.f32 %v8363_v24, %v8362_v16  ;;  %4366 = vmatmul.mubr.bf16.gmra.mxu1 %v3698_v59  ;;  %v3234_v16 = vadd.f32 %v14886_v37, %v11152_v26  ;;  %v14888_v24 = vld [vmem:[#allocation100_spill] sm:$0xff] }
 0x2d6   : > { %v11345_v7 = vpop.f32.mrf.mxu1  ;;  %4373 = vmatprep.mubr.bf16.mxu1 %v3705_v39  ;;  %v3351_v9 = vadd.f32 %v14888_v24, %v3238_v13  ;;  %v3363_v39 = vadd.f32 %v14889_v51, %v3250_v61 }
 0x2d7   : > { %v3347_v34 = vadd.f32 %v14890_v62, %v3234_v16 }
 0x2d8   : > { %v11352_v42 = vpop.f32.mrf.mxu1  ;;  %v11384_v54 = vadd.f32 %v11235_v32, %v3351_v9  ;;  %v11390_v30 = vadd.f32 %v11279_v41, %v3363_v39  ;;  %v14897_v32 = vld [vmem:[#allocation102_spill] sm:$0xff] }
 0x2d9   : > { %v11395_v0 = vadd.f32 %v11220_v46, %v3347_v34  ;;  %v3244_v28 = vadd.f32 %v14897_v32, %v11152_v26  ;;  %v8367_v12 = vadd.f32 %v11352_v42, %v11345_v7 }
 0x2da   : > { %v8368_v4 = vpop.f32.mrf.mxu1  ;;  %14891 = vst [vmem:[#allocation93_spill] sm:$0xff] %v11384_v54  ;;  %14893 = vst [vmem:[#allocation98_spill] sm:$0xff] %v11390_v30 }
 0x2db   : > { %14895 = vst [vmem:[#allocation99_spill] sm:$0xff] %v11395_v0  ;;  %v3710_v61 = vpack.c.bf16 %v11384_v54, %v11395_v0 }
 0x2dc   : > { %v8369_v52 = vpop.f32.mrf.mxu1 }
 0x2dd   : > { %v11376_v59 = vadd.f32 %v8369_v52, %v8368_v4  ;;  %4374 = vmatmul.mubr.bf16.gmra.mxu1 %v3704_v29  ;;  %v11398_v4 = vadd.f32 %v11266_v31, %v3359_v23  ;;  %v14898_v29 = vld [vmem:[#allocation108_spill] sm:$0xff]  ;;  %v14899_v31 = vld [vmem:[#allocation103_spill] sm:$0xff] }
 0x2de   : > { %v11379_v10 = vpop.f32.mrf.mxu1  ;;  %4381 = vmatprep.mubr.bf16.mxu1 %v3711_v33  ;;  %v3361_v52 = vadd.f32 %v14898_v29, %v3248_v53  ;;  %v3357_v40 = vadd.f32 %v14899_v31, %v3244_v28  ;;  %v9247_v29 = vld [vmem:[#allocation11 + $0x158] ss:$24 sps:$4 sm:$0xff]  }
 0x2df   : > { %14896 = vst [vmem:[#allocation25_spill] sm:$0xff] %v11398_v4  ;;  %v3717_v41 = vpack.c.bf16 %v11390_v30, %v11398_v4  ;;  %v9264_v30 = vld [vmem:[#allocation11 + $0x34] ss:$24 sps:$4 sm:$0xff]  }
 0x2e0   : > { %v11386_v38 = vpop.f32.mrf.mxu1  ;;  %v11413_v50 = vadd.f32 %v11271_v43, %v3361_v52  ;;  %v11418_v33 = vadd.f32 %v11252_v20, %v3357_v40  ;;  %v9252_v40 = vld [vmem:[#allocation11 + $0x12c] ss:$24 sps:$4 sm:$0xff]  }
 0x2e2   : > { %v8374_v13 = vpop.f32.mrf.mxu1  ;;  %14900 = vst [vmem:[#allocation95_spill] sm:$0xff] %v11413_v50  ;;  %14901 = vst [vmem:[#allocation105_spill] sm:$0xff] %v11418_v33  ;;  %v3716_v9 = vpack.c.bf16 %v11413_v50, %v11418_v33 }
 0x2e4   : > { %v8375_v37 = vpop.f32.mrf.mxu1 }
 0x2e5   : > { %v11406_v16 = vadd.f32 %v8375_v37, %v8374_v13  ;;  %4382 = vmatmul.mubr.bf16.gmra.mxu1 %v3710_v61  ;;  %v9249_v37 = vld [vmem:[#allocation11 + $0x15c] ss:$24 sps:$4 sm:$0xff]  }
 0x2e6   : > { %v11409_v46 = vpop.f32.mrf.mxu1  ;;  %4389 = vmatprep.mubr.bf16.mxu1 %v3717_v41  ;;  %5007 = vmatprep.subr.bf16.mxu1 %v9249_v37  ;;  %v9246_v37 = vld [vmem:[#allocation11 + $0x94] ss:$24 sps:$4 sm:$0xff]  }
 0x2e7   : > { %5008 = vmatpush1.bf16.msra.mxu1 %v9247_v29  ;;  %v9267_v29 = vld [vmem:[#allocation11 + $0x9c] ss:$24 sps:$4 sm:$0xff]  }
 0x2e8   : > { %v11415_v26 = vpop.f32.mrf.mxu1  ;;  %5009 = vmatprep.subr.bf16.mxu1 %v9252_v40  ;;  %v9255_v40 = vld [vmem:[#allocation11 + $0x64] ss:$24 sps:$4 sm:$0xff]  }
 0x2ea   : > { %v8380_v24 = vpop.f32.mrf.mxu1 }
 0x2ec   : > { %v8381_v51 = vpop.f32.mrf.mxu1 }
 0x2ed   : > { %v11422_v39 = vadd.f32 %v8381_v51, %v8380_v24  ;;  %4390 = vmatmul.mubr.bf16.gmra.mxu1 %v3716_v9  ;;  %v9250_v24 = vld [vmem:[#allocation11 + $0x128] ss:$24 sps:$4 sm:$0xff]   ;;  %v9258_v9 = vld [vmem:[#allocation11 + $0xfc] ss:$24 sps:$4 sm:$0xff]   ;;  %v9256_v51 = vld [vmem:[#allocation11 + $0xf8] ss:$24 sps:$4 sm:$0xff]  }
 0x2ee   : > { %v11424_v62 = vpop.f32.mrf.mxu1  ;;  %5010 = vmatpush1.bf16.msra.mxu1 %v9250_v24  ;;  %v9253_v24 = vld [vmem:[#allocation11 + $0x60] ss:$24 sps:$4 sm:$0xff]  }
 0x2ef   : > { %5011 = vmatprep.subr.bf16.mxu1 %v9258_v9  ;;  %v9270_v9 = vld [vmem:[#allocation11 + $0x6c] ss:$24 sps:$4 sm:$0xff]  }
 0x2f0   : > { %v11426_v34 = vpop.f32.mrf.mxu1 }
 0x2f2   : > { %v8386_v49 = vpop.f32.mrf.mxu1  ;;  %5012 = vmatpush1.bf16.msra.mxu1 %v9256_v51  ;;  %v9268_v51 = vld [vmem:[#allocation11 + $0x68] ss:$24 sps:$4 sm:$0xff]  }
 0x2f4   : > { %v8387_v43 = vpop.f32.mrf.mxu1 }
 0x2f5   : > { %v11428_v23 = vadd.f32 %v8387_v43, %v8386_v49  ;;  %v9243_v49 = vld [vmem:[#allocation11 + $0xc4] ss:$24 sps:$4 sm:$0xff]  }
 0x2f6   : > { %v11430_v56 = vpop.f32.mrf.mxu1  ;;  %v9261_v43 = vld [vmem:[#allocation11 + $0xcc] ss:$24 sps:$4 sm:$0xff]   ;;  %4900 = vmatprep.subr.bf16.mxu0 %v9243_v49  ;;  %v9262_v49 = vld [vmem:[#allocation11 + $0x30] ss:$24 sps:$4 sm:$0xff]  }
 0x2f7   : > { %5013 = vmatprep.subr.bf16.mxu1 %v9261_v43  ;;  %v9276_v43 = vld [vmem:[#allocation11 + $0x3c] ss:$24 sps:$4 sm:$0xff]  }
 0x2f8   : > { %v11432_v20 = vpop.f32.mrf.mxu1 }
 0x2fa   : > { %v8392_v53 = vpop.f32.mrf.mxu1 }
 0x2fc   : > { %v8393_v13 = vpop.f32.mrf.mxu1 }
 0x2fd   : > { %v11434_v32 = vadd.f32 %v8393_v13, %v8392_v53  ;;  %v9241_v53 = vld [vmem:[#allocation11 + $0xc0] ss:$24 sps:$4 sm:$0xff]  }
 0x2fe   : > { %v11436_v28 = vpop.f32.mrf.mxu1  ;;  %v9259_v13 = vld [vmem:[#allocation11 + $0xc8] ss:$24 sps:$4 sm:$0xff]   ;;  %4901 = vmatpush1.bf16.msra.mxu0 %v9241_v53  ;;  %v9274_v53 = vld [vmem:[#allocation11 + $0x38] ss:$24 sps:$4 sm:$0xff]  }
 0x2ff   : > { %5014 = vmatpush1.bf16.msra.mxu1 %v9259_v13  ;;  %4902 = vmatprep.subr.bf16.mxu0 %v9246_v37  ;;  %v9273_v13 = vld [vmem:[#allocation11 + $0x4] ss:$24 sps:$4 sm:$0xff]  }
 0x300   : > { %v11438_v61 = vpop.f32.mrf.mxu1  ;;  %5015 = vmatprep.subr.bf16.mxu1 %v9267_v29  ;;  %v9279_v37 = vld [vmem:[#allocation11 + $0xc] ss:$24 sps:$4 sm:$0xff]   ;;  %v9271_v29 = vld [vmem:[#allocation11] ss:$24 sps:$4 sm:$0xff]  }
 0x302   : > { %v8398_v41 = vpop.f32.mrf.mxu1 }
 0x304   : > { %v8399_v52 = vpop.f32.mrf.mxu1 }
 0x305   : > { %v11440_v31 = vadd.f32 %v8399_v52, %v8398_v41  ;;  %v9244_v41 = vld [vmem:[#allocation11 + $0x90] ss:$24 sps:$4 sm:$0xff]  }
 0x306   : > { %v9265_v52 = vld [vmem:[#allocation11 + $0x98] ss:$24 sps:$4 sm:$0xff]   ;;  %4903 = vmatpush1.bf16.msra.mxu0 %v9244_v41  ;;  %v9277_v41 = vld [vmem:[#allocation11 + $0x8] ss:$24 sps:$4 sm:$0xff]   ;;  %v11452_v54 = vpop.f32.mrf.mxu1 }
 0x307   : > { %5016 = vmatpush1.bf16.msra.mxu1 %v9265_v52  ;;  %4904 = vmatprep.subr.bf16.mxu0 %v9255_v40  ;;  %v14602_v52 = vmov 0   ;;  %v8420_v40 = vpop.f32.mrf.mxu0 }
 0x308   : > { %5017 = vmatprep.subr.bf16.mxu1 %v9270_v9  ;;  %4926 = vmatprep.mubr.bf16.mxu0 %v14602_v52  ;;  %v11458_v0 = vpop.f32.mrf.mxu1 }
 0x309   : > { %5039 = vmatprep.mubr.bf16.mxu1 %v14602_v52 }
 0x30a   : > { %4905 = vmatpush1.bf16.msra.mxu0 %v9253_v24  ;;  %v8421_v24 = vpop.f32.mrf.mxu0 }
 0x30b   : > { %5018 = vmatpush1.bf16.msra.mxu1 %v9268_v51  ;;  %4906 = vmatprep.subr.bf16.mxu0 %v9264_v30  ;;  %v8422_v1 = vadd.f32 %v8421_v24, %v8420_v40 }
 0x30c   : > { %5019 = vmatprep.subr.bf16.mxu1 %v9276_v43  ;;  %v8423_v30 = vpop.f32.mrf.mxu0 }
 0x30e   : > { %4907 = vmatpush1.bf16.msra.mxu0 %v9262_v49  ;;  %v8424_v9 = vpop.f32.mrf.mxu0  ;;  %v9282_v49 = vld [vmem:[#allocation11 + $0x164] ss:$24 sps:$4 sm:$0xff]  }
 0x30f   : > { %5020 = vmatpush1.bf16.msra.mxu1 %v9274_v53  ;;  %4908 = vmatprep.subr.bf16.mxu0 %v9273_v13  ;;  %v8425_v19 = vadd.f32 %v8424_v9, %v8423_v30 }
 0x310   : > { %5021 = vmatprep.subr.bf16.mxu1 %v9279_v37  ;;  %v8426_v51 = vpop.f32.mrf.mxu0 }
 0x312   : > { %4909 = vmatpush1.bf16.msra.mxu0 %v9271_v29  ;;  %v8427_v43 = vpop.f32.mrf.mxu0 }
 0x313   : > { %5022 = vmatpush1.bf16.msra.mxu1 %v9277_v41  ;;  %5120 = vmatprep.subr.bf16.mxu0 %v9282_v49  ;;  %v11456_v49 = vld [vmem:[#allocation14] ss:$0 sm:$0xff]  ;;  %v8428_v48 = vadd.f32 %v8427_v43, %v8426_v51 }
 0x314   : > { %v8429_v53 = vpop.f32.mrf.mxu0  ;;  %v4142_v35 = vadd.f32 %v11308_v15, %v11456_v49  ;;  %v4145_v45 = vadd.f32 %v8361_v5, %v11456_v49  ;;  %v4153_v7 = vadd.f32 %v8367_v12, %v11456_v49  ;;  %v8373_v12 = vadd.f32 %v11386_v38, %v11379_v10 }
 0x316   : > { %v8430_v50 = vpop.f32.mrf.mxu0  ;;  %v4239_v27 = vadd.f32 %v8422_v1, %v4142_v35  ;;  %v4242_v24 = vadd.f32 %v8425_v19, %v4145_v45  ;;  %v4150_v1 = vadd.f32 %v11342_v2, %v11456_v49  ;;  %v4161_v10 = vadd.f32 %v8373_v12, %v11456_v49 }
 0x318   : > { %v8432_v4 = vpop.f32.mrf.mxu0  ;;  %v4247_v19 = vadd.f32 %v8428_v48, %v4150_v1 }
 0x31a   : > { %v8433_v13 = vpop.f32.mrf.mxu0 }
 0x31c   : > { %v8435_v37 = vpop.f32.mrf.mxu0 }
 0x31e   : > { %v8436_v29 = vpop.f32.mrf.mxu0 }
 0x320   : > { %v11444_v41 = vpop.f32.mrf.mxu0 }
 0x322   : > { %v11446_v33 = vpop.f32.mrf.mxu0 }
 0x324   : > { %v11448_v14 = vpop.f32.mrf.mxu0 }
 0x326   : > { %v11450_v52 = vpop.f32.mrf.mxu0 }
 0x328   : > { %v11454_v8 = vpop.f32.mrf.mxu0 }
 0x32a   : > { %v11460_v47 = vpop.f32.mrf.mxu0 }
 0x32c   : > { %v11466_v11 = vpop.f32.mrf.mxu0 }
 0x32e   : > { %v11475_v36 = vpop.f32.mrf.mxu0 }
 0x330   : > { %v11485_v42 = vpop.f32.mrf.mxu0 }
 0x375   : > { %v8484_v57 = vpop.f32.mrf.mxu1 }
 0x377   : > { %v8485_v6 = vpop.f32.mrf.mxu1 }
 0x378   : > { %v8486_v25 = vadd.f32 %v8485_v6, %v8484_v57 }
 0x379   : > { %v8487_v21 = vpop.f32.mrf.mxu1 }
 0x37a   : > { %v11469_v60 = vadd.f32 %v8486_v25, %v4239_v27  ;;  %v8431_v27 = vadd.f32 %v8430_v50, %v8429_v53  ;;  %v8434_v50 = vadd.f32 %v8433_v13, %v8432_v4 }
 0x37b   : > { %v8488_v40 = vpop.f32.mrf.mxu1 }
 0x37c   : > { %v4398_v15 = vmul.f32 %v11469_v60, %v11469_v60  ;;  %v8489_v18 = vadd.f32 %v8488_v40, %v8487_v21 }
 0x37d   : > { %v8490_v6 = vpop.f32.mrf.mxu1 }
 0x37e   : > { %v4414_v5 = vmul.f32 %v4398_v15, %v11469_v60  ;;  %v11480_v25 = vadd.f32 %v8489_v18, %v4242_v24  ;;  %v4250_v18 = vadd.f32 %v8431_v27, %v4153_v7  ;;  %v4158_v15 = vadd.f32 %v11376_v59, %v11456_v49 }
 0x37f   : > { %v8491_v45 = vpop.f32.mrf.mxu1 }
 0x380   : > { %v4430_v57 = vmul.f32 0.044715, %v4414_v5  ;;  %v4399_v21 = vmul.f32 %v11480_v25, %v11480_v25  ;;  %v8492_v35 = vadd.f32 %v8491_v45, %v8490_v6  ;;  %v11497_v6 = vpop.f32.mrf.mxu0  ;;  %v4255_v27 = vadd.f32 %v8434_v50, %v4158_v15 }
 0x381   : > { %v8493_v30 = vpop.f32.mrf.mxu1  ;;  %v8437_v45 = vadd.f32 %v8436_v29, %v8435_v37  ;;  %v8440_v29 = vadd.f32 %v11446_v33, %v11444_v41  ;;  %v8379_v33 = vadd.f32 %v11415_v26, %v11409_v46 }
 0x382   : > { %v4446_v9 = vadd.f32 %v4430_v57, %v11469_v60  ;;  %v4415_v2 = vmul.f32 %v4399_v21, %v11480_v25  ;;  %v11489_v51 = vadd.f32 %v8492_v35, %v4247_v19  ;;  %v11506_v38 = vpop.f32.mrf.mxu0 }
 0x383   : > { %v8494_v43 = vpop.f32.mrf.mxu1  ;;  %v4258_v37 = vadd.f32 %v8437_v45, %v4161_v10 }
 0x384   : > { %v4462_v48 = vmul.f32 0.7978846, %v4446_v9  ;;  %v4431_v53 = vmul.f32 0.044715, %v4415_v2  ;;  %v4400_v40 = vmul.f32 %v11489_v51, %v11489_v51  ;;  %v8495_v24 = vadd.f32 %v8494_v43, %v8493_v30 }
 0x385   : > { %v8496_v1 = vpop.f32.mrf.mxu1 }
 0x386   : > { %9304 = vtanh.f32 %v4462_v48  ;;  %v4447_v5 = vadd.f32 %v4431_v53, %v11480_v25  ;;  %v4416_v4 = vmul.f32 %v4400_v40, %v11489_v51  ;;  %v11501_v13 = vadd.f32 %v8495_v24, %v4250_v18  ;;  %v11518_v24 = vpop.f32.mrf.mxu0 }
 0x387   : > { %v8497_v19 = vpop.f32.mrf.mxu1  ;;  %v4166_v40 = vadd.f32 %v11406_v16, %v11456_v49 }
 0x388   : > { %v4463_v57 = vmul.f32 0.7978846, %v4447_v5  ;;  %v4432_v21 = vmul.f32 0.044715, %v4416_v4  ;;  %v4401_v59 = vmul.f32 %v11501_v13, %v11501_v13  ;;  %v8498_v35 = vadd.f32 %v8497_v19, %v8496_v1 }
 0x389   : > { %v8499_v7 = vpop.f32.mrf.mxu1  ;;  %v4263_v41 = vadd.f32 %v8440_v29, %v4166_v40 }
 0x38a   : > { %9306 = vtanh.f32 %v4463_v57  ;;  %v4448_v30 = vadd.f32 %v4432_v21, %v11489_v51  ;;  %v4417_v9 = vmul.f32 %v4401_v59, %v11501_v13  ;;  %v11510_v2 = vadd.f32 %v8498_v35, %v4255_v27  ;;  %v11530_v21 = vpop.f32.mrf.mxu0 }
 0x38b   : > { %v8500_v18 = vpop.f32.mrf.mxu1  ;;  %v8443_v57 = vadd.f32 %v11450_v52, %v11448_v14 }
 0x38c   : > { %v4464_v50 = vmul.f32 0.7978846, %v4448_v30  ;;  %v4433_v43 = vmul.f32 0.044715, %v4417_v9  ;;  %v4402_v48 = vmul.f32 %v11510_v2, %v11510_v2  ;;  %v8501_v53 = vadd.f32 %v8500_v18, %v8499_v7 }
 0x38d   : > { %v8502_v15 = vpop.f32.mrf.mxu1  ;;  %v4169_v7 = vadd.f32 %v8379_v33, %v11456_v49  ;;  %v8385_v30 = vadd.f32 %v11426_v34, %v11424_v62 }
 0x38e   : > { %9308 = vtanh.f32 %v4464_v50  ;;  %v4449_v12 = vadd.f32 %v4433_v43, %v11501_v13  ;;  %v4418_v1 = vmul.f32 %v4402_v48, %v11510_v2  ;;  %v11522_v5 = vadd.f32 %v8501_v53, %v4258_v37  ;;  %v11543_v43 = vpop.f32.mrf.mxu0 }
 0x38f   : > { %v8503_v4 = vpop.f32.mrf.mxu1  ;;  %v4266_v18 = vadd.f32 %v8443_v57, %v4169_v7  ;;  %v8446_v50 = vadd.f32 %v11460_v47, %v11454_v8  ;;  %v8449_v47 = vadd.f32 %v11475_v36, %v11466_v11  ;;  %v11565_v7 = vld [vmem:[#allocation14 + $0x1] ss:$0 sm:$0xff] }
 0x390   : > { %v4465_v27 = vmul.f32 0.7978846, %v4449_v12  ;;  %v4434_v45 = vmul.f32 0.044715, %v4418_v1  ;;  %v4403_v16 = vmul.f32 %v11522_v5, %v11522_v5  ;;  %v8504_v19 = vadd.f32 %v8503_v4, %v8502_v15  ;;  %v11558_v57 = vpop.f32.mrf.mxu0 }
 0x391   : > { %v8505_v59 = vpop.f32.mrf.mxu1  ;;  %v4174_v12 = vadd.f32 %v11422_v39, %v11456_v49  ;;  %v8391_v1 = vadd.f32 %v11432_v20, %v11430_v56 }
 0x392   : > { %9310 = vtanh.f32 %v4465_v27  ;;  %v4450_v35 = vadd.f32 %v4434_v45, %v11510_v2  ;;  %v4419_v10 = vmul.f32 %v4403_v16, %v11522_v5  ;;  %v11534_v46 = vadd.f32 %v8504_v19, %v4263_v41 }
 0x393   : > { %v9305_v26 = vpop.eup %9304  ;;  %v8506_v9 = vpop.f32.mrf.mxu1  ;;  %v4177_v41 = vadd.f32 %v8385_v30, %v11456_v49  ;;  %v4182_v16 = vadd.f32 %v11428_v23, %v11456_v49  ;;  %v4271_v19 = vadd.f32 %v8446_v50, %v4174_v12 }
 0x394   : > { %v4494_v37 = vadd.f32 1.0, %v9305_v26  ;;  %v4466_v29 = vmul.f32 0.7978846, %v4450_v35  ;;  %v4435_v14 = vmul.f32 0.044715, %v4419_v10  ;;  %v4404_v52 = vmul.f32 %v11534_v46, %v11534_v46  ;;  %v8460_v50 = vpop.f32.mrf.mxu0 }
 0x395   : > { %v8507_v48 = vadd.f32 %v8506_v9, %v8505_v59  ;;  %v8508_v53 = vpop.f32.mrf.mxu1  ;;  %v4185_v10 = vadd.f32 %v8391_v1, %v11456_v49  ;;  %v4274_v26 = vadd.f32 %v8449_v47, %v4177_v41  ;;  %v9280_v1 = vld [vmem:[#allocation11 + $0x160] ss:$24 sps:$4 sm:$0xff]   ;;  %v8397_v47 = vadd.f32 %v11438_v61, %v11436_v28 }
 0x396   : > { %v4510_v40 = vmul.f32 0.5, %v4494_v37  ;;  %9312 = vtanh.f32 %v4466_v29  ;;  %v4451_v15 = vadd.f32 %v4435_v14, %v11522_v5  ;;  %v4420_v62 = vmul.f32 %v4404_v52, %v11534_v46 }
 0x397   : > { %v9307_v34 = vpop.eup %9306  ;;  %v11553_v8 = vadd.f32 %v8507_v48, %v4266_v18  ;;  %v8509_v33 = vpop.f32.mrf.mxu1  ;;  %v8452_v52 = vadd.f32 %v11497_v6, %v11485_v42  ;;  %v8455_v18 = vadd.f32 %v11518_v24, %v11506_v38  ;;  %v4190_v42 = vadd.f32 %v11434_v32, %v11456_v49 }
 0x398   : > { %v4495_v4 = vadd.f32 1.0, %v9307_v34  ;;  %v4467_v27 = vmul.f32 0.7978846, %v4451_v15  ;;  %v4436_v45 = vmul.f32 0.044715, %v4420_v62  ;;  %v8510_v56 = vadd.f32 %v8509_v33, %v8508_v53 }
 0x399   : > { %v4405_v39 = vmul.f32 %v11553_v8, %v11553_v8  ;;  %v8511_v20 = vpop.f32.mrf.mxu1  ;;  %v4526_v11 = vmul.f32 %v4510_v40, %v11469_v60 }
 0x39a   : > { %v4511_v36 = vmul.f32 0.5, %v4495_v4  ;;  %9314 = vtanh.f32 %v4467_v27  ;;  %v4452_v59 = vadd.f32 %v4436_v45, %v11534_v46  ;;  %v11568_v30 = vadd.f32 %v8510_v56, %v4271_v19  ;;  %v9285_v27 = vld [vmem:[#allocation11 + $0x134] ss:$24 sps:$4 sm:$0xff]   ;;  %v8462_v19 = vpop.f32.mrf.mxu0 }
 0x39b   : > { %v9309_v35 = vpop.eup %9308  ;;  %v4421_v23 = vmul.f32 %v4405_v39, %v11553_v8  ;;  %v8512_v9 = vpop.f32.mrf.mxu1  ;;  %v4547_v15 = vmul.f32 %v11565_v7, %v4526_v11  ;;  %v4279_v45 = vadd.f32 %v8452_v52, %v4182_v16  ;;  %v4282_v11 = vadd.f32 %v8455_v18, %v4185_v10 }
 0x39c   : > { %v4527_v37 = vmul.f32 %v4511_v36, %v11480_v25  ;;  %v4496_v29 = vadd.f32 1.0, %v9309_v35  ;;  %v4468_v14 = vmul.f32 0.7978846, %v4452_v59  ;;  %v8513_v60 = vadd.f32 %v8512_v9, %v8511_v20  ;;  %v8463_v52 = vpop.f32.mrf.mxu0 }
 0x39d   : > { %v4437_v48 = vmul.f32 0.044715, %v4421_v23  ;;  %v4406_v53 = vmul.f32 %v11568_v30, %v11568_v30  ;;  %v8514_v40 = vpop.f32.mrf.mxu1  ;;  %v8458_v36 = vadd.f32 %v11543_v43, %v11530_v21  ;;  %v14902_v10 = vmov 0   ;;  %v9283_v21 = vld [vmem:[#allocation11 + $0x130] ss:$24 sps:$4 sm:$0xff]  }
 0x39e   : > { %v4548_v62 = vmul.f32 %v11565_v7, %v4527_v37  ;;  %9316 = vtanh.f32 %v4468_v14  ;;  %v11579_v25 = vadd.f32 %v8513_v60, %v4274_v26  ;;  %v4512_v6 = vmul.f32 0.5, %v4496_v29  ;;  %v9288_v14 = vld [vmem:[#allocation11 + $0x104] ss:$24 sps:$4 sm:$0xff]  }
 0x39f   : > { %v9311_v34 = vpop.eup %9310  ;;  %v4453_v38 = vadd.f32 %v4437_v48, %v11553_v8  ;;  %v4422_v24 = vmul.f32 %v4406_v53, %v11568_v30  ;;  %v8515_v12 = vpop.f32.mrf.mxu1  ;;  %v8461_v60 = vadd.f32 %v8460_v50, %v11558_v57 }
 0x3a0   : > { %v11587_v33 = vpack.c.bf16 %v4548_v62, %v4547_v15  ;;  %v4497_v41 = vadd.f32 1.0, %v9311_v34  ;;  %v4407_v4 = vmul.f32 %v11579_v25, %v11579_v25  ;;  %v8516_v56 = vadd.f32 %v8515_v12, %v8514_v40 }
 0x3a1   : > { %v4469_v32 = vmul.f32 0.7978846, %v4453_v38  ;;  %v4438_v39 = vmul.f32 0.044715, %v4422_v24  ;;  %v8517_v20 = vpop.f32.mrf.mxu1  ;;  %v4528_v35 = vmul.f32 %v4512_v6, %v11489_v51  ;;  %v4193_v51 = vadd.f32 %v8397_v47, %v11456_v49 }
 0x3a2   : > { %v4513_v59 = vmul.f32 0.5, %v4497_v41  ;;  %v4423_v28 = vmul.f32 %v4407_v4, %v11579_v25  ;;  %4927 = vmatmul.mubr.bf16.vlgmr.msra.gmra.mxu0 %v11587_v33  ;;  %5040 = vmatmul.mubr.bf16.vlgmr.msra.gmra.mxu1 %v11587_v33  ;;  %v11598_v26 = vadd.f32 %v8516_v56, %v4279_v45  ;;  %v4287_v24 = vadd.f32 %v8458_v36, %v4190_v42  ;;  %v8465_v41 = vpop.f32.mrf.mxu0  ;;  %v9291_v42 = vld [vmem:[#allocation11 + $0xd4] ss:$24 sps:$4 sm:$0xff]  }
 0x3a3   : > { %v9313_v61 = vpop.eup %9312  ;;  %9318 = vtanh.f32 %v4469_v32  ;;  %v4454_v16 = vadd.f32 %v4438_v39, %v11568_v30  ;;  %v8518_v23 = vpop.f32.mrf.mxu1  ;;  %5121 = vmatpush1.bf16.msra.mxu0 %v9280_v1  ;;  %4936 = vmatprep.mubr.bf16.mxu0 %v14902_v10  ;;  %v4549_v38 = vmul.f32 %v11565_v7, %v4528_v35  ;;  %v4290_v47 = vadd.f32 %v8461_v60, %v4193_v51  ;;  %v9286_v39 = vld [vmem:[#allocation11 + $0x100] ss:$24 sps:$4 sm:$0xff]  }
 0x3a4   : > { %v4529_v43 = vmul.f32 %v4513_v59, %v11501_v13  ;;  %v4498_v9 = vadd.f32 1.0, %v9313_v61  ;;  %v4439_v37 = vmul.f32 0.044715, %v4423_v28  ;;  %v8519_v29 = vadd.f32 %v8518_v23, %v8517_v20  ;;  %5049 = vmatprep.mubr.bf16.mxu1 %v14902_v10  ;;  %5122 = vmatprep.subr.bf16.mxu0 %v9285_v27 }
 0x3a5   : > { %v4470_v18 = vmul.f32 0.7978846, %v4454_v16  ;;  %v4408_v48 = vmul.f32 %v11598_v26, %v11598_v26  ;;  %v8520_v53 = vpop.f32.mrf.mxu1  ;;  %v4198_v13 = vadd.f32 %v11440_v31, %v11456_v49  ;;  %v8464_v56 = vadd.f32 %v8463_v52, %v8462_v19 }
 0x3a6   : > { %v4455_v40 = vadd.f32 %v4439_v37, %v11579_v25  ;;  %v11610_v15 = vadd.f32 %v8519_v29, %v4282_v11  ;;  %v4550_v62 = vmul.f32 %v11565_v7, %v4529_v43  ;;  %v4514_v6 = vmul.f32 0.5, %v4498_v9  ;;  %v8466_v43 = vpop.f32.mrf.mxu0 }
 0x3a7   : > { %v9315_v34 = vpop.eup %9314  ;;  %9320 = vtanh.f32 %v4470_v18  ;;  %v4424_v57 = vmul.f32 %v4408_v48, %v11598_v26  ;;  %v8521_v50 = vpop.f32.mrf.mxu1  ;;  %5123 = vmatpush1.bf16.msra.mxu0 %v9283_v21  ;;  %v4295_v51 = vadd.f32 %v8464_v56, %v4198_v13  ;;  %v9294_v18 = vld [vmem:[#allocation11 + $0xa4] ss:$24 sps:$4 sm:$0xff]  }
 0x3a8   : > { %v4499_v12 = vadd.f32 1.0, %v9315_v34  ;;  %v4471_v1 = vmul.f32 0.7978846, %v4455_v40  ;;  %v4409_v31 = vmul.f32 %v11610_v15, %v11610_v15  ;;  %5124 = vmatprep.subr.bf16.mxu0 %v9288_v14  ;;  %v8522_v27 = vadd.f32 %v8521_v50, %v8520_v53  ;;  %v9289_v14 = vld [vmem:[#allocation11 + $0xd0] ss:$24 sps:$4 sm:$0xff]  }
 0x3a9   : > { %v4440_v4 = vmul.f32 0.044715, %v4424_v57  ;;  %v8523_v45 = vpop.f32.mrf.mxu1  ;;  %v11617_v32 = vpack.c.bf16 %v4550_v62, %v4549_v38  ;;  %v4530_v59 = vmul.f32 %v4514_v6, %v11510_v2  ;;  %v8403_v2 = vadd.f32 %v11458_v0, %v11452_v54 }
 0x3aa   : > { %v4515_v20 = vmul.f32 0.5, %v4499_v12  ;;  %9322 = vtanh.f32 %v4471_v1  ;;  %v4425_v11 = vmul.f32 %v4409_v31, %v11610_v15  ;;  %v11622_v61 = vadd.f32 %v8522_v27, %v4287_v24  ;;  %v9292_v12 = vld [vmem:[#allocation11 + $0xa0] ss:$24 sps:$4 sm:$0xff]  }
 0x3ab   : > { %v9317_v36 = vpop.eup %9316  ;;  %v4456_v28 = vadd.f32 %v4440_v4, %v11598_v26  ;;  %4937 = vmatmul.mubr.bf16.gmra.mxu0 %v11617_v32  ;;  %5050 = vmatmul.mubr.bf16.gmra.mxu1 %v11617_v32  ;;  %v8524_v35 = vpop.f32.mrf.mxu1  ;;  %v4551_v53 = vmul.f32 %v11565_v7, %v4530_v59  ;;  %v8467_v62 = vadd.f32 %v8466_v43, %v8465_v41  ;;  %v9297_v41 = vld [vmem:[#allocation11 + $0x74] ss:$24 sps:$4 sm:$0xff]  }
 0x3ac   : > { %v4531_v16 = vmul.f32 %v4515_v20, %v11522_v5  ;;  %v4500_v19 = vadd.f32 1.0, %v9317_v36  ;;  %v4441_v23 = vmul.f32 0.044715, %v4425_v11  ;;  %v8525_v21 = vadd.f32 %v8524_v35, %v8523_v45  ;;  %4946 = vmatprep.mubr.bf16.mxu0 %v14902_v10  ;;  %5059 = vmatprep.mubr.bf16.mxu1 %v14902_v10 }
 0x3ad   : > { %v4472_v9 = vmul.f32 0.7978846, %v4456_v28  ;;  %v4410_v37 = vmul.f32 %v11622_v61, %v11622_v61  ;;  %v8526_v29 = vpop.f32.mrf.mxu1  ;;  %5125 = vmatpush1.bf16.msra.mxu0 %v9286_v39  ;;  %v4201_v1 = vadd.f32 %v8403_v2, %v11456_v49  ;;  %v9295_v28 = vld [vmem:[#allocation11 + $0x70] ss:$24 sps:$4 sm:$0xff]  }
 0x3ae   : > { %v4457_v5 = vadd.f32 %v4441_v23, %v11610_v15  ;;  %v11634_v60 = vadd.f32 %v8525_v21, %v4290_v47  ;;  %v4552_v52 = vmul.f32 %v11565_v7, %v4531_v16  ;;  %5126 = vmatprep.subr.bf16.mxu0 %v9291_v42  ;;  %v4516_v48 = vmul.f32 0.5, %v4500_v19  ;;  %v9300_v23 = vld [vmem:[#allocation11 + $0x44] ss:$24 sps:$4 sm:$0xff]  }
 0x3af   : > { %9324 = vtanh.f32 %v4472_v9  ;;  %v4426_v54 = vmul.f32 %v4410_v37, %v11622_v61  ;;  %v8527_v0 = vpop.f32.mrf.mxu1  ;;  %v4298_v20 = vadd.f32 %v8467_v62, %v4201_v1 }
 0x3b0   : > { %v9319_v40 = vpop.eup %9318  ;;  %v4473_v34 = vmul.f32 0.7978846, %v4457_v5  ;;  %v4411_v13 = vmul.f32 %v11634_v60, %v11634_v60  ;;  %v8528_v6 = vadd.f32 %v8527_v0, %v8526_v29  ;;  %v11641_v24 = vpack.c.bf16 %v4552_v52, %v4551_v53  ;;  %v9298_v52 = vld [vmem:[#allocation11 + $0x40] ss:$24 sps:$4 sm:$0xff]   ;;  %v9303_v0 = vld [vmem:[#allocation11 + $0x14] ss:$24 sps:$4 sm:$0xff]  }
 0x3b1   : > { %v4501_v57 = vadd.f32 1.0, %v9319_v40  ;;  %v4442_v50 = vmul.f32 0.044715, %v4426_v54  ;;  %v8529_v38 = vpop.f32.mrf.mxu1  ;;  %5127 = vmatpush1.bf16.msra.mxu0 %v9289_v14  ;;  %v4532_v4 = vmul.f32 %v4516_v48, %v11534_v46 }
 0x3b2   : > { %9326 = vtanh.f32 %v4473_v34  ;;  %v4427_v31 = vmul.f32 %v4411_v13, %v11634_v60  ;;  %v11645_v47 = vadd.f32 %v8528_v6, %v4295_v51  ;;  %5128 = vmatprep.subr.bf16.mxu0 %v9294_v18  ;;  %v9301_v13 = vld [vmem:[#allocation11 + $0x10] ss:$24 sps:$4 sm:$0xff]  }
 0x3b3   : > { %v4517_v27 = vmul.f32 0.5, %v4501_v57  ;;  %v4458_v45 = vadd.f32 %v4442_v50, %v11622_v61  ;;  %4947 = vmatmul.mubr.bf16.gmra.mxu0 %v11641_v24  ;;  %5060 = vmatmul.mubr.bf16.gmra.mxu1 %v11641_v24  ;;  %v8530_v39 = vpop.f32.mrf.mxu1  ;;  %v4553_v43 = vmul.f32 %v11565_v7, %v4532_v4 }
 0x3b4   : > { %v9321_v56 = vpop.eup %9320  ;;  %v4443_v49 = vmul.f32 0.044715, %v4427_v31  ;;  %v4412_v11 = vmul.f32 %v11645_v47, %v11645_v47  ;;  %v8531_v42 = vadd.f32 %v8530_v39, %v8529_v38  ;;  %4956 = vmatprep.mubr.bf16.mxu0 %v14902_v10  ;;  %5069 = vmatprep.mubr.bf16.mxu1 %v14902_v10 }
 0x3b5   : > { %v4533_v46 = vmul.f32 %v4517_v27, %v11553_v8  ;;  %v4502_v36 = vadd.f32 1.0, %v9321_v56  ;;  %v4474_v59 = vmul.f32 0.7978846, %v4458_v45  ;;  %5129 = vmatpush1.bf16.msra.mxu0 %v9292_v12 }
 0x3b6   : > { %v4459_v35 = vadd.f32 %v4443_v49, %v11634_v60  ;;  %v4428_v16 = vmul.f32 %v4412_v11, %v11645_v47  ;;  %v11658_v19 = vadd.f32 %v8531_v42, %v4298_v20  ;;  %5130 = vmatprep.subr.bf16.mxu0 %v9297_v41 }
 0x3b7   : > { %v9323_v21 = vpop.eup %9322  ;;  %v4518_v2 = vmul.f32 0.5, %v4502_v36  ;;  %9328 = vtanh.f32 %v4474_v59  ;;  %v4554_v9 = vmul.f32 %v11565_v7, %v4533_v46 }
 0x3b8   : > { %v4503_v8 = vadd.f32 1.0, %v9323_v21  ;;  %v4475_v37 = vmul.f32 0.7978846, %v4459_v35  ;;  %v4444_v29 = vmul.f32 0.044715, %v4428_v16  ;;  %v4413_v14 = vmul.f32 %v11658_v19, %v11658_v19 }
 0x3b9   : > { %v4534_v51 = vmul.f32 %v4518_v2, %v11568_v30  ;;  %v11665_v5 = vpack.c.bf16 %v4554_v9, %v4553_v43  ;;  %5131 = vmatpush1.bf16.msra.mxu0 %v9295_v28 }
 0x3ba   : > { %v4519_v18 = vmul.f32 0.5, %v4503_v8  ;;  %9330 = vtanh.f32 %v4475_v37  ;;  %v4460_v48 = vadd.f32 %v4444_v29, %v11645_v47  ;;  %v4429_v54 = vmul.f32 %v4413_v14, %v11658_v19  ;;  %5132 = vmatprep.subr.bf16.mxu0 %v9300_v23  ;;  %v11712_v14 = vld [vmem:[%s10173_s13] sm:$0xff] }
 0x3bb   : > { %4957 = vmatmul.mubr.bf16.gmra.mxu0 %v11665_v5  ;;  %5070 = vmatmul.mubr.bf16.gmra.mxu1 %v11665_v5  ;;  %v4555_v57 = vmul.f32 %v11565_v7, %v4534_v51  ;;  %v11715_v51 = vld [vmem:[%s10173_s13 + $0x18] sm:$0xff] }
 0x3bc   : > { %v9325_v53 = vpop.eup %9324  ;;  %v4535_v40 = vmul.f32 %v4519_v18, %v11579_v25  ;;  %v4476_v30 = vmul.f32 0.7978846, %v4460_v48  ;;  %v4445_v62 = vmul.f32 0.044715, %v4429_v54  ;;  %4966 = vmatprep.mubr.bf16.mxu0 %v14902_v10  ;;  %5079 = vmatprep.mubr.bf16.mxu1 %v14902_v10  ;;  %v14907_v48 = vld [vmem:[#allocation24_spill] sm:$0xff] }
 0x3bd   : > { %v4504_v34 = vadd.f32 1.0, %v9325_v53  ;;  %5133 = vmatpush1.bf16.msra.mxu0 %v9298_v52  ;;  %v11733_v53 = vld [vmem:[%s10173_s13 + $0x30] sm:$0xff] }
 0x3be   : > { %9332 = vtanh.f32 %v4476_v30  ;;  %v4461_v6 = vadd.f32 %v4445_v62, %v11658_v19  ;;  %v4556_v50 = vmul.f32 %v11565_v7, %v4535_v40  ;;  %5134 = vmatprep.subr.bf16.mxu0 %v9303_v0  ;;  %v11730_v0 = vld [vmem:[%s10173_s13 + $0x20] sm:$0xff]  ;;  %v11736_v40 = vld [vmem:[%s10173_s13 + $0x38] sm:$0xff] }
 0x3bf   : > { %v9327_v38 = vpop.eup %9326  ;;  %v4520_v12 = vmul.f32 0.5, %v4504_v34 }
 0x3c0   : > { %v4505_v25 = vadd.f32 1.0, %v9327_v38  ;;  %v4477_v1 = vmul.f32 0.7978846, %v4461_v6  ;;  %v4567_v31 = vpack.c.bf16 %v4556_v50, %v4555_v57  ;;  %v11752_v57 = vld [vmem:[%s10173_s13 + $0x48] sm:$0xff]  ;;  %v11755_v50 = vld [vmem:[%s10173_s13 + $0x50] sm:$0xff] }
 0x3c1   : > { %5135 = vmatpush1.bf16.msra.mxu0 %v9301_v13  ;;  %v4536_v41 = vmul.f32 %v4520_v12, %v11598_v26  ;;  %v14908_v13 = vld [vmem:[#allocation53_spill] sm:$0xff] }
 0x3c2   : > { %v4521_v4 = vmul.f32 0.5, %v4505_v25  ;;  %9334 = vtanh.f32 %v4477_v1 }
 0x3c3   : > { %4967 = vmatmul.mubr.bf16.gmra.mxu0 %v4567_v31  ;;  %5080 = vmatmul.mubr.bf16.gmra.mxu1 %v4567_v31  ;;  %v4557_v56 = vmul.f32 %v11565_v7, %v4536_v41  ;;  %v11771_v41 = vld [vmem:[%s10173_s13 + $0x68] sm:$0xff] }
 0x3c4   : > { %v9329_v27 = vpop.eup %9328  ;;  %v4537_v45 = vmul.f32 %v4521_v4, %v11610_v15  ;;  %4976 = vmatprep.mubr.bf16.mxu0 %v14902_v10  ;;  %5089 = vmatprep.mubr.bf16.mxu1 %v14902_v10  ;;  %v11774_v4 = vld [vmem:[%s10173_s13 + $0x78] sm:$0xff] }
 0x3c5   : > { %v4506_v39 = vadd.f32 1.0, %v9329_v27 }
 0x3c6   : > { %v4558_v20 = vmul.f32 %v11565_v7, %v4537_v45 }
 0x3c7   : > { %v9331_v49 = vpop.eup %9330  ;;  %v4522_v11 = vmul.f32 0.5, %v4506_v39 }
 0x3c8   : > { %v4507_v42 = vadd.f32 1.0, %v9331_v49  ;;  %v4568_v26 = vpack.c.bf16 %v4558_v20, %v4557_v56  ;;  %v11781_v20 = vld [vmem:[%s10173_s13 + $0x80] sm:$0xff] }
 0x3c9   : > { %v4538_v46 = vmul.f32 %v4522_v11, %v11622_v61 }
 0x3ca   : > { %v4523_v36 = vmul.f32 0.5, %v4507_v42 }
 0x3cb   : > { %v9333_v59 = vpop.eup %9332  ;;  %4977 = vmatmul.mubr.bf16.gmra.mxu0 %v4568_v26  ;;  %5090 = vmatmul.mubr.bf16.gmra.mxu1 %v4568_v26  ;;  %v4559_v16 = vmul.f32 %v11565_v7, %v4538_v46  ;;  %v11788_v46 = vld [vmem:[%s10173_s13 + $0x90] sm:$0xff] }
 0x3cc   : > { %v4539_v15 = vmul.f32 %v4523_v36, %v11634_v60  ;;  %v4508_v28 = vadd.f32 1.0, %v9333_v59  ;;  %4986 = vmatprep.mubr.bf16.mxu0 %v14902_v10  ;;  %5099 = vmatprep.mubr.bf16.mxu1 %v14902_v10  ;;  %v11791_v36 = vld [vmem:[%s10173_s13 + $0x98] sm:$0xff]  ;;  %v11794_v59 = vld [vmem:[%s10173_s13 + $0xa8] sm:$0xff] }
 0x3ce   : > { %v4524_v35 = vmul.f32 0.5, %v4508_v28  ;;  %v4560_v23 = vmul.f32 %v11565_v7, %v4539_v15 }
 0x3cf   : > { %v9335_v21 = vpop.eup %9334 }
 0x3d0   : > { %v4509_v2 = vadd.f32 1.0, %v9335_v21  ;;  %v4569_v43 = vpack.c.bf16 %v4560_v23, %v4559_v16  ;;  %v4540_v61 = vmul.f32 %v4524_v35, %v11645_v47  ;;  %v11832_v23 = vld [vmem:[%s10173_s13 + $0xd8] sm:$0xff] }
 0x3d2   : > { %v4525_v9 = vmul.f32 0.5, %v4509_v2  ;;  %v4561_v8 = vmul.f32 %v11565_v7, %v4540_v61 }
 0x3d3   : > { %4987 = vmatmul.mubr.bf16.gmra.mxu0 %v4569_v43  ;;  %5100 = vmatmul.mubr.bf16.gmra.mxu1 %v4569_v43 }
 0x3d4   : > { %v4541_v60 = vmul.f32 %v4525_v9, %v11658_v19  ;;  %4996 = vmatprep.mubr.bf16.mxu0 %v14902_v10  ;;  %5109 = vmatprep.mubr.bf16.mxu1 %v14902_v10 }
 0x3d6   : > { %v4562_v37 = vmul.f32 %v11565_v7, %v4541_v60  ;;  %v4620_v7 = vld [vmem:[#allocation12 + $0x1] ss:$8 sm:$0xf] }
 0x3d7   : > { %v11809_v60 = vld [vmem:[%s10173_s13 + $0xb0] sm:$0xff] }
 0x3d8   : > { %v4570_v29 = vpack.c.bf16 %v4562_v37, %v4561_v8  ;;  %14909 = vst [vmem:[#allocation96_spill] sm:$0xff] %v11809_v60  ;;  %v11812_v8 = vld [vmem:[%s10173_s13 + $0xc0] sm:$0xff]  ;;  %v11815_v37 = vld [vmem:[%s10173_s13 + $0xc8] sm:$0xff] }
 0x3d9   : > { %14910 = vst [vmem:[#allocation106_spill] sm:$0xff] %v11812_v8  ;;  %14911 = vst [vmem:[#allocation107_spill] sm:$0xff] %v11815_v37 }
 0x3db   : > { %4997 = vmatmul.mubr.bf16.gmra.mxu0 %v4570_v29  ;;  %5110 = vmatmul.mubr.bf16.gmra.mxu1 %v4570_v29 }
 0x3dc   : > { %5152 = vmatprep.mubr.bf16.mxu0 %v14902_v10 }
 0x3e3   : > { %5153 = vmatmul.mubr.bf16.vlgmr.msra.gmra.mxu0 %v11587_v33  ;;  %v4621_v33 = vld [vmem:[#allocation12 + $0x1] ss:$8 sm:$0x30] }
 0x3e4   : > { %5162 = vmatprep.mubr.bf16.mxu0 %v14902_v10  ;;  %v11707_v47 = vor.u32 %v4621_v33, %v4620_v7 }
 0x3e6   : > { %14903 = vst [vmem:[#allocation100_spill] sm:$0xff] %v11707_v47  ;;  %v11727_v54 = vrot.slane %v11707_v47, %v14907_v48  ;;  %v11749_v6 = vrot.slane %v11707_v47, %v14908_v13 }
 0x3eb   : > { %5163 = vmatmul.mubr.bf16.gmra.mxu0 %v11617_v32  ;;  %v6098_v32 = vld [vmem:[#allocation12 + $0x2] ss:$8 sm:$0xf] }
 0x3ec   : > { %5172 = vmatprep.mubr.bf16.mxu0 %v14902_v10 }
 0x3f3   : > { %5173 = vmatmul.mubr.bf16.gmra.mxu0 %v11641_v24  ;;  %v6099_v24 = vld [vmem:[#allocation12 + $0x2] ss:$8 sm:$0x30] }
 0x3f4   : > { %5182 = vmatprep.mubr.bf16.mxu0 %v14902_v10  ;;  %v11709_v19 = vor.u32 %v6099_v24, %v6098_v32 }
 0x3f6   : > { %14904 = vst [vmem:[#allocation109_spill] sm:$0xff] %v11709_v19  ;;  %v11759_v38 = vrot.slane %v11709_v19, %v14907_v48  ;;  %v11764_v25 = vrot.slane %v11709_v19, %v14908_v13 }
 0x3fb   : > { %5183 = vmatmul.mubr.bf16.gmra.mxu0 %v11665_v5  ;;  %v14905_v5 = vld [vmem:[#allocation23_spill] sm:$0xff] }
 0x3fc   : > { %5192 = vmatprep.mubr.bf16.mxu0 %v14902_v10  ;;  %v11719_v52 = vrot.slane %v11707_v47, %v14905_v5  ;;  %v11740_v30 = vrot.slane %v11709_v19, %v14905_v5 }
 0x403   : > { %5193 = vmatmul.mubr.bf16.gmra.mxu0 %v4567_v31  ;;  %v11768_v31 = vld [vmem:[%s10173_s13 + $0x60] sm:$0xff] }
 0x404   : > { %5202 = vmatprep.mubr.bf16.mxu0 %v14902_v10 }
 0x40b   : > { %5203 = vmatmul.mubr.bf16.gmra.mxu0 %v4568_v26 }
 0x40c   : > { %5212 = vmatprep.mubr.bf16.mxu0 %v14902_v10 }
 0x413   : > { %5213 = vmatmul.mubr.bf16.gmra.mxu0 %v4569_v43 }
 0x414   : > { %5222 = vmatprep.mubr.bf16.mxu0 %v14902_v10  ;;  %v14906_v10 = vld [vmem:[#allocation52_spill] sm:$0xff] }
 0x415   : > { %v11723_v18 = vrot.slane %v11707_v47, %v14906_v10  ;;  %v11745_v34 = vrot.slane %v11709_v19, %v14906_v10 }
 0x41b   : > { %5223 = vmatmul.mubr.bf16.gmra.mxu0 %v4570_v29 }
 0x462   : > { %v4928_v15 = vpop.f32.mrf.mxu0  ;;  %v5041_v28 = vpop.f32.mrf.mxu1 }
 0x463   : > { %v11801_v2 = vadd.f32 %v4928_v15, %v11719_v52  ;;  %v11804_v43 = vadd.f32 %v5041_v28, %v11723_v18 }
 0x464   : > { %v4930_v29 = vpop.f32.mrf.mxu0  ;;  %v5043_v7 = vpop.f32.mrf.mxu1 }
 0x465   : > { %v5233_v28 = vmul.f32 %v11801_v2, %v11801_v2  ;;  %v5235_v9 = vmul.f32 %v11804_v43, %v11804_v43  ;;  %v11826_v61 = vadd.f32 %v4930_v29, %v11727_v54  ;;  %v11829_v21 = vadd.f32 %v5043_v7, %v11749_v6 }
 0x466   : > { %v4932_v33 = vpop.f32.mrf.mxu0  ;;  %v5045_v32 = vpop.f32.mrf.mxu1 }
 0x467   : > { %v5329_v26 = vmul.f32 %v5233_v28, %v11801_v2  ;;  %v5331_v29 = vmul.f32 %v5235_v9, %v11804_v43  ;;  %v5234_v7 = vmul.f32 %v11826_v61, %v11826_v61  ;;  %v5236_v42 = vmul.f32 %v11829_v21, %v11829_v21 }
 0x468   : > { %v11845_v11 = vadd.f32 %v4932_v33, %v11719_v52  ;;  %v11848_v24 = vadd.f32 %v5045_v32, %v11723_v18  ;;  %v4934_v15 = vpop.f32.mrf.mxu0  ;;  %v5047_v16 = vpop.f32.mrf.mxu1 }
 0x469   : > { %v5425_v49 = vmul.f32 0.044715, %v5329_v26  ;;  %v5427_v9 = vmul.f32 0.044715, %v5331_v29  ;;  %v5330_v56 = vmul.f32 %v5234_v7, %v11826_v61  ;;  %v5332_v39 = vmul.f32 %v5236_v42, %v11829_v21 }
 0x46a   : > { %v5239_v45 = vmul.f32 %v11845_v11, %v11845_v11  ;;  %v5241_v33 = vmul.f32 %v11848_v24, %v11848_v24  ;;  %v11859_v32 = vadd.f32 %v4934_v15, %v11727_v54  ;;  %v11862_v27 = vadd.f32 %v5047_v16, %v11749_v6 }
 0x46b   : > { %v5521_v28 = vadd.f32 %v5425_v49, %v11801_v2  ;;  %v5523_v26 = vadd.f32 %v5427_v9, %v11804_v43  ;;  %v5426_v29 = vmul.f32 0.044715, %v5330_v56  ;;  %v5428_v7 = vmul.f32 0.044715, %v5332_v39  ;;  %v4938_v35 = vpop.f32.mrf.mxu0  ;;  %v5051_v42 = vpop.f32.mrf.mxu1 }
 0x46c   : > { %v5335_v1 = vmul.f32 %v5239_v45, %v11845_v11  ;;  %v5337_v12 = vmul.f32 %v5241_v33, %v11848_v24  ;;  %v5240_v62 = vmul.f32 %v11859_v32, %v11859_v32  ;;  %v5242_v15 = vmul.f32 %v11862_v27, %v11862_v27 }
 0x46d   : > { %v5617_v16 = vmul.f32 0.7978846, %v5521_v28  ;;  %v5619_v13 = vmul.f32 0.7978846, %v5523_v26  ;;  %v5522_v49 = vadd.f32 %v5426_v29, %v11826_v61  ;;  %v5524_v9 = vadd.f32 %v5428_v7, %v11829_v21  ;;  %v4940_v56 = vpop.f32.mrf.mxu0  ;;  %v5053_v33 = vpop.f32.mrf.mxu1 }
 0x46e   : > { %v5431_v39 = vmul.f32 0.044715, %v5335_v1  ;;  %v5433_v10 = vmul.f32 0.044715, %v5337_v12  ;;  %v5336_v48 = vmul.f32 %v5240_v62, %v11859_v32  ;;  %v5338_v45 = vmul.f32 %v5242_v15, %v11862_v27 }
 0x46f   : > { %9336 = vtanh.f32 %v5617_v16  ;;  %v5618_v5 = vmul.f32 0.7978846, %v5522_v49  ;;  %v5620_v58 = vmul.f32 0.7978846, %v5524_v9  ;;  %v11877_v3 = vadd.f32 %v4938_v35, %v11719_v52  ;;  %v4942_v7 = vpop.f32.mrf.mxu0 }
 0x470   : > { %9338 = vtanh.f32 %v5619_v13  ;;  %v5527_v28 = vadd.f32 %v5431_v39, %v11845_v11  ;;  %v5529_v26 = vadd.f32 %v5433_v10, %v11848_v24  ;;  %v5432_v29 = vmul.f32 0.044715, %v5336_v48  ;;  %v5055_v13 = vpop.f32.mrf.mxu1 }
 0x471   : > { %9340 = vtanh.f32 %v5618_v5  ;;  %v5434_v1 = vmul.f32 0.044715, %v5338_v45  ;;  %v5245_v62 = vmul.f32 %v11877_v3, %v11877_v3  ;;  %v11884_v12 = vadd.f32 %v5051_v42, %v11723_v18 }
 0x472   : > { %9342 = vtanh.f32 %v5620_v58  ;;  %v5623_v15 = vmul.f32 0.7978846, %v5527_v28  ;;  %v5625_v16 = vmul.f32 0.7978846, %v5529_v26  ;;  %v5528_v35 = vadd.f32 %v5432_v29, %v11859_v32  ;;  %v4944_v26 = vpop.f32.mrf.mxu0 }
 0x473   : > { %v5530_v49 = vadd.f32 %v5434_v1, %v11862_v27  ;;  %v5341_v10 = vmul.f32 %v5245_v62, %v11877_v3  ;;  %v5247_v5 = vmul.f32 %v11884_v12, %v11884_v12  ;;  %v11892_v48 = vadd.f32 %v4940_v56, %v11727_v54  ;;  %v5057_v1 = vpop.f32.mrf.mxu1 }
 0x474   : > { %9344 = vtanh.f32 %v5623_v15  ;;  %v5624_v42 = vmul.f32 0.7978846, %v5528_v35  ;;  %v11895_v9 = vadd.f32 %v5053_v33, %v11749_v6  ;;  %v11898_v58 = vadd.f32 %v4942_v7, %v11719_v52 }
 0x475   : > { %9346 = vtanh.f32 %v5625_v16  ;;  %v5626_v39 = vmul.f32 0.7978846, %v5530_v49  ;;  %v5437_v45 = vmul.f32 0.044715, %v5341_v10  ;;  %v5343_v28 = vmul.f32 %v5247_v5, %v11884_v12 }
 0x476   : > { %9348 = vtanh.f32 %v5624_v42  ;;  %v5246_v29 = vmul.f32 %v11892_v48, %v11892_v48  ;;  %v5248_v56 = vmul.f32 %v11895_v9, %v11895_v9  ;;  %v5251_v33 = vmul.f32 %v11898_v58, %v11898_v58 }
 0x477   : > { %9350 = vtanh.f32 %v5626_v39  ;;  %v5533_v62 = vadd.f32 %v5437_v45, %v11877_v3  ;;  %v5439_v7 = vmul.f32 0.044715, %v5343_v28  ;;  %v11909_v15 = vadd.f32 %v5055_v13, %v11723_v18  ;;  %v11924_v13 = vld [vmem:[%s10173_s13 + $0xe0] sm:$0xff] }
 0x478   : > { %v5342_v16 = vmul.f32 %v5246_v29, %v11892_v48  ;;  %v5344_v35 = vmul.f32 %v5248_v56, %v11895_v9  ;;  %v5347_v49 = vmul.f32 %v5251_v33, %v11898_v58  ;;  %v11915_v10 = vadd.f32 %v4944_v26, %v11727_v54  ;;  %14912 = vst [vmem:[#allocation102_spill] sm:$0xff] %v11924_v13 }
 0x479   : > { %v5629_v5 = vmul.f32 0.7978846, %v5533_v62  ;;  %v5535_v42 = vadd.f32 %v5439_v7, %v11884_v12  ;;  %v5253_v39 = vmul.f32 %v11909_v15, %v11909_v15  ;;  %v11921_v45 = vadd.f32 %v5057_v1, %v11749_v6 }
 0x47a   : > { %v5438_v28 = vmul.f32 0.044715, %v5342_v16  ;;  %v5440_v29 = vmul.f32 0.044715, %v5344_v35  ;;  %v5443_v44 = vmul.f32 0.044715, %v5347_v49  ;;  %v5252_v56 = vmul.f32 %v11915_v10, %v11915_v10 }
 0x47b   : > { %9352 = vtanh.f32 %v5629_v5  ;;  %v5631_v26 = vmul.f32 0.7978846, %v5535_v42  ;;  %v5349_v33 = vmul.f32 %v5253_v39, %v11909_v15  ;;  %v5254_v62 = vmul.f32 %v11921_v45, %v11921_v45 }
 0x47c   : > { %v9337_v7 = vpop.eup %9336  ;;  %v5534_v17 = vadd.f32 %v5438_v28, %v11892_v48  ;;  %v5536_v1 = vadd.f32 %v5440_v29, %v11895_v9  ;;  %v5539_v22 = vadd.f32 %v5443_v44, %v11898_v58  ;;  %v5348_v16 = vmul.f32 %v5252_v56, %v11915_v10 }
 0x47d   : > { %v9339_v35 = vpop.eup %9338  ;;  %v5809_v49 = vadd.f32 1.0, %v9337_v7  ;;  %9354 = vtanh.f32 %v5631_v26  ;;  %v5445_v55 = vmul.f32 0.044715, %v5349_v33  ;;  %v5350_v47 = vmul.f32 %v5254_v62, %v11921_v45 }
 0x47e   : > { %v9341_v42 = vpop.eup %9340  ;;  %v5811_v39 = vadd.f32 1.0, %v9339_v35  ;;  %v5630_v63 = vmul.f32 0.7978846, %v5534_v17  ;;  %v5632_v19 = vmul.f32 0.7978846, %v5536_v1  ;;  %v4948_v17 = vpop.f32.mrf.mxu0 }
 0x47f   : > { %v9343_v37 = vpop.eup %9342  ;;  %v5905_v28 = vmul.f32 0.5, %v5809_v49  ;;  %v5810_v8 = vadd.f32 1.0, %v9341_v42  ;;  %v5635_v29 = vmul.f32 0.7978846, %v5539_v22  ;;  %v5541_v44 = vadd.f32 %v5445_v55, %v11909_v15 }
 0x480   : > { %v5907_v60 = vmul.f32 0.5, %v5811_v39  ;;  %v5812_v56 = vadd.f32 1.0, %v9343_v37  ;;  %9356 = vtanh.f32 %v5630_v63  ;;  %v5444_v7 = vmul.f32 0.044715, %v5348_v16 }
 0x481   : > { %v9345_v26 = vpop.eup %9344  ;;  %v6001_v33 = vmul.f32 %v5905_v28, %v11801_v2  ;;  %v5906_v5 = vmul.f32 0.5, %v5810_v8  ;;  %9358 = vtanh.f32 %v5632_v19  ;;  %v5637_v35 = vmul.f32 0.7978846, %v5541_v44 }
 0x482   : > { %v9347_v1 = vpop.eup %9346  ;;  %v6003_v62 = vmul.f32 %v5907_v60, %v11804_v43  ;;  %v5908_v13 = vmul.f32 0.5, %v5812_v56  ;;  %v5815_v49 = vadd.f32 1.0, %v9345_v26  ;;  %9360 = vtanh.f32 %v5635_v29 }
 0x483   : > { %v9349_v22 = vpop.eup %9348  ;;  %v6132_v55 = vmul.f32 %v11740_v30, %v6001_v33  ;;  %v6002_v37 = vmul.f32 %v5906_v5, %v11826_v61  ;;  %v5817_v63 = vadd.f32 1.0, %v9347_v1  ;;  %9362 = vtanh.f32 %v5637_v35 }
 0x484   : > { %v9351_v16 = vpop.eup %9350  ;;  %v6004_v2 = vmul.f32 %v5908_v13, %v11829_v21  ;;  %v5911_v8 = vmul.f32 0.5, %v5815_v49  ;;  %v5816_v19 = vadd.f32 1.0, %v9349_v22  ;;  %v11944_v42 = vadd.f32 %v4948_v17, %v11719_v52  ;;  %v5061_v13 = vpop.f32.mrf.mxu1 }
 0x485   : > { %v14913_v43 = vunpack.c.l.bf16 %v11712_v14  ;;  %v11951_v39 = vmul.f32 %v11745_v34, %v6003_v62  ;;  %v5913_v28 = vmul.f32 0.5, %v5817_v63  ;;  %v5818_v29 = vadd.f32 1.0, %v9351_v16 }
 0x486   : > { %v6133_v61 = vmul.f32 %v11759_v38, %v6002_v37  ;;  %v6007_v5 = vmul.f32 %v5911_v8, %v11845_v11  ;;  %v5912_v44 = vmul.f32 0.5, %v5816_v19  ;;  %v5540_v21 = vadd.f32 %v5444_v7, %v11915_v10  ;;  %v4950_v8 = vpop.f32.mrf.mxu0  ;;  %v5063_v19 = vpop.f32.mrf.mxu1 }
 0x487   : > { %v11948_v60 = vadd.f32 %v14913_v43, %v6132_v55  ;;  %v11957_v56 = vmul.f32 %v11764_v25, %v6004_v2  ;;  %v6009_v26 = vmul.f32 %v5913_v28, %v11848_v24  ;;  %v5914_v33 = vmul.f32 0.5, %v5818_v29 }
 0x488   : > { %v5446_v35 = vmul.f32 0.044715, %v5350_v47  ;;  %v9353_v17 = vpop.eup %9352  ;;  %v6138_v1 = vmul.f32 %v11740_v30, %v6007_v5  ;;  %v6008_v62 = vmul.f32 %v5912_v44, %v11859_v32  ;;  %v5636_v49 = vmul.f32 0.7978846, %v5540_v21 }
 0x489   : > { %v5257_v11 = vmul.f32 %v11944_v42, %v11944_v42  ;;  %v6140_v22 = vmul.f32 %v11745_v34, %v6009_v26  ;;  %v6010_v7 = vmul.f32 %v5914_v33, %v11862_v27  ;;  %v5821_v55 = vadd.f32 1.0, %v9353_v17 }
 0x48a   : > { %v5542_v37 = vadd.f32 %v5446_v35, %v11921_v45  ;;  %v9355_v63 = vpop.eup %9354  ;;  %v14914_v24 = vunpack.c.h.bf16 %v11712_v14  ;;  %v14915_v16 = vunpack.c.l.bf16 %v11715_v51  ;;  %9364 = vtanh.f32 %v5636_v49 }
 0x48b   : > { %v5353_v32 = vmul.f32 %v5257_v11, %v11944_v42  ;;  %v14916_v43 = vunpack.c.l.bf16 %v11730_v0  ;;  %v6139_v28 = vmul.f32 %v11759_v38, %v6008_v62  ;;  %v5917_v29 = vmul.f32 0.5, %v5821_v55 }
 0x48c   : > { %v11969_v47 = vadd.f32 %v14914_v24, %v6133_v61  ;;  %v11973_v2 = vadd.f32 %v14915_v16, %v6138_v1  ;;  %v5823_v5 = vadd.f32 1.0, %v9355_v63  ;;  %v11982_v14 = vmul.f32 %v11764_v25, %v6010_v7 }
 0x48d   : > { %v11978_v27 = vadd.f32 %v14916_v43, %v6140_v22  ;;  %v5638_v61 = vmul.f32 0.7978846, %v5542_v37  ;;  %v5449_v44 = vmul.f32 0.044715, %v5353_v32  ;;  %v11985_v21 = vadd.f32 %v5061_v13, %v11723_v18  ;;  %v9357_v26 = vpop.eup %9356 }
 0x48e   : > { %v6013_v33 = vmul.f32 %v5917_v29, %v11877_v3  ;;  %v5919_v35 = vmul.f32 0.5, %v5823_v5  ;;  %v11989_v0 = vadd.f32 %v4950_v8, %v11727_v54  ;;  %v11992_v17 = vadd.f32 %v5063_v19, %v11749_v6  ;;  %v9359_v1 = vpop.eup %9358  ;;  %v4952_v8 = vpop.f32.mrf.mxu0 }
 0x48f   : > { %v5822_v62 = vadd.f32 1.0, %v9357_v26  ;;  %9366 = vtanh.f32 %v5638_v61  ;;  %v5545_v49 = vadd.f32 %v5449_v44, %v11944_v42  ;;  %v5259_v11 = vmul.f32 %v11985_v21, %v11985_v21  ;;  %v9361_v13 = vpop.eup %9360 }
 0x490   : > { %v6144_v22 = vmul.f32 %v11740_v30, %v6013_v33  ;;  %v6015_v3 = vmul.f32 %v5919_v35, %v11884_v12  ;;  %v5824_v7 = vadd.f32 1.0, %v9359_v1  ;;  %v5258_v55 = vmul.f32 %v11989_v0, %v11989_v0  ;;  %v9363_v37 = vpop.eup %9362 }
 0x491   : > { %v5918_v63 = vmul.f32 0.5, %v5822_v62  ;;  %v5827_v24 = vadd.f32 1.0, %v9361_v13  ;;  %v5641_v16 = vmul.f32 0.7978846, %v5545_v49  ;;  %v5355_v32 = vmul.f32 %v5259_v11, %v11985_v21 }
 0x492   : > { %v14917_v19 = vunpack.c.h.bf16 %v11715_v51  ;;  %v6146_v29 = vmul.f32 %v11745_v34, %v6015_v3  ;;  %v5920_v5 = vmul.f32 0.5, %v5824_v7  ;;  %v5829_v61 = vadd.f32 1.0, %v9363_v37  ;;  %v4954_v3 = vpop.f32.mrf.mxu0 }
 0x493   : > { %v6014_v12 = vmul.f32 %v5918_v63, %v11892_v48  ;;  %v5923_v44 = vmul.f32 0.5, %v5827_v24  ;;  %9368 = vtanh.f32 %v5641_v16  ;;  %v5451_v26 = vmul.f32 0.044715, %v5355_v32 }
 0x494   : > { %v12004_v43 = vadd.f32 %v14917_v19, %v6139_v28  ;;  %v14918_v33 = vunpack.c.l.bf16 %v11733_v53  ;;  %v6016_v1 = vmul.f32 %v5920_v5, %v11895_v9  ;;  %v5925_v62 = vmul.f32 0.5, %v5829_v61  ;;  %v5065_v28 = vpop.f32.mrf.mxu1 }
 0x495   : > { %v5354_v51 = vmul.f32 %v5258_v55, %v11989_v0  ;;  %v6145_v49 = vmul.f32 %v11759_v38, %v6014_v12  ;;  %v6019_v11 = vmul.f32 %v5923_v44, %v11898_v58  ;;  %v5547_v13 = vadd.f32 %v5451_v26, %v11985_v21  ;;  %v4958_v26 = vpop.f32.mrf.mxu0 }
 0x496   : > { %v12010_v35 = vadd.f32 %v14918_v33, %v6144_v22  ;;  %v5260_v48 = vmul.f32 %v11992_v17, %v11992_v17  ;;  %v14920_v7 = vunpack.c.l.bf16 %v11736_v40  ;;  %v6021_v9 = vmul.f32 %v5925_v62, %v11909_v15  ;;  %v5067_v5 = vpop.f32.mrf.mxu1 }
 0x497   : > { %v5450_v37 = vmul.f32 0.044715, %v5354_v51  ;;  %v12025_v55 = vadd.f32 %v4952_v8, %v11719_v52  ;;  %v12028_v63 = vmul.f32 %v11764_v25, %v6016_v1  ;;  %v6150_v58 = vmul.f32 %v11740_v30, %v6019_v11  ;;  %v9365_v32 = vpop.eup %9364 }
 0x498   : > { %14919 = vst [vmem:[#allocation108_spill] sm:$0xff] %v12010_v35  ;;  %v12021_v22 = vadd.f32 %v14920_v7, %v6146_v29  ;;  %v5643_v24 = vmul.f32 0.7978846, %v5547_v13  ;;  %v5356_v16 = vmul.f32 %v5260_v48, %v11992_v17  ;;  %v14922_v19 = vunpack.c.h.bf16 %v11733_v53 }
 0x499   : > { %v5546_v29 = vadd.f32 %v5450_v37, %v11989_v0  ;;  %v5263_v15 = vmul.f32 %v12025_v55, %v12025_v55  ;;  %v12040_v8 = vadd.f32 %v5065_v28, %v11723_v18  ;;  %v6152_v61 = vmul.f32 %v11745_v34, %v6021_v9 }
 0x49a   : > { %14921 = vst [vmem:[#allocation103_spill] sm:$0xff] %v12021_v22  ;;  %v12034_v40 = vadd.f32 %v14922_v19, %v6145_v49  ;;  %v5828_v12 = vadd.f32 1.0, %v9365_v32  ;;  %9370 = vtanh.f32 %v5643_v24  ;;  %v5452_v44 = vmul.f32 0.044715, %v5356_v16 }
 0x49b   : > { %v14924_v33 = vunpack.c.l.bf16 %v11752_v57  ;;  %v5642_v1 = vmul.f32 0.7978846, %v5546_v29  ;;  %v5359_v62 = vmul.f32 %v5263_v15, %v12025_v55  ;;  %v5265_v51 = vmul.f32 %v12040_v8, %v12040_v8 }
 0x49c   : > { %14923 = vst [vmem:[#allocation132_spill] sm:$0xff] %v12034_v40  ;;  %v5924_v49 = vmul.f32 0.5, %v5828_v12  ;;  %v5548_v28 = vadd.f32 %v5452_v44, %v11992_v17  ;;  %v12052_v11 = vadd.f32 %v4954_v3, %v11727_v54  ;;  %v12055_v13 = vadd.f32 %v5067_v5, %v11749_v6  ;;  %v9367_v48 = vpop.eup %9366  ;;  %v5071_v5 = vpop.f32.mrf.mxu1 }
 0x49d   : > { %v12045_v53 = vadd.f32 %v14924_v33, %v6150_v58  ;;  %9372 = vtanh.f32 %v5642_v1  ;;  %v5455_v7 = vmul.f32 0.044715, %v5359_v62  ;;  %v5361_v9 = vmul.f32 %v5265_v51, %v12040_v8 }
 0x49e   : > { %v12059_v37 = vadd.f32 %v4958_v26, %v11719_v52  ;;  %v6020_v58 = vmul.f32 %v5924_v49, %v11915_v10  ;;  %v5830_v24 = vadd.f32 1.0, %v9367_v48  ;;  %v5644_v16 = vmul.f32 0.7978846, %v5548_v28  ;;  %v4960_v26 = vpop.f32.mrf.mxu0 }
 0x49f   : > { %14925 = vst [vmem:[#allocation133_spill] sm:$0xff] %v12045_v53  ;;  %v5264_v32 = vmul.f32 %v12052_v11, %v12052_v11  ;;  %v5551_v3 = vadd.f32 %v5455_v7, %v12025_v55  ;;  %v5457_v19 = vmul.f32 0.044715, %v5361_v9  ;;  %v5266_v29 = vmul.f32 %v12055_v13, %v12055_v13  ;;  %v5073_v53 = vpop.f32.mrf.mxu1 }
 0x4a0   : > { %v5269_v15 = vmul.f32 %v12059_v37, %v12059_v37  ;;  %v6151_v12 = vmul.f32 %v11759_v38, %v6020_v58  ;;  %v5926_v44 = vmul.f32 0.5, %v5830_v24  ;;  %9374 = vtanh.f32 %v5644_v16  ;;  %v9369_v33 = vpop.eup %9368 }
 0x4a1   : > { %v5360_v10 = vmul.f32 %v5264_v32, %v12052_v11  ;;  %v5647_v1 = vmul.f32 0.7978846, %v5551_v3  ;;  %v5553_v62 = vadd.f32 %v5457_v19, %v12040_v8  ;;  %v5362_v51 = vmul.f32 %v5266_v29, %v12055_v13 }
 0x4a2   : > { %v5365_v49 = vmul.f32 %v5269_v15, %v12059_v37  ;;  %v14926_v28 = vunpack.c.l.bf16 %v11755_v50  ;;  %v14928_v7 = vunpack.c.h.bf16 %v11752_v57  ;;  %v5833_v58 = vadd.f32 1.0, %v9369_v33 }
 0x4a3   : > { %v5456_v24 = vmul.f32 0.044715, %v5360_v10  ;;  %9376 = vtanh.f32 %v5647_v1  ;;  %v5649_v16 = vmul.f32 0.7978846, %v5553_v62  ;;  %v5458_v32 = vmul.f32 0.044715, %v5362_v51 }
 0x4a4   : > { %v12076_v48 = vadd.f32 %v14926_v28, %v6152_v61  ;;  %v12080_v9 = vadd.f32 %v14928_v7, %v6151_v12  ;;  %v5461_v3 = vmul.f32 0.044715, %v5365_v49  ;;  %v6022_v19 = vmul.f32 %v5926_v44, %v11921_v45  ;;  %v4962_v61 = vpop.f32.mrf.mxu0 }
 0x4a5   : > { %v5929_v29 = vmul.f32 0.5, %v5833_v58  ;;  %v5552_v15 = vadd.f32 %v5456_v24, %v12052_v11  ;;  %v12085_v50 = vadd.f32 %v5071_v5, %v11723_v18  ;;  %9378 = vtanh.f32 %v5649_v16  ;;  %v5075_v16 = vpop.f32.mrf.mxu1 }
 0x4a6   : > { %14927 = vst [vmem:[#allocation134_spill] sm:$0xff] %v12076_v48  ;;  %14929 = vst [vmem:[#allocation135_spill] sm:$0xff] %v12080_v9  ;;  %v5554_v57 = vadd.f32 %v5458_v32, %v12055_v13  ;;  %v5557_v12 = vadd.f32 %v5461_v3, %v12059_v37  ;;  %v12090_v10 = vadd.f32 %v4960_v26, %v11727_v54  ;;  %v4964_v32 = vpop.f32.mrf.mxu0 }
 0x4a7   : > { %v6025_v33 = vmul.f32 %v5929_v29, %v11944_v42  ;;  %v5648_v1 = vmul.f32 0.7978846, %v5552_v15  ;;  %v5271_v45 = vmul.f32 %v12085_v50, %v12085_v50  ;;  %v12096_v44 = vadd.f32 %v5073_v53, %v11749_v6  ;;  %v9371_v5 = vpop.eup %9370  ;;  %v5077_v48 = vpop.f32.mrf.mxu1 }
 0x4a8   : > { %v5650_v62 = vmul.f32 0.7978846, %v5554_v57  ;;  %v5653_v51 = vmul.f32 0.7978846, %v5557_v12  ;;  %v5270_v49 = vmul.f32 %v12090_v10, %v12090_v10  ;;  %v12101_v28 = vadd.f32 %v4962_v61, %v11719_v52 }
 0x4a9   : > { %v12104_v26 = vmul.f32 %v11764_v25, %v6022_v19  ;;  %v5835_v42 = vadd.f32 1.0, %v9371_v5  ;;  %9380 = vtanh.f32 %v5648_v1  ;;  %v5367_v7 = vmul.f32 %v5271_v45, %v12085_v50 }
 0x4aa   : > { %9382 = vtanh.f32 %v5650_v62  ;;  %v5366_v53 = vmul.f32 %v5270_v49, %v12090_v10  ;;  %v5272_v58 = vmul.f32 %v12096_v44, %v12096_v44  ;;  %v5275_v24 = vmul.f32 %v12101_v28, %v12101_v28  ;;  %v9373_v3 = vpop.eup %9372 }
 0x4ab   : > { %14930 = vst [vmem:[#allocation136_spill] sm:$0xff] %v12104_v26  ;;  %v6156_v29 = vmul.f32 %v11740_v30, %v6025_v33  ;;  %v5931_v19 = vmul.f32 0.5, %v5835_v42  ;;  %9384 = vtanh.f32 %v5653_v51  ;;  %v5463_v15 = vmul.f32 0.044715, %v5367_v7 }
 0x4ac   : > { %v5834_v61 = vadd.f32 1.0, %v9373_v3  ;;  %v5462_v57 = vmul.f32 0.044715, %v5366_v53  ;;  %v5368_v12 = vmul.f32 %v5272_v58, %v12096_v44  ;;  %v5371_v1 = vmul.f32 %v5275_v24, %v12101_v28 }
 0x4ad   : > { %v6027_v45 = vmul.f32 %v5931_v19, %v11985_v21  ;;  %v5559_v5 = vadd.f32 %v5463_v15, %v12085_v50  ;;  %v12118_v62 = vadd.f32 %v5075_v16, %v11723_v18  ;;  %v12121_v49 = vadd.f32 %v4964_v32, %v11727_v54  ;;  %v9375_v33 = vpop.eup %9374 }
 0x4ae   : > { %v5930_v42 = vmul.f32 0.5, %v5834_v61  ;;  %v5558_v51 = vadd.f32 %v5462_v57, %v12090_v10  ;;  %v5464_v7 = vmul.f32 0.044715, %v5368_v12  ;;  %v5467_v53 = vmul.f32 0.044715, %v5371_v1 }
 0x4af   : > { %v6158_v58 = vmul.f32 %v11745_v34, %v6027_v45  ;;  %v5836_v3 = vadd.f32 1.0, %v9375_v33  ;;  %v5655_v24 = vmul.f32 0.7978846, %v5559_v5  ;;  %v5277_v21 = vmul.f32 %v12118_v62, %v12118_v62 }
 0x4b0   : > { %v6026_v19 = vmul.f32 %v5930_v42, %v11989_v0  ;;  %v5654_v16 = vmul.f32 0.7978846, %v5558_v51  ;;  %v5560_v15 = vadd.f32 %v5464_v7, %v12096_v44  ;;  %v5563_v32 = vadd.f32 %v5467_v53, %v12101_v28  ;;  %v9377_v61 = vpop.eup %9376 }
 0x4b1   : > { %v14931_v57 = vunpack.c.l.bf16 %v11768_v31  ;;  %v5932_v1 = vmul.f32 0.5, %v5836_v3  ;;  %9386 = vtanh.f32 %v5655_v24  ;;  %v5373_v45 = vmul.f32 %v5277_v21, %v12118_v62 }
 0x4b2   : > { %v6157_v5 = vmul.f32 %v11759_v38, %v6026_v19  ;;  %v5839_v33 = vadd.f32 1.0, %v9377_v61  ;;  %9388 = vtanh.f32 %v5654_v16  ;;  %v5656_v0 = vmul.f32 0.7978846, %v5560_v15  ;;  %v9379_v42 = vpop.eup %9378  ;;  %v5081_v19 = vpop.f32.mrf.mxu1 }
 0x4b3   : > { %v12132_v12 = vadd.f32 %v14931_v57, %v6156_v29  ;;  %v14933_v51 = vunpack.c.l.bf16 %v11771_v41  ;;  %v5659_v53 = vmul.f32 0.7978846, %v5563_v32  ;;  %v5469_v9 = vmul.f32 0.044715, %v5373_v45  ;;  %v4968_v57 = vpop.f32.mrf.mxu0 }
 0x4b4   : > { %v5276_v29 = vmul.f32 %v12121_v49, %v12121_v49  ;;  %v6028_v3 = vmul.f32 %v5932_v1, %v11992_v17  ;;  %v5935_v24 = vmul.f32 0.5, %v5839_v33  ;;  %v5841_v21 = vadd.f32 1.0, %v9379_v42 }
 0x4b5   : > { %14932 = vst [vmem:[#allocation137_spill] sm:$0xff] %v12132_v12  ;;  %v12138_v7 = vadd.f32 %v14933_v51, %v6158_v58  ;;  %9390 = vtanh.f32 %v5656_v0  ;;  %v14935_v16 = vunpack.c.h.bf16 %v11768_v31  ;;  %v5565_v41 = vadd.f32 %v5469_v9, %v12118_v62 }
 0x4b6   : > { %9392 = vtanh.f32 %v5659_v53  ;;  %v5372_v58 = vmul.f32 %v5276_v29, %v12121_v49  ;;  %v9381_v32 = vpop.eup %9380  ;;  %v6031_v61 = vmul.f32 %v5935_v24, %v12025_v55  ;;  %v5937_v45 = vmul.f32 0.5, %v5841_v21 }
 0x4b7   : > { %14934 = vst [vmem:[#allocation138_spill] sm:$0xff] %v12138_v7  ;;  %v12145_v15 = vadd.f32 %v14935_v16, %v6157_v5  ;;  %v12151_v51 = vadd.f32 %v5077_v48, %v11749_v6  ;;  %v12154_v17 = vadd.f32 %v4968_v57, %v11719_v52  ;;  %v9383_v1 = vpop.eup %9382  ;;  %v5840_v33 = vadd.f32 1.0, %v9381_v32 }
 0x4b8   : > { %v5661_v31 = vmul.f32 0.7978846, %v5565_v41  ;;  %v5468_v5 = vmul.f32 0.044715, %v5372_v58  ;;  %v12157_v0 = vadd.f32 %v5081_v19, %v11723_v18  ;;  %v9385_v9 = vpop.eup %9384  ;;  %v6162_v42 = vmul.f32 %v11740_v30, %v6031_v61 }
 0x4b9   : > { %14936 = vst [vmem:[#allocation139_spill] sm:$0xff] %v12145_v15  ;;  %v6033_v53 = vmul.f32 %v5937_v45, %v12040_v8  ;;  %v5842_v55 = vadd.f32 1.0, %v9383_v1  ;;  %v5278_v48 = vmul.f32 %v12151_v51, %v12151_v51  ;;  %v5936_v29 = vmul.f32 0.5, %v5840_v33  ;;  %v4970_v45 = vpop.f32.mrf.mxu0 }
 0x4ba   : > { %v5845_v24 = vadd.f32 1.0, %v9385_v9  ;;  %9394 = vtanh.f32 %v5661_v31  ;;  %v5564_v57 = vadd.f32 %v5468_v5, %v12121_v49  ;;  %v12165_v21 = vmul.f32 %v11764_v25, %v6028_v3 }
 0x4bb   : > { %v6164_v19 = vmul.f32 %v11745_v34, %v6033_v53  ;;  %v5938_v16 = vmul.f32 0.5, %v5842_v55  ;;  %v5374_v41 = vmul.f32 %v5278_v48, %v12151_v51  ;;  %v6032_v58 = vmul.f32 %v5936_v29, %v12052_v11 }
 0x4bc   : > { %14937 = vst [vmem:[#allocation140_spill] sm:$0xff] %v12165_v21  ;;  %v5941_v8 = vmul.f32 0.5, %v5845_v24  ;;  %v5660_v32 = vmul.f32 0.7978846, %v5564_v57  ;;  %v5281_v61 = vmul.f32 %v12154_v17, %v12154_v17  ;;  %v14938_v1 = vunpack.c.l.bf16 %v11774_v4  ;;  %v5083_v57 = vpop.f32.mrf.mxu1 }
 0x4bd   : > { %v6034_v3 = vmul.f32 %v5938_v16, %v12055_v13  ;;  %v5470_v31 = vmul.f32 0.044715, %v5374_v41  ;;  %v5283_v5 = vmul.f32 %v12157_v0, %v12157_v0  ;;  %v6163_v9 = vmul.f32 %v11759_v38, %v6032_v58 }
 0x4be   : > { %v12174_v33 = vadd.f32 %v14938_v1, %v6162_v42  ;;  %v6037_v11 = vmul.f32 %v5941_v8, %v12059_v37  ;;  %9396 = vtanh.f32 %v5660_v32  ;;  %v5377_v53 = vmul.f32 %v5281_v61, %v12154_v17  ;;  %v9387_v55 = vpop.eup %9386 }
 0x4bf   : > { %v14940_v48 = vunpack.c.l.bf16 %v11781_v20  ;;  %v5566_v42 = vadd.f32 %v5470_v31, %v12151_v51  ;;  %v5379_v13 = vmul.f32 %v5283_v5, %v12157_v0  ;;  %v12189_v24 = vadd.f32 %v4970_v45, %v11727_v54  ;;  %v9389_v16 = vpop.eup %9388 }
 0x4c0   : > { %14939 = vst [vmem:[#allocation141_spill] sm:$0xff] %v12174_v33  ;;  %v14942_v41 = vunpack.c.h.bf16 %v11774_v4  ;;  %v12196_v58 = vmul.f32 %v11764_v25, %v6034_v3  ;;  %v5847_v8 = vadd.f32 1.0, %v9387_v55  ;;  %v5473_v20 = vmul.f32 0.044715, %v5377_v53  ;;  %v4972_v55 = vpop.f32.mrf.mxu0 }
 0x4c1   : > { %v12184_v29 = vadd.f32 %v14940_v48, %v6164_v19  ;;  %v5846_v19 = vadd.f32 1.0, %v9389_v16  ;;  %v5662_v32 = vmul.f32 0.7978846, %v5566_v42  ;;  %v5475_v61 = vmul.f32 0.044715, %v5379_v13 }
 0x4c2   : > { %v12193_v37 = vadd.f32 %v14942_v41, %v6163_v9  ;;  %14944 = vst [vmem:[#allocation144_spill] sm:$0xff] %v12196_v58  ;;  %v5282_v1 = vmul.f32 %v12189_v24, %v12189_v24  ;;  %v9391_v31 = vpop.eup %9390  ;;  %v6168_v45 = vmul.f32 %v11740_v30, %v6037_v11  ;;  %v5943_v5 = vmul.f32 0.5, %v5847_v8 }
 0x4c3   : > { %14941 = vst [vmem:[#allocation142_spill] sm:$0xff] %v12184_v29  ;;  %v5569_v48 = vadd.f32 %v5473_v20, %v12154_v17  ;;  %v12203_v4 = vadd.f32 %v5083_v57, %v11749_v6  ;;  %v9393_v9 = vpop.eup %9392  ;;  %v5942_v3 = vmul.f32 0.5, %v5846_v19  ;;  %v5848_v41 = vadd.f32 1.0, %v9391_v31 }
 0x4c4   : > { %14943 = vst [vmem:[#allocation143_spill] sm:$0xff] %v12193_v37  ;;  %9398 = vtanh.f32 %v5662_v32  ;;  %v5571_v53 = vadd.f32 %v5475_v61, %v12157_v0  ;;  %v6039_v42 = vmul.f32 %v5943_v5, %v12085_v50  ;;  %v5851_v13 = vadd.f32 1.0, %v9393_v9  ;;  %v5085_v5 = vpop.f32.mrf.mxu1 }
 0x4c5   : > { %v5665_v16 = vmul.f32 0.7978846, %v5569_v48  ;;  %v5378_v29 = vmul.f32 %v5282_v1, %v12189_v24  ;;  %v6038_v11 = vmul.f32 %v5942_v3, %v12090_v10  ;;  %v5944_v8 = vmul.f32 0.5, %v5848_v41  ;;  %v4974_v10 = vpop.f32.mrf.mxu0 }
 0x4c6   : > { %v5667_v20 = vmul.f32 0.7978846, %v5571_v53  ;;  %v5284_v57 = vmul.f32 %v12203_v4, %v12203_v4  ;;  %v6170_v19 = vmul.f32 %v11745_v34, %v6039_v42  ;;  %v5947_v31 = vmul.f32 0.5, %v5851_v13 }
 0x4c7   : > { %9400 = vtanh.f32 %v5665_v16  ;;  %v5474_v32 = vmul.f32 0.044715, %v5378_v29  ;;  %v9395_v61 = vpop.eup %9394  ;;  %v6169_v37 = vmul.f32 %v11759_v38, %v6038_v11  ;;  %v6040_v50 = vmul.f32 %v5944_v8, %v12096_v44 }
 0x4c8   : > { %9402 = vtanh.f32 %v5667_v20  ;;  %v5380_v1 = vmul.f32 %v5284_v57, %v12203_v4  ;;  %v14945_v48 = vunpack.c.l.bf16 %v11788_v46  ;;  %v6043_v3 = vmul.f32 %v5947_v31, %v12101_v28  ;;  %v4978_v31 = vpop.f32.mrf.mxu0 }
 0x4c9   : > { %v5853_v41 = vadd.f32 1.0, %v9395_v61  ;;  %v5570_v53 = vadd.f32 %v5474_v32, %v12189_v24  ;;  %v14947_v29 = vunpack.c.l.bf16 %v11791_v36  ;;  %v14949_v44 = vunpack.c.h.bf16 %v11788_v46 }
 0x4ca   : > { %v12217_v9 = vadd.f32 %v14945_v48, %v6168_v45  ;;  %v5476_v16 = vmul.f32 0.044715, %v5380_v1  ;;  %v12230_v11 = vadd.f32 %v4972_v55, %v11719_v52  ;;  %v12233_v45 = vmul.f32 %v11764_v25, %v6040_v50  ;;  %v5087_v55 = vpop.f32.mrf.mxu1 }
 0x4cb   : > { %v12223_v42 = vadd.f32 %v14947_v29, %v6170_v19  ;;  %v12227_v13 = vadd.f32 %v14949_v44, %v6169_v37  ;;  %v5949_v8 = vmul.f32 0.5, %v5853_v41  ;;  %v5666_v28 = vmul.f32 0.7978846, %v5570_v53  ;;  %v9397_v57 = vpop.eup %9396 }
 0x4cc   : > { %14946 = vst [vmem:[#allocation145_spill] sm:$0xff] %v12217_v9  ;;  %14951 = vst [vmem:[#allocation148_spill] sm:$0xff] %v12233_v45  ;;  %v12236_v20 = vadd.f32 %v5085_v5, %v11723_v18  ;;  %v6174_v36 = vmul.f32 %v11740_v30, %v6043_v3  ;;  %v5572_v19 = vadd.f32 %v5476_v16, %v12203_v4  ;;  %v5852_v61 = vadd.f32 1.0, %v9397_v57 }
 0x4cd   : > { %14948 = vst [vmem:[#allocation146_spill] sm:$0xff] %v12223_v42  ;;  %14950 = vst [vmem:[#allocation147_spill] sm:$0xff] %v12227_v13  ;;  %v5287_v46 = vmul.f32 %v12230_v11, %v12230_v11  ;;  %v12243_v37 = vadd.f32 %v4974_v10, %v11727_v54  ;;  %v6045_v32 = vmul.f32 %v5949_v8, %v12118_v62  ;;  %9404 = vtanh.f32 %v5666_v28 }
 0x4ce   : > { %v5668_v1 = vmul.f32 0.7978846, %v5572_v19  ;;  %v5289_v48 = vmul.f32 %v12236_v20, %v12236_v20  ;;  %v5948_v41 = vmul.f32 0.5, %v5852_v61  ;;  %v12254_v53 = vadd.f32 %v5087_v55, %v11749_v6 }
 0x4cf   : > { %v5383_v5 = vmul.f32 %v5287_v46, %v12230_v11  ;;  %v5288_v3 = vmul.f32 %v12243_v37, %v12243_v37  ;;  %v6176_v10 = vmul.f32 %v11745_v34, %v6045_v32  ;;  %v12257_v62 = vadd.f32 %v4978_v31, %v11719_v52  ;;  %v4980_v31 = vpop.f32.mrf.mxu0 }
 0x4d0   : > { %9406 = vtanh.f32 %v5668_v1  ;;  %v5385_v44 = vmul.f32 %v5289_v48, %v12236_v20  ;;  %v14952_v28 = vunpack.c.l.bf16 %v11794_v59  ;;  %v6044_v19 = vmul.f32 %v5948_v41, %v12121_v49  ;;  %v12272_v48 = vld [vmem:[%s10173_s13 + $0xf0] sm:$0xff] }
 0x4d1   : > { %v5479_v29 = vmul.f32 0.044715, %v5383_v5  ;;  %v5384_v16 = vmul.f32 %v5288_v3, %v12243_v37  ;;  %v9399_v8 = vpop.eup %9398  ;;  %v5290_v46 = vmul.f32 %v12254_v53, %v12254_v53  ;;  %v5293_v55 = vmul.f32 %v12257_v62, %v12257_v62  ;;  %v14954_v3 = vld [vmem:[#allocation96_spill] sm:$0xff] }
 0x4d2   : > { %v12263_v57 = vadd.f32 %v14952_v28, %v6174_v36  ;;  %v5854_v32 = vadd.f32 1.0, %v9399_v8  ;;  %v5481_v1 = vmul.f32 0.044715, %v5385_v44  ;;  %v14955_v50 = vunpack.c.l.bf16 %v14954_v3 }
 0x4d3   : > { %v5575_v61 = vadd.f32 %v5479_v29, %v12230_v11  ;;  %v5480_v5 = vmul.f32 0.044715, %v5384_v16  ;;  %v6175_v49 = vmul.f32 %v11759_v38, %v6044_v19  ;;  %v5386_v41 = vmul.f32 %v5290_v46, %v12254_v53  ;;  %v4982_v19 = vpop.f32.mrf.mxu0 }
 0x4d4   : > { %14953 = vst [vmem:[#allocation149_spill] sm:$0xff] %v12263_v57  ;;  %v12276_v36 = vadd.f32 %v14955_v50, %v6176_v10  ;;  %v5389_v28 = vmul.f32 %v5293_v55, %v12257_v62  ;;  %v9401_v57 = vpop.eup %9400  ;;  %v5950_v42 = vmul.f32 0.5, %v5854_v32  ;;  %v5577_v8 = vadd.f32 %v5481_v1, %v12236_v20  ;;  %v5091_v10 = vpop.f32.mrf.mxu1 }
 0x4d5   : > { %v5671_v13 = vmul.f32 0.7978846, %v5575_v61  ;;  %v5576_v29 = vadd.f32 %v5480_v5, %v12243_v37  ;;  %v9403_v44 = vpop.eup %9402  ;;  %v5857_v16 = vadd.f32 1.0, %v9401_v57  ;;  %v5482_v9 = vmul.f32 0.044715, %v5386_v41 }
 0x4d6   : > { %14956 = vst [vmem:[#allocation96_spill] sm:$0xff] %v12276_v36  ;;  %v5485_v45 = vmul.f32 0.044715, %v5389_v28  ;;  %v6046_v46 = vmul.f32 %v5950_v42, %v12151_v51  ;;  %v5859_v3 = vadd.f32 1.0, %v9403_v44  ;;  %v5673_v55 = vmul.f32 0.7978846, %v5577_v8  ;;  %v5093_v8 = vpop.f32.mrf.mxu1 }
 0x4d7   : > { %9408 = vtanh.f32 %v5671_v13  ;;  %v5953_v32 = vmul.f32 0.5, %v5857_v16  ;;  %v5672_v61 = vmul.f32 0.7978846, %v5576_v29  ;;  %v5578_v1 = vadd.f32 %v5482_v9, %v12254_v53  ;;  %v12295_v36 = vld [vmem:[%s10173_s13 + $0xf8] sm:$0xff]  ;;  %v4984_v9 = vpop.f32.mrf.mxu0 }
 0x4d8   : > { %v5581_v5 = vadd.f32 %v5485_v45, %v12257_v62  ;;  %v14957_v57 = vunpack.c.h.bf16 %v11794_v59  ;;  %v5955_v28 = vmul.f32 0.5, %v5859_v3  ;;  %9410 = vtanh.f32 %v5673_v55 }
 0x4d9   : > { %v12292_v50 = vadd.f32 %v5091_v10, %v11723_v18  ;;  %v6049_v51 = vmul.f32 %v5953_v32, %v12154_v17  ;;  %9412 = vtanh.f32 %v5672_v61  ;;  %v5674_v42 = vmul.f32 0.7978846, %v5578_v1 }
 0x4da   : > { %v12289_v41 = vadd.f32 %v14957_v57, %v6175_v49  ;;  %v5677_v13 = vmul.f32 0.7978846, %v5581_v5  ;;  %v9405_v29 = vpop.eup %9404  ;;  %v12299_v45 = vmul.f32 %v11764_v25, %v6046_v46  ;;  %v6051_v59 = vmul.f32 %v5955_v28, %v12157_v0  ;;  %v5095_v5 = vpop.f32.mrf.mxu1  ;;  %v14960_v28 = vld [vmem:[#allocation106_spill] sm:$0xff] }
 0x4db   : > { %v5295_v49 = vmul.f32 %v12292_v50, %v12292_v50  ;;  %v12305_v44 = vadd.f32 %v4980_v31, %v11727_v54  ;;  %v6180_v16 = vmul.f32 %v11740_v30, %v6049_v51  ;;  %v5858_v17 = vadd.f32 1.0, %v9405_v29  ;;  %v12320_v57 = vpop.f32.mrf.mxu0 }
 0x4dc   : > { %14958 = vst [vmem:[#allocation150_spill] sm:$0xff] %v12289_v41  ;;  %14959 = vst [vmem:[#allocation151_spill] sm:$0xff] %v12299_v45  ;;  %9414 = vtanh.f32 %v5674_v42  ;;  %v6182_v3 = vmul.f32 %v11745_v34, %v6051_v59  ;;  %v12315_v61 = vadd.f32 %v5093_v8, %v11749_v6  ;;  %v12318_v1 = vadd.f32 %v4982_v19, %v11719_v52 }
 0x4dd   : > { %9416 = vtanh.f32 %v5677_v13  ;;  %v5391_v46 = vmul.f32 %v5295_v49, %v12292_v50  ;;  %v5294_v0 = vmul.f32 %v12305_v44, %v12305_v44  ;;  %v9407_v55 = vpop.eup %9406  ;;  %v5954_v32 = vmul.f32 0.5, %v5858_v17  ;;  %v12328_v49 = vld [vmem:[%s10173_s13 + $0x108] sm:$0xff]  ;;  %v14963_v17 = vld [vmem:[#allocation107_spill] sm:$0xff] }
 0x4de   : > { %v14961_v51 = vunpack.c.l.bf16 %v14960_v28  ;;  %v5860_v13 = vadd.f32 1.0, %v9407_v55  ;;  %v14964_v8 = vunpack.c.l.bf16 %v14963_v17  ;;  %v5296_v10 = vmul.f32 %v12315_v61, %v12315_v61 }
 0x4df   : > { %v5487_v29 = vmul.f32 0.044715, %v5391_v46  ;;  %v5390_v59 = vmul.f32 %v5294_v0, %v12305_v44  ;;  %v6050_v19 = vmul.f32 %v5954_v32, %v12189_v24  ;;  %v5299_v41 = vmul.f32 %v12318_v1, %v12318_v1 }
 0x4e0   : > { %v12324_v42 = vadd.f32 %v14961_v51, %v6180_v16  ;;  %v12332_v31 = vadd.f32 %v14964_v8, %v6182_v3  ;;  %v5956_v16 = vmul.f32 0.5, %v5860_v13  ;;  %v12341_v0 = vadd.f32 %v5095_v5, %v11723_v18  ;;  %v12344_v51 = vld [vmem:[%s10173_s13 + $0x110] sm:$0xff]  ;;  %v12350_v8 = vpop.f32.mrf.mxu0 }
 0x4e1   : > { %v5583_v55 = vadd.f32 %v5487_v29, %v12292_v50  ;;  %v5486_v46 = vmul.f32 0.044715, %v5390_v59  ;;  %v6181_v3 = vmul.f32 %v11759_v38, %v6050_v19  ;;  %v5392_v17 = vmul.f32 %v5296_v10, %v12315_v61  ;;  %v5097_v19 = vpop.f32.mrf.mxu1 }
 0x4e2   : > { %14962 = vst [vmem:[#allocation106_spill] sm:$0xff] %v12324_v42  ;;  %14965 = vst [vmem:[#allocation107_spill] sm:$0xff] %v12332_v31  ;;  %v5395_v24 = vmul.f32 %v5299_v41, %v12318_v1  ;;  %v6052_v13 = vmul.f32 %v5956_v16, %v12203_v4  ;;  %v5301_v5 = vmul.f32 %v12341_v0, %v12341_v0  ;;  %v14966_v41 = vunpack.c.h.bf16 %v14960_v28 }
 0x4e3   : > { %v5679_v31 = vmul.f32 0.7978846, %v5583_v55  ;;  %v5582_v29 = vadd.f32 %v5486_v46, %v12305_v44  ;;  %v5488_v42 = vmul.f32 0.044715, %v5392_v17  ;;  %v12358_v10 = vadd.f32 %v4984_v9, %v11727_v54  ;;  %v12369_v9 = vpop.f32.mrf.mxu0 }
 0x4e4   : > { %v9409_v59 = vpop.eup %9408  ;;  %v5491_v45 = vmul.f32 0.044715, %v5395_v24  ;;  %v12362_v32 = vadd.f32 %v14966_v41, %v6181_v3  ;;  %v5397_v17 = vmul.f32 %v5301_v5, %v12341_v0  ;;  %v12372_v28 = vmul.f32 %v11764_v25, %v6052_v13 }
 0x4e5   : > { %v5863_v33 = vadd.f32 1.0, %v9409_v59  ;;  %9418 = vtanh.f32 %v5679_v31  ;;  %v5678_v4 = vmul.f32 0.7978846, %v5582_v29  ;;  %v9411_v16 = vpop.eup %9410  ;;  %v5584_v55 = vadd.f32 %v5488_v42, %v12315_v61 }
 0x4e6   : > { %14967 = vst [vmem:[#allocation152_spill] sm:$0xff] %v12362_v32  ;;  %v5587_v46 = vadd.f32 %v5491_v45, %v12318_v1  ;;  %v5300_v24 = vmul.f32 %v12358_v10, %v12358_v10  ;;  %v9413_v58 = vpop.eup %9412  ;;  %14968 = vst [vmem:[#allocation153_spill] sm:$0xff] %v12372_v28  ;;  %v5865_v31 = vadd.f32 1.0, %v9411_v16  ;;  %v5493_v7 = vmul.f32 0.044715, %v5397_v17  ;;  %v12379_v16 = vpop.f32.mrf.mxu0 }
 0x4e7   : > { %v5959_v3 = vmul.f32 0.5, %v5863_v33  ;;  %9420 = vtanh.f32 %v5678_v4  ;;  %v5864_v29 = vadd.f32 1.0, %v9413_v58  ;;  %v5680_v59 = vmul.f32 0.7978846, %v5584_v55 }
 0x4e8   : > { %v5683_v42 = vmul.f32 0.7978846, %v5587_v46  ;;  %v5396_v45 = vmul.f32 %v5300_v24, %v12358_v10  ;;  %v5961_v32 = vmul.f32 0.5, %v5865_v31  ;;  %v12377_v12 = vadd.f32 %v5097_v19, %v11749_v6 }
 0x4e9   : > { %v9415_v41 = vpop.eup %9414  ;;  %v6055_v5 = vmul.f32 %v5959_v3, %v12230_v11  ;;  %v5960_v21 = vmul.f32 0.5, %v5864_v29  ;;  %9422 = vtanh.f32 %v5680_v59  ;;  %v5589_v19 = vadd.f32 %v5493_v7, %v12341_v0  ;;  %v12393_v59 = vld [vmem:[%s10173_s13 + $0x120] sm:$0xff]  ;;  %v12395_v7 = vpop.f32.mrf.mxu0 }
 0x4ea   : > { %v9417_v15 = vpop.eup %9416  ;;  %v5866_v13 = vadd.f32 1.0, %v9415_v41  ;;  %v5492_v33 = vmul.f32 0.044715, %v5396_v45  ;;  %v6057_v4 = vmul.f32 %v5961_v32, %v12236_v20  ;;  %9424 = vtanh.f32 %v5683_v42  ;;  %v5101_v20 = vpop.f32.mrf.mxu1 }
 0x4eb   : > { %v6186_v58 = vmul.f32 %v11740_v30, %v6055_v5  ;;  %v5869_v55 = vadd.f32 1.0, %v9417_v15  ;;  %v6056_v11 = vmul.f32 %v5960_v21, %v12243_v37  ;;  %v5302_v29 = vmul.f32 %v12377_v12, %v12377_v12 }
 0x4ec   : > { %v5962_v46 = vmul.f32 0.5, %v5866_v13  ;;  %v5588_v17 = vadd.f32 %v5492_v33, %v12358_v10  ;;  %v6188_v24 = vmul.f32 %v11745_v34, %v6057_v4  ;;  %v5685_v21 = vmul.f32 0.7978846, %v5589_v19  ;;  %v12408_v33 = vld [vmem:[%s10173_s13 + $0x128] sm:$0xff] }
 0x4ed   : > { %v5965_v3 = vmul.f32 0.5, %v5869_v55  ;;  %v6187_v15 = vmul.f32 %v11759_v38, %v6056_v11  ;;  %v14969_v42 = vunpack.c.l.bf16 %v11832_v23  ;;  %v5398_v5 = vmul.f32 %v5302_v29, %v12377_v12 }
 0x4ee   : > { %v6058_v32 = vmul.f32 %v5962_v46, %v12254_v53  ;;  %v5684_v37 = vmul.f32 0.7978846, %v5588_v17  ;;  %v12405_v13 = vadd.f32 %v12320_v57, %v11719_v52  ;;  %v14971_v53 = vld [vmem:[#allocation102_spill] sm:$0xff]  ;;  %v14974_v11 = vunpack.c.h.bf16 %v11832_v23  ;;  %v5103_v17 = vpop.f32.mrf.mxu1 }
 0x4ef   : > { %v12399_v45 = vadd.f32 %v14969_v42, %v6186_v58  ;;  %v6061_v41 = vmul.f32 %v5965_v3, %v12257_v62  ;;  %v14972_v4 = vunpack.c.l.bf16 %v14971_v53  ;;  %9426 = vtanh.f32 %v5685_v21 }
 0x4f0   : > { %v12416_v46 = vadd.f32 %v14974_v11, %v6187_v15  ;;  %v12419_v58 = vmul.f32 %v11764_v25, %v6058_v32  ;;  %9428 = vtanh.f32 %v5684_v37  ;;  %v5494_v62 = vmul.f32 0.044715, %v5398_v5  ;;  %v12433_v32 = vpop.f32.mrf.mxu0 }
 0x4f1   : > { %14970 = vst [vmem:[#allocation154_spill] sm:$0xff] %v12399_v45  ;;  %v12412_v55 = vadd.f32 %v14972_v4, %v6188_v24  ;;  %v5305_v57 = vmul.f32 %v12405_v13, %v12405_v13  ;;  %v6192_v24 = vmul.f32 %v11740_v30, %v6061_v41  ;;  %v12426_v29 = vadd.f32 %v5101_v20, %v11723_v18 }
 0x4f2   : > { %14975 = vst [vmem:[#allocation155_spill] sm:$0xff] %v12416_v46  ;;  %14976 = vst [vmem:[#allocation156_spill] sm:$0xff] %v12419_v58  ;;  %v9419_v3 = vpop.eup %9418  ;;  %v12431_v15 = vadd.f32 %v12350_v8, %v11727_v54  ;;  %v5590_v37 = vadd.f32 %v5494_v62, %v12377_v12  ;;  %v12443_v4 = vadd.f32 %v5103_v17, %v11749_v6  ;;  %v12455_v17 = vpop.f32.mrf.mxu0 }
 0x4f3   : > { %14973 = vst [vmem:[#allocation102_spill] sm:$0xff] %v12412_v55  ;;  %v5871_v21 = vadd.f32 1.0, %v9419_v3  ;;  %v5401_v42 = vmul.f32 %v5305_v57, %v12405_v13  ;;  %v5307_v20 = vmul.f32 %v12426_v29, %v12426_v29  ;;  %v12447_v8 = vadd.f32 %v12369_v9, %v11719_v52 }
 0x4f4   : > { %v9421_v53 = vpop.eup %9420  ;;  %v5306_v41 = vmul.f32 %v12431_v15, %v12431_v15  ;;  %v5686_v3 = vmul.f32 0.7978846, %v5590_v37  ;;  %v5308_v19 = vmul.f32 %v12443_v4, %v12443_v4 }
 0x4f5   : > { %v5967_v11 = vmul.f32 0.5, %v5871_v21  ;;  %v5870_v62 = vadd.f32 1.0, %v9421_v53  ;;  %v5497_v57 = vmul.f32 0.044715, %v5401_v42  ;;  %v5403_v5 = vmul.f32 %v5307_v20, %v12426_v29 }
 0x4f6   : > { %v5402_v23 = vmul.f32 %v5306_v41, %v12431_v15  ;;  %v5311_v31 = vmul.f32 %v12447_v8, %v12447_v8  ;;  %v9423_v55 = vpop.eup %9422  ;;  %9430 = vtanh.f32 %v5686_v3  ;;  %v5404_v41 = vmul.f32 %v5308_v19, %v12443_v4  ;;  %v12464_v3 = vpop.f32.mrf.mxu0 }
 0x4f7   : > { %v6063_v9 = vmul.f32 %v5967_v11, %v12292_v50  ;;  %v5966_v46 = vmul.f32 0.5, %v5870_v62  ;;  %v5593_v21 = vadd.f32 %v5497_v57, %v12405_v13  ;;  %v9425_v37 = vpop.eup %9424  ;;  %v5872_v42 = vadd.f32 1.0, %v9423_v55  ;;  %v12472_v57 = vld [vmem:[%s10173_s13 + $0x138] sm:$0xff] }
 0x4f8   : > { %v5499_v53 = vmul.f32 0.044715, %v5403_v5  ;;  %v5498_v20 = vmul.f32 0.044715, %v5402_v23  ;;  %v5875_v28 = vadd.f32 1.0, %v9425_v37  ;;  %v14977_v55 = vunpack.c.l.bf16 %v12272_v48 }
 0x4f9   : > { %v6194_v58 = vmul.f32 %v11745_v34, %v6063_v9  ;;  %v6062_v45 = vmul.f32 %v5966_v46, %v12305_v44  ;;  %v5689_v26 = vmul.f32 0.7978846, %v5593_v21  ;;  %v5968_v22 = vmul.f32 0.5, %v5872_v42  ;;  %v5105_v44 = vpop.f32.mrf.mxu1 }
 0x4fa   : > { %v5595_v50 = vadd.f32 %v5499_v53, %v12426_v29  ;;  %v5594_v11 = vadd.f32 %v5498_v20, %v12431_v15  ;;  %v5500_v62 = vmul.f32 0.044715, %v5404_v41  ;;  %v12468_v5 = vadd.f32 %v14977_v55, %v6192_v24 }
 0x4fb   : > { %v6193_v19 = vmul.f32 %v11759_v38, %v6062_v45  ;;  %v5971_v23 = vmul.f32 0.5, %v5875_v28  ;;  %9432 = vtanh.f32 %v5689_v26  ;;  %v6064_v46 = vmul.f32 %v5968_v22, %v12315_v61 }
 0x4fc   : > { %14978 = vst [vmem:[#allocation157_spill] sm:$0xff] %v12468_v5  ;;  %v5691_v9 = vmul.f32 0.7978846, %v5595_v50  ;;  %v5690_v21 = vmul.f32 0.7978846, %v5594_v11  ;;  %v5596_v37 = vadd.f32 %v5500_v62, %v12443_v4  ;;  %v9427_v42 = vpop.eup %9426  ;;  %v14979_v53 = vunpack.c.l.bf16 %v12295_v36  ;;  %v12488_v50 = vld [vmem:[%s10173_s13 + $0x140] sm:$0xff]  ;;  %v12490_v11 = vpop.f32.mrf.mxu0 }
 0x4fd   : > { %v14981_v24 = vunpack.c.h.bf16 %v12272_v48  ;;  %v6067_v26 = vmul.f32 %v5971_v23, %v12318_v1  ;;  %v5407_v28 = vmul.f32 %v5311_v31, %v12447_v8  ;;  %v9429_v41 = vpop.eup %9428  ;;  %v5877_v55 = vadd.f32 1.0, %v9427_v42  ;;  %v5107_v62 = vpop.f32.mrf.mxu1 }
 0x4fe   : > { %v12478_v20 = vadd.f32 %v14979_v53, %v6194_v58  ;;  %9434 = vtanh.f32 %v5691_v9  ;;  %v5692_v22 = vmul.f32 0.7978846, %v5596_v37  ;;  %v5876_v58 = vadd.f32 1.0, %v9429_v41  ;;  %v12539_v37 = vld [vmem:[%s10173_s13 + $0x158] sm:$0xff] }
 0x4ff   : > { %v12482_v45 = vadd.f32 %v14981_v24, %v6193_v19  ;;  %v6198_v36 = vmul.f32 %v11740_v30, %v6067_v26  ;;  %9436 = vtanh.f32 %v5690_v21  ;;  %v5503_v48 = vmul.f32 0.044715, %v5407_v28  ;;  %v12515_v26 = vpop.f32.mrf.mxu0 }
 0x500   : > { %14980 = vst [vmem:[#allocation158_spill] sm:$0xff] %v12478_v20  ;;  %v12494_v1 = vmul.f32 %v11764_v25, %v6064_v46  ;;  %v5973_v31 = vmul.f32 0.5, %v5877_v55  ;;  %9438 = vtanh.f32 %v5692_v22  ;;  %v12497_v19 = vadd.f32 %v5105_v44, %v11723_v18 }
 0x501   : > { %14982 = vst [vmem:[#allocation159_spill] sm:$0xff] %v12482_v45  ;;  %v5972_v23 = vmul.f32 0.5, %v5876_v58  ;;  %v5599_v9 = vadd.f32 %v5503_v48, %v12447_v8  ;;  %v12503_v42 = vadd.f32 %v12379_v16, %v11727_v54  ;;  %v14984_v21 = vunpack.c.l.bf16 %v12328_v49  ;;  %v12541_v48 = vpop.f32.mrf.mxu0 }
 0x502   : > { %14983 = vst [vmem:[#allocation160_spill] sm:$0xff] %v12494_v1  ;;  %v6069_v46 = vmul.f32 %v5973_v31, %v12341_v0  ;;  %v5313_v24 = vmul.f32 %v12497_v19, %v12497_v19  ;;  %v12513_v44 = vadd.f32 %v5107_v62, %v11749_v6  ;;  %v12522_v55 = vadd.f32 %v12395_v7, %v11719_v52  ;;  %v12525_v0 = vld [vmem:[%s10173_s13 + $0x150] sm:$0xff]  ;;  %v5111_v62 = vpop.f32.mrf.mxu1 }
 0x503   : > { %v12507_v53 = vadd.f32 %v14984_v21, %v6198_v36  ;;  %v6068_v28 = vmul.f32 %v5972_v23, %v12358_v10  ;;  %v5695_v41 = vmul.f32 0.7978846, %v5599_v9  ;;  %v5312_v16 = vmul.f32 %v12503_v42, %v12503_v42  ;;  %v9431_v22 = vpop.eup %9430 }
 0x504   : > { %v6200_v36 = vmul.f32 %v11745_v34, %v6069_v46  ;;  %v5409_v58 = vmul.f32 %v5313_v24, %v12497_v19  ;;  %v5314_v10 = vmul.f32 %v12513_v44, %v12513_v44  ;;  %v5878_v23 = vadd.f32 1.0, %v9431_v22 }
 0x505   : > { %14985 = vst [vmem:[#allocation161_spill] sm:$0xff] %v12507_v53  ;;  %v6199_v31 = vmul.f32 %v11759_v38, %v6068_v28  ;;  %9440 = vtanh.f32 %v5695_v41  ;;  %v5408_v7 = vmul.f32 %v5312_v16, %v12503_v42  ;;  %v5317_v46 = vmul.f32 %v12522_v55, %v12522_v55 }
 0x506   : > { %v5505_v9 = vmul.f32 0.044715, %v5409_v58  ;;  %v5410_v21 = vmul.f32 %v5314_v10, %v12513_v44  ;;  %v14986_v61 = vunpack.c.l.bf16 %v12344_v51  ;;  %v5974_v28 = vmul.f32 0.5, %v5878_v23 }
 0x507   : > { %v5504_v41 = vmul.f32 0.044715, %v5408_v7  ;;  %v12548_v16 = vadd.f32 %v5111_v62, %v11723_v18  ;;  %v14988_v58 = vunpack.c.h.bf16 %v12328_v49  ;;  %v5413_v45 = vmul.f32 %v5317_v46, %v12522_v55  ;;  %v12562_v7 = vpop.f32.mrf.mxu0 }
 0x508   : > { %v12545_v53 = vadd.f32 %v14986_v61, %v6200_v36  ;;  %v9433_v22 = vpop.eup %9432  ;;  %v5601_v24 = vadd.f32 %v5505_v9, %v12497_v19  ;;  %v5506_v20 = vmul.f32 0.044715, %v5410_v21  ;;  %v6070_v62 = vmul.f32 %v5974_v28, %v12377_v12 }
 0x509   : > { %v12552_v10 = vadd.f32 %v14988_v58, %v6199_v31  ;;  %v5881_v5 = vadd.f32 1.0, %v9433_v22  ;;  %v5600_v51 = vadd.f32 %v5504_v41, %v12503_v42  ;;  %v5319_v61 = vmul.f32 %v12548_v16, %v12548_v16  ;;  %v12571_v1 = vpop.f32.mrf.mxu0 }
 0x50a   : > { %14987 = vst [vmem:[#allocation162_spill] sm:$0xff] %v12545_v53  ;;  %v5697_v23 = vmul.f32 0.7978846, %v5601_v24  ;;  %v5602_v49 = vadd.f32 %v5506_v20, %v12513_v44  ;;  %v5509_v31 = vmul.f32 0.044715, %v5413_v45  ;;  %v12567_v41 = vadd.f32 %v12433_v32, %v11727_v54 }
 0x50b   : > { %14989 = vst [vmem:[#allocation163_spill] sm:$0xff] %v12552_v10  ;;  %v9435_v9 = vpop.eup %9434  ;;  %v5977_v21 = vmul.f32 0.5, %v5881_v5  ;;  %v5696_v58 = vmul.f32 0.7978846, %v5600_v51  ;;  %v5415_v46 = vmul.f32 %v5319_v61, %v12548_v16  ;;  %v5113_v5 = vpop.f32.mrf.mxu1  ;;  %v12574_v32 = vmul.f32 %v11764_v25, %v6070_v62 }
 0x50c   : > { %v9437_v22 = vpop.eup %9436  ;;  %v5883_v53 = vadd.f32 1.0, %v9435_v9  ;;  %9442 = vtanh.f32 %v5697_v23  ;;  %v5698_v36 = vmul.f32 0.7978846, %v5602_v49  ;;  %v5605_v12 = vadd.f32 %v5509_v31, %v12522_v55 }
 0x50d   : > { %v9439_v24 = vpop.eup %9438  ;;  %v6073_v20 = vmul.f32 %v5977_v21, %v12405_v13  ;;  %v5882_v45 = vadd.f32 1.0, %v9437_v22  ;;  %9444 = vtanh.f32 %v5696_v58  ;;  %v5511_v28 = vmul.f32 0.044715, %v5415_v46  ;;  %14990 = vst [vmem:[#allocation164_spill] sm:$0xff] %v12574_v32  ;;  %v5115_v46 = vpop.f32.mrf.mxu1 }
 0x50e   : > { %v5979_v51 = vmul.f32 0.5, %v5883_v53  ;;  %v5884_v10 = vadd.f32 1.0, %v9439_v24  ;;  %9446 = vtanh.f32 %v5698_v36  ;;  %v5701_v61 = vmul.f32 0.7978846, %v5605_v12 }
 0x50f   : > { %v5978_v23 = vmul.f32 0.5, %v5882_v45  ;;  %v5607_v49 = vadd.f32 %v5511_v28, %v12548_v16  ;;  %v5318_v31 = vmul.f32 %v12567_v41, %v12567_v41  ;;  %v6204_v13 = vmul.f32 %v11740_v30, %v6073_v20 }
 0x510   : > { %v6075_v9 = vmul.f32 %v5979_v51, %v12426_v29  ;;  %v5980_v21 = vmul.f32 0.5, %v5884_v10  ;;  %9448 = vtanh.f32 %v5701_v61  ;;  %v12587_v20 = vadd.f32 %v5113_v5, %v11749_v6  ;;  %v12597_v51 = vld [vmem:[%s10173_s13 + $0x168] sm:$0xff] }
 0x511   : > { %v6074_v53 = vmul.f32 %v5978_v23, %v12431_v15  ;;  %v5703_v36 = vmul.f32 0.7978846, %v5607_v49  ;;  %v5414_v58 = vmul.f32 %v5318_v31, %v12567_v41  ;;  %v12591_v29 = vadd.f32 %v12455_v17, %v11719_v52  ;;  %v12593_v15 = vpop.f32.mrf.mxu0  ;;  %v12612_v49 = vld [vmem:[%s10173_s13 + $0x170] sm:$0xff] }
 0x512   : > { %v9441_v22 = vpop.eup %9440  ;;  %v6206_v12 = vmul.f32 %v11745_v34, %v6075_v9  ;;  %v6076_v24 = vmul.f32 %v5980_v21, %v12443_v4  ;;  %v14991_v61 = vunpack.c.l.bf16 %v12393_v59  ;;  %v14993_v4 = vunpack.c.l.bf16 %v12408_v33 }
 0x513   : > { %v6205_v10 = vmul.f32 %v11759_v38, %v6074_v53  ;;  %v5887_v45 = vadd.f32 1.0, %v9441_v22  ;;  %9450 = vtanh.f32 %v5703_v36  ;;  %v5510_v28 = vmul.f32 0.044715, %v5414_v58  ;;  %v5117_v53 = vpop.f32.mrf.mxu1  ;;  %v14999_v22 = vld [vmem:[#allocation100_spill] sm:$0xff] }
 0x514   : > { %v12601_v23 = vadd.f32 %v14991_v61, %v6204_v13  ;;  %v12605_v5 = vadd.f32 %v14993_v4, %v6206_v12  ;;  %v5320_v52 = vmul.f32 %v12587_v20, %v12587_v20  ;;  %v5323_v17 = vmul.f32 %v12591_v29, %v12591_v29  ;;  %v12628_v61 = vpop.f32.mrf.mxu0 }
 0x515   : > { %v14995_v31 = vunpack.c.h.bf16 %v12393_v59  ;;  %v12619_v21 = vmul.f32 %v11764_v25, %v6076_v24  ;;  %v5983_v13 = vmul.f32 0.5, %v5887_v45  ;;  %v5606_v33 = vadd.f32 %v5510_v28, %v12567_v41  ;;  %v14998_v24 = vld [vmem:[#allocation104_spill] sm:$0xff] }
 0x516   : > { %14992 = vst [vmem:[#allocation165_spill] sm:$0xff] %v12601_v23  ;;  %14994 = vst [vmem:[#allocation166_spill] sm:$0xff] %v12605_v5  ;;  %v5416_v36 = vmul.f32 %v5320_v52, %v12587_v20  ;;  %v5419_v58 = vmul.f32 %v5323_v17, %v12591_v29  ;;  %v12626_v12 = vadd.f32 %v5115_v46, %v11723_v18 }
 0x517   : > { %v12616_v9 = vadd.f32 %v14995_v31, %v6205_v10  ;;  %14997 = vst [vmem:[#allocation168_spill] sm:$0xff] %v12619_v21  ;;  %v6079_v59 = vmul.f32 %v5983_v13, %v12447_v8  ;;  %v5702_v10 = vmul.f32 0.7978846, %v5606_v33  ;;  %v12634_v45 = vadd.f32 %v12464_v3, %v11727_v54 }
 0x518   : > { %v5512_v28 = vmul.f32 0.044715, %v5416_v36  ;;  %v5515_v4 = vmul.f32 0.044715, %v5419_v58  ;;  %v5325_v52 = vmul.f32 %v12626_v12, %v12626_v12  ;;  %v12639_v17 = vadd.f32 %v5117_v53, %v11749_v6  ;;  %v12648_v58 = vpop.f32.mrf.mxu0 }
 0x519   : > { %14996 = vst [vmem:[#allocation167_spill] sm:$0xff] %v12616_v9  ;;  %v9443_v18 = vpop.eup %9442  ;;  %v6210_v46 = vmul.f32 %v11740_v30, %v6079_v59  ;;  %9452 = vtanh.f32 %v5702_v10  ;;  %v5324_v8 = vmul.f32 %v12634_v45, %v12634_v45  ;;  %v12655_v31 = vrot.slane %v14999_v22, %v14998_v24 }
 0x51a   : > { %v9445_v13 = vpop.eup %9444  ;;  %v5889_v54 = vadd.f32 1.0, %v9443_v18  ;;  %v5608_v3 = vadd.f32 %v5512_v28, %v12587_v20  ;;  %v5611_v33 = vadd.f32 %v5515_v4, %v12591_v29  ;;  %v5421_v36 = vmul.f32 %v5325_v52, %v12626_v12  ;;  %v12659_v40 = vpop.f32.mrf.mxu0 }
 0x51b   : > { %v9447_v6 = vpop.eup %9446  ;;  %v5888_v53 = vadd.f32 1.0, %v9445_v13  ;;  %v5420_v59 = vmul.f32 %v5324_v8, %v12634_v45  ;;  %v5326_v10 = vmul.f32 %v12639_v17, %v12639_v17 }
 0x51c   : > { %v5985_v18 = vmul.f32 0.5, %v5889_v54  ;;  %v5890_v62 = vadd.f32 1.0, %v9447_v6  ;;  %v5704_v28 = vmul.f32 0.7978846, %v5608_v3  ;;  %v5707_v5 = vmul.f32 0.7978846, %v5611_v33 }
 0x51d   : > { %v9449_v4 = vpop.eup %9448  ;;  %v5984_v21 = vmul.f32 0.5, %v5888_v53  ;;  %v5517_v52 = vmul.f32 0.044715, %v5421_v36  ;;  %v5516_v9 = vmul.f32 0.044715, %v5420_v59  ;;  %v5422_v23 = vmul.f32 %v5326_v10, %v12639_v17 }
 0x51e   : > { %v6081_v13 = vmul.f32 %v5985_v18, %v12497_v19  ;;  %v5986_v8 = vmul.f32 0.5, %v5890_v62  ;;  %v5893_v32 = vadd.f32 1.0, %v9449_v4  ;;  %9454 = vtanh.f32 %v5704_v28 }
 0x51f   : > { %v6080_v35 = vmul.f32 %v5984_v21, %v12503_v42  ;;  %9456 = vtanh.f32 %v5707_v5  ;;  %v5613_v54 = vadd.f32 %v5517_v52, %v12626_v12  ;;  %v5612_v3 = vadd.f32 %v5516_v9, %v12634_v45 }
 0x520   : > { %v9451_v33 = vpop.eup %9450  ;;  %v6212_v36 = vmul.f32 %v11745_v34, %v6081_v13  ;;  %v6082_v6 = vmul.f32 %v5986_v8, %v12513_v44  ;;  %v5989_v53 = vmul.f32 0.5, %v5893_v32  ;;  %v5518_v59 = vmul.f32 0.044715, %v5422_v23  ;;  %v12677_v44 = vpop.f32.mrf.mxu0 }
 0x521   : > { %v6211_v19 = vmul.f32 %v11759_v38, %v6080_v35  ;;  %v5895_v62 = vadd.f32 1.0, %v9451_v33  ;;  %v5709_v10 = vmul.f32 0.7978846, %v5613_v54  ;;  %v5708_v18 = vmul.f32 0.7978846, %v5612_v3 }
 0x522   : > { %v15000_v28 = vunpack.c.l.bf16 %v12472_v57  ;;  %v15001_v5 = vunpack.c.l.bf16 %v12488_v50  ;;  %v6085_v9 = vmul.f32 %v5989_v53, %v12522_v55  ;;  %v5614_v4 = vadd.f32 %v5518_v59, %v12639_v17  ;;  %v15004_v55 = vld [vmem:[#allocation22_spill] sm:$0xff] }
 0x523   : > { %v12680_v32 = vmul.f32 %v11764_v25, %v6082_v6  ;;  %v5991_v35 = vmul.f32 0.5, %v5895_v62  ;;  %9458 = vtanh.f32 %v5709_v10  ;;  %v12684_v23 = vadd.f32 %v12490_v11, %v12655_v31  ;;  %v12714_v6 = vpop.f32.mrf.mxu0 }
 0x524   : > { %v12669_v42 = vadd.f32 %v15000_v28, %v6210_v46  ;;  %v12673_v21 = vadd.f32 %v15001_v5, %v6212_v36  ;;  %v15003_v46 = vunpack.c.h.bf16 %v12472_v57  ;;  %9460 = vtanh.f32 %v5708_v18 }
 0x525   : > { %v5710_v52 = vmul.f32 0.7978846, %v5614_v4  ;;  %v12692_v13 = vrot.slane %v14999_v22, %v15004_v55  ;;  %v6216_v8 = vmul.f32 %v11740_v30, %v6085_v9  ;;  %v6087_v54 = vmul.f32 %v5991_v35, %v12548_v16  ;;  %v15005_v22 = vld [vmem:[#allocation109_spill] sm:$0xff] }
 0x526   : > { %15002 = vst [vmem:[#allocation100_spill] sm:$0xff] %v12673_v21  ;;  %v12688_v50 = vadd.f32 %v15003_v46, %v6211_v19  ;;  %v5237_v3 = vmul.f32 %v12684_v23, %v12684_v23  ;;  %v12700_v11 = vadd.f32 %v12541_v48, %v12655_v31  ;;  %v9453_v57 = vpop.eup %9452  ;;  %v12708_v36 = vrot.slane %v15005_v22, %v14998_v24 }
 0x527   : > { %9462 = vtanh.f32 %v5710_v52  ;;  %v12704_v33 = vadd.f32 %v12515_v26, %v12692_v13  ;;  %v12712_v16 = vadd.f32 %v12562_v7, %v12692_v13  ;;  %v6218_v53 = vmul.f32 %v11745_v34, %v6087_v54  ;;  %v12745_v54 = vpop.f32.mrf.mxu0 }
 0x528   : > { %v5894_v48 = vadd.f32 1.0, %v9453_v57  ;;  %v5333_v59 = vmul.f32 %v5237_v3, %v12684_v23  ;;  %v5243_v19 = vmul.f32 %v12700_v11, %v12700_v11  ;;  %v12726_v7 = vadd.f32 %v12571_v1, %v12655_v31 }
 0x529   : > { %v5238_v26 = vmul.f32 %v12704_v33, %v12704_v33  ;;  %v5244_v62 = vmul.f32 %v12712_v16, %v12712_v16  ;;  %v12730_v10 = vadd.f32 %v12593_v15, %v12692_v13  ;;  %v15006_v18 = vunpack.c.l.bf16 %v12525_v0 }
 0x52a   : > { %v5990_v5 = vmul.f32 0.5, %v5894_v48  ;;  %v5429_v9 = vmul.f32 0.044715, %v5333_v59  ;;  %v5339_v4 = vmul.f32 %v5243_v19, %v12700_v11  ;;  %v15008_v35 = vunpack.c.l.bf16 %v12539_v37 }
 0x52b   : > { %v12734_v28 = vadd.f32 %v15006_v18, %v6216_v8  ;;  %v5334_v52 = vmul.f32 %v5238_v26, %v12704_v33  ;;  %v5340_v1 = vmul.f32 %v5244_v62, %v12712_v16  ;;  %v5249_v15 = vmul.f32 %v12726_v7, %v12726_v7  ;;  %v9455_v3 = vpop.eup %9454 }
 0x52c   : > { %v12739_v46 = vadd.f32 %v15008_v35, %v6218_v53  ;;  %v6086_v8 = vmul.f32 %v5990_v5, %v12567_v41  ;;  %v5525_v57 = vadd.f32 %v5429_v9, %v12684_v23  ;;  %v5435_v48 = vmul.f32 0.044715, %v5339_v4  ;;  %v9457_v53 = vpop.eup %9456  ;;  %v12756_v4 = vpop.f32.mrf.mxu0 }
 0x52d   : > { %15007 = vst [vmem:[#allocation109_spill] sm:$0xff] %v12734_v28  ;;  %v5250_v37 = vmul.f32 %v12730_v10, %v12730_v10  ;;  %v5896_v59 = vadd.f32 1.0, %v9455_v3  ;;  %v5430_v19 = vmul.f32 0.044715, %v5334_v52  ;;  %v5436_v26 = vmul.f32 0.044715, %v5340_v1 }
 0x52e   : > { %15009 = vst [vmem:[#allocation169_spill] sm:$0xff] %v12739_v46  ;;  %v5345_v62 = vmul.f32 %v5249_v15, %v12726_v7  ;;  %v6217_v18 = vmul.f32 %v11759_v38, %v6086_v8  ;;  %v5899_v35 = vadd.f32 1.0, %v9457_v53  ;;  %v5621_v24 = vmul.f32 0.7978846, %v5525_v57 }
 0x52f   : > { %v5531_v46 = vadd.f32 %v5435_v48, %v12700_v11  ;;  %v5992_v28 = vmul.f32 0.5, %v5896_v59  ;;  %v5526_v41 = vadd.f32 %v5430_v19, %v12704_v33  ;;  %v5532_v5 = vadd.f32 %v5436_v26, %v12712_v16 }
 0x530   : > { %v5441_v9 = vmul.f32 0.044715, %v5345_v62  ;;  %v5995_v21 = vmul.f32 0.5, %v5899_v35  ;;  %9464 = vtanh.f32 %v5621_v24  ;;  %v12760_v1 = vadd.f32 %v12628_v61, %v12655_v31  ;;  %v9459_v15 = vpop.eup %9458  ;;  %v12770_v35 = vpop.f32.mrf.mxu0 }
 0x531   : > { %v5627_v52 = vmul.f32 0.7978846, %v5531_v46  ;;  %v6088_v3 = vmul.f32 %v5992_v28, %v12587_v20  ;;  %v5622_v8 = vmul.f32 0.7978846, %v5526_v41  ;;  %v5628_v57 = vmul.f32 0.7978846, %v5532_v5  ;;  %v9461_v53 = vpop.eup %9460 }
 0x532   : > { %v5537_v48 = vadd.f32 %v5441_v9, %v12726_v7  ;;  %v6091_v59 = vmul.f32 %v5995_v21, %v12591_v29  ;;  %v5901_v19 = vadd.f32 1.0, %v9459_v15  ;;  %v5346_v26 = vmul.f32 %v5250_v37, %v12730_v10 }
 0x533   : > { %9466 = vtanh.f32 %v5627_v52  ;;  %v15010_v24 = vunpack.c.h.bf16 %v12525_v0  ;;  %v5900_v61 = vadd.f32 1.0, %v9461_v53  ;;  %v12773_v28 = vmul.f32 %v11764_v25, %v6088_v3 }
 0x534   : > { %9468 = vtanh.f32 %v5622_v8  ;;  %v5633_v62 = vmul.f32 0.7978846, %v5537_v48  ;;  %v9463_v20 = vpop.eup %9462  ;;  %v5997_v41 = vmul.f32 0.5, %v5901_v19  ;;  %v5442_v29 = vmul.f32 0.044715, %v5346_v26  ;;  %v12790_v48 = vpop.f32.mrf.mxu0 }
 0x535   : > { %v12768_v46 = vadd.f32 %v15010_v24, %v6217_v18  ;;  %15012 = vst [vmem:[#allocation171_spill] sm:$0xff] %v12773_v28  ;;  %9470 = vtanh.f32 %v5628_v57  ;;  %v5996_v21 = vmul.f32 0.5, %v5900_v61  ;;  %v5902_v5 = vadd.f32 1.0, %v9463_v20 }
 0x536   : > { %9472 = vtanh.f32 %v5633_v62  ;;  %v5255_v0 = vmul.f32 %v12760_v1, %v12760_v1  ;;  %v6222_v37 = vmul.f32 %v11740_v30, %v6091_v59  ;;  %v6093_v18 = vmul.f32 %v5997_v41, %v12626_v12 }
 0x537   : > { %15011 = vst [vmem:[#allocation170_spill] sm:$0xff] %v12768_v46  ;;  %v5538_v9 = vadd.f32 %v5442_v29, %v12730_v10  ;;  %v12782_v52 = vadd.f32 %v12648_v58, %v12692_v13  ;;  %v6092_v15 = vmul.f32 %v5996_v21, %v12634_v45  ;;  %v5998_v3 = vmul.f32 0.5, %v5902_v5  ;;  %v5190_v29 = vpop.f32.mrf.mxu0 }
 0x538   : > { %v5351_v8 = vmul.f32 %v5255_v0, %v12760_v1  ;;  %v12788_v57 = vadd.f32 %v12659_v40, %v12655_v31  ;;  %v6224_v30 = vmul.f32 %v11745_v34, %v6093_v18  ;;  %v12797_v58 = vadd.f32 %v12677_v44, %v12692_v13 }
 0x539   : > { %v5634_v12 = vmul.f32 0.7978846, %v5538_v9  ;;  %v5256_v53 = vmul.f32 %v12782_v52, %v12782_v52  ;;  %v6223_v45 = vmul.f32 %v11759_v38, %v6092_v15  ;;  %v6094_v59 = vmul.f32 %v5998_v3, %v12639_v17 }
 0x53a   : > { %v5447_v19 = vmul.f32 0.044715, %v5351_v8  ;;  %v5261_v40 = vmul.f32 %v12788_v57, %v12788_v57  ;;  %v15013_v26 = vunpack.c.l.bf16 %v12597_v51  ;;  %v5262_v61 = vmul.f32 %v12797_v58, %v12797_v58 }
 0x53b   : > { %9474 = vtanh.f32 %v5634_v12  ;;  %v5352_v34 = vmul.f32 %v5256_v53, %v12782_v52  ;;  %v15015_v44 = vunpack.c.l.bf16 %v12612_v49  ;;  %v15017_v38 = vunpack.c.h.bf16 %v12597_v51 }
 0x53c   : > { %v12805_v24 = vadd.f32 %v15013_v26, %v6222_v37  ;;  %v5543_v20 = vadd.f32 %v5447_v19, %v12760_v1  ;;  %v5357_v41 = vmul.f32 %v5261_v40, %v12788_v57  ;;  %v5358_v5 = vmul.f32 %v5262_v61, %v12797_v58 }
 0x53d   : > { %v12812_v62 = vadd.f32 %v15015_v44, %v6224_v30  ;;  %v12816_v17 = vadd.f32 %v15017_v38, %v6223_v45  ;;  %v5448_v21 = vmul.f32 0.044715, %v5352_v34  ;;  %v12823_v0 = vadd.f32 %v12714_v6, %v12655_v31  ;;  %v9465_v37 = vpop.eup %9464  ;;  %v5194_v45 = vpop.f32.mrf.mxu0 }
 0x53e   : > { %15014 = vst [vmem:[#allocation172_spill] sm:$0xff] %v12805_v24  ;;  %v12827_v49 = vadd.f32 %v12745_v54, %v12692_v13  ;;  %v12830_v51 = vmul.f32 %v11764_v25, %v6094_v59  ;;  %v5639_v18 = vmul.f32 0.7978846, %v5543_v20  ;;  %v5453_v9 = vmul.f32 0.044715, %v5357_v41 }
 0x53f   : > { %15016 = vst [vmem:[#allocation173_spill] sm:$0xff] %v12812_v62  ;;  %15018 = vst [vmem:[#allocation174_spill] sm:$0xff] %v12816_v17  ;;  %v12834_v15 = vadd.f32 %v12756_v4, %v12655_v31  ;;  %v5813_v3 = vadd.f32 1.0, %v9465_v37  ;;  %v5544_v8 = vadd.f32 %v5448_v21, %v12782_v52  ;;  %v5454_v30 = vmul.f32 0.044715, %v5358_v5 }
 0x540   : > { %15019 = vst [vmem:[#allocation175_spill] sm:$0xff] %v12830_v51  ;;  %v5267_v6 = vmul.f32 %v12823_v0, %v12823_v0  ;;  %v9467_v12 = vpop.eup %9466  ;;  %9476 = vtanh.f32 %v5639_v18  ;;  %v5549_v54 = vadd.f32 %v5453_v9, %v12788_v57  ;;  %v5268_v25 = vmul.f32 %v12827_v49, %v12827_v49 }
 0x541   : > { %v5273_v53 = vmul.f32 %v12834_v15, %v12834_v15  ;;  %v9469_v4 = vpop.eup %9468  ;;  %v5909_v59 = vmul.f32 0.5, %v5813_v3  ;;  %v5819_v19 = vadd.f32 1.0, %v9467_v12  ;;  %v5640_v40 = vmul.f32 0.7978846, %v5544_v8  ;;  %v5196_v8 = vpop.f32.mrf.mxu0 }
 0x542   : > { %v5550_v26 = vadd.f32 %v5454_v30, %v12797_v58  ;;  %v9471_v34 = vpop.eup %9470  ;;  %v5814_v61 = vadd.f32 1.0, %v9469_v4  ;;  %v5645_v44 = vmul.f32 0.7978846, %v5549_v54  ;;  %v5363_v38 = vmul.f32 %v5267_v6, %v12823_v0 }
 0x543   : > { %v5364_v20 = vmul.f32 %v5268_v25, %v12827_v49  ;;  %v9473_v41 = vpop.eup %9472  ;;  %v5915_v21 = vmul.f32 0.5, %v5819_v19  ;;  %v5820_v5 = vadd.f32 1.0, %v9471_v34  ;;  %9478 = vtanh.f32 %v5640_v40 }
 0x544   : > { %v12849_v37 = vadd.f32 %v12770_v35, %v12692_v13  ;;  %v5910_v18 = vmul.f32 0.5, %v5814_v61  ;;  %v5825_v9 = vadd.f32 1.0, %v9473_v41  ;;  %9480 = vtanh.f32 %v5645_v44 }
 0x545   : > { %v5646_v3 = vmul.f32 0.7978846, %v5550_v26  ;;  %v12852_v30 = vmul.f32 %v5909_v59, %v12684_v23  ;;  %v6011_v6 = vmul.f32 %v5915_v21, %v12700_v11  ;;  %v5459_v12 = vmul.f32 0.044715, %v5363_v38 }
 0x546   : > { %v5460_v54 = vmul.f32 0.044715, %v5364_v20  ;;  %v5916_v25 = vmul.f32 0.5, %v5820_v5  ;;  %v5921_v4 = vmul.f32 0.5, %v5825_v9  ;;  %v5369_v19 = vmul.f32 %v5273_v53, %v12834_v15 }
 0x547   : > { %9482 = vtanh.f32 %v5646_v3  ;;  %v12857_v35 = vmul.f32 %v5910_v18, %v12704_v33  ;;  %v12860_v40 = vmul.f32 %v12708_v36, %v6011_v6  ;;  %v5555_v26 = vadd.f32 %v5459_v12, %v12823_v0  ;;  %v5198_v33 = vpop.f32.mrf.mxu0 }
 0x548   : > { %v5556_v23 = vadd.f32 %v5460_v54, %v12827_v49  ;;  %v9475_v59 = vpop.eup %9474  ;;  %v6017_v11 = vmul.f32 %v5921_v4, %v12726_v7  ;;  %v5465_v34 = vmul.f32 0.044715, %v5369_v19  ;;  %v5274_v61 = vmul.f32 %v12849_v37, %v12849_v37 }
 0x549   : > { %v12869_v53 = vadd.f32 %v12790_v48, %v12655_v31  ;;  %v5826_v44 = vadd.f32 1.0, %v9475_v59  ;;  %v5651_v38 = vmul.f32 0.7978846, %v5555_v26  ;;  %v12872_v41 = vadd.f32 %v5190_v29, %v12692_v13  ;;  %v5200_v12 = vpop.f32.mrf.mxu0 }
 0x54a   : > { %v5652_v20 = vmul.f32 0.7978846, %v5556_v23  ;;  %v12875_v21 = vmul.f32 %v5916_v25, %v12712_v16  ;;  %v5561_v7 = vadd.f32 %v5465_v34, %v12834_v15  ;;  %v5370_v5 = vmul.f32 %v5274_v61, %v12849_v37 }
 0x54b   : > { %v5279_v18 = vmul.f32 %v12869_v53, %v12869_v53  ;;  %v12882_v48 = vmul.f32 %v12708_v36, %v6017_v11  ;;  %9484 = vtanh.f32 %v5651_v38  ;;  %v5280_v9 = vmul.f32 %v12872_v41, %v12872_v41 }
 0x54c   : > { %v12887_v29 = vadd.f32 %v5194_v45, %v12655_v31  ;;  %9486 = vtanh.f32 %v5652_v20  ;;  %v5657_v16 = vmul.f32 0.7978846, %v5561_v7  ;;  %v5466_v3 = vmul.f32 0.044715, %v5370_v5 }
 0x54d   : > { %v5375_v6 = vmul.f32 %v5279_v18, %v12869_v53  ;;  %v9477_v54 = vpop.eup %9476  ;;  %v5922_v25 = vmul.f32 0.5, %v5826_v44  ;;  %v5376_v4 = vmul.f32 %v5280_v9, %v12872_v41  ;;  %v12894_v26 = vadd.f32 %v5196_v8, %v12692_v13  ;;  %v5204_v18 = vpop.f32.mrf.mxu0 }
 0x54e   : > { %v5285_v19 = vmul.f32 %v12887_v29, %v12887_v29  ;;  %v5831_v23 = vadd.f32 1.0, %v9477_v54  ;;  %9488 = vtanh.f32 %v5657_v16  ;;  %v5562_v45 = vadd.f32 %v5466_v3, %v12849_v37 }
 0x54f   : > { %v5471_v59 = vmul.f32 0.044715, %v5375_v6  ;;  %v5472_v11 = vmul.f32 0.044715, %v5376_v4  ;;  %v5286_v61 = vmul.f32 %v12894_v26, %v12894_v26  ;;  %v12901_v44 = vadd.f32 %v5198_v33, %v12655_v31 }
 0x550   : > { %v5381_v34 = vmul.f32 %v5285_v19, %v12887_v29  ;;  %v9479_v38 = vpop.eup %9478  ;;  %v5927_v20 = vmul.f32 0.5, %v5831_v23  ;;  %v5658_v7 = vmul.f32 0.7978846, %v5562_v45  ;;  %v12905_v5 = vadd.f32 %v5200_v12, %v12692_v13 }
 0x551   : > { %v5567_v8 = vadd.f32 %v5471_v59, %v12869_v53  ;;  %v9481_v9 = vpop.eup %9480  ;;  %v5832_v16 = vadd.f32 1.0, %v9479_v38  ;;  %v5568_v3 = vadd.f32 %v5472_v11, %v12872_v41  ;;  %v5382_v54 = vmul.f32 %v5286_v61, %v12894_v26  ;;  %v5206_v11 = vpop.f32.mrf.mxu0 }
 0x552   : > { %v5477_v6 = vmul.f32 0.044715, %v5381_v34  ;;  %v6023_v4 = vmul.f32 %v5927_v20, %v12760_v1  ;;  %v5837_v33 = vadd.f32 1.0, %v9481_v9  ;;  %9490 = vtanh.f32 %v5658_v7 }
 0x553   : > { %v5663_v19 = vmul.f32 0.7978846, %v5567_v8  ;;  %v12911_v45 = vmul.f32 %v5922_v25, %v12730_v10  ;;  %v5664_v59 = vmul.f32 0.7978846, %v5568_v3  ;;  %v5478_v62 = vmul.f32 0.044715, %v5382_v54 }
 0x554   : > { %v9483_v23 = vpop.eup %9482  ;;  %v5573_v12 = vadd.f32 %v5477_v6, %v12887_v29  ;;  %v5928_v17 = vmul.f32 0.5, %v5832_v16  ;;  %v5933_v38 = vmul.f32 0.5, %v5837_v33  ;;  %v12915_v34 = vmul.f32 %v12708_v36, %v6023_v4 }
 0x555   : > { %v5838_v51 = vadd.f32 1.0, %v9483_v23  ;;  %9492 = vtanh.f32 %v5663_v19  ;;  %v5574_v61 = vadd.f32 %v5478_v62, %v12894_v26  ;;  %v5291_v25 = vmul.f32 %v12901_v44, %v12901_v44 }
 0x556   : > { %9494 = vtanh.f32 %v5664_v59  ;;  %v5669_v1 = vmul.f32 0.7978846, %v5573_v12  ;;  %v6029_v20 = vmul.f32 %v5933_v38, %v12788_v57  ;;  %v5292_v7 = vmul.f32 %v12905_v5, %v12905_v5 }
 0x557   : > { %v5934_v10 = vmul.f32 0.5, %v5838_v51  ;;  %v5670_v8 = vmul.f32 0.7978846, %v5574_v61  ;;  %v12924_v9 = vadd.f32 %v5204_v18, %v12655_v31  ;;  %v12927_v16 = vadd.f32 %v5206_v11, %v12692_v13 }
 0x558   : > { %9496 = vtanh.f32 %v5669_v1  ;;  %v9485_v3 = vpop.eup %9484  ;;  %v12930_v62 = vmul.f32 %v5928_v17, %v12782_v52  ;;  %v12933_v57 = vmul.f32 %v12708_v36, %v6029_v20  ;;  %v5387_v51 = vmul.f32 %v5291_v25, %v12901_v44 }
 0x559   : > { %v5388_v6 = vmul.f32 %v5292_v7, %v12905_v5  ;;  %v9487_v54 = vpop.eup %9486  ;;  %v5843_v4 = vadd.f32 1.0, %v9485_v3  ;;  %9498 = vtanh.f32 %v5670_v8  ;;  %v5297_v18 = vmul.f32 %v12924_v9, %v12924_v9  ;;  %v6229_v8 = vld [vmem:[%s10173_s13 + $0x8] sm:$0xff] }
 0x55a   : > { %v5298_v33 = vmul.f32 %v12927_v16, %v12927_v16  ;;  %v5844_v19 = vadd.f32 1.0, %v9487_v54  ;;  %v5483_v52 = vmul.f32 0.044715, %v5387_v51  ;;  %v12943_v23 = vrot.slane %v15005_v22, %v15004_v55  ;;  %v5208_v55 = vpop.f32.mrf.mxu0 }
 0x55b   : > { %v5484_v17 = vmul.f32 0.044715, %v5388_v6  ;;  %v9489_v59 = vpop.eup %9488  ;;  %v12946_v12 = vmul.f32 %v5934_v10, %v12797_v58  ;;  %v5939_v38 = vmul.f32 0.5, %v5843_v4  ;;  %v5393_v11 = vmul.f32 %v5297_v18, %v12924_v9  ;;  %v6230_v18 = vld [vmem:[%s10173_s13 + $0x10] sm:$0xff] }
 0x55c   : > { %v5394_v1 = vmul.f32 %v5298_v33, %v12927_v16  ;;  %v5940_v61 = vmul.f32 0.5, %v5844_v19  ;;  %v5849_v20 = vadd.f32 1.0, %v9489_v59  ;;  %v5579_v25 = vadd.f32 %v5483_v52, %v12901_v44 }
 0x55d   : > { %v5580_v7 = vadd.f32 %v5484_v17, %v12905_v5  ;;  %v6035_v22 = vmul.f32 %v5939_v38, %v12823_v0  ;;  %v5489_v3 = vmul.f32 0.044715, %v5393_v11  ;;  %v6136_v58 = vmul.f32 %v12708_v36, %v12852_v30 }
 0x55e   : > { %v5490_v51 = vmul.f32 0.044715, %v5394_v1  ;;  %v5945_v10 = vmul.f32 0.5, %v5849_v20  ;;  %v5675_v6 = vmul.f32 0.7978846, %v5579_v25  ;;  %v6137_v4 = vmul.f32 %v12943_v23, %v12857_v35 }
 0x55f   : > { %v5676_v54 = vmul.f32 0.7978846, %v5580_v7  ;;  %v9491_v33 = vpop.eup %9490  ;;  %v12960_v19 = vmul.f32 %v5940_v61, %v12827_v49  ;;  %v5585_v52 = vadd.f32 %v5489_v3, %v12924_v9  ;;  %v6278_v17 = vunpack.c.l.bf16 %v6229_v8 }
 0x560   : > { %v5586_v0 = vadd.f32 %v5490_v51, %v12927_v16  ;;  %v6041_v59 = vmul.f32 %v5945_v10, %v12834_v15  ;;  %v5850_v38 = vadd.f32 1.0, %v9491_v33  ;;  %9500 = vtanh.f32 %v5675_v6 }
 0x561   : > { %v6279_v30 = vunpack.c.h.bf16 %v6229_v8  ;;  %9502 = vtanh.f32 %v5676_v54  ;;  %v5681_v1 = vmul.f32 0.7978846, %v5585_v52  ;;  %v6280_v35 = vunpack.c.l.bf16 %v6230_v18 }
 0x562   : > { %v9493_v11 = vpop.eup %9492  ;;  %v5682_v20 = vmul.f32 0.7978846, %v5586_v0  ;;  %v12966_v7 = vmul.f32 %v12708_v36, %v6035_v22  ;;  %v5946_v49 = vmul.f32 0.5, %v5850_v38  ;;  %v6281_v3 = vunpack.c.h.bf16 %v6230_v18 }
 0x563   : > { %v9495_v25 = vpop.eup %9494  ;;  %v5855_v61 = vadd.f32 1.0, %v9493_v11  ;;  %9504 = vtanh.f32 %v5681_v1  ;;  %v6374_v15 = vadd.f32 %v6278_v17, %v11951_v39  ;;  %v6375_v10 = vadd.f32 %v6279_v30, %v11957_v56  ;;  %v15020_v1 = vld [vmem:[#allocation37_spill] sm:$0xff]  ;;  %v15022_v56 = vld [vmem:[#allocation32_spill] sm:$0xff] }
 0x564   : > { %v5856_v51 = vadd.f32 1.0, %v9495_v25  ;;  %v12971_v6 = vmul.f32 %v12708_v36, %v6041_v59  ;;  %9506 = vtanh.f32 %v5682_v20  ;;  %v6376_v33 = vadd.f32 %v6280_v35, %v6136_v58  ;;  %v15024_v59 = vld [vmem:[#allocation65_spill] sm:$0xff]  ;;  %v5210_v58 = vpop.f32.mrf.mxu0  ;;  %v15026_v35 = vld [vmem:[#allocation62_spill] sm:$0xff] }
 0x565   : > { %v9497_v8 = vpop.eup %9496  ;;  %v5951_v54 = vmul.f32 0.5, %v5855_v61  ;;  %v12974_v22 = vmul.f32 %v5946_v49, %v12849_v37  ;;  %v6377_v18 = vadd.f32 %v6281_v3, %v6137_v4  ;;  %v12979_v39 = vadd.f32 %v11948_v60, %v15020_v1  ;;  %v15028_v60 = vld [vmem:[#allocation113_spill] sm:$0xff] }
 0x566   : > { %v5952_v52 = vmul.f32 0.5, %v5856_v51  ;;  %v5861_v0 = vadd.f32 1.0, %v9497_v8  ;;  %v9499_v38 = vpop.eup %9498  ;;  %v12983_v17 = vadd.f32 %v11969_v47, %v15022_v56  ;;  %v12986_v30 = vadd.f32 %v6374_v15, %v15024_v59  ;;  %v15030_v51 = vld [vmem:[#allocation111_spill] sm:$0xff] }
 0x567   : > { %v6047_v11 = vmul.f32 %v5951_v54, %v12869_v53  ;;  %15021 = vst [vmem:[#allocation37_spill] sm:$0xff] %v12979_v39  ;;  %v5862_v4 = vadd.f32 1.0, %v9499_v38  ;;  %v12992_v25 = vadd.f32 %v6375_v10, %v15026_v35  ;;  %v12998_v49 = vadd.f32 %v6376_v33, %v15028_v60  ;;  %v6233_v60 = vld [vmem:[%s10173_s13 + $0x28] sm:$0xff] }
 0x568   : > { %15023 = vst [vmem:[#allocation32_spill] sm:$0xff] %v12983_v17  ;;  %15025 = vst [vmem:[#allocation65_spill] sm:$0xff] %v12986_v30  ;;  %v12989_v37 = vmul.f32 %v5952_v52, %v12872_v41  ;;  %v5957_v20 = vmul.f32 0.5, %v5861_v0  ;;  %v6756_v47 = vadd.f32 %v12983_v17, %v12979_v39  ;;  %v13003_v61 = vadd.f32 %v5208_v55, %v12655_v31 }
 0x569   : > { %15027 = vst [vmem:[#allocation62_spill] sm:$0xff] %v12992_v25  ;;  %v12995_v53 = vmul.f32 %v12708_v36, %v6047_v11  ;;  %15029 = vst [vmem:[#allocation113_spill] sm:$0xff] %v12998_v49  ;;  %v5958_v3 = vmul.f32 0.5, %v5862_v4  ;;  %v13007_v15 = vadd.f32 %v6377_v18, %v15030_v51  ;;  %v13010_v10 = vadd.f32 %v5210_v58, %v12692_v13 }
 0x56a   : > { %v6053_v41 = vmul.f32 %v5957_v20, %v12887_v29  ;;  %v6757_v8 = vadd.f32 %v6756_v47, %v12986_v30  ;;  %v5303_v54 = vmul.f32 %v13003_v61, %v13003_v61  ;;  %v6885_v33 = vmul.f32 %v12979_v39, %v12979_v39  ;;  %v5214_v29 = vpop.f32.mrf.mxu0 }
 0x56b   : > { %v6886_v55 = vmul.f32 %v12983_v17, %v12983_v17  ;;  %v13023_v0 = vmul.f32 %v5958_v3, %v12894_v26  ;;  %v5304_v18 = vmul.f32 %v13010_v10, %v13010_v10  ;;  %v6887_v38 = vmul.f32 %v12986_v30, %v12986_v30 }
 0x56c   : > { %v13020_v52 = vmul.f32 %v12708_v36, %v6053_v41  ;;  %v6758_v11 = vadd.f32 %v6757_v8, %v12992_v25  ;;  %v5399_v1 = vmul.f32 %v5303_v54, %v13003_v61  ;;  %v6888_v56 = vmul.f32 %v12992_v25, %v12992_v25  ;;  %v9608_v8 = vld [vmem:[%s10173_s13 + $0x20] sm:$0xff] }
 0x56d   : > { %v6889_v59 = vmul.f32 %v12998_v49, %v12998_v49  ;;  %v9501_v58 = vpop.eup %9500  ;;  %v5400_v26 = vmul.f32 %v5304_v18, %v13010_v10  ;;  %v6890_v20 = vmul.f32 %v13007_v15, %v13007_v15  ;;  %v6981_v4 = vadd.f32 %v6886_v55, %v6885_v33 }
 0x56e   : > { %v13039_v35 = vadd.f32 %v5214_v29, %v12655_v31  ;;  %v9503_v47 = vpop.eup %9502  ;;  %v5867_v41 = vadd.f32 1.0, %v9501_v58  ;;  %v6759_v3 = vadd.f32 %v6758_v11, %v12998_v49  ;;  %v5495_v51 = vmul.f32 0.044715, %v5399_v1 }
 0x56f   : > { %v6285_v54 = vunpack.c.h.bf16 %v9608_v8  ;;  %v5868_v25 = vadd.f32 1.0, %v9503_v47  ;;  %v5496_v30 = vmul.f32 0.044715, %v5400_v26  ;;  %v6982_v17 = vadd.f32 %v6981_v4, %v6887_v38 }
 0x570   : > { %v5309_v18 = vmul.f32 %v13039_v35, %v13039_v35  ;;  %v9505_v39 = vpop.eup %9504  ;;  %v5963_v24 = vmul.f32 0.5, %v5867_v41  ;;  %v6760_v33 = vadd.f32 %v6759_v3, %v13007_v15  ;;  %v5591_v55 = vadd.f32 %v5495_v51, %v13003_v61 }
 0x571   : > { %v6286_v29 = vunpack.c.l.bf16 %v6233_v60  ;;  %v9507_v46 = vpop.eup %9506  ;;  %v5964_v58 = vmul.f32 0.5, %v5868_v25  ;;  %v5873_v28 = vadd.f32 1.0, %v9505_v39  ;;  %v5592_v11 = vadd.f32 %v5496_v30, %v13010_v10 }
 0x572   : > { %v6983_v1 = vadd.f32 %v6982_v17, %v6888_v56  ;;  %v6059_v47 = vmul.f32 %v5963_v24, %v12901_v44  ;;  %v5874_v26 = vadd.f32 1.0, %v9507_v46  ;;  %6761 = vadd.xlane.f32.xlu0 %v6760_v33  ;;  %v5687_v38 = vmul.f32 0.7978846, %v5591_v55  ;;  %v5216_v44 = vpop.f32.mrf.mxu0  ;;  %v15033_v33 = vld [vmem:[#allocation61_spill] sm:$0xff] }
 0x573   : > { %v5405_v4 = vmul.f32 %v5309_v18, %v13039_v35  ;;  %v5969_v8 = vmul.f32 0.5, %v5873_v28  ;;  %v5688_v41 = vmul.f32 0.7978846, %v5592_v11  ;;  %v6143_v3 = vmul.f32 %v12943_v23, %v12875_v21  ;;  %v6236_v11 = vld [vmem:[%s10173_s13 + $0x40] sm:$0xff] }
 0x574   : > { %v6984_v49 = vadd.f32 %v6983_v1, %v6889_v59  ;;  %v13054_v51 = vmul.f32 %v5964_v58, %v12905_v5  ;;  %v5970_v39 = vmul.f32 0.5, %v5874_v26  ;;  %9508 = vtanh.f32 %v5687_v38  ;;  %v15036_v1 = vld [vmem:[#allocation112_spill] sm:$0xff] }
 0x575   : > { %v5501_v30 = vmul.f32 0.044715, %v5405_v4  ;;  %v6065_v17 = vmul.f32 %v5969_v8, %v12924_v9  ;;  %9510 = vtanh.f32 %v5688_v41  ;;  %v6287_v24 = vunpack.c.h.bf16 %v6233_v60  ;;  %v15031_v9 = vld [vmem:[#allocation35_spill] sm:$0xff] }
 0x576   : > { %v6985_v46 = vadd.f32 %v6984_v49, %v6890_v20  ;;  %v13058_v25 = vmul.f32 %v12708_v36, %v6059_v47  ;;  %v6381_v56 = vadd.f32 %v6285_v54, %v11982_v14  ;;  %v6382_v21 = vadd.f32 %v6286_v29, %v12860_v40  ;;  %v15032_v20 = vld [vmem:[#allocation30_spill] sm:$0xff]  ;;  %v15034_v54 = vld [vmem:[#allocation63_spill] sm:$0xff] }
 0x577   : > { %v5597_v28 = vadd.f32 %v5501_v30, %v13039_v35  ;;  %v13064_v5 = vmul.f32 %v5970_v39, %v12927_v16  ;;  %v6383_v59 = vadd.f32 %v6287_v24, %v6143_v3  ;;  %v13068_v49 = vadd.f32 %v11973_v2, %v15031_v9  ;;  %v15035_v16 = vld [vmem:[#allocation110_spill] sm:$0xff] }
 0x578   : > { %6986 = vadd.xlane.f32.xlu0 %v6985_v46  ;;  %v13072_v60 = vadd.f32 %v12004_v43, %v15032_v20  ;;  %v13076_v14 = vadd.f32 %v11978_v27, %v15033_v33  ;;  %v13079_v40 = vadd.f32 %v6381_v56, %v15034_v54  ;;  %v13082_v55 = vadd.f32 %v6382_v21, %v15035_v16  ;;  %v5218_v27 = vpop.f32.mrf.mxu0  ;;  %v15038_v16 = vld [vmem:[#allocation41_spill] sm:$0xff] }
 0x579   : > { %v5693_v18 = vmul.f32 0.7978846, %v5597_v28  ;;  %v13085_v29 = vmul.f32 %v12708_v36, %v6065_v17  ;;  %v6891_v2 = vmul.f32 %v13068_v49, %v13068_v49  ;;  %v13092_v58 = vadd.f32 %v5216_v44, %v12692_v13  ;;  %v9609_v17 = vld [vmem:[%s10173_s13 + $0x38] sm:$0xff] }
 0x57a   : > { %v6892_v43 = vmul.f32 %v13072_v60, %v13072_v60  ;;  %v13096_v47 = vadd.f32 %v6383_v59, %v15036_v1  ;;  %v6893_v26 = vmul.f32 %v13076_v14, %v13076_v14  ;;  %v6894_v38 = vmul.f32 %v13079_v40, %v13079_v40  ;;  %v15041_v1 = vld [vmem:[#allocation38_spill] sm:$0xff] }
 0x57b   : > { %9512 = vtanh.f32 %v5693_v18  ;;  %v6895_v4 = vmul.f32 %v13082_v55, %v13082_v55  ;;  %v5310_v41 = vmul.f32 %v13092_v58, %v13092_v58  ;;  %v6763_v3 = vadd.f32 %v13072_v60, %v13068_v49 }
 0x57c   : > { %15037 = vst [vmem:[#allocation111_spill] sm:$0xff] %v13096_v47  ;;  %v6988_v8 = vadd.f32 %v6892_v43, %v6891_v2  ;;  %v13109_v39 = vadd.f32 %v5218_v27, %v12655_v31  ;;  %v6149_v30 = vmul.f32 %v12943_v23, %v12911_v45  ;;  %v6291_v46 = vunpack.c.h.bf16 %v9609_v17  ;;  %v15039_v2 = vld [vmem:[#allocation108_spill] sm:$0xff] }
 0x57d   : > { %v6292_v24 = vunpack.c.l.bf16 %v6236_v11  ;;  %v5406_v28 = vmul.f32 %v5310_v41, %v13092_v58  ;;  %v6764_v56 = vadd.f32 %v6763_v3, %v13076_v14  ;;  %v6293_v21 = vunpack.c.h.bf16 %v6236_v11  ;;  %v15044_v41 = vld [vmem:[#allocation72_spill] sm:$0xff]  ;;  %v15045_v3 = vld [vmem:[#allocation103_spill] sm:$0xff] }
 0x57e   : > { %v6989_v44 = vadd.f32 %v6988_v8, %v6893_v26  ;;  %v6896_v59 = vmul.f32 %v13096_v47, %v13096_v47  ;;  %v5315_v9 = vmul.f32 %v13109_v39, %v13109_v39  ;;  %v6387_v20 = vadd.f32 %v6291_v46, %v12028_v63  ;;  %v15042_v26 = vld [vmem:[#allocation132_spill] sm:$0xff] }
 0x57f   : > { %v6388_v18 = vadd.f32 %v6292_v24, %v12882_v48  ;;  %v5502_v33 = vmul.f32 0.044715, %v5406_v28  ;;  %v6765_v54 = vadd.f32 %v6764_v56, %v13079_v40  ;;  %v13125_v43 = vadd.f32 %v15039_v2, %v15038_v16  ;;  %v15047_v24 = vld [vmem:[#allocation70_spill] sm:$0xff]  ;;  %v5220_v28 = vpop.f32.mrf.mxu0 }
 0x580   : > { %v6990_v45 = vadd.f32 %v6989_v44, %v6894_v38  ;;  %v5411_v27 = vmul.f32 %v5315_v9, %v13109_v39  ;;  %v6389_v11 = vadd.f32 %v6293_v21, %v6149_v30  ;;  %v13130_v8 = vadd.f32 %v15042_v26, %v15041_v1  ;;  %v15049_v9 = vld [vmem:[#allocation117_spill] sm:$0xff] }
 0x581   : > { %15040 = vst [vmem:[#allocation35_spill] sm:$0xff] %v13125_v43  ;;  %v13134_v63 = vadd.f32 %v15045_v3, %v15044_v41  ;;  %v9509_v48 = vpop.eup %9508  ;;  %v5598_v17 = vadd.f32 %v5502_v33, %v13092_v58  ;;  %v6766_v46 = vadd.f32 %v6765_v54, %v13082_v55  ;;  %v13139_v44 = vadd.f32 %v6387_v20, %v15047_v24  ;;  %v5224_v24 = vpop.f32.mrf.mxu0 }
 0x582   : > { %15043 = vst [vmem:[#allocation30_spill] sm:$0xff] %v13130_v8  ;;  %v6991_v38 = vadd.f32 %v6990_v45, %v6895_v4  ;;  %v9511_v56 = vpop.eup %9510  ;;  %v5879_v30 = vadd.f32 1.0, %v9509_v48  ;;  %v5507_v21 = vmul.f32 0.044715, %v5411_v27  ;;  %v13142_v16 = vadd.f32 %v6388_v18, %v15049_v9  ;;  %v15051_v18 = vld [vmem:[#allocation115_spill] sm:$0xff] }
 0x583   : > { %15046 = vst [vmem:[#allocation61_spill] sm:$0xff] %v13134_v63  ;;  %15048 = vst [vmem:[#allocation63_spill] sm:$0xff] %v13139_v44  ;;  %v6770_v2 = vadd.f32 %v13130_v8, %v13125_v43  ;;  %v5880_v1 = vadd.f32 1.0, %v9511_v56  ;;  %v5694_v4 = vmul.f32 0.7978846, %v5598_v17  ;;  %v6767_v45 = vadd.f32 %v6766_v46, %v13096_v47  ;;  %v15072_v47 = vld [vmem:[#allocation137_spill] sm:$0xff] }
 0x584   : > { %15050 = vst [vmem:[#allocation110_spill] sm:$0xff] %v13142_v16  ;;  %v6992_v26 = vadd.f32 %v6991_v38, %v6896_v59  ;;  %v5975_v33 = vmul.f32 0.5, %v5879_v30  ;;  %v5603_v54 = vadd.f32 %v5507_v21, %v13109_v39  ;;  %v13150_v41 = vadd.f32 %v5220_v28, %v12692_v13 }
 0x585   : > { %v6771_v20 = vadd.f32 %v6770_v2, %v13134_v63  ;;  %v5976_v27 = vmul.f32 0.5, %v5880_v1  ;;  %9514 = vtanh.f32 %v5694_v4  ;;  %6768 = vadd.xlane.f32.xlu0 %v6767_v45  ;;  %v13153_v3 = vadd.f32 %v6389_v11, %v15051_v18  ;;  %v6239_v1 = vld [vmem:[%s10173_s13 + $0x58] sm:$0xff] }
 0x586   : > { %6993 = vadd.xlane.f32.xlu1 %v6992_v26  ;;  %v6898_v59 = vmul.f32 %v13130_v8, %v13130_v8  ;;  %v6071_v48 = vmul.f32 %v5975_v33, %v13003_v61  ;;  %v5699_v38 = vmul.f32 0.7978846, %v5603_v54  ;;  %v5316_v46 = vmul.f32 %v13150_v41, %v13150_v41 }
 0x587   : > { %15052 = vst [vmem:[#allocation112_spill] sm:$0xff] %v13153_v3  ;;  %v6772_v17 = vadd.f32 %v6771_v20, %v13139_v44  ;;  %v13162_v56 = vmul.f32 %v5976_v27, %v13010_v10  ;;  %v6897_v11 = vmul.f32 %v13125_v43, %v13125_v43  ;;  %v6899_v30 = vmul.f32 %v13134_v63, %v13134_v63  ;;  %v9610_v27 = vld [vmem:[%s10173_s13 + $0x50] sm:$0xff] }
 0x588   : > { %v9513_v28 = vpop.eup %9512  ;;  %v6900_v61 = vmul.f32 %v13139_v44, %v13139_v44  ;;  %9516 = vtanh.f32 %v5699_v38  ;;  %v6901_v2 = vmul.f32 %v13142_v16, %v13142_v16  ;;  %v13175_v10 = vmul.f32 %v12708_v36, %v6071_v48  ;;  %v15068_v43 = vld [vmem:[#allocation42_spill] sm:$0xff] }
 0x589   : > { %v5885_v21 = vadd.f32 1.0, %v9513_v28  ;;  %v6773_v9 = vadd.f32 %v6772_v17, %v13142_v16  ;;  %v5412_v26 = vmul.f32 %v5316_v46, %v13150_v41  ;;  %v6995_v4 = vadd.f32 %v6898_v59, %v6897_v11  ;;  %v15053_v11 = vld [vmem:[#allocation136_spill] sm:$0xff] }
 0x58a   : > { %v13179_v45 = vadd.f32 %v5224_v24, %v12655_v31  ;;  %v6155_v20 = vmul.f32 %v12943_v23, %v12930_v62  ;;  %v6297_v18 = vunpack.c.h.bf16 %v9610_v27  ;;  %v6298_v28 = vunpack.c.l.bf16 %v6239_v1 }
 0x58b   : > { %v5981_v33 = vmul.f32 0.5, %v5885_v21  ;;  %v6774_v54 = vadd.f32 %v6773_v9, %v13153_v3  ;;  %v5508_v38 = vmul.f32 0.044715, %v5412_v26  ;;  %v6996_v17 = vadd.f32 %v6995_v4, %v6899_v30  ;;  %v5226_v4 = vpop.f32.mrf.mxu0 }
 0x58c   : > { %v5321_v48 = vmul.f32 %v13179_v45, %v13179_v45  ;;  %v6902_v59 = vmul.f32 %v13153_v3, %v13153_v3  ;;  %v6299_v24 = vunpack.c.h.bf16 %v6239_v1  ;;  %v6393_v21 = vadd.f32 %v6297_v18, %v15053_v11  ;;  %v15056_v3 = vld [vmem:[#allocation36_spill] sm:$0xff]  ;;  %v15057_v1 = vld [vmem:[#allocation135_spill] sm:$0xff] }
 0x58d   : > { %v6077_v46 = vmul.f32 %v5981_v33, %v13039_v35  ;;  %6775 = vadd.xlane.f32.xlu1 %v6774_v54  ;;  %v5604_v62 = vadd.f32 %v5508_v38, %v13150_v41  ;;  %v6997_v9 = vadd.f32 %v6996_v17, %v6900_v61  ;;  %v6394_v30 = vadd.f32 %v6298_v28, %v12915_v34  ;;  %v15054_v33 = vld [vmem:[#allocation39_spill] sm:$0xff]  ;;  %v15055_v54 = vld [vmem:[#allocation133_spill] sm:$0xff] }
 0x58e   : > { %v5417_v26 = vmul.f32 %v5321_v48, %v13179_v45  ;;  %v6395_v35 = vadd.f32 %v6299_v24, %v6155_v20  ;;  %v13199_v16 = vadd.f32 %v15055_v54, %v15054_v33  ;;  %v13203_v44 = vadd.f32 %v15057_v1, %v15056_v3  ;;  %v15058_v17 = vld [vmem:[#allocation69_spill] sm:$0xff]  ;;  %v15059_v48 = vld [vmem:[#allocation134_spill] sm:$0xff] }
 0x58f   : > { %v13195_v27 = vmul.f32 %v12708_v36, %v6077_v46  ;;  %v5700_v18 = vmul.f32 0.7978846, %v5604_v62  ;;  %v6998_v61 = vadd.f32 %v6997_v9, %v6901_v2  ;;  %v13207_v34 = vadd.f32 %v15059_v48, %v15058_v17  ;;  %v6242_v28 = vld [vmem:[%s10173_s13 + $0x70] sm:$0xff]  ;;  %v15061_v46 = vld [vmem:[#allocation71_spill] sm:$0xff]  ;;  %v9611_v54 = vld [vmem:[%s10173_s13 + $0x68] sm:$0xff] }
 0x590   : > { %v5513_v38 = vmul.f32 0.044715, %v5417_v26  ;;  %v13211_v11 = vadd.f32 %v6393_v21, %v15061_v46  ;;  %v15063_v20 = vld [vmem:[#allocation114_spill] sm:$0xff]  ;;  %v6777_v33 = vadd.f32 %v13203_v44, %v13199_v16  ;;  %v13219_v3 = vadd.f32 %v5226_v4, %v12692_v13  ;;  %v15065_v46 = vld [vmem:[#allocation116_spill] sm:$0xff] }
 0x591   : > { %15060 = vst [vmem:[#allocation41_spill] sm:$0xff] %v13207_v34  ;;  %v13214_v24 = vadd.f32 %v6394_v30, %v15063_v20  ;;  %9518 = vtanh.f32 %v5700_v18  ;;  %v6999_v2 = vadd.f32 %v6998_v61, %v6902_v59  ;;  %v6161_v9 = vmul.f32 %v12943_v23, %v12946_v12 }
 0x592   : > { %15062 = vst [vmem:[#allocation108_spill] sm:$0xff] %v13211_v11  ;;  %v5609_v62 = vadd.f32 %v5513_v38, %v13179_v45  ;;  %v9515_v26 = vpop.eup %9514  ;;  %v6778_v21 = vadd.f32 %v6777_v33, %v13207_v34  ;;  %v5322_v30 = vmul.f32 %v13219_v3, %v13219_v3  ;;  %v6303_v1 = vunpack.c.h.bf16 %v9611_v54  ;;  %v15067_v38 = vld [vmem:[#allocation140_spill] sm:$0xff] }
 0x593   : > { %15064 = vst [vmem:[#allocation38_spill] sm:$0xff] %v13214_v24  ;;  %v6304_v17 = vunpack.c.l.bf16 %v6242_v28  ;;  %v5886_v48 = vadd.f32 1.0, %v9515_v26  ;;  %7000 = vadd.xlane.f32.xlu0 %v6999_v2  ;;  %v13229_v18 = vadd.f32 %v6395_v35, %v15065_v46  ;;  %v6305_v59 = vunpack.c.h.bf16 %v6242_v28  ;;  %v15069_v26 = vld [vmem:[#allocation139_spill] sm:$0xff] }
 0x594   : > { %v5705_v4 = vmul.f32 0.7978846, %v5609_v62  ;;  %v6779_v61 = vadd.f32 %v6778_v21, %v13211_v11  ;;  %v5418_v12 = vmul.f32 %v5322_v30, %v13219_v3  ;;  %v6399_v20 = vadd.f32 %v6303_v1, %v15067_v38  ;;  %v5228_v62 = vpop.f32.mrf.mxu0  ;;  %v15071_v21 = vld [vmem:[#allocation45_spill] sm:$0xff] }
 0x595   : > { %15066 = vst [vmem:[#allocation132_spill] sm:$0xff] %v13229_v18  ;;  %v6400_v33 = vadd.f32 %v6304_v17, %v12933_v57  ;;  %v9517_v63 = vpop.eup %9516  ;;  %v5982_v8 = vmul.f32 0.5, %v5886_v48  ;;  %v6401_v54 = vadd.f32 %v6305_v59, %v6161_v9  ;;  %v13237_v2 = vadd.f32 %v15069_v26, %v15068_v43  ;;  %v15074_v57 = vld [vmem:[#allocation33_spill] sm:$0xff]  ;;  %v15075_v17 = vld [vmem:[#allocation138_spill] sm:$0xff]  ;;  %v15077_v9 = vld [vmem:[#allocation28_spill] sm:$0xff] }
 0x596   : > { %9520 = vtanh.f32 %v5705_v4  ;;  %v5891_v35 = vadd.f32 1.0, %v9517_v63  ;;  %v6780_v28 = vadd.f32 %v6779_v61, %v13214_v24  ;;  %v5514_v46 = vmul.f32 0.044715, %v5418_v12  ;;  %v15079_v43 = vld [vmem:[#allocation121_spill] sm:$0xff]  ;;  %v5230_v26 = vpop.f32.mrf.mxu0 }
 0x597   : > { %15070 = vst [vmem:[#allocation72_spill] sm:$0xff] %v13237_v2  ;;  %v13242_v30 = vadd.f32 %v15072_v47, %v15071_v21  ;;  %v13245_v1 = vmul.f32 %v5982_v8, %v13092_v58  ;;  %v13249_v48 = vadd.f32 %v15075_v17, %v15074_v57  ;;  %v13252_v4 = vadd.f32 %v6399_v20, %v15077_v9  ;;  %v15081_v58 = vld [vmem:[#allocation119_spill] sm:$0xff] }
 0x598   : > { %v13255_v59 = vadd.f32 %v6400_v33, %v15079_v43  ;;  %v5987_v63 = vmul.f32 0.5, %v5891_v35  ;;  %v6781_v61 = vadd.f32 %v6780_v28, %v13229_v18  ;;  %v5610_v12 = vadd.f32 %v5514_v46, %v13219_v3 }
 0x599   : > { %15073 = vst [vmem:[#allocation103_spill] sm:$0xff] %v13242_v30  ;;  %15076 = vst [vmem:[#allocation70_spill] sm:$0xff] %v13249_v48  ;;  %v6784_v47 = vadd.f32 %v13237_v2, %v13242_v30  ;;  %v13262_v8 = vadd.f32 %v6401_v54, %v15081_v58  ;;  %v13265_v38 = vadd.f32 %v5228_v62, %v12655_v31 }
 0x59a   : > { %15078 = vst [vmem:[#allocation117_spill] sm:$0xff] %v13252_v4  ;;  %15080 = vst [vmem:[#allocation115_spill] sm:$0xff] %v13255_v59  ;;  %v6903_v20 = vmul.f32 %v13199_v16, %v13199_v16  ;;  %v6904_v33 = vmul.f32 %v13203_v44, %v13203_v44  ;;  %v6083_v35 = vmul.f32 %v5987_v63, %v13109_v39  ;;  %6782 = vadd.xlane.f32.xlu1 %v6781_v61 }
 0x59b   : > { %15082 = vst [vmem:[#allocation136_spill] sm:$0xff] %v13262_v8  ;;  %v5706_v28 = vmul.f32 0.7978846, %v5610_v12  ;;  %v6785_v46 = vadd.f32 %v6784_v47, %v13249_v48  ;;  %v6905_v54 = vmul.f32 %v13207_v34, %v13207_v34  ;;  %v5327_v31 = vmul.f32 %v13265_v38, %v13265_v38 }
 0x59c   : > { %v6906_v62 = vmul.f32 %v13211_v11, %v13211_v11  ;;  %v6907_v21 = vmul.f32 %v13214_v24, %v13214_v24  ;;  %v7002_v57 = vadd.f32 %v6904_v33, %v6903_v20  ;;  %v6908_v17 = vmul.f32 %v13229_v18, %v13229_v18 }
 0x59d   : > { %9522 = vtanh.f32 %v5706_v28  ;;  %v6786_v39 = vadd.f32 %v6785_v46, %v13252_v4  ;;  %v13285_v9 = vadd.f32 %v5230_v26, %v12692_v13  ;;  %v13288_v43 = vmul.f32 %v12708_v36, %v6083_v35 }
 0x59e   : > { %v5423_v63 = vmul.f32 %v5327_v31, %v13265_v38  ;;  %v7003_v61 = vadd.f32 %v7002_v57, %v6905_v54  ;;  %v6910_v12 = vmul.f32 %v13237_v2, %v13237_v2  ;;  %v9519_v47 = vpop.eup %9518  ;;  %v6909_v33 = vmul.f32 %v13242_v30, %v13242_v30  ;;  %v6245_v54 = vld [vmem:[%s10173_s13 + $0x88] sm:$0xff] }
 0x59f   : > { %v6787_v58 = vadd.f32 %v6786_v39, %v13255_v59  ;;  %v5328_v20 = vmul.f32 %v13285_v9, %v13285_v9  ;;  %v6911_v13 = vmul.f32 %v13249_v48, %v13249_v48  ;;  %v5892_v26 = vadd.f32 1.0, %v9519_v47 }
 0x5a0   : > { %v5519_v35 = vmul.f32 0.044715, %v5423_v63  ;;  %v7004_v28 = vadd.f32 %v7003_v61, %v6906_v62  ;;  %v6912_v46 = vmul.f32 %v13252_v4, %v13252_v4  ;;  %v6913_v39 = vmul.f32 %v13255_v59, %v13255_v59 }
 0x5a1   : > { %v6788_v31 = vadd.f32 %v6787_v58, %v13262_v8  ;;  %v5424_v57 = vmul.f32 %v5328_v20, %v13285_v9  ;;  %v7009_v2 = vadd.f32 %v6910_v12, %v6909_v33  ;;  %v6914_v63 = vmul.f32 %v13262_v8, %v13262_v8  ;;  %v9612_v58 = vld [vmem:[%s10173_s13 + $0x80] sm:$0xff] }
 0x5a2   : > { %v5615_v30 = vadd.f32 %v5519_v35, %v13265_v38  ;;  %v7005_v18 = vadd.f32 %v7004_v28, %v6907_v21  ;;  %v6167_v62 = vmul.f32 %v12943_v23, %v12960_v19  ;;  %v6309_v48 = vunpack.c.h.bf16 %v9612_v58  ;;  %v15083_v8 = vld [vmem:[#allocation144_spill] sm:$0xff] }
 0x5a3   : > { %v9521_v61 = vpop.eup %9520  ;;  %6789 = vadd.xlane.f32.xlu0 %v6788_v31  ;;  %v5520_v47 = vmul.f32 0.044715, %v5424_v57  ;;  %v7010_v4 = vadd.f32 %v7009_v2, %v6911_v13  ;;  %v6310_v20 = vunpack.c.l.bf16 %v6245_v54  ;;  %v5988_v24 = vmul.f32 0.5, %v5892_v26  ;;  %v15084_v2 = vld [vmem:[#allocation43_spill] sm:$0xff]  ;;  %v15085_v13 = vld [vmem:[#allocation141_spill] sm:$0xff] }
 0x5a4   : > { %v5897_v11 = vadd.f32 1.0, %v9521_v61  ;;  %v5711_v12 = vmul.f32 0.7978846, %v5615_v30  ;;  %v7006_v33 = vadd.f32 %v7005_v18, %v6908_v17  ;;  %v6311_v28 = vunpack.c.h.bf16 %v6245_v54  ;;  %v15086_v18 = vld [vmem:[#allocation40_spill] sm:$0xff]  ;;  %v15087_v17 = vld [vmem:[#allocation143_spill] sm:$0xff]  ;;  %v15090_v54 = vld [vmem:[#allocation26_spill] sm:$0xff] }
 0x5a5   : > { %v5616_v21 = vadd.f32 %v5520_v47, %v13285_v9  ;;  %v7011_v35 = vadd.f32 %v7010_v4, %v6912_v46  ;;  %v6405_v59 = vadd.f32 %v6309_v48, %v15083_v8  ;;  %v6406_v19 = vadd.f32 %v6310_v20, %v12966_v7  ;;  %v6248_v4 = vld [vmem:[%s10173_s13 + $0xa0] sm:$0xff]  ;;  %v15089_v7 = vld [vmem:[#allocation142_spill] sm:$0xff] }
 0x5a6   : > { %v5993_v34 = vmul.f32 0.5, %v5897_v11  ;;  %9524 = vtanh.f32 %v5711_v12  ;;  %7007 = vadd.xlane.f32.xlu1 %v7006_v33  ;;  %v13318_v31 = vadd.f32 %v15085_v13, %v15084_v2  ;;  %v6407_v30 = vadd.f32 %v6311_v28, %v6167_v62  ;;  %v15088_v8 = vld [vmem:[#allocation31_spill] sm:$0xff]  ;;  %v15091_v62 = vld [vmem:[#allocation118_spill] sm:$0xff] }
 0x5a7   : > { %v5712_v26 = vmul.f32 0.7978846, %v5616_v21  ;;  %v7012_v57 = vadd.f32 %v7011_v35, %v6913_v39  ;;  %v13322_v61 = vadd.f32 %v15087_v17, %v15086_v18  ;;  %v13326_v48 = vmul.f32 %v5988_v24, %v13150_v41  ;;  %v15093_v41 = vld [vmem:[#allocation120_spill] sm:$0xff]  ;;  %v15100_v18 = vld [vmem:[#allocation147_spill] sm:$0xff] }
 0x5a8   : > { %v6089_v11 = vmul.f32 %v5993_v34, %v13179_v45  ;;  %v13331_v46 = vadd.f32 %v15089_v7, %v15088_v8  ;;  %v13334_v47 = vadd.f32 %v6405_v59, %v15090_v54  ;;  %v13337_v58 = vadd.f32 %v6406_v19, %v15091_v62  ;;  %v9613_v34 = vld [vmem:[%s10173_s13 + $0x98] sm:$0xff]  ;;  %v15095_v19 = vld [vmem:[#allocation148_spill] sm:$0xff] }
 0x5a9   : > { %9526 = vtanh.f32 %v5712_v26  ;;  %v7013_v39 = vadd.f32 %v7012_v57, %v6914_v63  ;;  %v6791_v20 = vadd.f32 %v13322_v61, %v13318_v31  ;;  %v13342_v24 = vadd.f32 %v6407_v30, %v15093_v41  ;;  %v15096_v26 = vld [vmem:[#allocation49_spill] sm:$0xff]  ;;  %v15102_v54 = vld [vmem:[#allocation75_spill] sm:$0xff] }
 0x5aa   : > { %15092 = vst [vmem:[#allocation39_spill] sm:$0xff] %v13337_v58  ;;  %v9523_v12 = vpop.eup %9522  ;;  %v6173_v45 = vmul.f32 %v12943_v23, %v12974_v22  ;;  %v6315_v33 = vunpack.c.h.bf16 %v9613_v34  ;;  %v6316_v21 = vunpack.c.l.bf16 %v6248_v4  ;;  %v13348_v59 = vmul.f32 %v12708_v36, %v6089_v11  ;;  %v15097_v57 = vld [vmem:[#allocation145_spill] sm:$0xff]  ;;  %v15099_v22 = vld [vmem:[#allocation46_spill] sm:$0xff] }
 0x5ab   : > { %15094 = vst [vmem:[#allocation133_spill] sm:$0xff] %v13342_v24  ;;  %v5898_v63 = vadd.f32 1.0, %v9523_v12  ;;  %7014 = vadd.xlane.f32.xlu0 %v7013_v39  ;;  %v6792_v35 = vadd.f32 %v6791_v20, %v13331_v46  ;;  %v6317_v28 = vunpack.c.h.bf16 %v6248_v4  ;;  %v13355_v30 = vadd.f32 %v15097_v57, %v15096_v26  ;;  %v15103_v39 = vld [vmem:[#allocation146_spill] sm:$0xff]  ;;  %v15105_v4 = vld [vmem:[#allocation73_spill] sm:$0xff] }
 0x5ac   : > { %v6411_v2 = vadd.f32 %v6315_v33, %v15095_v19  ;;  %v6412_v13 = vadd.f32 %v6316_v21, %v12971_v6  ;;  %v13359_v17 = vadd.f32 %v15100_v18, %v15099_v22  ;;  %v13364_v62 = vadd.f32 %v15103_v39, %v15102_v54  ;;  %v15107_v33 = vld [vmem:[#allocation126_spill] sm:$0xff] }
 0x5ad   : > { %15098 = vst [vmem:[#allocation36_spill] sm:$0xff] %v13355_v30  ;;  %v5994_v8 = vmul.f32 0.5, %v5898_v63  ;;  %v6793_v11 = vadd.f32 %v6792_v35, %v13334_v47  ;;  %v6413_v7 = vadd.f32 %v6317_v28, %v6173_v45  ;;  %v6915_v12 = vmul.f32 %v13318_v31, %v13318_v31  ;;  %v15109_v63 = vld [vmem:[#allocation124_spill] sm:$0xff]  ;;  %v6251_v18 = vld [vmem:[%s10173_s13 + $0xb8] sm:$0xff] }
 0x5ae   : > { %15101 = vst [vmem:[#allocation135_spill] sm:$0xff] %v13359_v17  ;;  %15104 = vst [vmem:[#allocation69_spill] sm:$0xff] %v13364_v62  ;;  %v13367_v20 = vadd.f32 %v6411_v2, %v15105_v4  ;;  %v6798_v6 = vadd.f32 %v13359_v17, %v13355_v30  ;;  %v6916_v41 = vmul.f32 %v13322_v61, %v13322_v61 }
 0x5af   : > { %v13376_v34 = vmul.f32 %v5994_v8, %v13219_v3  ;;  %v6794_v45 = vadd.f32 %v6793_v11, %v13337_v58  ;;  %v13380_v21 = vadd.f32 %v6412_v13, %v15107_v33  ;;  %v13383_v35 = vadd.f32 %v6413_v7, %v15109_v63  ;;  %v9614_v63 = vld [vmem:[%s10173_s13 + $0xb0] sm:$0xff] }
 0x5b0   : > { %15106 = vst [vmem:[#allocation134_spill] sm:$0xff] %v13367_v20  ;;  %v6799_v28 = vadd.f32 %v6798_v6, %v13364_v62  ;;  %v6917_v19 = vmul.f32 %v13331_v46, %v13331_v46  ;;  %v6918_v2 = vmul.f32 %v13334_v47, %v13334_v47  ;;  %v6919_v3 = vmul.f32 %v13337_v58, %v13337_v58  ;;  %v15112_v58 = vld [vmem:[#allocation149_spill] sm:$0xff] }
 0x5b1   : > { %15108 = vst [vmem:[#allocation71_spill] sm:$0xff] %v13380_v21  ;;  %v6795_v26 = vadd.f32 %v6794_v45, %v13342_v24  ;;  %v7016_v57 = vadd.f32 %v6916_v41, %v6915_v12  ;;  %v6921_v13 = vmul.f32 %v13355_v30, %v13355_v30  ;;  %v6922_v22 = vmul.f32 %v13359_v17, %v13359_v17 }
 0x5b2   : > { %v6800_v8 = vadd.f32 %v6799_v28, %v13367_v20  ;;  %v6920_v11 = vmul.f32 %v13342_v24, %v13342_v24  ;;  %v6923_v7 = vmul.f32 %v13364_v62, %v13364_v62  ;;  %v6924_v54 = vmul.f32 %v13367_v20, %v13367_v20 }
 0x5b3   : > { %v9525_v39 = vpop.eup %9524  ;;  %6796 = vadd.xlane.f32.xlu1 %v6795_v26  ;;  %v7017_v4 = vadd.f32 %v7016_v57, %v6917_v19  ;;  %v6925_v6 = vmul.f32 %v13380_v21, %v13380_v21  ;;  %v7023_v12 = vadd.f32 %v6922_v22, %v6921_v13  ;;  %v6179_v41 = vmul.f32 %v12943_v23, %v12989_v37  ;;  %v15110_v22 = vld [vmem:[#allocation151_spill] sm:$0xff] }
 0x5b4   : > { %v5903_v45 = vadd.f32 1.0, %v9525_v39  ;;  %v6801_v33 = vadd.f32 %v6800_v8, %v13380_v21  ;;  %v6321_v28 = vunpack.c.h.bf16 %v9614_v63  ;;  %v6322_v17 = vunpack.c.l.bf16 %v6251_v18 }
 0x5b5   : > { %v7018_v62 = vadd.f32 %v7017_v4, %v6918_v2  ;;  %v6926_v20 = vmul.f32 %v13383_v35, %v13383_v35  ;;  %v7024_v30 = vadd.f32 %v7023_v12, %v6923_v7  ;;  %v6323_v19 = vunpack.c.h.bf16 %v6251_v18  ;;  %v15111_v4 = vld [vmem:[#allocation47_spill] sm:$0xff]  ;;  %v15113_v18 = vld [vmem:[#allocation44_spill] sm:$0xff]  ;;  %v15114_v12 = vld [vmem:[#allocation150_spill] sm:$0xff] }
 0x5b6   : > { %v9527_v26 = vpop.eup %9526  ;;  %v5999_v57 = vmul.f32 0.5, %v5903_v45  ;;  %v6802_v13 = vadd.f32 %v6801_v33, %v13383_v35  ;;  %v6417_v24 = vadd.f32 %v6321_v28, %v15110_v22  ;;  %v6418_v37 = vadd.f32 %v6322_v17, %v12995_v53  ;;  %v15115_v33 = vld [vmem:[#allocation34_spill] sm:$0xff]  ;;  %v15116_v28 = vld [vmem:[#allocation96_spill] sm:$0xff] }
 0x5b7   : > { %v5904_v39 = vadd.f32 1.0, %v9527_v26  ;;  %v7019_v8 = vadd.f32 %v7018_v62, %v6919_v3  ;;  %v7025_v21 = vadd.f32 %v7024_v30, %v6924_v54  ;;  %v6419_v63 = vadd.f32 %v6323_v19, %v6179_v41  ;;  %v6254_v53 = vld [vmem:[%s10173_s13 + $0xd0] sm:$0xff] }
 0x5b8   : > { %v6095_v2 = vmul.f32 %v5999_v57, %v13265_v38  ;;  %6803 = vadd.xlane.f32.xlu0 %v6802_v13  ;;  %v13419_v7 = vadd.f32 %v15112_v58, %v15111_v4  ;;  %v13423_v45 = vadd.f32 %v15114_v12, %v15113_v18  ;;  %v13427_v22 = vadd.f32 %v15116_v28, %v15115_v33  ;;  %v15117_v3 = vld [vmem:[#allocation74_spill] sm:$0xff]  ;;  %v15119_v13 = vld [vmem:[#allocation125_spill] sm:$0xff]  ;;  %v15124_v18 = vld [vmem:[#allocation152_spill] sm:$0xff] }
 0x5b9   : > { %v6000_v17 = vmul.f32 0.5, %v5904_v39  ;;  %v7020_v30 = vadd.f32 %v7019_v8, %v6920_v11  ;;  %v7026_v62 = vadd.f32 %v7025_v21, %v6925_v6  ;;  %v13431_v38 = vadd.f32 %v6417_v24, %v15117_v3  ;;  %v15118_v58 = vld [vmem:[#allocation122_spill] sm:$0xff]  ;;  %v9615_v21 = vld [vmem:[%s10173_s13 + $0xc8] sm:$0xff]  ;;  %v15120_v8 = vld [vmem:[#allocation55_spill] sm:$0xff] }
 0x5ba   : > { %v13434_v54 = vmul.f32 %v12708_v36, %v6095_v2  ;;  %v13437_v41 = vadd.f32 %v6418_v37, %v15118_v58  ;;  %v6805_v19 = vadd.f32 %v13423_v45, %v13419_v7  ;;  %v6185_v26 = vmul.f32 %v12943_v23, %v13023_v0  ;;  %v15121_v37 = vld [vmem:[#allocation106_spill] sm:$0xff]  ;;  %v15127_v28 = vld [vmem:[#allocation79_spill] sm:$0xff] }
 0x5bb   : > { %7021 = vadd.xlane.f32.xlu1 %v7020_v30  ;;  %v7027_v57 = vadd.f32 %v7026_v62, %v6926_v20  ;;  %v13444_v11 = vadd.f32 %v6419_v63, %v15119_v13  ;;  %v6327_v24 = vunpack.c.h.bf16 %v9615_v21  ;;  %v6328_v6 = vunpack.c.l.bf16 %v6254_v53  ;;  %v15123_v4 = vld [vmem:[#allocation50_spill] sm:$0xff]  ;;  %v15126_v20 = vld [vmem:[#allocation153_spill] sm:$0xff]  ;;  %v15128_v30 = vld [vmem:[#allocation107_spill] sm:$0xff] }
 0x5bc   : > { %v6806_v36 = vadd.f32 %v6805_v19, %v13427_v22  ;;  %v6329_v39 = vunpack.c.h.bf16 %v6254_v53  ;;  %v13450_v2 = vadd.f32 %v15121_v37, %v15120_v8  ;;  %v13454_v12 = vadd.f32 %v15124_v18, %v15123_v4 }
 0x5bd   : > { %v13457_v0 = vmul.f32 %v6000_v17, %v13285_v9  ;;  %7028 = vadd.xlane.f32.xlu0 %v7027_v57  ;;  %v6423_v63 = vadd.f32 %v6327_v24, %v15126_v20  ;;  %v6424_v33 = vadd.f32 %v6328_v6, %v13020_v52  ;;  %v13463_v62 = vadd.f32 %v15128_v30, %v15127_v28  ;;  %v15130_v17 = vld [vmem:[#allocation77_spill] sm:$0xff]  ;;  %v15132_v57 = vld [vmem:[#allocation130_spill] sm:$0xff]  ;;  %v15134_v24 = vld [vmem:[#allocation127_spill] sm:$0xff] }
 0x5be   : > { %15122 = vst [vmem:[#allocation114_spill] sm:$0xff] %v13450_v2  ;;  %15125 = vst [vmem:[#allocation116_spill] sm:$0xff] %v13454_v12  ;;  %v6807_v53 = vadd.f32 %v6806_v36, %v13431_v38  ;;  %v6425_v3 = vadd.f32 %v6329_v39, %v6185_v26  ;;  %v6812_v58 = vadd.f32 %v13454_v12, %v13450_v2  ;;  %v6257_v20 = vld [vmem:[%s10173_s13 + $0xe8] sm:$0xff] }
 0x5bf   : > { %15129 = vst [vmem:[#allocation140_spill] sm:$0xff] %v13463_v62  ;;  %v6928_v9 = vmul.f32 %v13423_v45, %v13423_v45  ;;  %v13471_v19 = vadd.f32 %v6423_v63, %v15130_v17  ;;  %v13474_v13 = vadd.f32 %v6424_v33, %v15132_v57  ;;  %v6927_v52 = vmul.f32 %v13419_v7, %v13419_v7 }
 0x5c0   : > { %v6929_v21 = vmul.f32 %v13427_v22, %v13427_v22  ;;  %v6808_v26 = vadd.f32 %v6807_v53, %v13437_v41  ;;  %v13482_v6 = vadd.f32 %v6425_v3, %v15134_v24  ;;  %v6813_v36 = vadd.f32 %v6812_v58, %v13463_v62 }
 0x5c1   : > { %15131 = vst [vmem:[#allocation42_spill] sm:$0xff] %v13471_v19  ;;  %15133 = vst [vmem:[#allocation139_spill] sm:$0xff] %v13474_v13  ;;  %v6930_v39 = vmul.f32 %v13431_v38, %v13431_v38  ;;  %v6931_v8 = vmul.f32 %v13437_v41, %v13437_v41  ;;  %v7030_v37 = vadd.f32 %v6928_v9, %v6927_v52  ;;  %v9616_v52 = vld [vmem:[%s10173_s13 + $0xe0] sm:$0xff]  ;;  %v6334_v24 = vunpack.c.l.bf16 %v6257_v20 }
 0x5c2   : > { %15135 = vst [vmem:[#allocation45_spill] sm:$0xff] %v13482_v6  ;;  %v6933_v4 = vmul.f32 %v13450_v2, %v13450_v2  ;;  %v6934_v18 = vmul.f32 %v13454_v12, %v13454_v12  ;;  %v6809_v63 = vadd.f32 %v6808_v26, %v13444_v11  ;;  %v6814_v33 = vadd.f32 %v6813_v36, %v13471_v19  ;;  %v15137_v12 = vld [vmem:[#allocation154_spill] sm:$0xff] }
 0x5c3   : > { %v6932_v28 = vmul.f32 %v13444_v11, %v13444_v11  ;;  %v6935_v30 = vmul.f32 %v13463_v62, %v13463_v62  ;;  %v7031_v53 = vadd.f32 %v7030_v37, %v6929_v21  ;;  %v6936_v3 = vmul.f32 %v13471_v19, %v13471_v19  ;;  %v15136_v37 = vld [vmem:[#allocation51_spill] sm:$0xff] }
 0x5c4   : > { %v6937_v58 = vmul.f32 %v13474_v13, %v13474_v13  ;;  %v7037_v9 = vadd.f32 %v6934_v18, %v6933_v4  ;;  %6810 = vadd.xlane.f32.xlu1 %v6809_v63  ;;  %v6815_v17 = vadd.f32 %v6814_v33, %v13474_v13  ;;  %v6191_v57 = vmul.f32 %v12943_v23, %v13054_v51  ;;  %v15138_v4 = vld [vmem:[#allocation156_spill] sm:$0xff]  ;;  %v15140_v51 = vld [vmem:[#allocation155_spill] sm:$0xff] }
 0x5c5   : > { %v6333_v26 = vunpack.c.h.bf16 %v9616_v52  ;;  %v7032_v36 = vadd.f32 %v7031_v53, %v6930_v39  ;;  %v6335_v21 = vunpack.c.h.bf16 %v6257_v20  ;;  %v13510_v19 = vadd.f32 %v15137_v12, %v15136_v37  ;;  %v15139_v33 = vld [vmem:[#allocation48_spill] sm:$0xff] }
 0x5c6   : > { %v7038_v62 = vadd.f32 %v7037_v9, %v6935_v30  ;;  %v6816_v2 = vadd.f32 %v6815_v17, %v13482_v6  ;;  %v6430_v63 = vadd.f32 %v6334_v24, %v13058_v25  ;;  %v13517_v13 = vadd.f32 %v15140_v51, %v15139_v33  ;;  %v6260_v53 = vld [vmem:[%s10173_s13 + $0x100] sm:$0xff]  ;;  %v15142_v9 = vld [vmem:[#allocation102_spill] sm:$0xff] }
 0x5c7   : > { %v6429_v18 = vadd.f32 %v6333_v26, %v15138_v4  ;;  %v7033_v52 = vadd.f32 %v7032_v36, %v6931_v8  ;;  %v6938_v39 = vmul.f32 %v13482_v6, %v13482_v6  ;;  %v6431_v30 = vadd.f32 %v6335_v21, %v6191_v57  ;;  %v15141_v12 = vld [vmem:[#allocation76_spill] sm:$0xff]  ;;  %v15143_v26 = vld [vmem:[#allocation78_spill] sm:$0xff]  ;;  %v15147_v57 = vld [vmem:[#allocation123_spill] sm:$0xff] }
 0x5c8   : > { %v7039_v20 = vadd.f32 %v7038_v62, %v6936_v3  ;;  %6817 = vadd.xlane.f32.xlu0 %v6816_v2  ;;  %v13524_v17 = vadd.f32 %v15142_v9, %v15141_v12  ;;  %v6819_v25 = vadd.f32 %v13517_v13, %v13510_v19  ;;  %v6197_v8 = vmul.f32 %v12943_v23, %v13064_v5  ;;  %v15145_v4 = vld [vmem:[#allocation128_spill] sm:$0xff]  ;;  %v9617_v3 = vld [vmem:[%s10173_s13 + $0xf8] sm:$0xff]  ;;  %v15151_v5 = vld [vmem:[#allocation157_spill] sm:$0xff] }
 0x5c9   : > { %v13527_v37 = vadd.f32 %v6429_v18, %v15143_v26  ;;  %v7034_v24 = vadd.f32 %v7033_v52, %v6932_v28  ;;  %v13534_v62 = vadd.f32 %v6430_v63, %v15145_v4  ;;  %v6339_v2 = vunpack.c.h.bf16 %v9617_v3  ;;  %v15149_v9 = vld [vmem:[#allocation160_spill] sm:$0xff]  ;;  %v15150_v6 = vld [vmem:[#allocation59_spill] sm:$0xff]  ;;  %v15157_v3 = vld [vmem:[#allocation158_spill] sm:$0xff] }
 0x5ca   : > { %v7040_v36 = vadd.f32 %v7039_v20, %v6937_v58  ;;  %v13538_v21 = vadd.f32 %v6431_v30, %v15147_v57  ;;  %v6820_v33 = vadd.f32 %v6819_v25, %v13524_v17  ;;  %v6340_v18 = vunpack.c.l.bf16 %v6260_v53  ;;  %v15153_v58 = vld [vmem:[#allocation56_spill] sm:$0xff]  ;;  %v15154_v63 = vld [vmem:[#allocation159_spill] sm:$0xff] }
 0x5cb   : > { %15144 = vst [vmem:[#allocation137_spill] sm:$0xff] %v13527_v37  ;;  %15146 = vst [vmem:[#allocation33_spill] sm:$0xff] %v13534_v62  ;;  %v6341_v51 = vunpack.c.h.bf16 %v6260_v53  ;;  %7035 = vadd.xlane.f32.xlu1 %v7034_v24  ;;  %v6435_v26 = vadd.f32 %v6339_v2, %v15149_v9  ;;  %v13544_v28 = vadd.f32 %v15151_v5, %v15150_v6  ;;  %v15156_v25 = vld [vmem:[#allocation83_spill] sm:$0xff] }
 0x5cc   : > { %15148 = vst [vmem:[#allocation138_spill] sm:$0xff] %v13538_v21  ;;  %v7041_v12 = vadd.f32 %v7040_v36, %v6938_v39  ;;  %v13548_v52 = vadd.f32 %v15154_v63, %v15153_v58  ;;  %v6821_v20 = vadd.f32 %v6820_v33, %v13527_v37  ;;  %v6436_v30 = vadd.f32 %v6340_v18, %v13085_v29  ;;  %v15159_v39 = vld [vmem:[#allocation81_spill] sm:$0xff]  ;;  %v15162_v33 = vld [vmem:[#allocation131_spill] sm:$0xff] }
 0x5cd   : > { %15152 = vst [vmem:[#allocation28_spill] sm:$0xff] %v13544_v28  ;;  %v6437_v4 = vadd.f32 %v6341_v51, %v6197_v8  ;;  %v13554_v53 = vadd.f32 %v15157_v3, %v15156_v25  ;;  %v13557_v24 = vadd.f32 %v6435_v26, %v15159_v39  ;;  %v6939_v36 = vmul.f32 %v13510_v19, %v13510_v19  ;;  %v15161_v8 = vld [vmem:[#allocation94_spill] sm:$0xff] }
 0x5ce   : > { %15155 = vst [vmem:[#allocation121_spill] sm:$0xff] %v13548_v52  ;;  %7042 = vadd.xlane.f32.xlu0 %v7041_v12  ;;  %v6826_v6 = vadd.f32 %v13548_v52, %v13544_v28  ;;  %v6940_v2 = vmul.f32 %v13517_v13, %v13517_v13  ;;  %v6822_v29 = vadd.f32 %v6821_v20, %v13534_v62 }
 0x5cf   : > { %15158 = vst [vmem:[#allocation119_spill] sm:$0xff] %v13554_v53  ;;  %15160 = vst [vmem:[#allocation144_spill] sm:$0xff] %v13557_v24  ;;  %v13567_v57 = vadd.f32 %v6436_v30, %v15161_v8  ;;  %v13570_v18 = vadd.f32 %v6437_v4, %v15162_v33  ;;  %v6941_v51 = vmul.f32 %v13524_v17, %v13524_v17  ;;  %v6263_v4 = vld [vmem:[%s10173_s13 + $0x118] sm:$0xff]  ;;  %v9618_v8 = vld [vmem:[%s10173_s13 + $0x110] sm:$0xff] }
 0x5d0   : > { %v6827_v12 = vadd.f32 %v6826_v6, %v13554_v53  ;;  %v6942_v9 = vmul.f32 %v13527_v37, %v13527_v37  ;;  %v6943_v26 = vmul.f32 %v13534_v62, %v13534_v62  ;;  %v7044_v5 = vadd.f32 %v6940_v2, %v6939_v36  ;;  %v15166_v37 = vld [vmem:[#allocation54_spill] sm:$0xff] }
 0x5d1   : > { %v6823_v58 = vadd.f32 %v6822_v29, %v13538_v21  ;;  %v6944_v63 = vmul.f32 %v13538_v21, %v13538_v21  ;;  %v6945_v20 = vmul.f32 %v13544_v28, %v13544_v28  ;;  %v6946_v30 = vmul.f32 %v13548_v52, %v13548_v52  ;;  %v15163_v28 = vld [vmem:[#allocation164_spill] sm:$0xff] }
 0x5d2   : > { %v6828_v25 = vadd.f32 %v6827_v12, %v13557_v24  ;;  %v7045_v3 = vadd.f32 %v7044_v5, %v6941_v51  ;;  %v6947_v39 = vmul.f32 %v13554_v53, %v13554_v53  ;;  %v6948_v6 = vmul.f32 %v13557_v24, %v13557_v24  ;;  %v15164_v24 = vld [vmem:[#allocation57_spill] sm:$0xff] }
 0x5d3   : > { %6824 = vadd.xlane.f32.xlu1 %v6823_v58  ;;  %v6949_v36 = vmul.f32 %v13567_v57, %v13567_v57  ;;  %v7051_v2 = vadd.f32 %v6946_v30, %v6945_v20  ;;  %v6203_v29 = vmul.f32 %v12943_v23, %v13162_v56  ;;  %v6345_v33 = vunpack.c.h.bf16 %v9618_v8  ;;  %v15165_v58 = vld [vmem:[#allocation161_spill] sm:$0xff]  ;;  %v15167_v20 = vld [vmem:[#allocation163_spill] sm:$0xff] }
 0x5d4   : > { %v6829_v12 = vadd.f32 %v6828_v25, %v13567_v57  ;;  %v7046_v51 = vadd.f32 %v7045_v3, %v6942_v9  ;;  %v6346_v5 = vunpack.c.l.bf16 %v6263_v4  ;;  %v6347_v52 = vunpack.c.h.bf16 %v6263_v4  ;;  %v6266_v3 = vld [vmem:[%s10173_s13 + $0x130] sm:$0xff] }
 0x5d5   : > { %v7052_v53 = vadd.f32 %v7051_v2, %v6947_v39  ;;  %v6441_v21 = vadd.f32 %v6345_v33, %v15163_v28  ;;  %v13601_v62 = vadd.f32 %v15165_v58, %v15164_v24  ;;  %v13605_v30 = vadd.f32 %v15167_v20, %v15166_v37  ;;  %v15168_v39 = vld [vmem:[#allocation80_spill] sm:$0xff]  ;;  %v15169_v2 = vld [vmem:[#allocation162_spill] sm:$0xff]  ;;  %v15173_v20 = vld [vmem:[#allocation129_spill] sm:$0xff] }
 0x5d6   : > { %v6830_v56 = vadd.f32 %v6829_v12, %v13570_v18  ;;  %v7047_v8 = vadd.f32 %v7046_v51, %v6943_v26  ;;  %v6442_v25 = vadd.f32 %v6346_v5, %v13175_v10  ;;  %v6443_v9 = vadd.f32 %v6347_v52, %v6203_v29  ;;  %v15170_v12 = vld [vmem:[#allocation82_spill] sm:$0xff]  ;;  %v15171_v26 = vld [vmem:[#allocation92_spill] sm:$0xff] }
 0x5d7   : > { %v6950_v4 = vmul.f32 %v13570_v18, %v13570_v18  ;;  %v7053_v28 = vadd.f32 %v7052_v53, %v6948_v6  ;;  %v13614_v24 = vadd.f32 %v15169_v2, %v15168_v39  ;;  %v6833_v37 = vadd.f32 %v13605_v30, %v13601_v62  ;;  %v9619_v6 = vld [vmem:[%s10173_s13 + $0x128] sm:$0xff]  ;;  %v15179_v2 = vld [vmem:[#allocation167_spill] sm:$0xff] }
 0x5d8   : > { %6831 = vadd.xlane.f32.xlu0 %v6830_v56  ;;  %v7048_v33 = vadd.f32 %v7047_v8, %v6944_v63  ;;  %v13619_v58 = vadd.f32 %v6441_v21, %v15170_v12  ;;  %v13622_v10 = vadd.f32 %v6442_v25, %v15171_v26  ;;  %v6209_v52 = vmul.f32 %v12943_v23, %v13245_v1  ;;  %v15175_v56 = vld [vmem:[#allocation67_spill] sm:$0xff]  ;;  %v15176_v21 = vld [vmem:[#allocation165_spill] sm:$0xff]  ;;  %v15178_v25 = vld [vmem:[#allocation60_spill] sm:$0xff] }
 0x5d9   : > { %v7054_v29 = vadd.f32 %v7053_v28, %v6949_v36  ;;  %v6834_v53 = vadd.f32 %v6833_v37, %v13614_v24  ;;  %v6351_v51 = vunpack.c.h.bf16 %v9619_v6  ;;  %v6352_v5 = vunpack.c.l.bf16 %v6266_v3  ;;  %v15181_v28 = vld [vmem:[#allocation168_spill] sm:$0xff]  ;;  %v15182_v6 = vld [vmem:[#allocation87_spill] sm:$0xff] }
 0x5da   : > { %15172 = vst [vmem:[#allocation43_spill] sm:$0xff] %v13622_v10  ;;  %7049 = vadd.xlane.f32.xlu1 %v7048_v33  ;;  %v13629_v39 = vadd.f32 %v6443_v9, %v15173_v20  ;;  %v6353_v63 = vunpack.c.h.bf16 %v6266_v3  ;;  %v13633_v8 = vadd.f32 %v15176_v21, %v15175_v56  ;;  %v13637_v12 = vadd.f32 %v15179_v2, %v15178_v25  ;;  %v15183_v9 = vld [vmem:[#allocation166_spill] sm:$0xff] }
 0x5db   : > { %v7055_v1 = vadd.f32 %v7054_v29, %v6950_v4  ;;  %v6835_v36 = vadd.f32 %v6834_v53, %v13619_v58  ;;  %v6447_v37 = vadd.f32 %v6351_v51, %v15181_v28  ;;  %v6448_v26 = vadd.f32 %v6352_v5, %v13195_v27  ;;  %v15185_v29 = vld [vmem:[#allocation85_spill] sm:$0xff]  ;;  %v15187_v51 = vld [vmem:[#allocation99_spill] sm:$0xff] }
 0x5dc   : > { %15174 = vst [vmem:[#allocation141_spill] sm:$0xff] %v13629_v39  ;;  %15177 = vst [vmem:[#allocation40_spill] sm:$0xff] %v13633_v8  ;;  %v6449_v33 = vadd.f32 %v6353_v63, %v6209_v52  ;;  %v13644_v20 = vadd.f32 %v15183_v9, %v15182_v6  ;;  %v6840_v3 = vadd.f32 %v13637_v12, %v13633_v8  ;;  %v15188_v5 = vld [vmem:[#allocation101_spill] sm:$0xff] }
 0x5dd   : > { %15180 = vst [vmem:[#allocation143_spill] sm:$0xff] %v13637_v12  ;;  %v6952_v56 = vmul.f32 %v13605_v30, %v13605_v30  ;;  %7056 = vadd.xlane.f32.xlu0 %v7055_v1  ;;  %v6836_v4 = vadd.f32 %v6835_v36, %v13622_v10  ;;  %v13652_v53 = vadd.f32 %v6447_v37, %v15185_v29 }
 0x5de   : > { %15184 = vst [vmem:[#allocation31_spill] sm:$0xff] %v13644_v20  ;;  %v13655_v27 = vadd.f32 %v6448_v26, %v15187_v51  ;;  %v6951_v52 = vmul.f32 %v13601_v62, %v13601_v62  ;;  %v13660_v63 = vadd.f32 %v6449_v33, %v15188_v5  ;;  %v6841_v21 = vadd.f32 %v6840_v3, %v13644_v20  ;;  %v6269_v26 = vld [vmem:[%s10173_s13 + $0x148] sm:$0xff] }
 0x5df   : > { %15186 = vst [vmem:[#allocation142_spill] sm:$0xff] %v13652_v53  ;;  %v6953_v25 = vmul.f32 %v13614_v24, %v13614_v24  ;;  %v6954_v2 = vmul.f32 %v13619_v58, %v13619_v58  ;;  %v6837_v1 = vadd.f32 %v6836_v4, %v13629_v39  ;;  %v6955_v36 = vmul.f32 %v13622_v10, %v13622_v10 }
 0x5e0   : > { %15189 = vst [vmem:[#allocation26_spill] sm:$0xff] %v13660_v63  ;;  %v6956_v28 = vmul.f32 %v13629_v39, %v13629_v39  ;;  %v7058_v37 = vadd.f32 %v6952_v56, %v6951_v52  ;;  %v6842_v33 = vadd.f32 %v6841_v21, %v13652_v53  ;;  %v6957_v6 = vmul.f32 %v13633_v8, %v13633_v8  ;;  %v9620_v21 = vld [vmem:[%s10173_s13 + $0x140] sm:$0xff] }
 0x5e1   : > { %v6958_v9 = vmul.f32 %v13637_v12, %v13637_v12  ;;  %v6959_v3 = vmul.f32 %v13644_v20, %v13644_v20  ;;  %6838 = vadd.xlane.f32.xlu1 %v6837_v1  ;;  %v6960_v29 = vmul.f32 %v13652_v53, %v13652_v53  ;;  %v6961_v56 = vmul.f32 %v13655_v27, %v13655_v27  ;;  %v15190_v1 = vld [vmem:[#allocation64_spill] sm:$0xff] }
 0x5e2   : > { %v7059_v4 = vadd.f32 %v7058_v37, %v6953_v25  ;;  %v6215_v51 = vmul.f32 %v12943_v23, %v13326_v48  ;;  %v6843_v52 = vadd.f32 %v6842_v33, %v13655_v27  ;;  %v6357_v12 = vunpack.c.h.bf16 %v9620_v21  ;;  %v15192_v37 = vld [vmem:[#allocation58_spill] sm:$0xff] }
 0x5e3   : > { %v7065_v5 = vadd.f32 %v6958_v9, %v6957_v6  ;;  %v6358_v8 = vunpack.c.l.bf16 %v6269_v26  ;;  %v6359_v20 = vunpack.c.h.bf16 %v6269_v26  ;;  %v13690_v25 = vadd.f32 %v12669_v42, %v15190_v1  ;;  %v15195_v26 = vld [vmem:[#allocation100_spill] sm:$0xff] }
 0x5e4   : > { %v7060_v39 = vadd.f32 %v7059_v4, %v6954_v2  ;;  %v13694_v53 = vadd.f32 %v12688_v50, %v15192_v37  ;;  %v6844_v10 = vadd.f32 %v6843_v52, %v13660_v63  ;;  %v6453_v33 = vadd.f32 %v6357_v12, %v12680_v32  ;;  %v15194_v2 = vld [vmem:[#allocation84_spill] sm:$0xff]  ;;  %v15197_v52 = vld [vmem:[#allocation86_spill] sm:$0xff] }
 0x5e5   : > { %15191 = vst [vmem:[#allocation118_spill] sm:$0xff] %v13690_v25  ;;  %v7066_v48 = vadd.f32 %v7065_v5, %v6959_v3  ;;  %v6454_v6 = vadd.f32 %v6358_v8, %v13288_v43  ;;  %v6455_v21 = vadd.f32 %v6359_v20, %v6215_v51  ;;  %v13701_v4 = vadd.f32 %v15195_v26, %v15194_v2  ;;  %v6272_v1 = vld [vmem:[%s10173_s13 + $0x160] sm:$0xff]  ;;  %v9621_v20 = vld [vmem:[%s10173_s13 + $0x158] sm:$0xff] }
 0x5e6   : > { %15193 = vst [vmem:[#allocation120_spill] sm:$0xff] %v13694_v53  ;;  %v7061_v9 = vadd.f32 %v7060_v39, %v6955_v36  ;;  %v6847_v42 = vadd.f32 %v13694_v53, %v13690_v25  ;;  %6845 = vadd.xlane.f32.xlu0 %v6844_v10  ;;  %v6962_v50 = vmul.f32 %v13660_v63, %v13660_v63  ;;  %v15199_v39 = vld [vmem:[#allocation93_spill] sm:$0xff]  ;;  %v6363_v36 = vunpack.c.h.bf16 %v9621_v20 }
 0x5e7   : > { %15196 = vst [vmem:[#allocation148_spill] sm:$0xff] %v13701_v4  ;;  %v7067_v3 = vadd.f32 %v7066_v48, %v6960_v29  ;;  %v13709_v5 = vadd.f32 %v6453_v33, %v15197_v52  ;;  %v6221_v32 = vmul.f32 %v12943_v23, %v13376_v34  ;;  %v13714_v8 = vadd.f32 %v6454_v6, %v15199_v39  ;;  %v15201_v10 = vld [vmem:[#allocation97_spill] sm:$0xff]  ;;  %v15203_v33 = vld [vmem:[#allocation171_spill] sm:$0xff]  ;;  %v15207_v6 = vld [vmem:[#allocation68_spill] sm:$0xff] }
 0x5e8   : > { %v7062_v43 = vadd.f32 %v7061_v9, %v6956_v28  ;;  %v6848_v12 = vadd.f32 %v6847_v42, %v13701_v4  ;;  %v13719_v37 = vadd.f32 %v6455_v21, %v15201_v10  ;;  %v6364_v2 = vunpack.c.l.bf16 %v6272_v1  ;;  %v15204_v34 = vld [vmem:[#allocation29_spill] sm:$0xff]  ;;  %v15208_v52 = vld [vmem:[#allocation170_spill] sm:$0xff] }
 0x5e9   : > { %15198 = vst [vmem:[#allocation49_spill] sm:$0xff] %v13709_v5  ;;  %15200 = vst [vmem:[#allocation145_spill] sm:$0xff] %v13714_v8  ;;  %v7068_v51 = vadd.f32 %v7067_v3, %v6961_v56  ;;  %v6365_v29 = vunpack.c.h.bf16 %v6272_v1  ;;  %v6459_v26 = vadd.f32 %v6363_v36, %v15203_v33  ;;  %v15205_v28 = vld [vmem:[#allocation109_spill] sm:$0xff]  ;;  %v13729_v42 = vadd.f32 %v15208_v52, %v15207_v6  ;;  %v15210_v3 = vld [vmem:[#allocation91_spill] sm:$0xff] }
 0x5ea   : > { %15202 = vst [vmem:[#allocation46_spill] sm:$0xff] %v13719_v37  ;;  %7063 = vadd.xlane.f32.xlu1 %v7062_v43  ;;  %v6849_v48 = vadd.f32 %v6848_v12, %v13709_v5  ;;  %v13725_v9 = vadd.f32 %v15205_v28, %v15204_v34  ;;  %v6460_v56 = vadd.f32 %v6364_v2, %v13348_v59  ;;  %v15211_v20 = vld [vmem:[#allocation169_spill] sm:$0xff] }
 0x5eb   : > { %15209 = vst [vmem:[#allocation75_spill] sm:$0xff] %v13729_v42  ;;  %v7069_v39 = vadd.f32 %v7068_v51, %v6962_v50  ;;  %v6461_v21 = vadd.f32 %v6365_v29, %v6221_v32  ;;  %v13734_v1 = vadd.f32 %v15211_v20, %v15210_v3  ;;  %v15213_v12 = vld [vmem:[#allocation89_spill] sm:$0xff]  ;;  %v6964_v33 = vmul.f32 %v13694_v53, %v13694_v53  ;;  %v15223_v53 = vld [vmem:[#allocation66_spill] sm:$0xff] }
 0x5ec   : > { %15206 = vst [vmem:[#allocation147_spill] sm:$0xff] %v13725_v9  ;;  %v6850_v43 = vadd.f32 %v6849_v48, %v13714_v8  ;;  %v13738_v36 = vadd.f32 %v6459_v26, %v15213_v12  ;;  %v6854_v10 = vadd.f32 %v13729_v42, %v13725_v9  ;;  %v15215_v50 = vld [vmem:[#allocation105_spill] sm:$0xff]  ;;  %v6963_v2 = vmul.f32 %v13690_v25, %v13690_v25 }
 0x5ed   : > { %15212 = vst [vmem:[#allocation146_spill] sm:$0xff] %v13734_v1  ;;  %7070 = vadd.xlane.f32.xlu0 %v7069_v39  ;;  %v13745_v59 = vadd.f32 %v6460_v56, %v15215_v50  ;;  %v15217_v32 = vld [vmem:[#allocation25_spill] sm:$0xff]  ;;  %v6965_v29 = vmul.f32 %v13701_v4, %v13701_v4  ;;  %v6966_v34 = vmul.f32 %v13709_v5, %v13709_v5  ;;  %v15222_v5 = vld [vmem:[#allocation175_spill] sm:$0xff] }
 0x5ee   : > { %15214 = vst [vmem:[#allocation73_spill] sm:$0xff] %v13738_v36  ;;  %v13748_v51 = vadd.f32 %v6461_v21, %v15217_v32  ;;  %v6851_v48 = vadd.f32 %v6850_v43, %v13719_v37  ;;  %v6855_v26 = vadd.f32 %v6854_v10, %v13734_v1  ;;  %v6967_v28 = vmul.f32 %v13714_v8, %v13714_v8  ;;  %v6275_v21 = vld [vmem:[%s10173_s13 + $0x178] sm:$0xff]  ;;  %v9622_v32 = vld [vmem:[%s10173_s13 + $0x170] sm:$0xff] }
 0x5ef   : > { %15216 = vst [vmem:[#allocation126_spill] sm:$0xff] %v13745_v59  ;;  %v6968_v6 = vmul.f32 %v13719_v37, %v13719_v37  ;;  %v7072_v52 = vadd.f32 %v6964_v33, %v6963_v2  ;;  %v6969_v39 = vmul.f32 %v13725_v9, %v13725_v9  ;;  %v6970_v56 = vmul.f32 %v13729_v42, %v13729_v42  ;;  %v15219_v9 = vld [vmem:[#allocation27_spill] sm:$0xff]  ;;  %v15220_v37 = vld [vmem:[#allocation172_spill] sm:$0xff] }
 0x5f0   : > { %15218 = vst [vmem:[#allocation124_spill] sm:$0xff] %v13748_v51  ;;  %6852 = vadd.xlane.f32.xlu1 %v6851_v48  ;;  %v6856_v3 = vadd.f32 %v6855_v26, %v13738_v36  ;;  %v6971_v20 = vmul.f32 %v13734_v1, %v13734_v1  ;;  %v6972_v43 = vmul.f32 %v13738_v36, %v13738_v36  ;;  %v6369_v2 = vunpack.c.h.bf16 %v9622_v32 }
 0x5f1   : > { %v6973_v12 = vmul.f32 %v13745_v59, %v13745_v59  ;;  %v7073_v10 = vadd.f32 %v7072_v52, %v6965_v29  ;;  %v7079_v33 = vadd.f32 %v6970_v56, %v6969_v39  ;;  %v6227_v50 = vmul.f32 %v12943_v23, %v13457_v0  ;;  %v15224_v29 = vld [vmem:[#allocation174_spill] sm:$0xff]  ;;  %v15226_v56 = vld [vmem:[#allocation88_spill] sm:$0xff] }
 0x5f2   : > { %v6857_v48 = vadd.f32 %v6856_v3, %v13745_v59  ;;  %v6370_v42 = vunpack.c.l.bf16 %v6275_v21  ;;  %v6371_v26 = vunpack.c.h.bf16 %v6275_v21  ;;  %v13780_v1 = vadd.f32 %v15220_v37, %v15219_v9  ;;  %v15227_v21 = vld [vmem:[#allocation173_spill] sm:$0xff] }
 0x5f3   : > { %v7074_v8 = vadd.f32 %v7073_v10, %v6966_v34  ;;  %v7080_v36 = vadd.f32 %v7079_v33, %v6971_v20  ;;  %v6465_v4 = vadd.f32 %v6369_v2, %v15222_v5  ;;  %v13785_v52 = vadd.f32 %v15224_v29, %v15223_v53  ;;  %v15229_v53 = vld [vmem:[#allocation90_spill] sm:$0xff]  ;;  %v15231_v10 = vld [vmem:[#allocation95_spill] sm:$0xff] }
 0x5f4   : > { %15221 = vst [vmem:[#allocation151_spill] sm:$0xff] %v13780_v1  ;;  %v6858_v23 = vadd.f32 %v6857_v48, %v13748_v51  ;;  %v6974_v0 = vmul.f32 %v13748_v51, %v13748_v51  ;;  %v6466_v39 = vadd.f32 %v6370_v42, %v13434_v54  ;;  %v13793_v3 = vadd.f32 %v15227_v21, %v15226_v56 }
 0x5f5   : > { %15225 = vst [vmem:[#allocation47_spill] sm:$0xff] %v13785_v52  ;;  %v7075_v37 = vadd.f32 %v7074_v8, %v6967_v28  ;;  %v7081_v9 = vadd.f32 %v7080_v36, %v6972_v43  ;;  %v6467_v34 = vadd.f32 %v6371_v26, %v6227_v50  ;;  %v6861_v5 = vadd.f32 %v13785_v52, %v13780_v1  ;;  %v15233_v50 = vld [vmem:[#allocation98_spill] sm:$0xff] }
 0x5f6   : > { %15228 = vst [vmem:[#allocation149_spill] sm:$0xff] %v13793_v3  ;;  %6859 = vadd.xlane.f32.xlu0 %v6858_v23  ;;  %v13798_v20 = vadd.f32 %v6465_v4, %v15229_v53  ;;  %v13801_v33 = vadd.f32 %v6466_v39, %v15231_v10  ;;  %v6975_v54 = vmul.f32 %v13780_v1, %v13780_v1  ;;  %v15245_v1 = vld [vmem:[#allocation113_spill] sm:$0xff] }
 0x5f7   : > { %v6976_v42 = vmul.f32 %v13785_v52, %v13785_v52  ;;  %v7076_v32 = vadd.f32 %v7075_v37, %v6968_v6  ;;  %v7082_v8 = vadd.f32 %v7081_v9, %v6973_v12  ;;  %v6862_v36 = vadd.f32 %v6861_v5, %v13793_v3 }
 0x5f8   : > { %15230 = vst [vmem:[#allocation44_spill] sm:$0xff] %v13798_v20  ;;  %15232 = vst [vmem:[#allocation150_spill] sm:$0xff] %v13801_v33  ;;  %v6977_v28 = vmul.f32 %v13793_v3, %v13793_v3  ;;  %v13811_v2 = vadd.f32 %v6467_v34, %v15233_v50  ;;  %v6978_v26 = vmul.f32 %v13798_v20, %v13798_v20 }
 0x5f9   : > { %v7086_v43 = vadd.f32 %v6976_v42, %v6975_v54  ;;  %7077 = vadd.xlane.f32.xlu1 %v7076_v32  ;;  %v7083_v4 = vadd.f32 %v7082_v8, %v6974_v0  ;;  %v6863_v48 = vadd.f32 %v6862_v36, %v13798_v20  ;;  %v6979_v6 = vmul.f32 %v13801_v33, %v13801_v33  ;;  %v7366_v42 = vld [vmem:[#allocation12 + $0x3] ss:$8 sm:$0xf]  ;;  %v7497_v8 = vld [vmem:[#allocation12 + $0x4] ss:$8 sm:$0xf] }
 0x5fa   : > { %15234 = vst [vmem:[#allocation34_spill] sm:$0xff] %v13811_v2  ;;  %v6980_v0 = vmul.f32 %v13811_v2, %v13811_v2  ;;  %v7367_v32 = vld [vmem:[#allocation12 + $0x3] ss:$8 sm:$0x30]  ;;  %v15244_v20 = vld [vmem:[#allocation62_spill] sm:$0xff] }
 0x5fb   : > { %v7087_v12 = vadd.f32 %v7086_v43, %v6977_v28  ;;  %7084 = vadd.xlane.f32.xlu0 %v7083_v4  ;;  %v6864_v29 = vadd.f32 %v6863_v48, %v13801_v33  ;;  %v6762_v21 = vpop.xlane.xlu0 %6761  ;;  %v7498_v36 = vld [vmem:[#allocation12 + $0x4] ss:$8 sm:$0x30]  ;;  %v7368_v28 = vor.u32 %v7367_v32, %v7366_v42  ;;  %v15235_v48 = vld [vmem:[#allocation22_spill] sm:$0xff] }
 0x5fc   : > { %v6869_v37 = vmul.f32 0.0013020834, %v6762_v21  ;;  %v7499_v43 = vor.u32 %v7498_v36, %v7497_v8  ;;  %v15241_v42 = vld [vmem:[#allocation37_spill] sm:$0xff] }
 0x5fd   : > { %v7088_v23 = vadd.f32 %v7087_v12, %v6978_v26  ;;  %v6865_v39 = vadd.f32 %v6864_v29, %v13811_v2  ;;  %v13823_v26 = vrot.slane %v7368_v28, %v15235_v48  ;;  %v15236_v29 = vld [vmem:[#allocation23_spill] sm:$0xff]  ;;  %v15243_v33 = vld [vmem:[#allocation65_spill] sm:$0xff] }
 0x5fe   : > { %v7109_v5 = vmul.f32 %v6869_v37, %v6869_v37  ;;  %v13828_v12 = vrot.slane %v7499_v43, %v15235_v48  ;;  %v7141_v32 = vsub.f32 %v15241_v42, %v6869_v37  ;;  %v13849_v8 = vrot.slane %v7499_v43, %v15236_v29  ;;  %v15242_v48 = vld [vmem:[#allocation32_spill] sm:$0xff] }
 0x5ff   : > { %v7089_v56 = vadd.f32 %v7088_v23, %v6979_v6  ;;  %6866 = vadd.xlane.f32.xlu1 %v6865_v39  ;;  %v13831_v23 = vrot.slane %v7368_v28, %v15236_v29  ;;  %v15237_v39 = vld [vmem:[#allocation24_spill] sm:$0xff]  ;;  %v7142_v2 = vsub.f32 %v15242_v48, %v6869_v37  ;;  %v7145_v51 = vsub.f32 %v15245_v1, %v6869_v37 }
 0x600   : > { %v13852_v36 = vrot.slane %v7499_v43, %v15237_v39  ;;  %v7146_v42 = vsub.f32 %v13007_v15, %v6869_v37 }
 0x601   : > { %v7090_v9 = vadd.f32 %v7089_v56, %v6980_v0  ;;  %v6987_v34 = vpop.xlane.xlu0 %6986  ;;  %v13834_v0 = vrot.slane %v7368_v28, %v15237_v39  ;;  %v15238_v56 = vld [vmem:[#allocation52_spill] sm:$0xff] }
 0x602   : > { %v7093_v53 = vmul.f32 0.0013020834, %v6987_v34  ;;  %v13837_v21 = vrot.slane %v7368_v28, %v15238_v56 }
 0x603   : > { %7091 = vadd.xlane.f32.xlu1 %v7090_v9  ;;  %v15239_v9 = vld [vmem:[#allocation53_spill] sm:$0xff] }
 0x604   : > { %v7125_v10 = vsub.f32 %v7093_v53, %v7109_v5  ;;  %v13840_v34 = vrot.slane %v7368_v28, %v15239_v9  ;;  %v15240_v5 = vld [vmem:[#allocation104_spill] sm:$0xff]  ;;  %v13864_v29 = vrot.slane %v7499_v43, %v15239_v9 }
 0x605   : > { %v13843_v53 = vrot.slane %v7368_v28, %v15240_v5  ;;  %v7143_v28 = vsub.f32 %v15243_v33, %v6869_v37  ;;  %v13867_v39 = vrot.slane %v7499_v43, %v15240_v5 }
 0x606   : > { %v7237_v54 = vadd.f32 1e-12, %v7125_v10 }
 0x608   : > { %9528 = vrsqrt.f32 %v7237_v54 }
 0x60e   : > { %v6769_v50 = vpop.xlane.xlu0 %6768 }
 0x60f   : > { %v6994_v4 = vpop.xlane.xlu1 %6993  ;;  %v13825_v6 = vmul.f32 0.0013020834, %v6769_v50  ;;  %v13855_v50 = vrot.slane %v7499_v43, %v15238_v56 }
 0x610   : > { %v7094_v10 = vmul.f32 0.0013020834, %v6994_v4  ;;  %v7144_v4 = vsub.f32 %v15244_v20, %v6869_v37 }
 0x611   : > { %v7110_v54 = vmul.f32 %v13825_v6, %v13825_v6 }
 0x613   : > { %v7126_v3 = vsub.f32 %v7094_v10, %v7110_v54 }
 0x615   : > { %v9529_v52 = vpop.eup %9528  ;;  %v7238_v10 = vadd.f32 1e-12, %v7126_v3 }
 0x616   : > { %v7269_v56 = vmul.f32 %v9529_v52, %v7141_v32  ;;  %v7270_v59 = vmul.f32 %v9529_v52, %v7142_v2  ;;  %v7271_v48 = vmul.f32 %v9529_v52, %v7143_v28  ;;  %v7272_v25 = vmul.f32 %v9529_v52, %v7144_v4  ;;  %v6776_v33 = vpop.xlane.xlu1 %6775 }
 0x617   : > { %v7273_v63 = vmul.f32 %v9529_v52, %v7145_v51  ;;  %v7274_v20 = vmul.f32 %v9529_v52, %v7146_v42  ;;  %v13869_v54 = vmul.f32 0.0013020834, %v6776_v33  ;;  %9530 = vrsqrt.f32 %v7238_v10 }
 0x618   : > { %v7400_v1 = vmul.f32 %v13831_v23, %v7269_v56  ;;  %v7401_v15 = vmul.f32 %v13834_v0, %v7270_v59  ;;  %v7402_v37 = vmul.f32 %v13837_v21, %v7271_v48  ;;  %v7403_v9 = vmul.f32 %v13840_v34, %v7272_v25 }
 0x619   : > { %v7404_v43 = vmul.f32 %v13843_v53, %v7273_v63  ;;  %v7405_v2 = vmul.f32 %v13823_v26, %v7274_v20  ;;  %v7111_v63 = vmul.f32 %v13869_v54, %v13869_v54  ;;  %v7147_v56 = vsub.f32 %v13068_v49, %v13825_v6 }
 0x61a   : > { %v7531_v5 = vadd.f32 %v13849_v8, %v7400_v1  ;;  %v7532_v51 = vadd.f32 %v13852_v36, %v7401_v15  ;;  %v7533_v52 = vadd.f32 %v13855_v50, %v7402_v37  ;;  %v7534_v3 = vadd.f32 %v13864_v29, %v7403_v9  ;;  %v15246_v15 = vld [vmem:[#allocation111_spill] sm:$0xff] }
 0x61b   : > { %v7535_v32 = vadd.f32 %v13867_v39, %v7404_v43  ;;  %v7536_v59 = vadd.f32 %v13828_v12, %v7405_v2  ;;  %v7148_v48 = vsub.f32 %v13072_v60, %v13825_v6  ;;  %v7149_v33 = vsub.f32 %v13076_v14, %v13825_v6 }
 0x61c   : > { %7627 = vst [vmem:[%s13883_s2] sm:$0xff] %v7531_v5  ;;  %7628 = vst [vmem:[%s13883_s2 + $0x8] sm:$0xff] %v7532_v51  ;;  %v7001_v25 = vpop.xlane.xlu0 %7000  ;;  %v7150_v20 = vsub.f32 %v13079_v40, %v13825_v6  ;;  %v7151_v1 = vsub.f32 %v13082_v55, %v13825_v6  ;;  %v7152_v37 = vsub.f32 %v15246_v15, %v13825_v6 }
 0x61d   : > { %7629 = vst [vmem:[%s13883_s2 + $0x10] sm:$0xff] %v7533_v52  ;;  %7630 = vst [vmem:[%s13883_s2 + $0x18] sm:$0xff] %v7534_v3  ;;  %v7095_v28 = vmul.f32 0.0013020834, %v7001_v25 }
 0x61e   : > { %7631 = vst [vmem:[%s13883_s2 + $0x20] sm:$0xff] %v7535_v32  ;;  %7632 = vst [vmem:[%s13883_s2 + $0x28] sm:$0xff] %v7536_v59 }
 0x61f   : > { %v7127_v4 = vsub.f32 %v7095_v28, %v7111_v63 }
 0x621   : > { %v7239_v42 = vadd.f32 1e-12, %v7127_v4 }
 0x623   : > { %9532 = vrsqrt.f32 %v7239_v42  ;;  %v6783_v6 = vpop.xlane.xlu1 %6782 }
 0x624   : > { %v9531_v10 = vpop.eup %9530 }
 0x625   : > { %v7275_v9 = vmul.f32 %v9531_v10, %v7147_v56  ;;  %v7276_v43 = vmul.f32 %v9531_v10, %v7148_v48  ;;  %v7277_v2 = vmul.f32 %v9531_v10, %v7149_v33  ;;  %v7278_v49 = vmul.f32 %v9531_v10, %v7150_v20  ;;  %v15247_v48 = vld [vmem:[#allocation35_spill] sm:$0xff] }
 0x626   : > { %v7279_v5 = vmul.f32 %v9531_v10, %v7151_v1  ;;  %v7280_v60 = vmul.f32 %v9531_v10, %v7152_v37  ;;  %v13921_v56 = vmul.f32 0.0013020834, %v6783_v6  ;;  %v7153_v33 = vsub.f32 %v15247_v48, %v13869_v54  ;;  %v15248_v1 = vld [vmem:[#allocation30_spill] sm:$0xff]  ;;  %v15249_v37 = vld [vmem:[#allocation61_spill] sm:$0xff] }
 0x627   : > { %v7406_v14 = vmul.f32 %v13831_v23, %v7275_v9  ;;  %v7407_v40 = vmul.f32 %v13834_v0, %v7276_v43  ;;  %v7408_v51 = vmul.f32 %v13837_v21, %v7277_v2  ;;  %v7409_v55 = vmul.f32 %v13840_v34, %v7278_v49  ;;  %v15250_v43 = vld [vmem:[#allocation63_spill] sm:$0xff] }
 0x628   : > { %v7410_v52 = vmul.f32 %v13843_v53, %v7279_v5  ;;  %v7411_v3 = vmul.f32 %v13823_v26, %v7280_v60  ;;  %v7154_v15 = vsub.f32 %v15248_v1, %v13869_v54  ;;  %v7155_v9 = vsub.f32 %v15249_v37, %v13869_v54  ;;  %v15251_v60 = vld [vmem:[#allocation110_spill] sm:$0xff] }
 0x629   : > { %v7537_v32 = vadd.f32 %v13849_v8, %v7406_v14  ;;  %v7538_v59 = vadd.f32 %v13852_v36, %v7407_v40  ;;  %v7539_v63 = vadd.f32 %v13855_v50, %v7408_v51  ;;  %v7540_v25 = vadd.f32 %v13864_v29, %v7409_v55  ;;  %v15252_v40 = vld [vmem:[#allocation112_spill] sm:$0xff] }
 0x62a   : > { %v7541_v28 = vadd.f32 %v13867_v39, %v7410_v52  ;;  %v7542_v4 = vadd.f32 %v13828_v12, %v7411_v3  ;;  %v7156_v2 = vsub.f32 %v15250_v43, %v13869_v54  ;;  %v7157_v14 = vsub.f32 %v15251_v60, %v13869_v54 }
 0x62b   : > { %7633 = vst [vmem:[%s13883_s2 + $0x30] sm:$0xff] %v7537_v32  ;;  %7634 = vst [vmem:[%s13883_s2 + $0x38] sm:$0xff] %v7538_v59  ;;  %v7158_v51 = vsub.f32 %v15252_v40, %v13869_v54  ;;  %v7112_v55 = vmul.f32 %v13921_v56, %v13921_v56 }
 0x62c   : > { %v6790_v42 = vpop.xlane.xlu0 %6789  ;;  %7635 = vst [vmem:[%s13883_s2 + $0x40] sm:$0xff] %v7539_v63  ;;  %7636 = vst [vmem:[%s13883_s2 + $0x48] sm:$0xff] %v7540_v25 }
 0x62d   : > { %7637 = vst [vmem:[%s13883_s2 + $0x50] sm:$0xff] %v7541_v28  ;;  %7638 = vst [vmem:[%s13883_s2 + $0x58] sm:$0xff] %v7542_v4  ;;  %v13927_v20 = vmul.f32 0.0013020834, %v6790_v42 }
 0x62f   : > { %v7008_v10 = vpop.xlane.xlu1 %7007  ;;  %v7113_v28 = vmul.f32 %v13927_v20, %v13927_v20 }
 0x630   : > { %v7096_v49 = vmul.f32 0.0013020834, %v7008_v10  ;;  %v9533_v5 = vpop.eup %9532 }
 0x631   : > { %v7281_v6 = vmul.f32 %v9533_v5, %v7153_v33  ;;  %v7282_v52 = vmul.f32 %v9533_v5, %v7154_v15  ;;  %v7283_v3 = vmul.f32 %v9533_v5, %v7155_v9  ;;  %v7284_v32 = vmul.f32 %v9533_v5, %v7156_v2 }
 0x632   : > { %v7285_v59 = vmul.f32 %v9533_v5, %v7157_v14  ;;  %v7286_v63 = vmul.f32 %v9533_v5, %v7158_v51  ;;  %v7128_v25 = vsub.f32 %v7096_v49, %v7112_v55  ;;  %v7159_v55 = vsub.f32 %v13199_v16, %v13921_v56  ;;  %v15257_v16 = vld [vmem:[#allocation103_spill] sm:$0xff] }
 0x633   : > { %v7412_v4 = vmul.f32 %v13831_v23, %v7281_v6  ;;  %v7413_v42 = vmul.f32 %v13834_v0, %v7282_v52  ;;  %v7414_v54 = vmul.f32 %v13837_v21, %v7283_v3  ;;  %v7415_v48 = vmul.f32 %v13840_v34, %v7284_v32  ;;  %v15253_v3 = vld [vmem:[#allocation41_spill] sm:$0xff] }
 0x634   : > { %v7015_v33 = vpop.xlane.xlu0 %7014  ;;  %v7416_v10 = vmul.f32 %v13843_v53, %v7285_v59  ;;  %v7417_v1 = vmul.f32 %v13823_v26, %v7286_v63  ;;  %v7240_v15 = vadd.f32 1e-12, %v7128_v25  ;;  %v7160_v52 = vsub.f32 %v13203_v44, %v13921_v56  ;;  %v15254_v59 = vld [vmem:[#allocation108_spill] sm:$0xff] }
 0x635   : > { %v7097_v37 = vmul.f32 0.0013020834, %v7015_v33  ;;  %v7543_v9 = vadd.f32 %v13849_v8, %v7412_v4  ;;  %v7544_v43 = vadd.f32 %v13852_v36, %v7413_v42  ;;  %v7545_v2 = vadd.f32 %v13855_v50, %v7414_v54  ;;  %v15256_v42 = vld [vmem:[#allocation132_spill] sm:$0xff] }
 0x636   : > { %v7546_v49 = vadd.f32 %v13864_v29, %v7415_v48  ;;  %v7547_v5 = vadd.f32 %v13867_v39, %v7416_v10  ;;  %v7548_v60 = vadd.f32 %v13828_v12, %v7417_v1  ;;  %9534 = vrsqrt.f32 %v7240_v15  ;;  %v15258_v33 = vld [vmem:[#allocation72_spill] sm:$0xff]  ;;  %v15259_v1 = vld [vmem:[#allocation70_spill] sm:$0xff] }
 0x637   : > { %v7129_v14 = vsub.f32 %v7097_v37, %v7113_v28  ;;  %7639 = vst [vmem:[%s13883_s2 + $0x60] sm:$0xff] %v7543_v9  ;;  %7640 = vst [vmem:[%s13883_s2 + $0x68] sm:$0xff] %v7544_v43  ;;  %v7161_v32 = vsub.f32 %v15253_v3, %v13921_v56  ;;  %v7162_v63 = vsub.f32 %v15254_v59, %v13921_v56  ;;  %v15255_v28 = vld [vmem:[#allocation38_spill] sm:$0xff]  ;;  %v15260_v37 = vld [vmem:[#allocation117_spill] sm:$0xff] }
 0x638   : > { %7641 = vst [vmem:[%s13883_s2 + $0x70] sm:$0xff] %v7545_v2  ;;  %7642 = vst [vmem:[%s13883_s2 + $0x78] sm:$0xff] %v7546_v49  ;;  %v7163_v4 = vsub.f32 %v15255_v28, %v13921_v56  ;;  %v7164_v54 = vsub.f32 %v15256_v42, %v13921_v56  ;;  %v7165_v48 = vsub.f32 %v15257_v16, %v13927_v20  ;;  %v15261_v43 = vld [vmem:[#allocation115_spill] sm:$0xff] }
 0x639   : > { %7643 = vst [vmem:[%s13883_s2 + $0x80] sm:$0xff] %v7547_v5  ;;  %7644 = vst [vmem:[%s13883_s2 + $0x88] sm:$0xff] %v7548_v60  ;;  %v7241_v40 = vadd.f32 1e-12, %v7129_v14  ;;  %v7166_v44 = vsub.f32 %v15258_v33, %v13927_v20  ;;  %v7167_v15 = vsub.f32 %v15259_v1, %v13927_v20  ;;  %v7168_v9 = vsub.f32 %v15260_v37, %v13927_v20 }
 0x63a   : > { %v7169_v2 = vsub.f32 %v15261_v43, %v13927_v20 }
 0x63b   : > { %9536 = vrsqrt.f32 %v7241_v40 }
 0x63c   : > { %v6797_v51 = vpop.xlane.xlu1 %6796 }
 0x63d   : > { %v13969_v25 = vmul.f32 0.0013020834, %v6797_v51  ;;  %v15262_v51 = vld [vmem:[#allocation136_spill] sm:$0xff] }
 0x63e   : > { %v7170_v3 = vsub.f32 %v15262_v51, %v13927_v20 }
 0x63f   : > { %v7114_v42 = vmul.f32 %v13969_v25, %v13969_v25 }
 0x641   : > { %v6804_v6 = vpop.xlane.xlu0 %6803 }
 0x642   : > { %v13985_v49 = vmul.f32 0.0013020834, %v6804_v6 }
 0x643   : > { %v9535_v10 = vpop.eup %9534 }
 0x644   : > { %v7287_v5 = vmul.f32 %v9535_v10, %v7159_v55  ;;  %v7288_v56 = vmul.f32 %v9535_v10, %v7160_v52  ;;  %v7289_v60 = vmul.f32 %v9535_v10, %v7161_v32  ;;  %v7290_v14 = vmul.f32 %v9535_v10, %v7162_v63  ;;  %v7022_v40 = vpop.xlane.xlu1 %7021 }
 0x645   : > { %v7291_v59 = vmul.f32 %v9535_v10, %v7163_v4  ;;  %v7292_v28 = vmul.f32 %v9535_v10, %v7164_v54  ;;  %v7098_v63 = vmul.f32 0.0013020834, %v7022_v40  ;;  %v7115_v4 = vmul.f32 %v13985_v49, %v13985_v49 }
 0x646   : > { %v7418_v16 = vmul.f32 %v13831_v23, %v7287_v5  ;;  %v7419_v33 = vmul.f32 %v13834_v0, %v7288_v56  ;;  %v7420_v6 = vmul.f32 %v13837_v21, %v7289_v60  ;;  %v7421_v55 = vmul.f32 %v13840_v34, %v7290_v14  ;;  %v7029_v43 = vpop.xlane.xlu0 %7028 }
 0x647   : > { %v7422_v32 = vmul.f32 %v13843_v53, %v7291_v59  ;;  %v7423_v20 = vmul.f32 %v13823_v26, %v7292_v28 }
 0x648   : > { %v9537_v52 = vpop.eup %9536  ;;  %v7549_v54 = vadd.f32 %v13849_v8, %v7418_v16  ;;  %v7550_v10 = vadd.f32 %v13852_v36, %v7419_v33  ;;  %v7551_v1 = vadd.f32 %v13855_v50, %v7420_v6  ;;  %v7552_v37 = vadd.f32 %v13864_v29, %v7421_v55 }
 0x649   : > { %v7553_v5 = vadd.f32 %v13867_v39, %v7422_v32  ;;  %v7554_v56 = vadd.f32 %v13828_v12, %v7423_v20  ;;  %v7293_v60 = vmul.f32 %v9537_v52, %v7165_v48  ;;  %v7294_v14 = vmul.f32 %v9537_v52, %v7166_v44 }
 0x64a   : > { %7645 = vst [vmem:[%s13883_s2 + $0x90] sm:$0xff] %v7549_v54  ;;  %7646 = vst [vmem:[%s13883_s2 + $0x98] sm:$0xff] %v7550_v10  ;;  %v7295_v40 = vmul.f32 %v9537_v52, %v7167_v15  ;;  %v7296_v51 = vmul.f32 %v9537_v52, %v7168_v9  ;;  %v7297_v59 = vmul.f32 %v9537_v52, %v7169_v2  ;;  %v7099_v55 = vmul.f32 0.0013020834, %v7029_v43 }
 0x64b   : > { %7647 = vst [vmem:[%s13883_s2 + $0xa0] sm:$0xff] %v7551_v1  ;;  %7648 = vst [vmem:[%s13883_s2 + $0xa8] sm:$0xff] %v7552_v37  ;;  %v7298_v28 = vmul.f32 %v9537_v52, %v7170_v3  ;;  %v7424_v16 = vmul.f32 %v13831_v23, %v7293_v60  ;;  %v7425_v33 = vmul.f32 %v13834_v0, %v7294_v14 }
 0x64c   : > { %7649 = vst [vmem:[%s13883_s2 + $0xb0] sm:$0xff] %v7553_v5  ;;  %7650 = vst [vmem:[%s13883_s2 + $0xb8] sm:$0xff] %v7554_v56  ;;  %v7130_v6 = vsub.f32 %v7098_v63, %v7114_v42  ;;  %v7426_v48 = vmul.f32 %v13837_v21, %v7295_v40  ;;  %v7427_v44 = vmul.f32 %v13840_v34, %v7296_v51 }
 0x64d   : > { %v7428_v15 = vmul.f32 %v13843_v53, %v7297_v59  ;;  %v7429_v9 = vmul.f32 %v13823_v26, %v7298_v28  ;;  %v7555_v2 = vadd.f32 %v13849_v8, %v7424_v16  ;;  %v7556_v3 = vadd.f32 %v13852_v36, %v7425_v33  ;;  %v6811_v32 = vpop.xlane.xlu1 %6810 }
 0x64e   : > { %v7242_v52 = vadd.f32 1e-12, %v7130_v6  ;;  %v7131_v42 = vsub.f32 %v7099_v55, %v7115_v4  ;;  %v7557_v20 = vadd.f32 %v13855_v50, %v7426_v48  ;;  %v7558_v63 = vadd.f32 %v13864_v29, %v7427_v44  ;;  %v15263_v48 = vld [vmem:[#allocation39_spill] sm:$0xff] }
 0x64f   : > { %v7559_v54 = vadd.f32 %v13867_v39, %v7428_v15  ;;  %v7560_v10 = vadd.f32 %v13828_v12, %v7429_v9  ;;  %7651 = vst [vmem:[%s13883_s2 + $0xc0] sm:$0xff] %v7555_v2  ;;  %7652 = vst [vmem:[%s13883_s2 + $0xc8] sm:$0xff] %v7556_v3  ;;  %v14029_v4 = vmul.f32 0.0013020834, %v6811_v32  ;;  %v7171_v28 = vsub.f32 %v13318_v31, %v13969_v25  ;;  %v15264_v15 = vld [vmem:[#allocation133_spill] sm:$0xff]  ;;  %v15265_v3 = vld [vmem:[#allocation36_spill] sm:$0xff] }
 0x650   : > { %9538 = vrsqrt.f32 %v7242_v52  ;;  %v7243_v1 = vadd.f32 1e-12, %v7131_v42  ;;  %7653 = vst [vmem:[%s13883_s2 + $0xd0] sm:$0xff] %v7557_v20  ;;  %7654 = vst [vmem:[%s13883_s2 + $0xd8] sm:$0xff] %v7558_v63  ;;  %v7172_v16 = vsub.f32 %v13322_v61, %v13969_v25  ;;  %v7173_v33 = vsub.f32 %v13331_v46, %v13969_v25  ;;  %v15266_v52 = vld [vmem:[#allocation135_spill] sm:$0xff]  ;;  %v15267_v42 = vld [vmem:[#allocation69_spill] sm:$0xff] }
 0x651   : > { %7655 = vst [vmem:[%s13883_s2 + $0xe0] sm:$0xff] %v7559_v54  ;;  %7656 = vst [vmem:[%s13883_s2 + $0xe8] sm:$0xff] %v7560_v10  ;;  %v6818_v37 = vpop.xlane.xlu0 %6817  ;;  %v7116_v56 = vmul.f32 %v14029_v4, %v14029_v4  ;;  %v7174_v55 = vsub.f32 %v13334_v47, %v13969_v25  ;;  %v7175_v44 = vsub.f32 %v15263_v48, %v13969_v25  ;;  %v15268_v20 = vld [vmem:[#allocation134_spill] sm:$0xff]  ;;  %v15269_v63 = vld [vmem:[#allocation71_spill] sm:$0xff] }
 0x652   : > { %9540 = vrsqrt.f32 %v7243_v1  ;;  %v14031_v43 = vmul.f32 0.0013020834, %v6818_v37  ;;  %v7176_v9 = vsub.f32 %v15264_v15, %v13969_v25  ;;  %v7177_v31 = vsub.f32 %v15265_v3, %v13985_v49 }
 0x653   : > { %v7178_v61 = vsub.f32 %v15266_v52, %v13985_v49  ;;  %v7179_v46 = vsub.f32 %v15267_v42, %v13985_v49  ;;  %v7180_v47 = vsub.f32 %v15268_v20, %v13985_v49  ;;  %v7181_v54 = vsub.f32 %v15269_v63, %v13985_v49 }
 0x654   : > { %v7036_v5 = vpop.xlane.xlu1 %7035  ;;  %v7117_v40 = vmul.f32 %v14031_v43, %v14031_v43  ;;  %v7182_v25 = vsub.f32 %v13383_v35, %v13985_v49  ;;  %v7183_v1 = vsub.f32 %v13419_v7, %v14029_v4  ;;  %v7184_v37 = vsub.f32 %v13423_v45, %v14029_v4 }
 0x655   : > { %v7100_v60 = vmul.f32 0.0013020834, %v7036_v5  ;;  %v7185_v5 = vsub.f32 %v13427_v22, %v14029_v4  ;;  %v7186_v35 = vsub.f32 %v13431_v38, %v14029_v4  ;;  %v7187_v49 = vsub.f32 %v13437_v41, %v14029_v4 }
 0x657   : > { %v7043_v14 = vpop.xlane.xlu0 %7042  ;;  %v7132_v59 = vsub.f32 %v7100_v60, %v7116_v56 }
 0x658   : > { %v7101_v51 = vmul.f32 0.0013020834, %v7043_v14 }
 0x659   : > { %v7244_v2 = vadd.f32 1e-12, %v7132_v59 }
 0x65a   : > { %v7133_v6 = vsub.f32 %v7101_v51, %v7117_v40 }
 0x65b   : > { %9542 = vrsqrt.f32 %v7244_v2 }
 0x65c   : > { %v7245_v32 = vadd.f32 1e-12, %v7133_v6 }
 0x65d   : > { %v9539_v10 = vpop.eup %9538 }
 0x65e   : > { %9544 = vrsqrt.f32 %v7245_v32  ;;  %v7299_v56 = vmul.f32 %v9539_v10, %v7171_v28  ;;  %v7300_v60 = vmul.f32 %v9539_v10, %v7172_v16  ;;  %v7301_v14 = vmul.f32 %v9539_v10, %v7173_v33  ;;  %v6825_v16 = vpop.xlane.xlu1 %6824 }
 0x65f   : > { %v7302_v40 = vmul.f32 %v9539_v10, %v7174_v55  ;;  %v9541_v51 = vpop.eup %9540  ;;  %v7303_v59 = vmul.f32 %v9539_v10, %v7175_v44  ;;  %v7304_v6 = vmul.f32 %v9539_v10, %v7176_v9 }
 0x660   : > { %v7430_v48 = vmul.f32 %v13831_v23, %v7299_v56  ;;  %v7431_v15 = vmul.f32 %v13834_v0, %v7300_v60  ;;  %v7432_v2 = vmul.f32 %v13837_v21, %v7301_v14  ;;  %v7305_v55 = vmul.f32 %v9541_v51, %v7177_v31 }
 0x661   : > { %v7433_v28 = vmul.f32 %v13840_v34, %v7302_v40  ;;  %v7434_v33 = vmul.f32 %v13843_v53, %v7303_v59  ;;  %v7435_v38 = vmul.f32 %v13823_v26, %v7304_v6  ;;  %v7306_v44 = vmul.f32 %v9541_v51, %v7178_v61  ;;  %v6832_v14 = vpop.xlane.xlu0 %6831  ;;  %v15270_v59 = vld [vmem:[#allocation114_spill] sm:$0xff] }
 0x662   : > { %v7561_v9 = vadd.f32 %v13849_v8, %v7430_v48  ;;  %v7562_v3 = vadd.f32 %v13852_v36, %v7431_v15  ;;  %v7563_v52 = vadd.f32 %v13855_v50, %v7432_v2  ;;  %v7307_v63 = vmul.f32 %v9541_v51, %v7179_v46 }
 0x663   : > { %v7564_v42 = vadd.f32 %v13864_v29, %v7433_v28  ;;  %v7565_v32 = vadd.f32 %v13867_v39, %v7434_v33  ;;  %v7566_v20 = vadd.f32 %v13828_v12, %v7435_v38  ;;  %v7308_v10 = vmul.f32 %v9541_v51, %v7180_v47  ;;  %v7050_v15 = vpop.xlane.xlu1 %7049  ;;  %v15272_v38 = vld [vmem:[#allocation140_spill] sm:$0xff] }
 0x664   : > { %7657 = vst [vmem:[%s13883_s2 + $0xf0] sm:$0xff] %v7561_v9  ;;  %7658 = vst [vmem:[%s13883_s2 + $0xf8] sm:$0xff] %v7562_v3  ;;  %v7309_v31 = vmul.f32 %v9541_v51, %v7181_v54  ;;  %v7310_v61 = vmul.f32 %v9541_v51, %v7182_v25  ;;  %v7436_v56 = vmul.f32 %v13831_v23, %v7305_v55  ;;  %v15273_v3 = vld [vmem:[#allocation42_spill] sm:$0xff] }
 0x665   : > { %7659 = vst [vmem:[%s13883_s2 + $0x100] sm:$0xff] %v7563_v52  ;;  %7660 = vst [vmem:[%s13883_s2 + $0x108] sm:$0xff] %v7564_v42  ;;  %v7437_v60 = vmul.f32 %v13834_v0, %v7306_v44  ;;  %v7438_v40 = vmul.f32 %v13837_v21, %v7307_v63  ;;  %v7439_v46 = vmul.f32 %v13840_v34, %v7308_v10  ;;  %v15274_v42 = vld [vmem:[#allocation139_spill] sm:$0xff]  ;;  %v15275_v63 = vld [vmem:[#allocation45_spill] sm:$0xff] }
 0x666   : > { %7661 = vst [vmem:[%s13883_s2 + $0x110] sm:$0xff] %v7565_v32  ;;  %7662 = vst [vmem:[%s13883_s2 + $0x118] sm:$0xff] %v7566_v20  ;;  %v7188_v47 = vsub.f32 %v13444_v11, %v14029_v4  ;;  %v7189_v54 = vsub.f32 %v15270_v59, %v14031_v43  ;;  %v7440_v25 = vmul.f32 %v13843_v53, %v7309_v31  ;;  %v15271_v11 = vld [vmem:[#allocation116_spill] sm:$0xff]  ;;  %v14119_v31 = vmul.f32 0.0013020834, %v6825_v16  ;;  %v7057_v59 = vpop.xlane.xlu0 %7056 }
 0x667   : > { %v7441_v51 = vmul.f32 %v13823_v26, %v7310_v61  ;;  %v7567_v6 = vadd.f32 %v13849_v8, %v7436_v56  ;;  %v7568_v48 = vadd.f32 %v13852_v36, %v7437_v60  ;;  %v7569_v2 = vadd.f32 %v13855_v50, %v7438_v40 }
 0x668   : > { %v7570_v28 = vadd.f32 %v13864_v29, %v7439_v46  ;;  %v7190_v33 = vsub.f32 %v15271_v11, %v14031_v43  ;;  %v7191_v55 = vsub.f32 %v15272_v38, %v14031_v43  ;;  %v7571_v44 = vadd.f32 %v13867_v39, %v7440_v25  ;;  %v9543_v20 = vpop.eup %9542 }
 0x669   : > { %v7572_v9 = vadd.f32 %v13828_v12, %v7441_v51  ;;  %7663 = vst [vmem:[%s13883_s2 + $0x120] sm:$0xff] %v7567_v6  ;;  %7664 = vst [vmem:[%s13883_s2 + $0x128] sm:$0xff] %v7568_v48  ;;  %v7192_v52 = vsub.f32 %v15273_v3, %v14031_v43  ;;  %v7193_v32 = vsub.f32 %v15274_v42, %v14031_v43  ;;  %v14121_v61 = vmul.f32 0.0013020834, %v6832_v14 }
 0x66a   : > { %7665 = vst [vmem:[%s13883_s2 + $0x130] sm:$0xff] %v7569_v2  ;;  %7666 = vst [vmem:[%s13883_s2 + $0x138] sm:$0xff] %v7570_v28  ;;  %v7194_v10 = vsub.f32 %v15275_v63, %v14031_v43  ;;  %v7102_v56 = vmul.f32 0.0013020834, %v7050_v15  ;;  %v7311_v40 = vmul.f32 %v9543_v20, %v7183_v1  ;;  %v7312_v46 = vmul.f32 %v9543_v20, %v7184_v37  ;;  %v6839_v48 = vpop.xlane.xlu1 %6838 }
 0x66b   : > { %v9545_v60 = vpop.eup %9544  ;;  %7667 = vst [vmem:[%s13883_s2 + $0x140] sm:$0xff] %v7571_v44  ;;  %7668 = vst [vmem:[%s13883_s2 + $0x148] sm:$0xff] %v7572_v9  ;;  %v7313_v43 = vmul.f32 %v9543_v20, %v7185_v5  ;;  %v7314_v16 = vmul.f32 %v9543_v20, %v7186_v35  ;;  %v7315_v14 = vmul.f32 %v9543_v20, %v7187_v49 }
 0x66c   : > { %v7316_v25 = vmul.f32 %v9543_v20, %v7188_v47  ;;  %v7317_v51 = vmul.f32 %v9545_v60, %v7189_v54  ;;  %v7318_v6 = vmul.f32 %v9545_v60, %v7190_v33  ;;  %v7442_v7 = vmul.f32 %v13831_v23, %v7311_v40 }
 0x66d   : > { %v7443_v1 = vmul.f32 %v13834_v0, %v7312_v46  ;;  %v7444_v45 = vmul.f32 %v13837_v21, %v7313_v43  ;;  %v7445_v22 = vmul.f32 %v13840_v34, %v7314_v16  ;;  %v7446_v37 = vmul.f32 %v13843_v53, %v7315_v14 }
 0x66e   : > { %v7447_v41 = vmul.f32 %v13823_v26, %v7316_v25  ;;  %v7319_v4 = vmul.f32 %v9545_v60, %v7191_v55  ;;  %v7320_v5 = vmul.f32 %v9545_v60, %v7192_v52  ;;  %v7573_v35 = vadd.f32 %v13849_v8, %v7442_v7 }
 0x66f   : > { %v7574_v49 = vadd.f32 %v13852_v36, %v7443_v1  ;;  %v7575_v47 = vadd.f32 %v13855_v50, %v7444_v45  ;;  %v7576_v54 = vadd.f32 %v13864_v29, %v7445_v22  ;;  %v7577_v15 = vadd.f32 %v13867_v39, %v7446_v37  ;;  %v6846_v9 = vpop.xlane.xlu0 %6845 }
 0x670   : > { %v7578_v2 = vadd.f32 %v13828_v12, %v7447_v41  ;;  %v7321_v28 = vmul.f32 %v9545_v60, %v7193_v32  ;;  %v7322_v11 = vmul.f32 %v9545_v60, %v7194_v10  ;;  %7669 = vst [vmem:[%s13883_s2 + $0x150] sm:$0xff] %v7573_v35  ;;  %v7448_v33 = vmul.f32 %v13831_v23, %v7317_v51 }
 0x671   : > { %7670 = vst [vmem:[%s13883_s2 + $0x158] sm:$0xff] %v7574_v49  ;;  %7671 = vst [vmem:[%s13883_s2 + $0x160] sm:$0xff] %v7575_v47  ;;  %v7449_v38 = vmul.f32 %v13834_v0, %v7318_v6  ;;  %v7450_v55 = vmul.f32 %v13837_v21, %v7319_v4  ;;  %v7451_v44 = vmul.f32 %v13840_v34, %v7320_v5  ;;  %v7103_v32 = vmul.f32 0.0013020834, %v7057_v59  ;;  %v15276_v47 = vld [vmem:[#allocation137_spill] sm:$0xff] }
 0x672   : > { %7672 = vst [vmem:[%s13883_s2 + $0x168] sm:$0xff] %v7576_v54  ;;  %7673 = vst [vmem:[%s13883_s2 + $0x170] sm:$0xff] %v7577_v15  ;;  %v7452_v3 = vmul.f32 %v13843_v53, %v7321_v28  ;;  %v7453_v52 = vmul.f32 %v13823_v26, %v7322_v11  ;;  %v7118_v42 = vmul.f32 %v14119_v31, %v14119_v31  ;;  %v14177_v51 = vmul.f32 0.0013020834, %v6839_v48  ;;  %v15277_v48 = vld [vmem:[#allocation33_spill] sm:$0xff]  ;;  %v15278_v11 = vld [vmem:[#allocation138_spill] sm:$0xff] }
 0x673   : > { %7674 = vst [vmem:[%s13883_s2 + $0x178] sm:$0xff] %v7578_v2  ;;  %v7579_v20 = vadd.f32 %v13849_v8, %v7448_v33  ;;  %v7580_v63 = vadd.f32 %v13852_v36, %v7449_v38  ;;  %v7581_v10 = vadd.f32 %v13855_v50, %v7450_v55  ;;  %v7582_v60 = vadd.f32 %v13864_v29, %v7451_v44  ;;  %v7064_v59 = vpop.xlane.xlu1 %7063  ;;  %v15280_v44 = vld [vmem:[#allocation121_spill] sm:$0xff] }
 0x674   : > { %v7583_v40 = vadd.f32 %v13867_v39, %v7452_v3  ;;  %v7584_v46 = vadd.f32 %v13828_v12, %v7453_v52  ;;  %v7134_v43 = vsub.f32 %v7102_v56, %v7118_v42  ;;  %v7119_v16 = vmul.f32 %v14121_v61, %v14121_v61  ;;  %v15282_v52 = vld [vmem:[#allocation144_spill] sm:$0xff] }
 0x675   : > { %7675 = vst [vmem:[%s13883_s2 + $0x180] sm:$0xff] %v7579_v20  ;;  %7676 = vst [vmem:[%s13883_s2 + $0x188] sm:$0xff] %v7580_v63  ;;  %v14179_v7 = vmul.f32 0.0013020834, %v6846_v9  ;;  %v7104_v45 = vmul.f32 0.0013020834, %v7064_v59  ;;  %v7120_v56 = vmul.f32 %v14177_v51, %v14177_v51  ;;  %v7195_v4 = vsub.f32 %v13510_v19, %v14119_v31 }
 0x676   : > { %7677 = vst [vmem:[%s13883_s2 + $0x190] sm:$0xff] %v7581_v10  ;;  %7678 = vst [vmem:[%s13883_s2 + $0x198] sm:$0xff] %v7582_v60  ;;  %v7246_v14 = vadd.f32 1e-12, %v7134_v43  ;;  %v7135_v25 = vsub.f32 %v7103_v32, %v7119_v16  ;;  %v7071_v6 = vpop.xlane.xlu0 %7070  ;;  %v7196_v5 = vsub.f32 %v13517_v13, %v14119_v31  ;;  %v7197_v49 = vsub.f32 %v13524_v17, %v14119_v31  ;;  %v15279_v19 = vld [vmem:[#allocation28_spill] sm:$0xff]  ;;  %v15281_v9 = vld [vmem:[#allocation119_spill] sm:$0xff] }
 0x677   : > { %7679 = vst [vmem:[%s13883_s2 + $0x1a0] sm:$0xff] %v7583_v40  ;;  %7680 = vst [vmem:[%s13883_s2 + $0x1a8] sm:$0xff] %v7584_v46  ;;  %v7105_v22 = vmul.f32 0.0013020834, %v7071_v6  ;;  %v7121_v41 = vmul.f32 %v14179_v7, %v14179_v7  ;;  %v7136_v35 = vsub.f32 %v7104_v45, %v7120_v56  ;;  %v7198_v54 = vsub.f32 %v15276_v47, %v14119_v31  ;;  %v15285_v6 = vld [vmem:[#allocation40_spill] sm:$0xff]  ;;  %v15286_v45 = vld [vmem:[#allocation143_spill] sm:$0xff] }
 0x678   : > { %9546 = vrsqrt.f32 %v7246_v14  ;;  %v7247_v1 = vadd.f32 1e-12, %v7135_v25  ;;  %v7199_v15 = vsub.f32 %v15277_v48, %v14119_v31  ;;  %v7200_v33 = vsub.f32 %v15278_v11, %v14119_v31  ;;  %v15284_v14 = vld [vmem:[#allocation141_spill] sm:$0xff]  ;;  %v15289_v11 = vld [vmem:[#allocation26_spill] sm:$0xff] }
 0x679   : > { %v6853_v37 = vpop.xlane.xlu1 %6852  ;;  %v7137_v2 = vsub.f32 %v7105_v22, %v7121_v41  ;;  %v7201_v38 = vsub.f32 %v15279_v19, %v14121_v61  ;;  %v7248_v55 = vadd.f32 1e-12, %v7136_v35  ;;  %v7202_v17 = vsub.f32 %v15280_v44, %v14121_v61  ;;  %v15288_v35 = vld [vmem:[#allocation142_spill] sm:$0xff] }
 0x67a   : > { %9548 = vrsqrt.f32 %v7247_v1  ;;  %v14199_v13 = vmul.f32 0.0013020834, %v6853_v37  ;;  %v7203_v3 = vsub.f32 %v15281_v9, %v14121_v61  ;;  %v7204_v42 = vsub.f32 %v15282_v52, %v14121_v61  ;;  %v15287_v37 = vld [vmem:[#allocation31_spill] sm:$0xff]  ;;  %v15291_v9 = vld [vmem:[#allocation120_spill] sm:$0xff] }
 0x67b   : > { %v7249_v32 = vadd.f32 1e-12, %v7137_v2  ;;  %v7205_v20 = vsub.f32 %v13567_v57, %v14121_v61  ;;  %v7206_v31 = vsub.f32 %v13570_v18, %v14121_v61  ;;  %v7207_v63 = vsub.f32 %v13601_v62, %v14177_v51  ;;  %v15283_v57 = vld [vmem:[#allocation43_spill] sm:$0xff] }
 0x67c   : > { %9550 = vrsqrt.f32 %v7248_v55  ;;  %v7208_v60 = vsub.f32 %v13605_v30, %v14177_v51  ;;  %v7209_v40 = vsub.f32 %v13614_v24, %v14177_v51  ;;  %v7210_v46 = vsub.f32 %v13619_v58, %v14177_v51  ;;  %v15290_v55 = vld [vmem:[#allocation118_spill] sm:$0xff] }
 0x67d   : > { %v7211_v16 = vsub.f32 %v15283_v57, %v14177_v51  ;;  %9552 = vrsqrt.f32 %v7249_v32  ;;  %v7122_v18 = vmul.f32 %v14199_v13, %v14199_v13 }
 0x67f   : > { %v6860_v28 = vpop.xlane.xlu0 %6859 }
 0x680   : > { %v14219_v43 = vmul.f32 0.0013020834, %v6860_v28 }
 0x682   : > { %v7078_v10 = vpop.xlane.xlu1 %7077  ;;  %v7123_v32 = vmul.f32 %v14219_v43, %v14219_v43 }
 0x683   : > { %v7106_v61 = vmul.f32 0.0013020834, %v7078_v10 }
 0x684   : > { %v7085_v59 = vpop.xlane.xlu0 %7084 }
 0x685   : > { %v7107_v56 = vmul.f32 0.0013020834, %v7085_v59  ;;  %v7138_v2 = vsub.f32 %v7106_v61, %v7122_v18  ;;  %v9547_v28 = vpop.eup %9546 }
 0x686   : > { %v7323_v10 = vmul.f32 %v9547_v28, %v7195_v4  ;;  %v7324_v59 = vmul.f32 %v9547_v28, %v7196_v5  ;;  %v7325_v47 = vmul.f32 %v9547_v28, %v7197_v49  ;;  %v7326_v41 = vmul.f32 %v9547_v28, %v7198_v54 }
 0x687   : > { %v9549_v22 = vpop.eup %9548  ;;  %v7327_v48 = vmul.f32 %v9547_v28, %v7199_v15  ;;  %v7328_v18 = vmul.f32 %v9547_v28, %v7200_v33  ;;  %v7250_v61 = vadd.f32 1e-12, %v7138_v2  ;;  %v7139_v1 = vsub.f32 %v7107_v56, %v7123_v32 }
 0x688   : > { %v7454_v19 = vmul.f32 %v13831_v23, %v7323_v10  ;;  %v7455_v44 = vmul.f32 %v13834_v0, %v7324_v59  ;;  %v7456_v52 = vmul.f32 %v13837_v21, %v7325_v47  ;;  %v7457_v25 = vmul.f32 %v13840_v34, %v7326_v41 }
 0x689   : > { %v7458_v4 = vmul.f32 %v13843_v53, %v7327_v48  ;;  %v7459_v5 = vmul.f32 %v13823_v26, %v7328_v18  ;;  %v7329_v49 = vmul.f32 %v9549_v22, %v7201_v38  ;;  %v7330_v54 = vmul.f32 %v9549_v22, %v7202_v17 }
 0x68a   : > { %v7585_v15 = vadd.f32 %v13849_v8, %v7454_v19  ;;  %v7586_v33 = vadd.f32 %v13852_v36, %v7455_v44  ;;  %v7587_v56 = vadd.f32 %v13855_v50, %v7456_v52  ;;  %v7588_v47 = vadd.f32 %v13864_v29, %v7457_v25  ;;  %v9551_v52 = vpop.eup %9550 }
 0x68b   : > { %v7589_v2 = vadd.f32 %v13867_v39, %v7458_v4  ;;  %v7590_v41 = vadd.f32 %v13828_v12, %v7459_v5  ;;  %v7331_v28 = vmul.f32 %v9549_v22, %v7203_v3  ;;  %v7332_v48 = vmul.f32 %v9549_v22, %v7204_v42  ;;  %v9553_v10 = vpop.eup %9552 }
 0x68c   : > { %7681 = vst [vmem:[%s13883_s2 + $0x1b0] sm:$0xff] %v7585_v15  ;;  %7682 = vst [vmem:[%s13883_s2 + $0x1b8] sm:$0xff] %v7586_v33  ;;  %v7333_v38 = vmul.f32 %v9549_v22, %v7205_v20  ;;  %v7334_v17 = vmul.f32 %v9549_v22, %v7206_v31  ;;  %v7460_v19 = vmul.f32 %v13831_v23, %v7329_v49  ;;  %9554 = vrsqrt.f32 %v7250_v61 }
 0x68d   : > { %7683 = vst [vmem:[%s13883_s2 + $0x1c0] sm:$0xff] %v7587_v56  ;;  %7684 = vst [vmem:[%s13883_s2 + $0x1c8] sm:$0xff] %v7588_v47  ;;  %v7461_v44 = vmul.f32 %v13834_v0, %v7330_v54  ;;  %v7462_v25 = vmul.f32 %v13837_v21, %v7331_v28  ;;  %v7463_v3 = vmul.f32 %v13840_v34, %v7332_v48  ;;  %v7251_v42 = vadd.f32 1e-12, %v7139_v1  ;;  %v6867_v47 = vpop.xlane.xlu1 %6866 }
 0x68e   : > { %7685 = vst [vmem:[%s13883_s2 + $0x1d0] sm:$0xff] %v7589_v2  ;;  %7686 = vst [vmem:[%s13883_s2 + $0x1d8] sm:$0xff] %v7590_v41  ;;  %v7464_v32 = vmul.f32 %v13843_v53, %v7333_v38  ;;  %v7465_v20 = vmul.f32 %v13823_v26, %v7334_v17  ;;  %v7591_v31 = vadd.f32 %v13849_v8, %v7460_v19 }
 0x68f   : > { %v7592_v22 = vadd.f32 %v13852_v36, %v7461_v44  ;;  %v7593_v59 = vadd.f32 %v13855_v50, %v7462_v25  ;;  %v7594_v18 = vadd.f32 %v13864_v29, %v7463_v3  ;;  %v7335_v1 = vmul.f32 %v9551_v52, %v7207_v63 }
 0x690   : > { %v7336_v61 = vmul.f32 %v9551_v52, %v7208_v60  ;;  %v7595_v4 = vadd.f32 %v13867_v39, %v7464_v32  ;;  %v7596_v5 = vadd.f32 %v13828_v12, %v7465_v20  ;;  %7687 = vst [vmem:[%s13883_s2 + $0x1e0] sm:$0xff] %v7591_v31  ;;  %v7337_v49 = vmul.f32 %v9551_v52, %v7209_v40 }
 0x691   : > { %7688 = vst [vmem:[%s13883_s2 + $0x1e8] sm:$0xff] %v7592_v22  ;;  %v7338_v62 = vmul.f32 %v9551_v52, %v7210_v46  ;;  %7689 = vst [vmem:[%s13883_s2 + $0x1f0] sm:$0xff] %v7593_v59  ;;  %v7339_v30 = vmul.f32 %v9551_v52, %v7211_v16  ;;  %v15292_v63 = vsub.f32 %v15284_v14, %v14177_v51  ;;  %9556 = vrsqrt.f32 %v7251_v42  ;;  %v15300_v42 = vld [vmem:[#allocation49_spill] sm:$0xff] }
 0x692   : > { %7690 = vst [vmem:[%s13883_s2 + $0x1f8] sm:$0xff] %v7594_v18  ;;  %v7466_v54 = vmul.f32 %v13831_v23, %v7335_v1  ;;  %v7467_v15 = vmul.f32 %v13834_v0, %v7336_v61  ;;  %7691 = vst [vmem:[%s13883_s2 + $0x200] sm:$0xff] %v7595_v4  ;;  %v7468_v24 = vmul.f32 %v13837_v21, %v7337_v49  ;;  %v15299_v1 = vld [vmem:[#allocation148_spill] sm:$0xff] }
 0x693   : > { %v7340_v60 = vmul.f32 %v9551_v52, %v15292_v63  ;;  %7692 = vst [vmem:[%s13883_s2 + $0x208] sm:$0xff] %v7596_v5  ;;  %v7469_v58 = vmul.f32 %v13840_v34, %v7338_v62  ;;  %v15293_v40 = vsub.f32 %v15285_v6, %v14179_v7  ;;  %v15294_v51 = vsub.f32 %v15286_v45, %v14179_v7  ;;  %v7092_v5 = vpop.xlane.xlu1 %7091  ;;  %v15301_v62 = vld [vmem:[#allocation145_spill] sm:$0xff]  ;;  %v15302_v63 = vld [vmem:[#allocation46_spill] sm:$0xff] }
 0x694   : > { %v7470_v16 = vmul.f32 %v13843_v53, %v7339_v30  ;;  %v7597_v33 = vadd.f32 %v13849_v8, %v7466_v54  ;;  %v7598_v56 = vadd.f32 %v13852_v36, %v7467_v15  ;;  %v7599_v2 = vadd.f32 %v13855_v50, %v7468_v24 }
 0x695   : > { %v7341_v46 = vmul.f32 %v9553_v10, %v15293_v40  ;;  %v7342_v57 = vmul.f32 %v9553_v10, %v15294_v51  ;;  %v7471_v14 = vmul.f32 %v13823_v26, %v7340_v60  ;;  %v7600_v6 = vadd.f32 %v13864_v29, %v7469_v58 }
 0x696   : > { %v15295_v45 = vsub.f32 %v15287_v37, %v14179_v7  ;;  %v15296_v28 = vsub.f32 %v15288_v35, %v14179_v7  ;;  %v7601_v38 = vadd.f32 %v13867_v39, %v7470_v16  ;;  %7693 = vst [vmem:[%s13883_s2 + $0x210] sm:$0xff] %v7597_v33  ;;  %7694 = vst [vmem:[%s13883_s2 + $0x218] sm:$0xff] %v7598_v56 }
 0x697   : > { %v7602_v17 = vadd.f32 %v13828_v12, %v7471_v14  ;;  %v15297_v19 = vsub.f32 %v13655_v27, %v14179_v7  ;;  %v15298_v52 = vsub.f32 %v15289_v11, %v14179_v7  ;;  %7695 = vst [vmem:[%s13883_s2 + $0x220] sm:$0xff] %v7599_v2  ;;  %7696 = vst [vmem:[%s13883_s2 + $0x228] sm:$0xff] %v7600_v6  ;;  %v14341_v11 = vmul.f32 0.0013020834, %v6867_v47 }
 0x698   : > { %v7343_v41 = vmul.f32 %v9553_v10, %v15295_v45  ;;  %v7344_v48 = vmul.f32 %v9553_v10, %v15296_v28  ;;  %v7472_v25 = vmul.f32 %v13831_v23, %v7341_v46  ;;  %v7473_v35 = vmul.f32 %v13834_v0, %v7342_v57  ;;  %7697 = vst [vmem:[%s13883_s2 + $0x230] sm:$0xff] %v7601_v38 }
 0x699   : > { %v7345_v44 = vmul.f32 %v9553_v10, %v15297_v19  ;;  %v7346_v37 = vmul.f32 %v9553_v10, %v15298_v52  ;;  %7698 = vst [vmem:[%s13883_s2 + $0x238] sm:$0xff] %v7602_v17  ;;  %v7221_v61 = vsub.f32 %v15299_v1, %v14199_v13  ;;  %v7222_v4 = vsub.f32 %v15300_v42, %v14199_v13  ;;  %v9555_v49 = vpop.eup %9554  ;;  %v15305_v19 = vld [vmem:[#allocation147_spill] sm:$0xff] }
 0x69a   : > { %v7474_v3 = vmul.f32 %v13837_v21, %v7343_v41  ;;  %v7475_v32 = vmul.f32 %v13840_v34, %v7344_v48  ;;  %v7603_v20 = vadd.f32 %v13849_v8, %v7472_v25  ;;  %v7604_v31 = vadd.f32 %v13852_v36, %v7473_v35  ;;  %v15306_v52 = vld [vmem:[#allocation75_spill] sm:$0xff]  ;;  %v15307_v25 = vld [vmem:[#allocation146_spill] sm:$0xff] }
 0x69b   : > { %v7476_v27 = vmul.f32 %v13843_v53, %v7345_v44  ;;  %v7477_v7 = vmul.f32 %v13823_v26, %v7346_v37  ;;  %v7223_v30 = vsub.f32 %v15301_v62, %v14199_v13  ;;  %v7224_v60 = vsub.f32 %v15302_v63, %v14199_v13 }
 0x69c   : > { %v7605_v22 = vadd.f32 %v13855_v50, %v7474_v3  ;;  %v7606_v10 = vadd.f32 %v13864_v29, %v7475_v32  ;;  %7699 = vst [vmem:[%s13883_s2 + $0x240] sm:$0xff] %v7603_v20  ;;  %7700 = vst [vmem:[%s13883_s2 + $0x248] sm:$0xff] %v7604_v31  ;;  %v15303_v54 = vsub.f32 %v15290_v55, %v14199_v13  ;;  %v7108_v14 = vmul.f32 0.0013020834, %v7092_v5  ;;  %v15308_v3 = vld [vmem:[#allocation73_spill] sm:$0xff]  ;;  %v15310_v31 = vld [vmem:[#allocation124_spill] sm:$0xff] }
 0x69d   : > { %v7607_v59 = vadd.f32 %v13867_v39, %v7476_v27  ;;  %v7608_v18 = vadd.f32 %v13828_v12, %v7477_v7  ;;  %v15304_v24 = vsub.f32 %v15291_v9, %v14199_v13  ;;  %v7349_v40 = vmul.f32 %v9555_v49, %v7221_v61  ;;  %v15309_v7 = vld [vmem:[#allocation126_spill] sm:$0xff] }
 0x69e   : > { %7701 = vst [vmem:[%s13883_s2 + $0x250] sm:$0xff] %v7605_v22  ;;  %7702 = vst [vmem:[%s13883_s2 + $0x258] sm:$0xff] %v7606_v10  ;;  %v7347_v15 = vmul.f32 %v9555_v49, %v15303_v54  ;;  %v7350_v46 = vmul.f32 %v9555_v49, %v7222_v4  ;;  %v7351_v51 = vmul.f32 %v9555_v49, %v7223_v30  ;;  %v9557_v27 = vpop.eup %9556 }
 0x69f   : > { %7703 = vst [vmem:[%s13883_s2 + $0x260] sm:$0xff] %v7607_v59  ;;  %7704 = vst [vmem:[%s13883_s2 + $0x268] sm:$0xff] %v7608_v18  ;;  %v7348_v58 = vmul.f32 %v9555_v49, %v15304_v24  ;;  %v7352_v57 = vmul.f32 %v9555_v49, %v7224_v60  ;;  %v7124_v16 = vmul.f32 %v14341_v11, %v14341_v11 }
 0x6a0   : > { %v7478_v33 = vmul.f32 %v13831_v23, %v7347_v15  ;;  %v7480_v56 = vmul.f32 %v13837_v21, %v7349_v40  ;;  %v7481_v13 = vmul.f32 %v13840_v34, %v7350_v46  ;;  %v7482_v9 = vmul.f32 %v13843_v53, %v7351_v51  ;;  %v15311_v40 = vld [vmem:[#allocation151_spill] sm:$0xff] }
 0x6a1   : > { %v7479_v55 = vmul.f32 %v13834_v0, %v7348_v58  ;;  %v7483_v47 = vmul.f32 %v13823_v26, %v7352_v57  ;;  %v7140_v2 = vsub.f32 %v7108_v14, %v7124_v16  ;;  %v7225_v44 = vsub.f32 %v15305_v19, %v14219_v43  ;;  %v15312_v51 = vld [vmem:[#allocation47_spill] sm:$0xff]  ;;  %v15313_v16 = vld [vmem:[#allocation149_spill] sm:$0xff] }
 0x6a2   : > { %v7609_v6 = vadd.f32 %v13849_v8, %v7478_v33  ;;  %v7611_v41 = vadd.f32 %v13855_v50, %v7480_v56  ;;  %v7612_v28 = vadd.f32 %v13864_v29, %v7481_v13  ;;  %v7613_v48 = vadd.f32 %v13867_v39, %v7482_v9  ;;  %v15314_v33 = vld [vmem:[#allocation44_spill] sm:$0xff]  ;;  %v15315_v13 = vld [vmem:[#allocation150_spill] sm:$0xff] }
 0x6a3   : > { %v7610_v45 = vadd.f32 %v13852_v36, %v7479_v55  ;;  %v7614_v38 = vadd.f32 %v13828_v12, %v7483_v47  ;;  %v7252_v17 = vadd.f32 1e-12, %v7140_v2  ;;  %v7226_v37 = vsub.f32 %v15306_v52, %v14219_v43  ;;  %v15316_v47 = vld [vmem:[#allocation34_spill] sm:$0xff] }
 0x6a4   : > { %7705 = vst [vmem:[%s13883_s2 + $0x270] sm:$0xff] %v7609_v6  ;;  %7707 = vst [vmem:[%s13883_s2 + $0x280] sm:$0xff] %v7611_v41  ;;  %v7227_v35 = vsub.f32 %v15307_v25, %v14219_v43  ;;  %v7228_v32 = vsub.f32 %v15308_v3, %v14219_v43  ;;  %v7229_v20 = vsub.f32 %v15309_v7, %v14219_v43 }
 0x6a5   : > { %7706 = vst [vmem:[%s13883_s2 + $0x278] sm:$0xff] %v7610_v45  ;;  %7708 = vst [vmem:[%s13883_s2 + $0x288] sm:$0xff] %v7612_v28  ;;  %9558 = vrsqrt.f32 %v7252_v17  ;;  %v7230_v22 = vsub.f32 %v15310_v31, %v14219_v43  ;;  %v7353_v10 = vmul.f32 %v9557_v27, %v7225_v44  ;;  %v7354_v59 = vmul.f32 %v9557_v27, %v7226_v37 }
 0x6a6   : > { %7709 = vst [vmem:[%s13883_s2 + $0x290] sm:$0xff] %v7613_v48  ;;  %7710 = vst [vmem:[%s13883_s2 + $0x298] sm:$0xff] %v7614_v38  ;;  %v7355_v18 = vmul.f32 %v9557_v27, %v7227_v35  ;;  %v7356_v1 = vmul.f32 %v9557_v27, %v7228_v32  ;;  %v7357_v61 = vmul.f32 %v9557_v27, %v7229_v20 }
 0x6a7   : > { %v7358_v42 = vmul.f32 %v9557_v27, %v7230_v22  ;;  %v7484_v4 = vmul.f32 %v13831_v23, %v7353_v10  ;;  %v7485_v5 = vmul.f32 %v13834_v0, %v7354_v59  ;;  %v7231_v46 = vsub.f32 %v15311_v40, %v14341_v11 }
 0x6a8   : > { %v7486_v49 = vmul.f32 %v13837_v21, %v7355_v18  ;;  %v7487_v43 = vmul.f32 %v13840_v34, %v7356_v1  ;;  %v7488_v62 = vmul.f32 %v13843_v53, %v7357_v61  ;;  %v7232_v57 = vsub.f32 %v15312_v51, %v14341_v11 }
 0x6a9   : > { %v7489_v30 = vmul.f32 %v13823_v26, %v7358_v42  ;;  %v7615_v63 = vadd.f32 %v13849_v8, %v7484_v4  ;;  %v7616_v60 = vadd.f32 %v13852_v36, %v7485_v5  ;;  %v7233_v14 = vsub.f32 %v15313_v16, %v14341_v11 }
 0x6aa   : > { %v7617_v54 = vadd.f32 %v13855_v50, %v7486_v49  ;;  %v7618_v15 = vadd.f32 %v13864_v29, %v7487_v43  ;;  %v7619_v24 = vadd.f32 %v13867_v39, %v7488_v62  ;;  %v7234_v55 = vsub.f32 %v15314_v33, %v14341_v11 }
 0x6ab   : > { %v7620_v58 = vadd.f32 %v13828_v12, %v7489_v30  ;;  %7711 = vst [vmem:[%s13883_s2 + $0x2a0] sm:$0xff] %v7615_v63  ;;  %7712 = vst [vmem:[%s13883_s2 + $0x2a8] sm:$0xff] %v7616_v60  ;;  %v7235_v9 = vsub.f32 %v15315_v13, %v14341_v11  ;;  %v7236_v2 = vsub.f32 %v15316_v47, %v14341_v11 }
 0x6ac   : > { %7713 = vst [vmem:[%s13883_s2 + $0x2b0] sm:$0xff] %v7617_v54  ;;  %7714 = vst [vmem:[%s13883_s2 + $0x2b8] sm:$0xff] %v7618_v15 }
 0x6ad   : > { %7715 = vst [vmem:[%s13883_s2 + $0x2c0] sm:$0xff] %v7619_v24  ;;  %7716 = vst [vmem:[%s13883_s2 + $0x2c8] sm:$0xff] %v7620_v58 }
 0x6b2   : > { %v9559_v56 = vpop.eup %9558 }
 0x6b3   : > { %v7359_v6 = vmul.f32 %v9559_v56, %v7231_v46  ;;  %v7360_v45 = vmul.f32 %v9559_v56, %v7232_v57  ;;  %v7361_v41 = vmul.f32 %v9559_v56, %v7233_v14  ;;  %v7362_v28 = vmul.f32 %v9559_v56, %v7234_v55 }
 0x6b4   : > { %v7363_v48 = vmul.f32 %v9559_v56, %v7235_v9  ;;  %v7364_v38 = vmul.f32 %v9559_v56, %v7236_v2 }
 0x6b5   : > { %v7490_v17 = vmul.f32 %v13831_v23, %v7359_v6  ;;  %v7491_v19 = vmul.f32 %v13834_v0, %v7360_v45  ;;  %v7492_v44 = vmul.f32 %v13837_v21, %v7361_v41  ;;  %v7493_v52 = vmul.f32 %v13840_v34, %v7362_v28 }
 0x6b6   : > { %v7494_v11 = vmul.f32 %v13843_v53, %v7363_v48  ;;  %v7495_v37 = vmul.f32 %v13823_v26, %v7364_v38 }
 0x6b7   : > { %v7621_v25 = vadd.f32 %v13849_v8, %v7490_v17  ;;  %v7622_v23 = vadd.f32 %v13852_v36, %v7491_v19  ;;  %v7623_v0 = vadd.f32 %v13855_v50, %v7492_v44  ;;  %v7624_v21 = vadd.f32 %v13864_v29, %v7493_v52 }
 0x6b8   : > { %v7625_v34 = vadd.f32 %v13867_v39, %v7494_v11  ;;  %v7626_v53 = vadd.f32 %v13828_v12, %v7495_v37 }
 0x6b9   : > { %7717 = vst [vmem:[%s13883_s2 + $0x2d0] sm:$0xff] %v7621_v25  ;;  %7718 = vst [vmem:[%s13883_s2 + $0x2d8] sm:$0xff] %v7622_v23 }
 0x6ba   : > { %7719 = vst [vmem:[%s13883_s2 + $0x2e0] sm:$0xff] %v7623_v0  ;;  %7720 = vst [vmem:[%s13883_s2 + $0x2e8] sm:$0xff] %v7624_v21 }
 0x6bb   : > { %7721 = vst [vmem:[%s13883_s2 + $0x2f0] sm:$0xff] %v7625_v34  ;;  %7722 = vst [vmem:[%s13883_s2 + $0x2f8] sm:$0xff] %v7626_v53 }
 0x6bc   : > { %9822 = shalt.err (!%p9819_p8)
}
 0x6bd   : > { %s9823_s16 = scalar_lea.hbm %s14446_s21, 12288  ;;  %s9827_s3 = scalar_lea.hbm %s14506_s7, 24576 }
 0x6be   : > { %p9824_p3 = scmp.ne.s32.totalorder %s14446_s21, %s9823_s16  ;;  %p9828_p2 = scmp.lt.s32.totalorder %s14446_s21, %s14506_s7 }
 0x6bf   : > { %p9829_p10 = scmp.lt.s32.totalorder %s9827_s3, %s9823_s16 }
 0x6c0   : > { %p9825_p5 = pnand %p9824_p3, %p15317_p7 }
 0x6c1   : > { %p9830_p0 = por %p9829_p10, %p9828_p2 }
 0x6c2   : > { %p9826_p6 = pneg %p9825_p5 }
 0x6c4   : > { %p9831_p13 = pnand %p9830_p0, %p9826_p6 }
 0x6c6   : > { %9834 = shalt.err (!%p9831_p13)
}
 0x6c7   : > { %s9904_s15 = smov 768   ;;  %s9905_s2 = smov 48  }
 0x6c8   : > { %8595 = dma.vmem_to_hbm [thread:$0]  (%p15317_p7), %s14450_s18, 12288, %s14446_s21, %s7724_s22, %s9904_s15, %s9904_s15, %s9905_s2  }
 0x6c9 PF: > { %s7753_s17 = sand.u32 1, %s9877_s24   ;;  %p15318_p9 = scmp.ne.s32.totalorder %s14732_s19, 0 }
 0x6ca   : > { %p15319_p11 = scmp.ge.s32.totalorder %s9889_s27, 2  ;;  %s7754_s30 = scalar_lea.sflag [#allocation5], %s7753_s17 }
 0x6cc   : > { %p8621_p1 = pnand %p15319_p11, %p15318_p9 }
 0x6ce   : > { %p8622_p4 = pneg %p8621_p1 }
 0x6d0   : > { %9872 = dma.done.wait (%p8622_p4), %s7754_s30, 12288  }
 0x6d1   : > { %9874 = vsyncadd (%p8622_p4), %s7754_s30, 4294955008  ;;  %p25_p12 = scmp.ge.s32.totalorder %s10044_s11, 4   ;;  %s15320_s24 = smov %s9881_s25 }
 0x6d2   : > { %s15321_s25 = smov %s9885_s26  ;;  %s15322_s26 = smov %s10056_s12 }
 0x6d3   : > { %s15323_s27 = smov %s10044_s11  ;;  %27 = sbr.rel (!%p25_p12) target bundleno = 14 (0xe), region = 130 }
 0x6d8   :  { %7759 = vsyncpa [#allocation4], 1 }
 0x6d9   :  { %7761 = vsyncpa [#allocation4 + $0x1], 1 }
 0x6da   :  { %7762 = vsyncpa [#allocation7], 1 }
 0x6db   :  { %7764 = vsyncpa [#allocation7 + $0x1], 1 }
 0x6dc   :  { %7765 = vsyncpa [#allocation10], 1 }
 0x6dd   :  { %7766 = vsyncpa [#allocation13], 1 }
 0x6de   :  { %7767 = vsyncpa [#allocation5], 1 }
 0x6df   :  { %7769 = vsyncpa [#allocation5 + $0x1], 1 }

</bundles_post_ra>
